<compile_context>
chip_gen: v6e
topology: v6e:2x2x1
jax: 0.10.0
libtpu: 0.0.40
codegen_flags: <defaults>
</compile_context>

<pallas_src>
import functools

import numpy as np
import jax
import jax.numpy as jnp
from jax.experimental import pallas as pl
from jax.experimental.pallas import tpu as pltpu


# ----------------------------------------------------------------------------
# generation-aware tiling policy
# ----------------------------------------------------------------------------
def _device_hints():
    """Best-effort (tensorcores sharing one pallas grid, vmem_limit_bytes)."""
    kind = ""
    try:
        kind = jax.devices()[0].device_kind.lower()
    except Exception:
        pass
    if "v5 lite" in kind or "v5e" in kind or "v6" in kind:
        return 1, 64 * 1024 * 1024          # single TC, 128 MiB physical VMEM
    if "v7" in kind:
        return 2, 48 * 1024 * 1024          # 2 TCs / chip, 64 MiB physical VMEM
    return 2, 32 * 1024 * 1024              # v4/v5p megacore & unknown: conservative


def _pick_group(nw, n_tok, n_cores, target_rows=2048, min_rows=256):
    """Windows per grid step: largest divisor of nw with <= target_rows token rows.
    On multi-TC parts back off until the grid has >= 2 steps per core."""
    divs = [g for g in range(1, nw + 1) if nw % g == 0]
    cands = [g for g in divs if g * n_tok <= target_rows] or [1]
    g = max(cands)
    if n_cores > 1:
        want_steps = 2 * n_cores
        while nw // g < want_steps:
            smaller = [d for d in cands if d < g and d * n_tok >= min_rows]
            if not smaller:
                break
            g = max(smaller)
    return g


def _pick_row_block(hw, batch, n_cores, target=2048):
    """Spatial columns per head-kernel step (prefer lane-dense multiples of 128)."""
    divs = [d for d in range(1, hw + 1) if hw % d == 0]
    lane_dense = [d for d in divs if d % 128 == 0 and d <= target]
    cands = lane_dense or [d for d in divs if d <= target] or [hw]
    rb = max(cands)
    if n_cores > 1:
        want_steps = 2 * n_cores
        while batch * (hw // rb) < want_steps:
            smaller = ([d for d in cands if d < rb and d >= 128]
                       or [d for d in cands if d < rb])
            if not smaller:
                break
            rb = max(smaller)
    return rb


# ----------------------------------------------------------------------------
# in-kernel helpers
# ----------------------------------------------------------------------------
def _layernorm(x, g, b, eps=1e-5):
    mu = jnp.mean(x, axis=-1, keepdims=True)
    var = jnp.mean(jnp.square(x - mu), axis=-1, keepdims=True)
    return (x - mu) * jax.lax.rsqrt(var + eps) * g + b


def _erf_approx(x):
    # Abramowitz & Stegun 7.1.26 (|err| < 1.5e-7); exact divide (no approx recip)
    # so GELU matches torch's erf-exact nn.GELU to ~f32 polynomial precision.
    a1, a2, a3, a4, a5 = 0.254829592, -0.284496736, 1.421413741, -1.453152027, 1.061405429
    p = 0.3275911
    s = jnp.where(x >= 0.0, 1.0, -1.0)
    ax = jnp.abs(x)
    t = 1.0 / (1.0 + p * ax)
    poly = ((((a5 * t + a4) * t + a3) * t + a2) * t + a1) * t
    return s * (1.0 - poly * jnp.exp(-ax * ax))


def _gelu_exact(x):
    return 0.5 * x * (1.0 + _erf_approx(x * 0.7071067811865476))


# ----------------------------------------------------------------------------
# Pallas kernels
# ----------------------------------------------------------------------------
def _attn_ffn_kernel(x_ref, kb_ref, bias_ref,
                     ln1_g_ref, ln1_b_ref, wq_ref, wk_ref, wv_ref, wout_ref,
                     ln2_g_ref, ln2_b_ref, w1_ref, b1_ref, w2_ref, b2_ref,
                     o_ref, *, heads, dim_head, scale):
    """G windows per step (pre-norm): x = x + Attn(LN1(x)); x = x + FFN(LN2(x))."""
    G, N, D = x_ref.shape
    x = x_ref[...].astype(jnp.float32).reshape(G * N, D)      # f32 on-chip residual
    key_bias = kb_ref[...]                                    # (G, 1, N) additive mask
    rel_bias = bias_ref[...]                                  # (heads, N, N)
    w_out = wout_ref[...]                                     # (D, D) bf16

    # ---- pre-norm multi-head attention --------------------------------------
    xn = _layernorm(x, ln1_g_ref[...], ln1_b_ref[...]).astype(jnp.bfloat16)
    q = jnp.dot(xn, wq_ref[...], preferred_element_type=jnp.float32) * scale
    k = jnp.dot(xn, wk_ref[...], preferred_element_type=jnp.float32)
    v = jnp.dot(xn, wv_ref[...], preferred_element_type=jnp.float32)
    q = q.reshape(G, N, D).astype(jnp.bfloat16)
    k = k.reshape(G, N, D).astype(jnp.bfloat16)
    v = v.reshape(G, N, D).astype(jnp.bfloat16)

    attn = jnp.zeros((G * N, D), jnp.float32)
    for h in range(heads):                                    # static & tiny
        sl = slice(h * dim_head, (h + 1) * dim_head)
        sim = jnp.einsum('gne,gme->gnm', q[:, :, sl], k[:, :, sl],
                         preferred_element_type=jnp.float32)  # (G, N, N) f32
        sim = sim + rel_bias[h] + key_bias
        m = jnp.max(sim, axis=-1, keepdims=True)
        p = jnp.exp(sim - m)
        # approx reciprocal error (~2^-12) is far below the bf16 residual rounding.
        inv_l = pl.reciprocal(jnp.sum(p, axis=-1, keepdims=True), approx=True)
        pv = jnp.einsum('gnm,gme->gne', p.astype(jnp.bfloat16), v[:, :, sl],
                        preferred_element_type=jnp.float32) * inv_l
        # fold head concat into the output projection: pv_h @ Wout[h*dh:(h+1)*dh, :]
        attn = attn + jnp.dot(pv.reshape(G * N, dim_head).astype(jnp.bfloat16),
                              w_out[sl, :], preferred_element_type=jnp.float32)
    y = x + attn

    # ---- pre-norm feed-forward (Linear -> GELU(erf) -> Linear) --------------
    yn = _layernorm(y, ln2_g_ref[...], ln2_b_ref[...]).astype(jnp.bfloat16)
    h1 = jnp.dot(yn, w1_ref[...], preferred_element_type=jnp.float32) + b1_ref[...]
    h1 = _gelu_exact(h1).astype(jnp.bfloat16)
    h2 = jnp.dot(h1, w2_ref[...], preferred_element_type=jnp.float32) + b2_ref[...]
    o_ref[...] = (y + h2).reshape(G, N, D).astype(jnp.bfloat16)


def _head_kernel(x_ref, g_ref, b_ref, wt_ref, hb_ref, o_ref, *, agents, dim):
    """mlp_head on a (L*D, RB) column tile: mean over agents -> LayerNorm(D) ->
    Linear(D,D); output stored channel-major so the result is already NCHW."""
    x = x_ref[0].astype(jnp.float32)                          # (L*D, RB)
    acc = x[0:dim, :]
    for l in range(1, agents):                                # static & tiny
        acc = acc + x[l * dim:(l + 1) * dim, :]
    m = acc * (1.0 / agents)                                  # mean over max_cav (incl. pads)
    mu = jnp.mean(m, axis=0, keepdims=True)
    var = jnp.mean(jnp.square(m - mu), axis=0, keepdims=True)
    mn = (m - mu) * jax.lax.rsqrt(var + 1e-5) * g_ref[...] + b_ref[...]
    y = jnp.dot(wt_ref[...], mn.astype(jnp.bfloat16),
                preferred_element_type=jnp.float32) + hb_ref[...]
    o_ref[0] = y                                              # (D, RB) lane-dense store


# ----------------------------------------------------------------------------
# Pallas wrappers
# ----------------------------------------------------------------------------
def _attn_ffn(tokens, key_bias, attn_p, ffd_p, heads, dim_head, n_cores, vmem_bytes):
    nw, N, D = tokens.shape
    mlp = ffd_p['w1'].shape[1]
    scale = dim_head ** -0.5
    G = _pick_group(nw, N, n_cores)
    grid = nw // G
    kernel = functools.partial(_attn_ffn_kernel, heads=heads,
                               dim_head=dim_head, scale=scale)

    rows = nw * N
    flops = int(2 * rows * D * 3 * D                 # q,k,v projections
                + 4 * nw * heads * N * N * dim_head  # QK^T + PV
                + 2 * rows * D * D                   # output projection
                + 4 * rows * D * mlp)                # FFN
    transcendentals = int(rows * (heads * N + mlp))
    bytes_accessed = int(2 * 2 * rows * D            # bf16 tokens in + out
                         + 4 * nw * N                # key bias
                         + 4 * heads * N * N         # rel-pos bias
                         + 2 * (4 * D * D + 2 * D * mlp)  # bf16 weights
                         + 4 * (5 * D + mlp))
    cost = pl.CostEstimate(flops=flops, transcendentals=transcendentals,
                           bytes_accessed=bytes_accessed)

    return pl.pallas_call(
        kernel,
        out_shape=jax.ShapeDtypeStruct((nw, N, D), jnp.bfloat16),
        grid=(grid,),
        in_specs=[
            pl.BlockSpec((G, N, D), lambda i: (i, 0, 0)),       # tokens (bf16)
            pl.BlockSpec((G, 1, N), lambda i: (i, 0, 0)),       # additive key mask (f32)
            pl.BlockSpec((heads, N, N), lambda i: (0, 0, 0)),   # rel-pos bias (resident)
            pl.BlockSpec((1, D), lambda i: (0, 0)),             # ln1 gamma
            pl.BlockSpec((1, D), lambda i: (0, 0)),             # ln1 beta
            pl.BlockSpec((D, D), lambda i: (0, 0)),             # Wq (bf16)
            pl.BlockSpec((D, D), lambda i: (0, 0)),             # Wk (bf16)
            pl.BlockSpec((D, D), lambda i: (0, 0)),             # Wv (bf16)
            pl.BlockSpec((D, D), lambda i: (0, 0)),             # Wout (bf16)
            pl.BlockSpec((1, D), lambda i: (0, 0)),             # ln2 gamma
            pl.BlockSpec((1, D), lambda i: (0, 0)),             # ln2 beta
            pl.BlockSpec((D, mlp), lambda i: (0, 0)),           # W1 (bf16)
            pl.BlockSpec((1, mlp), lambda i: (0, 0)),           # b1
            pl.BlockSpec((mlp, D), lambda i: (0, 0)),           # W2 (bf16)
            pl.BlockSpec((1, D), lambda i: (0, 0)),             # b2
        ],
        out_specs=pl.BlockSpec((G, N, D), lambda i: (i, 0, 0)),
        compiler_params=pltpu.CompilerParams(
            dimension_semantics=("parallel",), vmem_limit_bytes=vmem_bytes),
        cost_estimate=cost,
    )(tokens, key_bias, attn_p['bias'], attn_p['ln_g'], attn_p['ln_b'],
      attn_p['w_q'], attn_p['w_k'], attn_p['w_v'], attn_p['w_out'],
      ffd_p['ln_g'], ffd_p['ln_b'], ffd_p['w1'], ffd_p['b1'], ffd_p['w2'], ffd_p['b2'])


def _mlp_head(xh, p, H, W, L, D, n_cores, vmem_bytes):
    # xh: (B, L*D, H*W) bf16 -> fused (B, D, H, W) f32 (no host-side NCHW transpose)
    B, LD, HW = xh.shape
    RB = _pick_row_block(HW, B, n_cores)
    grid = (B, HW // RB)
    kernel = functools.partial(_head_kernel, agents=L, dim=D)

    cost = pl.CostEstimate(
        flops=int(2 * B * HW * D * D + B * HW * L * D),
        transcendentals=int(B * HW),
        bytes_accessed=int(2 * B * HW * LD + 4 * B * HW * D + 2 * D * D + 16 * D))

    out = pl.pallas_call(
        kernel,
        out_shape=jax.ShapeDtypeStruct((B, D, HW), jnp.float32),
        grid=grid,
        in_specs=[
            pl.BlockSpec((1, LD, RB), lambda b, i: (b, 0, i)),   # tokens (bf16)
            pl.BlockSpec((D, 1), lambda b, i: (0, 0)),           # ln gamma
            pl.BlockSpec((D, 1), lambda b, i: (0, 0)),           # ln beta
            pl.BlockSpec((D, D), lambda b, i: (0, 0)),           # W^T (bf16)
            pl.BlockSpec((D, 1), lambda b, i: (0, 0)),           # bias
        ],
        out_specs=pl.BlockSpec((1, D, RB), lambda b, i: (b, 0, i)),
        compiler_params=pltpu.CompilerParams(
            dimension_semantics=("parallel", "parallel"), vmem_limit_bytes=vmem_bytes),
        cost_estimate=cost,
    )(xh, p['ln_g'], p['ln_b'], p['w_t'], p['b'])
    return out.reshape(B, D, H, W)


# ----------------------------------------------------------------------------
# glue: regroup + single composed layout transforms (all on bf16)
# ----------------------------------------------------------------------------
def regroup(features, record_len, max_cav):
    # features: (sum(record_len), C, H, W)
    feats, mask_rows = [], []
    start = 0
    for l in record_len:
        f = features[start:start + l]
        pad = max_cav - l
        if pad > 0:
            f = jnp.concatenate(
                [f, jnp.zeros((pad,) + features.shape[1:], features.dtype)], axis=0)
        feats.append(f[None])
        mask_rows.append([1.0] * l + [0.0] * pad)
        start += l
    return jnp.concatenate(feats, axis=0), jnp.asarray(mask_rows, jnp.float32)


def _regroup_to_window_tokens(regroup_feature, ws):
    # (B, L, C, H, W) -> window tokens (B*nx*ny, ws*ws*L, C), token order (w1, w2, L)
    B, L, C, H, W = regroup_feature.shape
    nx, ny = H // ws, W // ws
    x = regroup_feature.astype(jnp.bfloat16)
    x = x.reshape(B, L, C, nx, ws, ny, ws).transpose(0, 3, 5, 4, 6, 1, 2)
    return x.reshape(B * nx * ny, ws * ws * L, C)


def _win_to_grid(tw, B, nx, ny, ws, L, D):
    H, W = nx * ws, ny * ws
    x = tw.reshape(B, nx, ny, ws, ws, L, D).transpose(0, 1, 3, 2, 4, 5, 6)
    x = x.reshape(B, H, W, L, D)
    x = x.reshape(B, ws, nx, ws, ny, L, D).transpose(0, 2, 4, 1, 3, 5, 6)
    return x.reshape(B * nx * ny, ws * ws * L, D)


def _grid_to_win(tg, B, nx, ny, ws, L, D):
    H, W = nx * ws, ny * ws
    x = tg.reshape(B, nx, ny, ws, ws, L, D).transpose(0, 3, 1, 4, 2, 5, 6)
    x = x.reshape(B, H, W, L, D)
    x = x.reshape(B, nx, ws, ny, ws, L, D).transpose(0, 1, 3, 2, 4, 5, 6)
    return x.reshape(B * nx * ny, ws * ws * L, D)


def _grid_to_head(tg, B, nx, ny, ws, L, D):
    # grid tokens -> (B, L*D, H*W) channel-major head input (single transpose)
    H, W = nx * ws, ny * ws
    x = tg.reshape(B, nx, ny, ws, ws, L, D).transpose(0, 5, 6, 3, 1, 4, 2)
    return x.reshape(B, L * D, H * W)


# ----------------------------------------------------------------------------
# parameter init (deterministic, synthetic)
# ----------------------------------------------------------------------------
def _relative_position_index(agent_size, ws):
    d, h, w = agent_size, ws, ws
    coords = np.stack(np.meshgrid(np.arange(d), np.arange(h), np.arange(w), indexing='ij'))
    flat = coords.reshape(3, -1)
    rel = (flat[:, :, None] - flat[:, None, :]).transpose(1, 2, 0).astype(np.int64)
    rel[:, :, 0] += d - 1
    rel[:, :, 1] += h - 1
    rel[:, :, 2] += w - 1
    rel[:, :, 0] *= (2 * h - 1) * (2 * w - 1)
    rel[:, :, 1] *= (2 * w - 1)
    return jnp.asarray(rel.sum(-1))          # (N, N), torch token order (agent, w1, w2)


def _token_perm(agent_size, ws):
    # map kernel token order (w1, w2, agent) -> torch token order (agent, w1, w2)
    return np.arange(agent_size * ws * ws).reshape(agent_size, ws, ws) \
             .transpose(1, 2, 0).reshape(-1)


def _init_attn(key, dim, heads, rel_index, n_rel, perm):
    k1, k2, k3, k4, k5 = jax.random.split(key, 5)
    rnd = lambda k, s: (jax.random.normal(k, s, jnp.float32) * 0.02).astype(jnp.bfloat16)
    table = jax.random.normal(k5, (n_rel, heads), jnp.float32) * 0.02
    bias = jnp.transpose(table[rel_index], (2, 0, 1))          # (heads, N, N) torch order
    bias = bias[:, perm][:, :, perm]                           # permute once to kernel order
    return dict(ln_g=jnp.ones((1, dim), jnp.float32), ln_b=jnp.zeros((1, dim), jnp.float32),
                w_q=rnd(k1, (dim, dim)), w_k=rnd(k2, (dim, dim)),
                w_v=rnd(k3, (dim, dim)), w_out=rnd(k4, (dim, dim)), bias=bias)


def _init_ffd(key, dim, mlp_dim):
    k1, k2 = jax.random.split(key)
    return dict(ln_g=jnp.ones((1, dim), jnp.float32), ln_b=jnp.zeros((1, dim), jnp.float32),
                w1=(jax.random.normal(k1, (dim, mlp_dim), jnp.float32) * 0.02).astype(jnp.bfloat16),
                b1=jnp.zeros((1, mlp_dim), jnp.float32),
                w2=(jax.random.normal(k2, (mlp_dim, dim), jnp.float32) * 0.02).astype(jnp.bfloat16),
                b2=jnp.zeros((1, dim), jnp.float32))


def init_params(key, args):
    dim, mlp_dim = args['input_dim'], args['mlp_dim']
    heads = dim // args['dim_head']
    L, ws = args['agent_size'], args['window_size']
    n_rel = (2 * L - 1) * (2 * ws - 1) * (2 * ws - 1)
    rel_index = _relative_position_index(L, ws)
    perm = _token_perm(L, ws)
    layers = []
    for _ in range(args['depth']):
        key, k1, k2, k3, k4 = jax.random.split(key, 5)
        layers.append(dict(win_attn=_init_attn(k1, dim, heads, rel_index, n_rel, perm),
                           win_ffd=_init_ffd(k2, dim, mlp_dim),
                           grid_attn=_init_attn(k3, dim, heads, rel_index, n_rel, perm),
                           grid_ffd=_init_ffd(k4, dim, mlp_dim)))
    key, kh = jax.random.split(key)
    w_head = jax.random.normal(kh, (dim, dim), jnp.float32) * 0.02
    head = dict(ln_g=jnp.ones((dim, 1), jnp.float32), ln_b=jnp.zeros((dim, 1), jnp.float32),
                w_t=jnp.transpose(w_head).astype(jnp.bfloat16),   # column-form weight
                b=jnp.zeros((dim, 1), jnp.float32))
    return dict(layers=layers, head=head)


# ----------------------------------------------------------------------------
# HeteCobevtFuse.forward (neb_middle_info=None path)
# ----------------------------------------------------------------------------
def hete_cobevt_fuse_forward(params, middle_info, args, neb_middle_info=None):
    if neb_middle_info is not None:
        # TODO(synk): ProjEncoder projection + bilinear interpolation (align_corners)
        # + non-ego replacement for heterogeneous neighbors is not implemented here.
        raise NotImplementedError("hetero neighbor branch not implemented")

    features = middle_info['features_2d']                # (N, C, H, W), NCHW
    record_len = middle_info['record_len']               # python list of ints

    regroup_feature, mask = regroup(features, record_len, args['max_cav'])
    B, L, C, H, W = regroup_feature.shape
    ws = args['window_size']
    heads = args['input_dim'] // args['dim_head']
    assert H % ws == 0 and W % ws == 0
    assert heads * args['dim_head'] == C == args['input_dim']
    nx, ny = H // ws, W // ws
    N = ws * ws * L
    n_cores, vmem_bytes = _device_hints()

    # bf16 window-token residual stream (single initial transpose from NCHW regroup)
    tok = _regroup_to_window_tokens(regroup_feature, ws)          # (nw, N, C)

    # additive key mask from the tiny (B, L) agent mask (spatially constant -> the
    # same per-window mask serves both window and grid attention), kernel token order.
    tok_mask = jnp.tile(mask, (1, ws * ws))                       # (B, N), agent fastest
    kbias = jnp.where(tok_mask > 0, 0.0, -1e30).astype(jnp.float32)
    kbias = jnp.repeat(kbias, nx * ny, axis=0)[:, None, :]        # (nw, 1, N)

    for li, layer_p in enumerate(params['layers']):
        if li > 0:  # grid-restore of previous layer fused with this window-partition
            tok = _grid_to_win(tok, B, nx, ny, ws, L, C)
        tok = _attn_ffn(tok, kbias, layer_p['win_attn'], layer_p['win_ffd'],
                        heads, args['dim_head'], n_cores, vmem_bytes)
        tok = _win_to_grid(tok, B, nx, ny, ws, L, C)
        tok = _attn_ffn(tok, kbias, layer_p['grid_attn'], layer_p['grid_ffd'],
                        heads, args['dim_head'], n_cores, vmem_bytes)

    xh = _grid_to_head(tok, B, nx, ny, ws, L, C)                  # (B, L*C, H*W)
    fused_feature = _mlp_head(xh, params['head'], H, W, L, C, n_cores, vmem_bytes)
    return fused_feature, 1


# ----------------------------------------------------------------------------
if __name__ == "__main__":
    args = dict(
        max_cav=2,
        in_channels=64,
        input_dim=64,
        mlp_dim=128,
        agent_size=2,          # == max_cav
        window_size=4,
        dim_head=32,
        drop_out=0.0,          # eval-mode dropout = identity
        depth=1,
    )
    H = W = 16
    record_len = [2, 1]
    n_total = sum(record_len)
    B = len(record_len)

    key = jax.random.PRNGKey(0)
    k_feat, k_param = jax.random.split(key)
    features_2d = jax.random.normal(k_feat, (n_total, args['in_channels'], H, W), jnp.float32)
    pairwise_t_matrix = jnp.tile(jnp.eye(4, dtype=jnp.float32),
                                 (B, args['max_cav'], args['max_cav'], 1, 1))
    middle_info = dict(features_2d=features_2d, record_len=record_len,
                       pairwise_t_matrix=pairwise_t_matrix, model_name='PointPillar')

    params = init_params(k_param, args)

    @jax.jit
    def run(p, feats):
        mi = dict(middle_info, features_2d=feats)
        return hete_cobevt_fuse_forward(p, mi, args, neb_middle_info=None)[0]

    fused = jax.block_until_ready(run(params, features_2d))

    assert fused.shape == (B, args['in_channels'], H, W)
    assert bool(jnp.all(jnp.isfinite(fused)))
    print("KERNEL_OK")
</pallas_src>

<mosaic_0001>
module attributes {stable_mosaic.version = 11 : i64} {
  func.func @_attn_ffn_kernel(%arg0: i32, %arg1: memref<8x32x64xbf16, #tpu.memory_space<vmem>>, %arg2: memref<8x1x32xf32, #tpu.memory_space<vmem>>, %arg3: memref<2x32x32xf32, #tpu.memory_space<vmem>>, %arg4: memref<1x64xf32, #tpu.memory_space<vmem>>, %arg5: memref<1x64xf32, #tpu.memory_space<vmem>>, %arg6: memref<64x64xbf16, #tpu.memory_space<vmem>>, %arg7: memref<64x64xbf16, #tpu.memory_space<vmem>>, %arg8: memref<64x64xbf16, #tpu.memory_space<vmem>>, %arg9: memref<64x64xbf16, #tpu.memory_space<vmem>>, %arg10: memref<1x64xf32, #tpu.memory_space<vmem>>, %arg11: memref<1x64xf32, #tpu.memory_space<vmem>>, %arg12: memref<64x128xbf16, #tpu.memory_space<vmem>>, %arg13: memref<1x128xf32, #tpu.memory_space<vmem>>, %arg14: memref<128x64xbf16, #tpu.memory_space<vmem>>, %arg15: memref<1x64xf32, #tpu.memory_space<vmem>>, %arg16: memref<8x32x64xbf16, #tpu.memory_space<vmem>>) attributes {dimension_semantics = [#tpu.dimension_semantics<parallel>], iteration_bounds = array<i64: 4>, scalar_prefetch = 0 : i64, scratch_operands = 0 : i64, tpu.core_type = #tpu.core_type<tc>, window_params = [{transform_indices = @transform_0, window_bounds = array<i64: 8, 32, 64>}, {transform_indices = @transform_1, window_bounds = array<i64: 8, 1, 32>}, {pipeline_mode = #tpu.pipeline_mode<synchronous>, transform_indices = @transform_2, window_bounds = array<i64: 2, 32, 32>}, {pipeline_mode = #tpu.pipeline_mode<synchronous>, transform_indices = @transform_3, window_bounds = array<i64: 1, 64>}, {pipeline_mode = #tpu.pipeline_mode<synchronous>, transform_indices = @transform_4, window_bounds = array<i64: 1, 64>}, {pipeline_mode = #tpu.pipeline_mode<synchronous>, transform_indices = @transform_5, window_bounds = array<i64: 64, 64>}, {pipeline_mode = #tpu.pipeline_mode<synchronous>, transform_indices = @transform_6, window_bounds = array<i64: 64, 64>}, {pipeline_mode = #tpu.pipeline_mode<synchronous>, transform_indices = @transform_7, window_bounds = array<i64: 64, 64>}, {pipeline_mode = #tpu.pipeline_mode<synchronous>, transform_indices = @transform_8, window_bounds = array<i64: 64, 64>}, {pipeline_mode = #tpu.pipeline_mode<synchronous>, transform_indices = @transform_9, window_bounds = array<i64: 1, 64>}, {pipeline_mode = #tpu.pipeline_mode<synchronous>, transform_indices = @transform_10, window_bounds = array<i64: 1, 64>}, {pipeline_mode = #tpu.pipeline_mode<synchronous>, transform_indices = @transform_11, window_bounds = array<i64: 64, 128>}, {pipeline_mode = #tpu.pipeline_mode<synchronous>, transform_indices = @transform_12, window_bounds = array<i64: 1, 128>}, {pipeline_mode = #tpu.pipeline_mode<synchronous>, transform_indices = @transform_13, window_bounds = array<i64: 128, 64>}, {pipeline_mode = #tpu.pipeline_mode<synchronous>, transform_indices = @transform_14, window_bounds = array<i64: 1, 64>}, {transform_indices = @transform_15, window_bounds = array<i64: 8, 32, 64>}]} {
    %c0 = arith.constant 0 : index
    %c0_0 = arith.constant 0 : index
    %c0_1 = arith.constant 0 : index
    %0 = vector.load %arg1[%c0, %c0_0, %c0_1] : memref<8x32x64xbf16, #tpu.memory_space<vmem>>, vector<8x32x64xbf16>
    %1 = arith.extf %0 : vector<8x32x64xbf16> to vector<8x32x64xf32>
    %2 = vector.shape_cast %1 : vector<8x32x64xf32> to vector<256x64xf32>
    %c0_2 = arith.constant 0 : index
    %c0_3 = arith.constant 0 : index
    %c0_4 = arith.constant 0 : index
    %3 = vector.load %arg2[%c0_2, %c0_3, %c0_4] : memref<8x1x32xf32, #tpu.memory_space<vmem>>, vector<8x1x32xf32>
    %c0_5 = arith.constant 0 : index
    %c0_6 = arith.constant 0 : index
    %c0_7 = arith.constant 0 : index
    %4 = vector.load %arg3[%c0_5, %c0_6, %c0_7] : memref<2x32x32xf32, #tpu.memory_space<vmem>>, vector<2x32x32xf32>
    %c0_8 = arith.constant 0 : index
    %c0_9 = arith.constant 0 : index
    %5 = vector.load %arg9[%c0_8, %c0_9] : memref<64x64xbf16, #tpu.memory_space<vmem>>, vector<64x64xbf16>
    %c0_10 = arith.constant 0 : index
    %c0_11 = arith.constant 0 : index
    %6 = vector.load %arg4[%c0_10, %c0_11] : memref<1x64xf32, #tpu.memory_space<vmem>>, vector<1x64xf32>
    %c0_12 = arith.constant 0 : index
    %c0_13 = arith.constant 0 : index
    %7 = vector.load %arg5[%c0_12, %c0_13] : memref<1x64xf32, #tpu.memory_space<vmem>>, vector<1x64xf32>
    %cst = arith.constant dense<0.000000e+00> : vector<256xf32>
    %8 = vector.multi_reduction <add>, %2, %cst [1] : vector<256x64xf32> to vector<256xf32>
    %9 = vector.shape_cast %8 : vector<256xf32> to vector<256x1xf32>
    %cst_14 = arith.constant 6.400000e+01 : f32
    %10 = vector.broadcast %cst_14 : f32 to vector<256x1xf32>
    %11 = arith.divf %9, %10 : vector<256x1xf32>
    %12 = vector.broadcast %11 : vector<256x1xf32> to vector<256x64xf32>
    %13 = arith.subf %2, %12 : vector<256x64xf32>
    %14 = arith.mulf %13, %13 : vector<256x64xf32>
    %cst_15 = arith.constant dense<0.000000e+00> : vector<256xf32>
    %15 = vector.multi_reduction <add>, %14, %cst_15 [1] : vector<256x64xf32> to vector<256xf32>
    %16 = vector.shape_cast %15 : vector<256xf32> to vector<256x1xf32>
    %cst_16 = arith.constant 6.400000e+01 : f32
    %17 = vector.broadcast %cst_16 : f32 to vector<256x1xf32>
    %18 = arith.divf %16, %17 : vector<256x1xf32>
    %19 = vector.broadcast %11 : vector<256x1xf32> to vector<256x64xf32>
    %20 = arith.subf %2, %19 : vector<256x64xf32>
    %cst_17 = arith.constant 9.99999974E-6 : f32
    %21 = vector.broadcast %cst_17 : f32 to vector<256x1xf32>
    %22 = arith.addf %18, %21 : vector<256x1xf32>
    %23 = math.rsqrt %22 : vector<256x1xf32>
    %24 = vector.broadcast %23 : vector<256x1xf32> to vector<256x64xf32>
    %25 = arith.mulf %20, %24 : vector<256x64xf32>
    %26 = vector.broadcast %6 : vector<1x64xf32> to vector<256x64xf32>
    %27 = arith.mulf %25, %26 : vector<256x64xf32>
    %28 = vector.broadcast %7 : vector<1x64xf32> to vector<256x64xf32>
    %29 = arith.addf %27, %28 : vector<256x64xf32>
    %30 = arith.truncf %29 : vector<256x64xf32> to vector<256x64xbf16>
    %c0_18 = arith.constant 0 : index
    %c0_19 = arith.constant 0 : index
    %31 = vector.load %arg6[%c0_18, %c0_19] : memref<64x64xbf16, #tpu.memory_space<vmem>>, vector<64x64xbf16>
    %cst_20 = arith.constant dense<0.000000e+00> : vector<256x64xf32>
    %32 = tpu.matmul %30, %31, %cst_20 {dimension_numbers = #tpu.dot_dimension_numbers<[1], [0], [0], [1], [0, 0, 1, 1], [], []>} : vector<256x64xbf16>, vector<64x64xbf16>, vector<256x64xf32> -> vector<256x64xf32>
    %cst_21 = arith.constant 0.176776692 : f32
    %33 = vector.broadcast %cst_21 : f32 to vector<256x64xf32>
    %34 = arith.mulf %32, %33 : vector<256x64xf32>
    %c0_22 = arith.constant 0 : index
    %c0_23 = arith.constant 0 : index
    %35 = vector.load %arg7[%c0_22, %c0_23] : memref<64x64xbf16, #tpu.memory_space<vmem>>, vector<64x64xbf16>
    %cst_24 = arith.constant dense<0.000000e+00> : vector<256x64xf32>
    %36 = tpu.matmul %30, %35, %cst_24 {dimension_numbers = #tpu.dot_dimension_numbers<[1], [0], [0], [1], [0, 0, 1, 1], [], []>} : vector<256x64xbf16>, vector<64x64xbf16>, vector<256x64xf32> -> vector<256x64xf32>
    %c0_25 = arith.constant 0 : index
    %c0_26 = arith.constant 0 : index
    %37 = vector.load %arg8[%c0_25, %c0_26] : memref<64x64xbf16, #tpu.memory_space<vmem>>, vector<64x64xbf16>
    %cst_27 = arith.constant dense<0.000000e+00> : vector<256x64xf32>
    %38 = tpu.matmul %30, %37, %cst_27 {dimension_numbers = #tpu.dot_dimension_numbers<[1], [0], [0], [1], [0, 0, 1, 1], [], []>} : vector<256x64xbf16>, vector<64x64xbf16>, vector<256x64xf32> -> vector<256x64xf32>
    %39 = vector.shape_cast %34 : vector<256x64xf32> to vector<8x32x64xf32>
    %40 = arith.truncf %39 : vector<8x32x64xf32> to vector<8x32x64xbf16>
    %41 = vector.shape_cast %36 : vector<256x64xf32> to vector<8x32x64xf32>
    %42 = arith.truncf %41 : vector<8x32x64xf32> to vector<8x32x64xbf16>
    %43 = vector.shape_cast %38 : vector<256x64xf32> to vector<8x32x64xf32>
    %44 = arith.truncf %43 : vector<8x32x64xf32> to vector<8x32x64xbf16>
    %cst_28 = arith.constant 0.000000e+00 : f32
    %45 = vector.broadcast %cst_28 : f32 to vector<256x64xf32>
    %46 = vector.extract_strided_slice %40 {offsets = [0, 0, 0], sizes = [8, 32, 32], strides = [1, 1, 1]} : vector<8x32x64xbf16> to vector<8x32x32xbf16>
    %47 = vector.extract_strided_slice %42 {offsets = [0, 0, 0], sizes = [8, 32, 32], strides = [1, 1, 1]} : vector<8x32x64xbf16> to vector<8x32x32xbf16>
    "tpu.trace_start"() <{level = 10 : i32, message = "gne,gme->gnm"}> : () -> ()
    %cst_29 = arith.constant dense<0.000000e+00> : vector<8x32x32xf32>
    %48 = tpu.matmul %46, %47, %cst_29 {dimension_numbers = #tpu.dot_dimension_numbers<[2], [2], [1], [1], [0, 0, 0, 1, 1, 1], [0], [0]>} : vector<8x32x32xbf16>, vector<8x32x32xbf16>, vector<8x32x32xf32> -> vector<8x32x32xf32>
    "tpu.trace_stop"() : () -> ()
    %49 = vector.extract_strided_slice %4 {offsets = [0, 0, 0], sizes = [1, 32, 32], strides = [1, 1, 1]} : vector<2x32x32xf32> to vector<1x32x32xf32>
    %50 = vector.shape_cast %49 : vector<1x32x32xf32> to vector<32x32xf32>
    %51 = vector.shape_cast %50 : vector<32x32xf32> to vector<1x32x32xf32>
    %52 = vector.broadcast %51 : vector<1x32x32xf32> to vector<8x32x32xf32>
    %53 = arith.addf %48, %52 : vector<8x32x32xf32>
    %54 = vector.broadcast %3 : vector<8x1x32xf32> to vector<8x32x32xf32>
    %55 = arith.addf %53, %54 : vector<8x32x32xf32>
    %cst_30 = arith.constant dense<0xFF800000> : vector<8x32xf32>
    %56 = vector.multi_reduction <maximumf>, %55, %cst_30 [2] : vector<8x32x32xf32> to vector<8x32xf32>
    %57 = vector.shape_cast %56 : vector<8x32xf32> to vector<8x32x1xf32>
    %58 = vector.broadcast %57 : vector<8x32x1xf32> to vector<8x32x32xf32>
    %59 = arith.subf %55, %58 : vector<8x32x32xf32>
    %60 = math.exp %59 : vector<8x32x32xf32>
    %cst_31 = arith.constant dense<0.000000e+00> : vector<8x32xf32>
    %61 = vector.multi_reduction <add>, %60, %cst_31 [2] : vector<8x32x32xf32> to vector<8x32xf32>
    %62 = vector.shape_cast %61 : vector<8x32xf32> to vector<8x32x1xf32>
    %63 = tpu.reciprocal %62 {approx = true} : vector<8x32x1xf32> -> vector<8x32x1xf32>
    %64 = arith.truncf %60 : vector<8x32x32xf32> to vector<8x32x32xbf16>
    %65 = vector.extract_strided_slice %44 {offsets = [0, 0, 0], sizes = [8, 32, 32], strides = [1, 1, 1]} : vector<8x32x64xbf16> to vector<8x32x32xbf16>
    "tpu.trace_start"() <{level = 10 : i32, message = "gnm,gme->gne"}> : () -> ()
    %cst_32 = arith.constant dense<0.000000e+00> : vector<8x32x32xf32>
    %66 = tpu.matmul %64, %65, %cst_32 {dimension_numbers = #tpu.dot_dimension_numbers<[2], [1], [1], [2], [0, 0, 0, 1, 1, 2], [0], [0]>} : vector<8x32x32xbf16>, vector<8x32x32xbf16>, vector<8x32x32xf32> -> vector<8x32x32xf32>
    "tpu.trace_stop"() : () -> ()
    %67 = vector.broadcast %63 : vector<8x32x1xf32> to vector<8x32x32xf32>
    %68 = arith.mulf %66, %67 : vector<8x32x32xf32>
    %69 = vector.shape_cast %68 : vector<8x32x32xf32> to vector<256x32xf32>
    %70 = arith.truncf %69 : vector<256x32xf32> to vector<256x32xbf16>
    %71 = vector.extract_strided_slice %5 {offsets = [0, 0], sizes = [32, 64], strides = [1, 1]} : vector<64x64xbf16> to vector<32x64xbf16>
    %cst_33 = arith.constant dense<0.000000e+00> : vector<256x64xf32>
    %72 = tpu.matmul %70, %71, %cst_33 {dimension_numbers = #tpu.dot_dimension_numbers<[1], [0], [0], [1], [0, 0, 1, 1], [], []>} : vector<256x32xbf16>, vector<32x64xbf16>, vector<256x64xf32> -> vector<256x64xf32>
    %73 = arith.addf %45, %72 : vector<256x64xf32>
    %74 = vector.extract_strided_slice %40 {offsets = [0, 0, 32], sizes = [8, 32, 32], strides = [1, 1, 1]} : vector<8x32x64xbf16> to vector<8x32x32xbf16>
    %75 = vector.extract_strided_slice %42 {offsets = [0, 0, 32], sizes = [8, 32, 32], strides = [1, 1, 1]} : vector<8x32x64xbf16> to vector<8x32x32xbf16>
    "tpu.trace_start"() <{level = 10 : i32, message = "gne,gme->gnm"}> : () -> ()
    %cst_34 = arith.constant dense<0.000000e+00> : vector<8x32x32xf32>
    %76 = tpu.matmul %74, %75, %cst_34 {dimension_numbers = #tpu.dot_dimension_numbers<[2], [2], [1], [1], [0, 0, 0, 1, 1, 1], [0], [0]>} : vector<8x32x32xbf16>, vector<8x32x32xbf16>, vector<8x32x32xf32> -> vector<8x32x32xf32>
    "tpu.trace_stop"() : () -> ()
    %77 = vector.extract_strided_slice %4 {offsets = [1, 0, 0], sizes = [1, 32, 32], strides = [1, 1, 1]} : vector<2x32x32xf32> to vector<1x32x32xf32>
    %78 = vector.shape_cast %77 : vector<1x32x32xf32> to vector<32x32xf32>
    %79 = vector.shape_cast %78 : vector<32x32xf32> to vector<1x32x32xf32>
    %80 = vector.broadcast %79 : vector<1x32x32xf32> to vector<8x32x32xf32>
    %81 = arith.addf %76, %80 : vector<8x32x32xf32>
    %82 = vector.broadcast %3 : vector<8x1x32xf32> to vector<8x32x32xf32>
    %83 = arith.addf %81, %82 : vector<8x32x32xf32>
    %cst_35 = arith.constant dense<0xFF800000> : vector<8x32xf32>
    %84 = vector.multi_reduction <maximumf>, %83, %cst_35 [2] : vector<8x32x32xf32> to vector<8x32xf32>
    %85 = vector.shape_cast %84 : vector<8x32xf32> to vector<8x32x1xf32>
    %86 = vector.broadcast %85 : vector<8x32x1xf32> to vector<8x32x32xf32>
    %87 = arith.subf %83, %86 : vector<8x32x32xf32>
    %88 = math.exp %87 : vector<8x32x32xf32>
    %cst_36 = arith.constant dense<0.000000e+00> : vector<8x32xf32>
    %89 = vector.multi_reduction <add>, %88, %cst_36 [2] : vector<8x32x32xf32> to vector<8x32xf32>
    %90 = vector.shape_cast %89 : vector<8x32xf32> to vector<8x32x1xf32>
    %91 = tpu.reciprocal %90 {approx = true} : vector<8x32x1xf32> -> vector<8x32x1xf32>
    %92 = arith.truncf %88 : vector<8x32x32xf32> to vector<8x32x32xbf16>
    %93 = vector.extract_strided_slice %44 {offsets = [0, 0, 32], sizes = [8, 32, 32], strides = [1, 1, 1]} : vector<8x32x64xbf16> to vector<8x32x32xbf16>
    "tpu.trace_start"() <{level = 10 : i32, message = "gnm,gme->gne"}> : () -> ()
    %cst_37 = arith.constant dense<0.000000e+00> : vector<8x32x32xf32>
    %94 = tpu.matmul %92, %93, %cst_37 {dimension_numbers = #tpu.dot_dimension_numbers<[2], [1], [1], [2], [0, 0, 0, 1, 1, 2], [0], [0]>} : vector<8x32x32xbf16>, vector<8x32x32xbf16>, vector<8x32x32xf32> -> vector<8x32x32xf32>
    "tpu.trace_stop"() : () -> ()
    %95 = vector.broadcast %91 : vector<8x32x1xf32> to vector<8x32x32xf32>
    %96 = arith.mulf %94, %95 : vector<8x32x32xf32>
    %97 = vector.shape_cast %96 : vector<8x32x32xf32> to vector<256x32xf32>
    %98 = arith.truncf %97 : vector<256x32xf32> to vector<256x32xbf16>
    %99 = vector.extract_strided_slice %5 {offsets = [32, 0], sizes = [32, 64], strides = [1, 1]} : vector<64x64xbf16> to vector<32x64xbf16>
    %cst_38 = arith.constant dense<0.000000e+00> : vector<256x64xf32>
    %100 = tpu.matmul %98, %99, %cst_38 {dimension_numbers = #tpu.dot_dimension_numbers<[1], [0], [0], [1], [0, 0, 1, 1], [], []>} : vector<256x32xbf16>, vector<32x64xbf16>, vector<256x64xf32> -> vector<256x64xf32>
    %101 = arith.addf %73, %100 : vector<256x64xf32>
    %102 = arith.addf %2, %101 : vector<256x64xf32>
    %c0_39 = arith.constant 0 : index
    %c0_40 = arith.constant 0 : index
    %103 = vector.load %arg10[%c0_39, %c0_40] : memref<1x64xf32, #tpu.memory_space<vmem>>, vector<1x64xf32>
    %c0_41 = arith.constant 0 : index
    %c0_42 = arith.constant 0 : index
    %104 = vector.load %arg11[%c0_41, %c0_42] : memref<1x64xf32, #tpu.memory_space<vmem>>, vector<1x64xf32>
    %cst_43 = arith.constant dense<0.000000e+00> : vector<256xf32>
    %105 = vector.multi_reduction <add>, %102, %cst_43 [1] : vector<256x64xf32> to vector<256xf32>
    %106 = vector.shape_cast %105 : vector<256xf32> to vector<256x1xf32>
    %cst_44 = arith.constant 6.400000e+01 : f32
    %107 = vector.broadcast %cst_44 : f32 to vector<256x1xf32>
    %108 = arith.divf %106, %107 : vector<256x1xf32>
    %109 = vector.broadcast %108 : vector<256x1xf32> to vector<256x64xf32>
    %110 = arith.subf %102, %109 : vector<256x64xf32>
    %111 = arith.mulf %110, %110 : vector<256x64xf32>
    %cst_45 = arith.constant dense<0.000000e+00> : vector<256xf32>
    %112 = vector.multi_reduction <add>, %111, %cst_45 [1] : vector<256x64xf32> to vector<256xf32>
    %113 = vector.shape_cast %112 : vector<256xf32> to vector<256x1xf32>
    %cst_46 = arith.constant 6.400000e+01 : f32
    %114 = vector.broadcast %cst_46 : f32 to vector<256x1xf32>
    %115 = arith.divf %113, %114 : vector<256x1xf32>
    %116 = vector.broadcast %108 : vector<256x1xf32> to vector<256x64xf32>
    %117 = arith.subf %102, %116 : vector<256x64xf32>
    %cst_47 = arith.constant 9.99999974E-6 : f32
    %118 = vector.broadcast %cst_47 : f32 to vector<256x1xf32>
    %119 = arith.addf %115, %118 : vector<256x1xf32>
    %120 = math.rsqrt %119 : vector<256x1xf32>
    %121 = vector.broadcast %120 : vector<256x1xf32> to vector<256x64xf32>
    %122 = arith.mulf %117, %121 : vector<256x64xf32>
    %123 = vector.broadcast %103 : vector<1x64xf32> to vector<256x64xf32>
    %124 = arith.mulf %122, %123 : vector<256x64xf32>
    %125 = vector.broadcast %104 : vector<1x64xf32> to vector<256x64xf32>
    %126 = arith.addf %124, %125 : vector<256x64xf32>
    %127 = arith.truncf %126 : vector<256x64xf32> to vector<256x64xbf16>
    %c0_48 = arith.constant 0 : index
    %c0_49 = arith.constant 0 : index
    %128 = vector.load %arg12[%c0_48, %c0_49] : memref<64x128xbf16, #tpu.memory_space<vmem>>, vector<64x128xbf16>
    %cst_50 = arith.constant dense<0.000000e+00> : vector<256x128xf32>
    %129 = tpu.matmul %127, %128, %cst_50 {dimension_numbers = #tpu.dot_dimension_numbers<[1], [0], [0], [1], [0, 0, 1, 1], [], []>} : vector<256x64xbf16>, vector<64x128xbf16>, vector<256x128xf32> -> vector<256x128xf32>
    %c0_51 = arith.constant 0 : index
    %c0_52 = arith.constant 0 : index
    %130 = vector.load %arg13[%c0_51, %c0_52] : memref<1x128xf32, #tpu.memory_space<vmem>>, vector<1x128xf32>
    %131 = vector.broadcast %130 : vector<1x128xf32> to vector<256x128xf32>
    %132 = arith.addf %129, %131 : vector<256x128xf32>
    %cst_53 = arith.constant 5.000000e-01 : f32
    %133 = vector.broadcast %cst_53 : f32 to vector<256x128xf32>
    %134 = arith.mulf %133, %132 : vector<256x128xf32>
    %cst_54 = arith.constant 0.707106769 : f32
    %135 = vector.broadcast %cst_54 : f32 to vector<256x128xf32>
    %136 = arith.mulf %132, %135 : vector<256x128xf32>
    %cst_55 = arith.constant 0.000000e+00 : f32
    %137 = vector.broadcast %cst_55 : f32 to vector<256x128xf32>
    %138 = arith.cmpf oge, %136, %137 : vector<256x128xf32>
    %cst_56 = arith.constant 1.000000e+00 : f32
    %cst_57 = arith.constant -1.000000e+00 : f32
    %139 = vector.broadcast %cst_56 : f32 to vector<256x128xf32>
    %140 = vector.broadcast %cst_57 : f32 to vector<256x128xf32>
    %141 = arith.select %138, %139, %140 : vector<256x128xi1>, vector<256x128xf32>
    %142 = math.absf %136 : vector<256x128xf32>
    %cst_58 = arith.constant 0.327591091 : f32
    %143 = vector.broadcast %cst_58 : f32 to vector<256x128xf32>
    %144 = arith.mulf %143, %142 : vector<256x128xf32>
    %cst_59 = arith.constant 1.000000e+00 : f32
    %145 = vector.broadcast %cst_59 : f32 to vector<256x128xf32>
    %146 = arith.addf %145, %144 : vector<256x128xf32>
    %cst_60 = arith.constant 1.000000e+00 : f32
    %147 = vector.broadcast %cst_60 : f32 to vector<256x128xf32>
    %148 = arith.divf %147, %146 : vector<256x128xf32>
    %cst_61 = arith.constant 1.06140542 : f32
    %149 = vector.broadcast %cst_61 : f32 to vector<256x128xf32>
    %150 = arith.mulf %149, %148 : vector<256x128xf32>
    %cst_62 = arith.constant -1.45315206 : f32
    %151 = vector.broadcast %cst_62 : f32 to vector<256x128xf32>
    %152 = arith.addf %150, %151 : vector<256x128xf32>
    %153 = arith.mulf %152, %148 : vector<256x128xf32>
    %cst_63 = arith.constant 1.42141378 : f32
    %154 = vector.broadcast %cst_63 : f32 to vector<256x128xf32>
    %155 = arith.addf %153, %154 : vector<256x128xf32>
    %156 = arith.mulf %155, %148 : vector<256x128xf32>
    %cst_64 = arith.constant -0.284496725 : f32
    %157 = vector.broadcast %cst_64 : f32 to vector<256x128xf32>
    %158 = arith.addf %156, %157 : vector<256x128xf32>
    %159 = arith.mulf %158, %148 : vector<256x128xf32>
    %cst_65 = arith.constant 0.254829586 : f32
    %160 = vector.broadcast %cst_65 : f32 to vector<256x128xf32>
    %161 = arith.addf %159, %160 : vector<256x128xf32>
    %162 = arith.mulf %161, %148 : vector<256x128xf32>
    %cst_66 = arith.constant 0.000000e+00 : f32
    %163 = vector.broadcast %cst_66 : f32 to vector<256x128xf32>
    %164 = arith.subf %163, %142 : vector<256x128xf32>
    %165 = arith.mulf %164, %142 : vector<256x128xf32>
    %166 = math.exp %165 : vector<256x128xf32>
    %167 = arith.mulf %162, %166 : vector<256x128xf32>
    %cst_67 = arith.constant 1.000000e+00 : f32
    %168 = vector.broadcast %cst_67 : f32 to vector<256x128xf32>
    %169 = arith.subf %168, %167 : vector<256x128xf32>
    %170 = arith.mulf %141, %169 : vector<256x128xf32>
    %cst_68 = arith.constant 1.000000e+00 : f32
    %171 = vector.broadcast %cst_68 : f32 to vector<256x128xf32>
    %172 = arith.addf %171, %170 : vector<256x128xf32>
    %173 = arith.mulf %134, %172 : vector<256x128xf32>
    %174 = arith.truncf %173 : vector<256x128xf32> to vector<256x128xbf16>
    %c0_69 = arith.constant 0 : index
    %c0_70 = arith.constant 0 : index
    %175 = vector.load %arg14[%c0_69, %c0_70] : memref<128x64xbf16, #tpu.memory_space<vmem>>, vector<128x64xbf16>
    %cst_71 = arith.constant dense<0.000000e+00> : vector<256x64xf32>
    %176 = tpu.matmul %174, %175, %cst_71 {dimension_numbers = #tpu.dot_dimension_numbers<[1], [0], [0], [1], [0, 0, 1, 1], [], []>} : vector<256x128xbf16>, vector<128x64xbf16>, vector<256x64xf32> -> vector<256x64xf32>
    %c0_72 = arith.constant 0 : index
    %c0_73 = arith.constant 0 : index
    %177 = vector.load %arg15[%c0_72, %c0_73] : memref<1x64xf32, #tpu.memory_space<vmem>>, vector<1x64xf32>
    %178 = vector.broadcast %177 : vector<1x64xf32> to vector<256x64xf32>
    %179 = arith.addf %176, %178 : vector<256x64xf32>
    %180 = arith.addf %102, %179 : vector<256x64xf32>
    %181 = vector.shape_cast %180 : vector<256x64xf32> to vector<8x32x64xf32>
    %182 = arith.truncf %181 : vector<8x32x64xf32> to vector<8x32x64xbf16>
    %c0_74 = arith.constant 0 : index
    %c0_75 = arith.constant 0 : index
    %c0_76 = arith.constant 0 : index
    %183 = vector.load %arg16[%c0_74, %c0_75, %c0_76] : memref<8x32x64xbf16, #tpu.memory_space<vmem>>, vector<8x32x64xbf16>
    tpu.vector_store %arg16[%c0_74, %c0_75, %c0_76], %182 {strides = array<i32>} : memref<8x32x64xbf16, #tpu.memory_space<vmem>>, vector<8x32x64xbf16>,
    return
  }
  func.func @transform_0(%arg0: i32) -> (i32, i32, i32) {
    %c0_i32 = arith.constant 0 : i32
    %c0_i32_0 = arith.constant 0 : i32
    %c0_i32_1 = arith.constant 0 : i32
    return %arg0, %c0_i32, %c0_i32_0 : i32, i32, i32
  }
  func.func @transform_1(%arg0: i32) -> (i32, i32, i32) {
    %c0_i32 = arith.constant 0 : i32
    %c0_i32_0 = arith.constant 0 : i32
    %c0_i32_1 = arith.constant 0 : i32
    return %arg0, %c0_i32, %c0_i32_0 : i32, i32, i32
  }
  func.func @transform_2(%arg0: i32) -> (i32, i32, i32) {
    %c0_i32 = arith.constant 0 : i32
    %c0_i32_0 = arith.constant 0 : i32
    %c0_i32_1 = arith.constant 0 : i32
    %c0_i32_2 = arith.constant 0 : i32
    return %c0_i32, %c0_i32_0, %c0_i32_1 : i32, i32, i32
  }
  func.func @transform_3(%arg0: i32) -> (i32, i32) {
    %c0_i32 = arith.constant 0 : i32
    %c0_i32_0 = arith.constant 0 : i32
    %c0_i32_1 = arith.constant 0 : i32
    return %c0_i32, %c0_i32_0 : i32, i32
  }
  func.func @transform_4(%arg0: i32) -> (i32, i32) {
    %c0_i32 = arith.constant 0 : i32
    %c0_i32_0 = arith.constant 0 : i32
    %c0_i32_1 = arith.constant 0 : i32
    return %c0_i32, %c0_i32_0 : i32, i32
  }
  func.func @transform_5(%arg0: i32) -> (i32, i32) {
    %c0_i32 = arith.constant 0 : i32
    %c0_i32_0 = arith.constant 0 : i32
    %c0_i32_1 = arith.constant 0 : i32
    return %c0_i32, %c0_i32_0 : i32, i32
  }
  func.func @transform_6(%arg0: i32) -> (i32, i32) {
    %c0_i32 = arith.constant 0 : i32
    %c0_i32_0 = arith.constant 0 : i32
    %c0_i32_1 = arith.constant 0 : i32
    return %c0_i32, %c0_i32_0 : i32, i32
  }
  func.func @transform_7(%arg0: i32) -> (i32, i32) {
    %c0_i32 = arith.constant 0 : i32
    %c0_i32_0 = arith.constant 0 : i32
    %c0_i32_1 = arith.constant 0 : i32
    return %c0_i32, %c0_i32_0 : i32, i32
  }
  func.func @transform_8(%arg0: i32) -> (i32, i32) {
    %c0_i32 = arith.constant 0 : i32
    %c0_i32_0 = arith.constant 0 : i32
    %c0_i32_1 = arith.constant 0 : i32
    return %c0_i32, %c0_i32_0 : i32, i32
  }
  func.func @transform_9(%arg0: i32) -> (i32, i32) {
    %c0_i32 = arith.constant 0 : i32
    %c0_i32_0 = arith.constant 0 : i32
    %c0_i32_1 = arith.constant 0 : i32
    return %c0_i32, %c0_i32_0 : i32, i32
  }
  func.func @transform_10(%arg0: i32) -> (i32, i32) {
    %c0_i32 = arith.constant 0 : i32
    %c0_i32_0 = arith.constant 0 : i32
    %c0_i32_1 = arith.constant 0 : i32
    return %c0_i32, %c0_i32_0 : i32, i32
  }
  func.func @transform_11(%arg0: i32) -> (i32, i32) {
    %c0_i32 = arith.constant 0 : i32
    %c0_i32_0 = arith.constant 0 : i32
    %c0_i32_1 = arith.constant 0 : i32
    return %c0_i32, %c0_i32_0 : i32, i32
  }
  func.func @transform_12(%arg0: i32) -> (i32, i32) {
    %c0_i32 = arith.constant 0 : i32
    %c0_i32_0 = arith.constant 0 : i32
    %c0_i32_1 = arith.constant 0 : i32
    return %c0_i32, %c0_i32_0 : i32, i32
  }
  func.func @transform_13(%arg0: i32) -> (i32, i32) {
    %c0_i32 = arith.constant 0 : i32
    %c0_i32_0 = arith.constant 0 : i32
    %c0_i32_1 = arith.constant 0 : i32
    return %c0_i32, %c0_i32_0 : i32, i32
  }
  func.func @transform_14(%arg0: i32) -> (i32, i32) {
    %c0_i32 = arith.constant 0 : i32
    %c0_i32_0 = arith.constant 0 : i32
    %c0_i32_1 = arith.constant 0 : i32
    return %c0_i32, %c0_i32_0 : i32, i32
  }
  func.func @transform_15(%arg0: i32) -> (i32, i32, i32) {
    %c0_i32 = arith.constant 0 : i32
    %c0_i32_0 = arith.constant 0 : i32
    %c0_i32_1 = arith.constant 0 : i32
    return %arg0, %c0_i32, %c0_i32_0 : i32, i32, i32
  }
}

module attributes {stable_mosaic.version = 11 : i64} {
  func.func @_head_kernel(%arg0: i32, %arg1: i32, %arg2: memref<1x128x128xbf16, #tpu.memory_space<vmem>>, %arg3: memref<64x1xf32, #tpu.memory_space<vmem>>, %arg4: memref<64x1xf32, #tpu.memory_space<vmem>>, %arg5: memref<64x64xbf16, #tpu.memory_space<vmem>>, %arg6: memref<64x1xf32, #tpu.memory_space<vmem>>, %arg7: memref<1x64x128xf32, #tpu.memory_space<vmem>>) attributes {dimension_semantics = [#tpu.dimension_semantics<parallel>, #tpu.dimension_semantics<parallel>], iteration_bounds = array<i64: 2, 2>, scalar_prefetch = 0 : i64, scratch_operands = 0 : i64, tpu.core_type = #tpu.core_type<tc>, window_params = [{transform_indices = @transform_0, window_bounds = array<i64: 1, 128, 128>}, {pipeline_mode = #tpu.pipeline_mode<synchronous>, transform_indices = @transform_1, window_bounds = array<i64: 64, 1>}, {pipeline_mode = #tpu.pipeline_mode<synchronous>, transform_indices = @transform_2, window_bounds = array<i64: 64, 1>}, {pipeline_mode = #tpu.pipeline_mode<synchronous>, transform_indices = @transform_3, window_bounds = array<i64: 64, 64>}, {pipeline_mode = #tpu.pipeline_mode<synchronous>, transform_indices = @transform_4, window_bounds = array<i64: 64, 1>}, {transform_indices = @transform_5, window_bounds = array<i64: 1, 64, 128>}]} {
    %c0 = arith.constant 0 : index
    %c0_0 = arith.constant 0 : index
    %c0_1 = arith.constant 0 : index
    %0 = vector.load %arg2[%c0, %c0_0, %c0_1] : memref<1x128x128xbf16, #tpu.memory_space<vmem>>, vector<1x128x128xbf16>
    %1 = vector.shape_cast %0 : vector<1x128x128xbf16> to vector<128x128xbf16>
    %2 = arith.extf %1 : vector<128x128xbf16> to vector<128x128xf32>
    %3 = vector.extract_strided_slice %2 {offsets = [0, 0], sizes = [64, 128], strides = [1, 1]} : vector<128x128xf32> to vector<64x128xf32>
    %4 = vector.extract_strided_slice %2 {offsets = [64, 0], sizes = [64, 128], strides = [1, 1]} : vector<128x128xf32> to vector<64x128xf32>
    %5 = arith.addf %3, %4 : vector<64x128xf32>
    %cst = arith.constant 5.000000e-01 : f32
    %6 = vector.broadcast %cst : f32 to vector<64x128xf32>
    %7 = arith.mulf %5, %6 : vector<64x128xf32>
    %cst_2 = arith.constant dense<0.000000e+00> : vector<128xf32>
    %8 = vector.multi_reduction <add>, %7, %cst_2 [0] : vector<64x128xf32> to vector<128xf32>
    %9 = vector.shape_cast %8 : vector<128xf32> to vector<1x128xf32>
    %cst_3 = arith.constant 6.400000e+01 : f32
    %10 = vector.broadcast %cst_3 : f32 to vector<1x128xf32>
    %11 = arith.divf %9, %10 : vector<1x128xf32>
    %12 = vector.broadcast %11 : vector<1x128xf32> to vector<64x128xf32>
    %13 = arith.subf %7, %12 : vector<64x128xf32>
    %14 = arith.mulf %13, %13 : vector<64x128xf32>
    %cst_4 = arith.constant dense<0.000000e+00> : vector<128xf32>
    %15 = vector.multi_reduction <add>, %14, %cst_4 [0] : vector<64x128xf32> to vector<128xf32>
    %16 = vector.shape_cast %15 : vector<128xf32> to vector<1x128xf32>
    %cst_5 = arith.constant 6.400000e+01 : f32
    %17 = vector.broadcast %cst_5 : f32 to vector<1x128xf32>
    %18 = arith.divf %16, %17 : vector<1x128xf32>
    %19 = vector.broadcast %11 : vector<1x128xf32> to vector<64x128xf32>
    %20 = arith.subf %7, %19 : vector<64x128xf32>
    %cst_6 = arith.constant 9.99999974E-6 : f32
    %21 = vector.broadcast %cst_6 : f32 to vector<1x128xf32>
    %22 = arith.addf %18, %21 : vector<1x128xf32>
    %23 = math.rsqrt %22 : vector<1x128xf32>
    %24 = vector.broadcast %23 : vector<1x128xf32> to vector<64x128xf32>
    %25 = arith.mulf %20, %24 : vector<64x128xf32>
    %c0_7 = arith.constant 0 : index
    %c0_8 = arith.constant 0 : index
    %26 = vector.load %arg3[%c0_7, %c0_8] : memref<64x1xf32, #tpu.memory_space<vmem>>, vector<64x1xf32>
    %27 = vector.broadcast %26 : vector<64x1xf32> to vector<64x128xf32>
    %28 = arith.mulf %25, %27 : vector<64x128xf32>
    %c0_9 = arith.constant 0 : index
    %c0_10 = arith.constant 0 : index
    %29 = vector.load %arg4[%c0_9, %c0_10] : memref<64x1xf32, #tpu.memory_space<vmem>>, vector<64x1xf32>
    %30 = vector.broadcast %29 : vector<64x1xf32> to vector<64x128xf32>
    %31 = arith.addf %28, %30 : vector<64x128xf32>
    %c0_11 = arith.constant 0 : index
    %c0_12 = arith.constant 0 : index
    %32 = vector.load %arg5[%c0_11, %c0_12] : memref<64x64xbf16, #tpu.memory_space<vmem>>, vector<64x64xbf16>
    %33 = arith.truncf %31 : vector<64x128xf32> to vector<64x128xbf16>
    %cst_13 = arith.constant dense<0.000000e+00> : vector<64x128xf32>
    %34 = tpu.matmul %32, %33, %cst_13 {dimension_numbers = #tpu.dot_dimension_numbers<[1], [0], [0], [1], [0, 0, 1, 1], [], []>} : vector<64x64xbf16>, vector<64x128xbf16>, vector<64x128xf32> -> vector<64x128xf32>
    %c0_14 = arith.constant 0 : index
    %c0_15 = arith.constant 0 : index
    %35 = vector.load %arg6[%c0_14, %c0_15] : memref<64x1xf32, #tpu.memory_space<vmem>>, vector<64x1xf32>
    %36 = vector.broadcast %35 : vector<64x1xf32> to vector<64x128xf32>
    %37 = arith.addf %34, %36 : vector<64x128xf32>
    %c0_16 = arith.constant 0 : index
    %c0_17 = arith.constant 0 : index
    %c0_18 = arith.constant 0 : index
    %38 = vector.load %arg7[%c0_16, %c0_17, %c0_18] : memref<1x64x128xf32, #tpu.memory_space<vmem>>, vector<1x64x128xf32>
    %39 = vector.shape_cast %38 : vector<1x64x128xf32> to vector<64x128xf32>
    %40 = vector.shape_cast %37 : vector<64x128xf32> to vector<1x64x128xf32>
    tpu.vector_store %arg7[%c0_16, %c0_17, %c0_18], %40 {strides = array<i32>} : memref<1x64x128xf32, #tpu.memory_space<vmem>>, vector<1x64x128xf32>,
    return
  }
  func.func @transform_0(%arg0: i32, %arg1: i32) -> (i32, i32, i32) {
    %c0_i32 = arith.constant 0 : i32
    %c0_i32_0 = arith.constant 0 : i32
    return %arg0, %c0_i32, %arg1 : i32, i32, i32
  }
  func.func @transform_1(%arg0: i32, %arg1: i32) -> (i32, i32) {
    %c0_i32 = arith.constant 0 : i32
    %c0_i32_0 = arith.constant 0 : i32
    %c0_i32_1 = arith.constant 0 : i32
    return %c0_i32, %c0_i32_0 : i32, i32
  }
  func.func @transform_2(%arg0: i32, %arg1: i32) -> (i32, i32) {
    %c0_i32 = arith.constant 0 : i32
    %c0_i32_0 = arith.constant 0 : i32
    %c0_i32_1 = arith.constant 0 : i32
    return %c0_i32, %c0_i32_0 : i32, i32
  }
  func.func @transform_3(%arg0: i32, %arg1: i32) -> (i32, i32) {
    %c0_i32 = arith.constant 0 : i32
    %c0_i32_0 = arith.constant 0 : i32
    %c0_i32_1 = arith.constant 0 : i32
    return %c0_i32, %c0_i32_0 : i32, i32
  }
  func.func @transform_4(%arg0: i32, %arg1: i32) -> (i32, i32) {
    %c0_i32 = arith.constant 0 : i32
    %c0_i32_0 = arith.constant 0 : i32
    %c0_i32_1 = arith.constant 0 : i32
    return %c0_i32, %c0_i32_0 : i32, i32
  }
  func.func @transform_5(%arg0: i32, %arg1: i32) -> (i32, i32, i32) {
    %c0_i32 = arith.constant 0 : i32
    %c0_i32_0 = arith.constant 0 : i32
    return %arg0, %c0_i32, %arg1 : i32, i32, i32
  }
}

</mosaic_0001>

<bundles_post_ra>
// kernel: run.5
= control target key start
LH: loop header
LB: loop body
LE: loop exit
PB: predicated region body
PF: predicated region fallthrough
CT: control target
= control target key end

     0   :  { %s1112_s18 = smov 0   ;;  %s1114_s19 = smov 0   ;;  %s1328_s0 = inlined_call_operand.vmem [shape: bf16[2,128,256], index: 0, kind: input, shape index: {}]   ;;  %s1329_s1 = inlined_call_operand.vmem [shape: f32[64,1], index: 1, kind: input, shape index: {}]   ;;  %s1330_s2 = inlined_call_operand.vmem [shape: f32[64,1], index: 2, kind: input, shape index: {}]   ;;  %s1331_s3 = inlined_call_operand.vmem [shape: bf16[64,64], index: 3, kind: input, shape index: {}]   ;;  %s1332_s4 = inlined_call_operand.vmem [shape: f32[64,1], index: 4, kind: input, shape index: {}]   ;;  %s1333_s5 = inlined_call_operand.vmem [shape: f32[2,64,256], index: 5, kind: output, shape index: {}]  }
   0x1   :  { %s1116_s20 = smov 0   ;;  %s1118_s21 = smov 0  }
   0x2   :  { %s1120_s22 = smov 0   ;;  %s1122_s23 = smov 0  }
   0x3   :  { %s1124_s24 = smov 0  }
   0x4 LB: > { %s24_s25 = sadd.s32 1, %s1071_s22  ;;  %s27_s26 = sadd.s32 1, %s1075_s23  ;;  %s1079_s24 = sphi %s1124_s24, %s15_s24   ;;  %s1075_s23 = sphi %s1122_s23, %s1340_s23   ;;  %s1071_s22 = sphi %s1120_s22, %s1339_s22   ;;  %s1067_s21 = sphi %s1118_s21, %s1338_s21   ;;  %s1063_s20 = sphi %s1116_s20, %s1337_s20   ;;  %s1059_s19 = sphi %s1114_s19, %s1336_s19   ;;  %s1055_s18 = sphi %s1112_s18, %s1335_s18  }
   0x5   : > { %p25_p0 = scmp.ge.s32.totalorder %s24_s25, 2  ;;  %s866_s27 = sadd.s32 4294967295, %s1079_s24  }
   0x6   : > { %p43_p1 = scmp.ne.s32.totalorder %s1059_s19, %s1055_s18  ;;  %p44_p2 = scmp.eq.s32.totalorder %s1079_s24, 0 }
   0x7   : > { %s1342_s25 = smov (%p25_p0, %s24_s25), 0  ;;  %s1344_s26 = smov (!%p25_p0, %s27_s26), %s1075_s23 }
   0x8   : > { %p29_p3 = scmp.ge.s32.totalorder %s1344_s26, 2  ;;  %p159_p4 = scmp.eq.s32.totalorder %s866_s27, 3 }
   0x9   : > { %s32_s28 = ssub.s32 %s1071_s22, %s1342_s25  ;;  %p45_p5 = por %p44_p2, %p43_p1 }
   0xa   : > { %s1346_s26 = smov (%p29_p3, %s1344_s26), 0  ;;  %p1160_p6 = por %p159_p4, %p43_p1 }
   0xb   : > { %s31_s30 = ssub.s32 %s1075_s23, %s1346_s26  ;;  %s36_s7 = sadd.s32 1, %s1059_s19 }
   0xc   : > { %s33_s6 = sor.u32 %s32_s28, %s31_s30  ;;  %p869_p8 = scmp.ge.s32.totalorder %s1079_s24, 4 }
   0xd   : > { %p34_p7 = scmp.eq.s32.totalorder %s33_s6, 0 }
   0xe   : > { %193 = sbr.rel (%p869_p8) target bundleno = 35 (0x23), region = 32 }
   0xf   : > { %s1168_s8 = scalar_select %p34_p7, %s1059_s19, %s36_s7  }
  0x13   : > { %196 = sbr.rel (!%p45_p5) target bundleno = 35 (0x23), region = 36  ;;  %s198_s9 = sand.u32 (%p45_p5), 1, %s1059_s19  }
  0x14   : > { %s871_s10 = sshll.u32 (%p45_p5), %s1075_s23, 5  ;;  %s870_s11 = sshll.u32 (%p45_p5), %s198_s9, 6 }
  0x15   : > { %s202_s12 = sadd.s32 (%p45_p5), %s1071_s22, %s871_s10  ;;  %s200_s17 = scalar_lea.vmem (%p45_p5), [#allocation2], %s870_s11 }
  0x16   : > { %s872_s13 = sshll.u32 (%p45_p5), %s202_s12, 2 }
  0x17   : > { %s1177_s16 = scalar_lea.vmem (%p45_p5), %s1328_s0, %s872_s13 }
  0x18   : > { %v221_v0 = vld [vmem:[%s1177_s16] sm:$0xf]  ;;  %v223_v1 = vld [vmem:[%s1177_s16 + $0x8] sm:$0xf]  ;;  %v225_v2 = vld [vmem:[%s1177_s16 + $0x10] sm:$0xf] }
  0x19   : > { %222 = vst [vmem:[%s200_s17] sm:$0xf] %v221_v0  ;;  %224 = vst [vmem:[%s200_s17 + $0x4] sm:$0xf] %v223_v1  ;;  %v227_v3 = vld [vmem:[%s1177_s16 + $0x18] sm:$0xf] }
  0x1a   : > { %226 = vst [vmem:[%s200_s17 + $0x8] sm:$0xf] %v225_v2  ;;  %v229_v4 = vld [vmem:[%s1177_s16 + $0x20] sm:$0xf]  ;;  %v231_v5 = vld [vmem:[%s1177_s16 + $0x28] sm:$0xf] }
  0x1b   : > { %228 = vst [vmem:[%s200_s17 + $0xc] sm:$0xf] %v227_v3  ;;  %230 = vst [vmem:[%s200_s17 + $0x10] sm:$0xf] %v229_v4  ;;  %v233_v6 = vld [vmem:[%s1177_s16 + $0x30] sm:$0xf] }
  0x1c   : > { %232 = vst [vmem:[%s200_s17 + $0x14] sm:$0xf] %v231_v5  ;;  %v235_v7 = vld [vmem:[%s1177_s16 + $0x38] sm:$0xf]  ;;  %v237_v8 = vld [vmem:[%s1177_s16 + $0x40] sm:$0xf] }
  0x1d   : > { %234 = vst [vmem:[%s200_s17 + $0x18] sm:$0xf] %v233_v6  ;;  %236 = vst [vmem:[%s200_s17 + $0x1c] sm:$0xf] %v235_v7  ;;  %v239_v9 = vld [vmem:[%s1177_s16 + $0x48] sm:$0xf] }
  0x1e   : > { %238 = vst [vmem:[%s200_s17 + $0x20] sm:$0xf] %v237_v8  ;;  %v241_v10 = vld [vmem:[%s1177_s16 + $0x50] sm:$0xf]  ;;  %v243_v11 = vld [vmem:[%s1177_s16 + $0x58] sm:$0xf] }
  0x1f   : > { %240 = vst [vmem:[%s200_s17 + $0x24] sm:$0xf] %v239_v9  ;;  %242 = vst [vmem:[%s200_s17 + $0x28] sm:$0xf] %v241_v10  ;;  %v245_v12 = vld [vmem:[%s1177_s16 + $0x60] sm:$0xf] }
  0x20   : > { %244 = vst [vmem:[%s200_s17 + $0x2c] sm:$0xf] %v243_v11  ;;  %v247_v13 = vld [vmem:[%s1177_s16 + $0x68] sm:$0xf]  ;;  %v249_v14 = vld [vmem:[%s1177_s16 + $0x70] sm:$0xf] }
  0x21   : > { %246 = vst [vmem:[%s200_s17 + $0x30] sm:$0xf] %v245_v12  ;;  %248 = vst [vmem:[%s200_s17 + $0x34] sm:$0xf] %v247_v13  ;;  %v251_v15 = vld [vmem:[%s1177_s16 + $0x78] sm:$0xf] }
  0x22   : > { %250 = vst [vmem:[%s200_s17 + $0x38] sm:$0xf] %v249_v14  ;;  %252 = vst [vmem:[%s200_s17 + $0x3c] sm:$0xf] %v251_v15 }
  0x23 PF: > { %p873_p9 = scmp.ge.s32.totalorder %s1079_s24, 1  ;;  %p307_p10 = scmp.lt.s32.totalorder %s1079_s24, 5 }
  0x25   : > { %p308_p11 = pnand %p873_p9, %p307_p10 }
  0x26   : > { %s314_s7 = sand.u32 (!%p308_p11), 1, %s1055_s18  }
  0x27   : > { %311 = sbr.rel (%p308_p11) target bundleno = 417 (0x1a1), region = 77  ;;  %s1204_s9 = sshll.u32 (!%p308_p11), %s314_s7, 6 }
  0x28   : > { %s316_s17 = scalar_lea.vmem (!%p308_p11), [#allocation2], %s1204_s9  ;;  %s339_s30 = scalar_lea.vmem (!%p308_p11), [#allocation3], %s1204_s9 }
  0x2c   : > { %v506_v16 = vld [vmem:[%s1330_s2 + $0x30] sm:$0xff]  ;;  %v1081_v18 = vmov 0   ;;  %v507_v19 = vld [vmem:[%s1330_s2 + $0x38] sm:$0xff]  ;;  %v449_v21 = vld [vmem:[%s1329_s1 + $0x28] sm:$0xff]  ;;  %vm636_vm0 = vcmask 523264   ;;  %s885_s9 = sshll.u32 (%p1160_p6), %s1067_s21, 4 }
  0x2d   : > { %v450_v17 = vld [vmem:[%s1329_s1 + $0x30] sm:$0xff]  ;;  %1018 = vset.pattern.permute.xlu1 %v1081_v18  ;;  %1017 = vset.pattern.permute.xlu0 %v1081_v18  ;;  %v451_v20 = vld [vmem:[%s1329_s1 + $0x38] sm:$0xff]  ;;  %v448_v22 = vld [vmem:[%s1329_s1 + $0x20] sm:$0xff]  ;;  %s730_s6 = sadd.s32 (%p1160_p6), %s1063_s20, %s885_s9 }
  0x2e   : > { %540 = vperm.xlu1 %1018, %v506_v16   ;;  %484 = vperm.xlu0 %1017, %v450_v17   ;;  %v890_v23 = vld [vmem:[%s316_s17] sm:$0xff]   ;;  %v921_v24 = vld [vmem:[%s316_s17 + $0x8] sm:$0xff]   ;;  %v922_v25 = vld [vmem:[%s316_s17 + $0x10] sm:$0xff]   ;;  %s886_s7 = sshll.u32 (%p1160_p6), %s730_s6, 3 }
  0x2f   : > { %v505_v26 = vld [vmem:[%s1330_s2 + $0x28] sm:$0xff]  ;;  %v504_v27 = vld [vmem:[%s1330_s2 + $0x20] sm:$0xff]  ;;  %v891_v28 = vunpack.c.l.bf16 %v890_v23  ;;  %v892_v29 = vunpack.c.h.bf16 %v890_v23  ;;  %v895_v30 = vunpack.c.l.bf16 %v921_v24  ;;  %v896_v31 = vunpack.c.h.bf16 %v921_v24  ;;  %v923_v32 = vld [vmem:[%s316_s17 + $0x18] sm:$0xff]   ;;  %s732_s12 = scalar_lea.vmem (%p1160_p6), %s1333_s5, %s886_s7 }
  0x30   : > { %v924_v33 = vld [vmem:[%s316_s17 + $0x20] sm:$0xff]   ;;  %v925_v34 = vld [vmem:[%s316_s17 + $0x28] sm:$0xff]   ;;  %v899_v35 = vunpack.c.l.bf16 %v922_v25  ;;  %v926_v36 = vld [vmem:[%s316_s17 + $0x30] sm:$0xff]   ;;  %v900_v42 = vunpack.c.h.bf16 %v922_v25  ;;  %v903_v49 = vunpack.c.l.bf16 %v923_v32  ;;  %v904_v57 = vunpack.c.h.bf16 %v923_v32 }
  0x31   : > { %v927_v37 = vld [vmem:[%s316_s17 + $0x38] sm:$0xff]   ;;  %v907_v38 = vunpack.c.l.bf16 %v924_v33  ;;  %v908_v39 = vunpack.c.h.bf16 %v924_v33  ;;  %v911_v40 = vunpack.c.l.bf16 %v925_v34  ;;  %v912_v41 = vunpack.c.h.bf16 %v925_v34  ;;  %v446_v52 = vld [vmem:[%s1329_s1 + $0x10] sm:$0xff]  ;;  %v445_v6 = vld [vmem:[%s1329_s1 + $0x8] sm:$0xff] }
  0x32   : > { %545 = vperm.xlu1 %1018, %v507_v19   ;;  %489 = vperm.xlu0 %1017, %v451_v20   ;;  %v915_v43 = vunpack.c.l.bf16 %v926_v36  ;;  %v916_v44 = vunpack.c.h.bf16 %v926_v36  ;;  %v919_v50 = vunpack.c.l.bf16 %v927_v37  ;;  %v447_v51 = vld [vmem:[%s1329_s1 + $0x18] sm:$0xff]  ;;  %v920_v58 = vunpack.c.h.bf16 %v927_v37  ;;  %v502_v63 = vld [vmem:[%s1330_s2 + $0x10] sm:$0xff]  ;;  %v444_v7 = vld [vmem:[%s1329_s1] sm:$0xff] }
  0x33   : > { %v373_v45 = vadd.f32 %v907_v38, %v891_v28  ;;  %v374_v46 = vadd.f32 %v908_v39, %v892_v29  ;;  %v375_v47 = vadd.f32 %v911_v40, %v895_v30  ;;  %v376_v48 = vadd.f32 %v912_v41, %v896_v31  ;;  %v503_v62 = vld [vmem:[%s1330_s2 + $0x18] sm:$0xff]  ;;  %v501_v12 = vld [vmem:[%s1330_s2 + $0x8] sm:$0xff]  ;;  %v500_v13 = vld [vmem:[%s1330_s2] sm:$0xff] }
  0x34   : > { %v377_v53 = vadd.f32 %v915_v43, %v899_v35  ;;  %v378_v59 = vadd.f32 %v916_v44, %v900_v42  ;;  %v379_v0 = vadd.f32 %v919_v50, %v903_v49  ;;  %v380_v3 = vadd.f32 %v920_v58, %v904_v57  ;;  %v569_v16 = vld [vmem:[%s1332_s4 + $0x8] sm:$0xff]  ;;  %v568_v17 = vld [vmem:[%s1332_s4] sm:$0xff]  ;;  %v1020_v20 = vld [vmem:[%s1331_s3 + $0x10] sm:$0xff]  }
  0x35   : > { %v381_v54 = vmul.f32 0.5, %v373_v45  ;;  %v382_v55 = vmul.f32 0.5, %v374_v46  ;;  %v383_v56 = vmul.f32 0.5, %v375_v47  ;;  %v384_v60 = vmul.f32 0.5, %v376_v48  ;;  %v1019_v19 = vld [vmem:[%s1331_s3] sm:$0xff]   ;;  %948 = vmatprep.mubr.msk.bf16.mxu1 %vm636_vm0, %v1020_v20  ;;  %v570_v23 = vld [vmem:[%s1332_s4 + $0x10] sm:$0xff] }
  0x36   : > { %479 = vperm.xlu1 %1018, %v449_v21   ;;  %474 = vperm.xlu0 %1017, %v448_v22   ;;  %v385_v1 = vmul.f32 0.5, %v377_v53  ;;  %v386_v4 = vmul.f32 0.5, %v378_v59  ;;  %v387_v8 = vmul.f32 0.5, %v379_v0  ;;  %v388_v10 = vmul.f32 0.5, %v380_v3  ;;  %v571_v22 = vld [vmem:[%s1332_s4 + $0x18] sm:$0xff]  ;;  %v574_v31 = vld [vmem:[%s1332_s4 + $0x30] sm:$0xff] }
  0x37   : > { %v389_v61 = vadd.f32 %v382_v55, %v381_v54  ;;  %944 = vmatprep.mubr.msk.bf16.mxu0 %vm636_vm0, %v1019_v19  ;;  %v575_v30 = vld [vmem:[%s1332_s4 + $0x38] sm:$0xff] }
  0x39   : > { %v390_v2 = vadd.f32 %v389_v61, %v383_v56 }
  0x3a   : > { %535 = vperm.xlu1 %1018, %v505_v26   ;;  %530 = vperm.xlu0 %1017, %v504_v27   ;;  %v573_v26 = vld [vmem:[%s1332_s4 + $0x28] sm:$0xff]  ;;  %v572_v27 = vld [vmem:[%s1332_s4 + $0x20] sm:$0xff] }
  0x3b   : > { %v391_v5 = vadd.f32 %v390_v2, %v384_v60 }
  0x3d   : > { %v392_v9 = vadd.f32 %v391_v5, %v385_v1 }
  0x3e   : > { %469 = vperm.xlu1 %1018, %v447_v51   ;;  %464 = vperm.xlu0 %1017, %v446_v52  }
  0x3f   : > { %v393_v11 = vadd.f32 %v392_v9, %v386_v4 }
  0x41   : > { %v394_v14 = vadd.f32 %v393_v11, %v387_v8 }
  0x42   : > { %525 = vperm.xlu1 %1018, %v503_v62   ;;  %520 = vperm.xlu0 %1017, %v502_v63  }
  0x43   : > { %v395_v15 = vadd.f32 %v394_v14, %v388_v10 }
  0x45   : > { %v396_v18 = vrot.slane %v395_v15, 4 }
  0x46   : > { %459 = vperm.xlu1 %1018, %v445_v6   ;;  %454 = vperm.xlu0 %1017, %v444_v7  }
  0x47   : > { %v397_v21 = vadd.f32 %v396_v18, %v395_v15 }
  0x49   : > { %v398_v24 = vrot.slane %v397_v21, 2 }
  0x4a   : > { %515 = vperm.xlu1 %1018, %v501_v12   ;;  %510 = vperm.xlu0 %1017, %v500_v13  }
  0x4b   : > { %v399_v25 = vadd.f32 %v398_v24, %v397_v21 }
  0x4d   : > { %v400_v28 = vrot.slane %v399_v25, 1 }
  0x4e   : > { %583 = vperm.xlu1 %1018, %v569_v16   ;;  %578 = vperm.xlu0 %1017, %v568_v17  }
  0x4f   : > { %v401_v29 = vadd.f32 %v400_v28, %v399_v25 }
  0x51   : > { %v403_v32 = vmul.f32 0.015625, %v401_v29 }
  0x52   : > { %593 = vperm.xlu1 %1018, %v571_v22   ;;  %588 = vperm.xlu0 %1017, %v570_v23  }
  0x53   : > { %v1281_v33 = vsub.f32 %v381_v54, %v403_v32  ;;  %v1283_v34 = vsub.f32 %v382_v55, %v403_v32  ;;  %v406_v35 = vsub.f32 %v383_v56, %v403_v32  ;;  %v407_v38 = vsub.f32 %v384_v60, %v403_v32 }
  0x54   : > { %v408_v41 = vsub.f32 %v385_v1, %v403_v32  ;;  %v409_v44 = vsub.f32 %v386_v4, %v403_v32  ;;  %v410_v47 = vsub.f32 %v387_v8, %v403_v32  ;;  %v411_v50 = vsub.f32 %v388_v10, %v403_v32 }
  0x55   : > { %v412_v36 = vmul.f32 %v1281_v33, %v1281_v33  ;;  %v413_v37 = vmul.f32 %v1283_v34, %v1283_v34  ;;  %v414_v39 = vmul.f32 %v406_v35, %v406_v35  ;;  %v415_v42 = vmul.f32 %v407_v38, %v407_v38 }
  0x56   : > { %603 = vperm.xlu1 %1018, %v573_v26   ;;  %598 = vperm.xlu0 %1017, %v572_v27   ;;  %v416_v45 = vmul.f32 %v408_v41, %v408_v41  ;;  %v417_v48 = vmul.f32 %v409_v44, %v409_v44  ;;  %v418_v51 = vmul.f32 %v410_v47, %v410_v47 }
  0x57   : > { %v420_v40 = vadd.f32 %v413_v37, %v412_v36  ;;  %v419_v53 = vmul.f32 %v411_v50, %v411_v50 }
  0x59   : > { %v421_v43 = vadd.f32 %v420_v40, %v414_v39 }
  0x5a   : > { %613 = vperm.xlu1 %1018, %v575_v30   ;;  %608 = vperm.xlu0 %1017, %v574_v31  }
  0x5b   : > { %v422_v46 = vadd.f32 %v421_v43, %v415_v42 }
  0x5d   : > { %v423_v49 = vadd.f32 %v422_v46, %v416_v45 }
  0x5f   : > { %v424_v52 = vadd.f32 %v423_v49, %v417_v48 }
  0x61   : > { %v425_v54 = vadd.f32 %v424_v52, %v418_v51 }
  0x63   : > { %v426_v55 = vadd.f32 %v425_v54, %v419_v53 }
  0x65   : > { %v427_v56 = vrot.slane %v426_v55, 4 }
  0x67   : > { %v428_v57 = vadd.f32 %v427_v56, %v426_v55 }
  0x69   : > { %v429_v58 = vrot.slane %v428_v57, 2 }
  0x6b   : > { %v430_v59 = vadd.f32 %v429_v58, %v428_v57 }
  0x6d   : > { %v431_v60 = vrot.slane %v430_v59, 1 }
  0x6f   : > { %v432_v61 = vadd.f32 %v431_v60, %v430_v59 }
  0x71   : > { %v433_v62 = vmul.f32 0.015625, %v432_v61 }
  0x73   : > { %v434_v63 = vadd.f32 1e-05, %v433_v62 }
  0x75   : > { %1023 = vrsqrt.f32 %v434_v63 }
  0x82   : > { %v1024_v0 = vpop.eup %1023 }
  0x83   : > { %v442_v1 = vmul.f32 %v1024_v0, %v410_v47  ;;  %v443_v4 = vmul.f32 %v1024_v0, %v411_v50  ;;  %v441_v11 = vmul.f32 %v1024_v0, %v409_v44  ;;  %v440_v12 = vmul.f32 %v1024_v0, %v408_v41 }
  0x84   : > { %v439_v23 = vmul.f32 %v1024_v0, %v407_v38  ;;  %v438_v24 = vmul.f32 %v1024_v0, %v406_v35  ;;  %v437_v37 = vmul.f32 %v1024_v0, %v1283_v34  ;;  %v436_v39 = vmul.f32 %v1024_v0, %v1281_v33  ;;  %v1021_v34 = vld [vmem:[%s1331_s3 + $0x8] sm:$0xff]   ;;  %v1022_v33 = vld [vmem:[%s1331_s3 + $0x18] sm:$0xff]  }
  0xa9   : > { %v541_v2 = vpop.permute.xlu1 %540  ;;  %v485_v3 = vpop.permute.xlu0 %484 }
  0xaa   : > { %v498_v5 = vmul.f32 %v485_v3, %v442_v1 }
  0xac   : > { %v554_v9 = vadd.f32 %v541_v2, %v498_v5 }
  0xad   : > { %v546_v6 = vpop.permute.xlu1 %545  ;;  %v490_v7 = vpop.permute.xlu0 %489 }
  0xae   : > { %v499_v8 = vmul.f32 %v490_v7, %v443_v4 }
  0xb0   : > { %v555_v10 = vadd.f32 %v546_v6, %v499_v8 }
  0xb1   : > { %v480_v13 = vpop.permute.xlu1 %479  ;;  %v475_v14 = vpop.permute.xlu0 %474 }
  0xb2   : > { %v567_v15 = vpack.c.bf16 %v555_v10, %v554_v9  ;;  %v497_v16 = vmul.f32 %v480_v13, %v441_v11  ;;  %v496_v17 = vmul.f32 %v475_v14, %v440_v12 }
  0xb4   : > { %936 = vmatprep.subr.bf16.mxu0 %v567_v15  ;;  %952 = vmatprep.subr.bf16.mxu1 %v567_v15 }
  0xb5   : > { %v536_v18 = vpop.permute.xlu1 %535  ;;  %v531_v19 = vpop.permute.xlu0 %530  ;;  %937 = vmatpush3.bf16.msra.mxu0 %v567_v15  ;;  %956 = vmatpush3.bf16.msra.mxu1 %v567_v15 }
  0xb6   : > { %v553_v20 = vadd.f32 %v536_v18, %v497_v16  ;;  %v552_v21 = vadd.f32 %v531_v19, %v496_v17 }
  0xb8   : > { %v566_v22 = vpack.c.bf16 %v553_v20, %v552_v21 }
  0xb9   : > { %v470_v25 = vpop.permute.xlu1 %469  ;;  %v465_v26 = vpop.permute.xlu0 %464 }
  0xba   : > { %938 = vmatprep.subr.bf16.mxu0 %v566_v22  ;;  %953 = vmatprep.subr.bf16.mxu1 %v566_v22  ;;  %v495_v27 = vmul.f32 %v470_v25, %v439_v23  ;;  %v494_v28 = vmul.f32 %v465_v26, %v438_v24 }
  0xbb   : > { %939 = vmatpush3.bf16.msra.mxu0 %v566_v22  ;;  %957 = vmatpush3.bf16.msra.mxu1 %v566_v22 }
  0xbd   : > { %v526_v29 = vpop.permute.xlu1 %525  ;;  %v521_v30 = vpop.permute.xlu0 %520 }
  0xbe   : > { %v551_v31 = vadd.f32 %v526_v29, %v495_v27  ;;  %v550_v32 = vadd.f32 %v521_v30, %v494_v28 }
  0xc0   : > { %v565_v36 = vpack.c.bf16 %v551_v31, %v550_v32 }
  0xc1   : > { %v460_v40 = vpop.permute.xlu1 %459  ;;  %v455_v38 = vpop.permute.xlu0 %454 }
  0xc2   : > { %940 = vmatprep.subr.bf16.mxu0 %v565_v36  ;;  %954 = vmatprep.subr.bf16.mxu1 %v565_v36  ;;  %v493_v35 = vmul.f32 %v460_v40, %v437_v37  ;;  %v492_v41 = vmul.f32 %v455_v38, %v436_v39 }
  0xc3   : > { %941 = vmatpush3.bf16.msra.mxu0 %v565_v36  ;;  %958 = vmatpush3.bf16.msra.mxu1 %v565_v36 }
  0xc5   : > { %v516_v42 = vpop.permute.xlu1 %515  ;;  %v511_v43 = vpop.permute.xlu0 %510 }
  0xc6   : > { %v549_v44 = vadd.f32 %v516_v42, %v493_v35  ;;  %v548_v45 = vadd.f32 %v511_v43, %v492_v41 }
  0xc8   : > { %v564_v46 = vpack.c.bf16 %v549_v44, %v548_v45 }
  0xc9   : > { %v579_v47 = vpop.permute.xlu0 %578  ;;  %v584_v48 = vpop.permute.xlu1 %583 }
  0xca   : > { %942 = vmatprep.subr.bf16.mxu0 %v564_v46  ;;  %955 = vmatprep.subr.bf16.mxu1 %v564_v46 }
  0xcb   : > { %943 = vmatpush3.bf16.msra.mxu0 %v564_v46  ;;  %959 = vmatpush3.bf16.msra.mxu1 %v564_v46 }
  0xcd   : > { %v589_v49 = vpop.permute.xlu0 %588  ;;  %v594_v50 = vpop.permute.xlu1 %593 }
  0xce   : > { %945 = vmatmul.mubr.msk.bf16.vlgmr.msra.gmra.mxu0 %vm636_vm0, %v1021_v34  ;;  %949 = vmatmul.mubr.msk.bf16.vlgmr.msra.gmra.mxu1 %vm636_vm0, %v1022_v33 }
  0xd1   : > { %v599_v51 = vpop.permute.xlu0 %598  ;;  %v604_v52 = vpop.permute.xlu1 %603 }
  0xd5   : > { %v609_v53 = vpop.permute.xlu0 %608  ;;  %v614_v60 = vpop.permute.xlu1 %613 }
 0x18e   : > { %v946_v54 = vpop.f32.mrf.mxu0  ;;  %v950_v55 = vpop.f32.mrf.mxu1 }
 0x18f   : > { %v692_v56 = vadd.f32 %v946_v54, %v589_v49  ;;  %v708_v57 = vadd.f32 %v950_v55, %v609_v53 }
 0x190   : > { %v683_v58 = vpop.f32.mrf.mxu0  ;;  %v699_v59 = vpop.f32.mrf.mxu1 }
 0x191   : > { %716 = vst [vmem:[%s339_s30 + $0x10] sm:$0xff] %v692_v56  ;;  %720 = vst [vmem:[%s339_s30 + $0x30] sm:$0xff] %v708_v57  ;;  %v684_v61 = vadd.f32 %v683_v58, %v579_v47  ;;  %v700_v62 = vadd.f32 %v699_v59, %v599_v51 }
 0x192   : > { %v947_v63 = vpop.f32.mrf.mxu0  ;;  %v951_v0 = vpop.f32.mrf.mxu1 }
 0x193   : > { %714 = vst [vmem:[%s339_s30] sm:$0xff] %v684_v61  ;;  %718 = vst [vmem:[%s339_s30 + $0x20] sm:$0xff] %v700_v62  ;;  %v695_v1 = vadd.f32 %v947_v63, %v594_v50  ;;  %v711_v2 = vadd.f32 %v951_v0, %v614_v60  ;;  %728 = sbr.rel (!%p1160_p6) target bundleno = 417 (0x1a1), region = 85 }
 0x194   : > { %v686_v3 = vpop.f32.mrf.mxu0  ;;  %v702_v4 = vpop.f32.mrf.mxu1 }
 0x195   : > { %717 = vst [vmem:[%s339_s30 + $0x18] sm:$0xff] %v695_v1  ;;  %721 = vst [vmem:[%s339_s30 + $0x38] sm:$0xff] %v711_v2  ;;  %v687_v5 = vadd.f32 %v686_v3, %v584_v48  ;;  %v703_v6 = vadd.f32 %v702_v4, %v604_v52 }
 0x197   : > { %715 = vst [vmem:[%s339_s30 + $0x8] sm:$0xff] %v687_v5  ;;  %719 = vst [vmem:[%s339_s30 + $0x28] sm:$0xff] %v703_v6 }
 0x198   : > { %v779_v9 = vld [vmem:[%s339_s30 + $0x10] sm:$0xff] }
 0x199   : > { %v787_v13 = vld [vmem:[%s339_s30 + $0x30] sm:$0xff]  ;;  %780 = vst [vmem:[%s732_s12 + $0x20] sm:$0xff] %v779_v9 }
 0x19a   : > { %v775_v7 = vld [vmem:[%s339_s30] sm:$0xff]  ;;  %788 = vst [vmem:[%s732_s12 + $0x60] sm:$0xff] %v787_v13 }
 0x19b   : > { %v783_v11 = vld [vmem:[%s339_s30 + $0x20] sm:$0xff]  ;;  %776 = vst [vmem:[%s732_s12] sm:$0xff] %v775_v7 }
 0x19c   : > { %v781_v10 = vld [vmem:[%s339_s30 + $0x18] sm:$0xff]  ;;  %784 = vst [vmem:[%s732_s12 + $0x40] sm:$0xff] %v783_v11 }
 0x19d   : > { %v789_v14 = vld [vmem:[%s339_s30 + $0x38] sm:$0xff]  ;;  %782 = vst [vmem:[%s732_s12 + $0x30] sm:$0xff] %v781_v10 }
 0x19e   : > { %v777_v8 = vld [vmem:[%s339_s30 + $0x8] sm:$0xff]  ;;  %790 = vst [vmem:[%s732_s12 + $0x70] sm:$0xff] %v789_v14 }
 0x19f   : > { %v785_v12 = vld [vmem:[%s339_s30 + $0x28] sm:$0xff]  ;;  %778 = vst [vmem:[%s732_s12 + $0x10] sm:$0xff] %v777_v8 }
 0x1a0   : > { %786 = vst [vmem:[%s732_s12 + $0x50] sm:$0xff] %v785_v12 }
 0x1a1 PF: > { %s15_s24 = sadd.s32 1, %s1079_s24   ;;  %s1335_s18 = smov %s1059_s19 }
 0x1a2   : > { %p12_p12 = scmp.ge.s32.totalorder %s15_s24, 6   ;;  %s1336_s19 = smov %s1168_s8 }
 0x1a3   : > { %s1337_s20 = smov %s1071_s22  ;;  %s1338_s21 = smov %s1075_s23 }
 0x1a4   : > { %s1339_s22 = smov %s1342_s25  ;;  %s1340_s23 = smov %s1346_s26 }
 0x1a5   :  { %14 = sbr.rel (!%p12_p12) target bundleno = 4 (0x4), region = 154 }

// kernel: run.3
= control target key start
LH: loop header
LB: loop body
LE: loop exit
PB: predicated region body
PF: predicated region fallthrough
CT: control target
= control target key end

     0   :  { %s9177_s18 = smov 0   ;;  %s12752_s0 = inlined_call_operand.vmem [shape: bf16[32,32,64], index: 0, kind: input, shape index: {}]   ;;  %s12753_s1 = inlined_call_operand.vmem [shape: f32[32,1,32], index: 1, kind: input, shape index: {}]   ;;  %s12754_s2 = inlined_call_operand.vmem [shape: f32[2,32,32], index: 2, kind: input, shape index: {}]   ;;  %s12755_s3 = inlined_call_operand.vmem [shape: f32[1,64], index: 3, kind: input, shape index: {}]   ;;  %s12756_s4 = inlined_call_operand.vmem [shape: f32[1,64], index: 4, kind: input, shape index: {}]   ;;  %s12757_s5 = inlined_call_operand.vmem [shape: bf16[64,64], index: 5, kind: input, shape index: {}]   ;;  %s12758_s6 = inlined_call_operand.vmem [shape: bf16[64,64], index: 6, kind: input, shape index: {}]   ;;  %s12759_s7 = inlined_call_operand.vmem [shape: bf16[64,64], index: 7, kind: input, shape index: {}]   ;;  %s12760_s8 = inlined_call_operand.vmem [shape: bf16[64,64], index: 8, kind: input, shape index: {}]   ;;  %s12761_s9 = inlined_call_operand.vmem [shape: f32[1,64], index: 9, kind: input, shape index: {}]   ;;  %s12762_s10 = inlined_call_operand.vmem [shape: f32[1,64], index: 10, kind: input, shape index: {}]   ;;  %s12763_s11 = inlined_call_operand.vmem [shape: bf16[64,128], index: 11, kind: input, shape index: {}]   ;;  %s12764_s12 = inlined_call_operand.vmem [shape: f32[1,128], index: 12, kind: input, shape index: {}]   ;;  %s12765_s13 = inlined_call_operand.vmem [shape: bf16[128,64], index: 13, kind: input, shape index: {}]   ;;  %s12766_s14 = inlined_call_operand.vmem [shape: f32[1,64], index: 14, kind: input, shape index: {}]   ;;  %s12767_s15 = inlined_call_operand.vmem [shape: bf16[32,32,64], index: 15, kind: output, shape index: {}]  }
   0x1 LB: > { %s7331_s19 = sadd.s32 4294967295, %s9093_s18   ;;  %p7335_p0 = scmp.ge.s32.totalorder %s9093_s18, 1  ;;  %s9093_s18 = sphi %s9177_s18, %s25_s18  }
   0x2   : > { %p449_p1 = scmp.lt.s32.totalorder %s9093_s18, 5 }
   0x4   : > { %p450_p2 = pnand %p7335_p0, %p449_p1 }
   0x6   : > { %453 = sbr.rel (%p450_p2) target bundleno = 2819 (0xb03), region = 80 }
   0xb   : > { %s7336_s20 = sshll.u32 %s7331_s19, 3  ;;  %vm613_vm0 = vcmask 523264   ;;  %vm1830_vm1 = vcmask 261120   ;;  %s9095_s28 = smov 96  }
   0xc   : > { %p504_p3 = scmp.lt.s32.totalorder %s7336_s20, 31 }
   0xe   : > { %s13210_s20 = smov (!%p504_p3, %s7336_s20), 31 }
   0xf   : > { %s7579_s21 = sshll.u32 %s13210_s20, 4  ;;  %s10011_s16 = scalar_lea.vmem %s12753_s1, %s13210_s20 }
  0x10   : > { %s9193_s24 = scalar_lea.vmem %s12752_s0, %s7579_s21  ;;  %s12622_s22 = scalar_lea.vmem %s12767_s15, %s7579_s21 }
  0x11   : > { %v7614_v0 = vld [vmem:[%s9193_s24] sm:$0xff]   ;;  %v7677_v1 = vld [vmem:[%s9193_s24 + $0x8] sm:$0xff]   ;;  %v7678_v6 = vld [vmem:[%s9193_s24 + $0x10] sm:$0xff]  }
  0x12   : > { %v9197_v2 = vunpack.c.l.bf16 %v7614_v0  ;;  %v9199_v3 = vunpack.c.l.bf16 %v7677_v1  ;;  %v9201_v4 = vunpack.c.h.bf16 %v7614_v0  ;;  %v9203_v5 = vunpack.c.h.bf16 %v7677_v1  ;;  %v7679_v13 = vld [vmem:[%s9193_s24 + $0x18] sm:$0xff]   ;;  %v7680_v18 = vld [vmem:[%s9193_s24 + $0x20] sm:$0xff]   ;;  %v7681_v19 = vld [vmem:[%s9193_s24 + $0x28] sm:$0xff]  }
  0x13   : > { %v9210_v9 = vunpack.c.l.bf16 %v7678_v6  ;;  %v9212_v10 = vunpack.c.h.bf16 %v7678_v6  ;;  %v9223_v16 = vunpack.c.l.bf16 %v7679_v13  ;;  %v9225_v17 = vunpack.c.h.bf16 %v7679_v13  ;;  %v7682_v30 = vld [vmem:[%s9193_s24 + $0x30] sm:$0xff]   ;;  %v7683_v33 = vld [vmem:[%s9193_s24 + $0x38] sm:$0xff]   ;;  %v7684_v38 = vld [vmem:[%s9193_s24 + $0x40] sm:$0xff]  }
  0x14   : > { %12888 = vst [vmem:[#allocation2_spill] sm:$0xff] %v9197_v2  ;;  %12889 = vst [vmem:[#allocation3_spill] sm:$0xff] %v9199_v3  ;;  %v614_v7 = vsel %vm613_vm0, %v9197_v2, 0.0  ;;  %v620_v8 = vsel %vm613_vm0, %v9199_v3, 0.0  ;;  %v617_v11 = vsel %vm613_vm0, %v9201_v4, 0.0  ;;  %v623_v12 = vsel %vm613_vm0, %v9203_v5, 0.0 }
  0x15   : > { %12890 = vst [vmem:[#allocation4_spill] sm:$0xff] %v9201_v4  ;;  %12891 = vst [vmem:[#allocation5_spill] sm:$0xff] %v9203_v5  ;;  %615 = vadd.xlane.f32.xlu0 %v614_v7  ;;  %621 = vadd.xlane.f32.xlu1 %v620_v8  ;;  %v626_v14 = vsel %vm613_vm0, %v9210_v9, 0.0  ;;  %v629_v15 = vsel %vm613_vm0, %v9212_v10, 0.0  ;;  %v9229_v20 = vunpack.c.l.bf16 %v7680_v18  ;;  %v9231_v21 = vunpack.c.h.bf16 %v7680_v18  ;;  %v7685_v43 = vld [vmem:[%s9193_s24 + $0x48] sm:$0xff]   ;;  %v7686_v48 = vld [vmem:[%s9193_s24 + $0x50] sm:$0xff]  }
  0x16   : > { %12892 = vst [vmem:[#allocation6_spill] sm:$0xff] %v9210_v9  ;;  %12893 = vst [vmem:[#allocation7_spill] sm:$0xff] %v9212_v10  ;;  %v632_v22 = vsel %vm613_vm0, %v9223_v16, 0.0  ;;  %v635_v23 = vsel %vm613_vm0, %v9225_v17, 0.0  ;;  %v9237_v24 = vunpack.c.l.bf16 %v7681_v19  ;;  %v9239_v25 = vunpack.c.h.bf16 %v7681_v19  ;;  %v7687_v53 = vld [vmem:[%s9193_s24 + $0x58] sm:$0xff]   ;;  %v7688_v58 = vld [vmem:[%s9193_s24 + $0x60] sm:$0xff]  }
  0x17   : > { %12894 = vst [vmem:[#allocation8_spill] sm:$0xff] %v9223_v16  ;;  %12895 = vst [vmem:[#allocation9_spill] sm:$0xff] %v9225_v17  ;;  %v638_v26 = vsel %vm613_vm0, %v9229_v20, 0.0  ;;  %v641_v27 = vsel %vm613_vm0, %v9231_v21, 0.0  ;;  %v9250_v31 = vunpack.c.l.bf16 %v7682_v30  ;;  %v9252_v32 = vunpack.c.h.bf16 %v7682_v30  ;;  %v7689_v63 = vld [vmem:[%s9193_s24 + $0x68] sm:$0xff]   ;;  %v7690_v8 = vld [vmem:[%s9193_s24 + $0x70] sm:$0xff]  }
  0x18   : > { %12896 = vst [vmem:[#allocation10_spill] sm:$0xff] %v9229_v20  ;;  %12897 = vst [vmem:[#allocation11_spill] sm:$0xff] %v9231_v21  ;;  %v644_v28 = vsel %vm613_vm0, %v9237_v24, 0.0  ;;  %v647_v29 = vsel %vm613_vm0, %v9239_v25, 0.0  ;;  %v9259_v36 = vunpack.c.l.bf16 %v7683_v33  ;;  %v9261_v37 = vunpack.c.h.bf16 %v7683_v33 }
  0x19   : > { %618 = vadd.xlane.f32.xlu0 %v617_v11  ;;  %624 = vadd.xlane.f32.xlu1 %v623_v12  ;;  %12898 = vst [vmem:[#allocation12_spill] sm:$0xff] %v9237_v24  ;;  %12899 = vst [vmem:[#allocation13_spill] sm:$0xff] %v9239_v25  ;;  %v650_v34 = vsel %vm613_vm0, %v9250_v31, 0.0  ;;  %v653_v35 = vsel %vm613_vm0, %v9252_v32, 0.0  ;;  %v9268_v41 = vunpack.c.l.bf16 %v7684_v38  ;;  %v9270_v42 = vunpack.c.h.bf16 %v7684_v38 }
  0x1a   : > { %12900 = vst [vmem:[#allocation14_spill] sm:$0xff] %v9250_v31  ;;  %12901 = vst [vmem:[#allocation15_spill] sm:$0xff] %v9252_v32  ;;  %v656_v39 = vsel %vm613_vm0, %v9259_v36, 0.0  ;;  %v659_v40 = vsel %vm613_vm0, %v9261_v37, 0.0  ;;  %v9277_v46 = vunpack.c.l.bf16 %v7685_v43  ;;  %v9279_v47 = vunpack.c.h.bf16 %v7685_v43 }
  0x1b   : > { %12902 = vst [vmem:[#allocation16_spill] sm:$0xff] %v9259_v36  ;;  %12903 = vst [vmem:[#allocation17_spill] sm:$0xff] %v9261_v37  ;;  %v662_v44 = vsel %vm613_vm0, %v9268_v41, 0.0  ;;  %v665_v45 = vsel %vm613_vm0, %v9270_v42, 0.0  ;;  %v9286_v51 = vunpack.c.l.bf16 %v7686_v48  ;;  %v9288_v52 = vunpack.c.h.bf16 %v7686_v48 }
  0x1c   : > { %12904 = vst [vmem:[#allocation18_spill] sm:$0xff] %v9268_v41  ;;  %12905 = vst [vmem:[#allocation19_spill] sm:$0xff] %v9270_v42  ;;  %v668_v49 = vsel %vm613_vm0, %v9277_v46, 0.0  ;;  %v671_v50 = vsel %vm613_vm0, %v9279_v47, 0.0  ;;  %v9295_v56 = vunpack.c.l.bf16 %v7687_v53  ;;  %v9297_v57 = vunpack.c.h.bf16 %v7687_v53 }
  0x1d   : > { %627 = vadd.xlane.f32.xlu0 %v626_v14  ;;  %630 = vadd.xlane.f32.xlu1 %v629_v15  ;;  %12906 = vst [vmem:[#allocation20_spill] sm:$0xff] %v9277_v46  ;;  %12907 = vst [vmem:[#allocation21_spill] sm:$0xff] %v9279_v47  ;;  %v674_v54 = vsel %vm613_vm0, %v9286_v51, 0.0  ;;  %v677_v55 = vsel %vm613_vm0, %v9288_v52, 0.0  ;;  %v9304_v61 = vunpack.c.l.bf16 %v7688_v58  ;;  %v9306_v62 = vunpack.c.h.bf16 %v7688_v58 }
  0x1e   : > { %12908 = vst [vmem:[#allocation22_spill] sm:$0xff] %v9286_v51  ;;  %12909 = vst [vmem:[#allocation23_spill] sm:$0xff] %v9288_v52  ;;  %v680_v59 = vsel %vm613_vm0, %v9295_v56, 0.0  ;;  %v683_v60 = vsel %vm613_vm0, %v9297_v57, 0.0  ;;  %v9313_v6 = vunpack.c.l.bf16 %v7689_v63  ;;  %v9315_v7 = vunpack.c.h.bf16 %v7689_v63 }
  0x1f   : > { %12910 = vst [vmem:[#allocation24_spill] sm:$0xff] %v9295_v56  ;;  %12911 = vst [vmem:[#allocation25_spill] sm:$0xff] %v9297_v57  ;;  %v686_v0 = vsel %vm613_vm0, %v9304_v61, 0.0  ;;  %v689_v1 = vsel %vm613_vm0, %v9306_v62, 0.0  ;;  %v9322_v13 = vunpack.c.l.bf16 %v7690_v8  ;;  %v9324_v14 = vunpack.c.h.bf16 %v7690_v8 }
  0x20   : > { %12912 = vst [vmem:[#allocation26_spill] sm:$0xff] %v9304_v61  ;;  %12913 = vst [vmem:[#allocation27_spill] sm:$0xff] %v9306_v62  ;;  %v692_v11 = vsel %vm613_vm0, %v9313_v6, 0.0  ;;  %v695_v12 = vsel %vm613_vm0, %v9315_v7, 0.0 }
  0x21   : > { %633 = vadd.xlane.f32.xlu0 %v632_v22  ;;  %636 = vadd.xlane.f32.xlu1 %v635_v23  ;;  %12914 = vst [vmem:[#allocation28_spill] sm:$0xff] %v9313_v6  ;;  %12915 = vst [vmem:[#allocation29_spill] sm:$0xff] %v9315_v7  ;;  %v698_v15 = vsel %vm613_vm0, %v9322_v13, 0.0  ;;  %v701_v18 = vsel %vm613_vm0, %v9324_v14, 0.0 }
  0x22   : > { %12916 = vst [vmem:[#allocation30_spill] sm:$0xff] %v9322_v13  ;;  %12917 = vst [vmem:[#allocation31_spill] sm:$0xff] %v9324_v14 }
  0x25   : > { %639 = vadd.xlane.f32.xlu0 %v638_v26  ;;  %642 = vadd.xlane.f32.xlu1 %v641_v27 }
  0x29   : > { %645 = vadd.xlane.f32.xlu0 %v644_v28  ;;  %648 = vadd.xlane.f32.xlu1 %v647_v29 }
  0x2d   : > { %651 = vadd.xlane.f32.xlu0 %v650_v34  ;;  %654 = vadd.xlane.f32.xlu1 %v653_v35 }
  0x31   : > { %657 = vadd.xlane.f32.xlu0 %v656_v39  ;;  %660 = vadd.xlane.f32.xlu1 %v659_v40  ;;  %v7691_v39 = vld [vmem:[%s9193_s24 + $0x78] sm:$0xff]  }
  0x35   : > { %663 = vadd.xlane.f32.xlu0 %v662_v44  ;;  %666 = vadd.xlane.f32.xlu1 %v665_v45 }
  0x39   : > { %669 = vadd.xlane.f32.xlu0 %v668_v49  ;;  %672 = vadd.xlane.f32.xlu1 %v671_v50  ;;  %v9349_v50 = vunpack.c.l.bf16 %v7691_v39 }
  0x3b   : > { %12918 = vst [vmem:[#allocation32_spill] sm:$0xff] %v9349_v50 }
  0x3d   : > { %675 = vadd.xlane.f32.xlu0 %v674_v54  ;;  %678 = vadd.xlane.f32.xlu1 %v677_v55 }
  0x41   : > { %681 = vadd.xlane.f32.xlu0 %v680_v59  ;;  %684 = vadd.xlane.f32.xlu1 %v683_v60 }
  0x45   : > { %687 = vadd.xlane.f32.xlu0 %v686_v0  ;;  %690 = vadd.xlane.f32.xlu1 %v689_v1  ;;  %v704_v0 = vsel %vm613_vm0, %v9349_v50, 0.0 }
  0x49   : > { %693 = vadd.xlane.f32.xlu0 %v692_v11  ;;  %696 = vadd.xlane.f32.xlu1 %v695_v12  ;;  %v9364_v11 = vunpack.c.h.bf16 %v7691_v39 }
  0x4b   : > { %12919 = vst [vmem:[#allocation33_spill] sm:$0xff] %v9364_v11 }
  0x4d   : > { %699 = vadd.xlane.f32.xlu0 %v698_v15  ;;  %702 = vadd.xlane.f32.xlu1 %v701_v18 }
  0x9e   : > { %v616_v19 = vpop.xlane.xlu0 %615  ;;  %v622_v22 = vpop.xlane.xlu1 %621 }
  0x9f   : > { %v711_v23 = vmul.f32 0.015625, %v616_v19  ;;  %v713_v26 = vmul.f32 0.015625, %v622_v22 }
  0xa1   : > { %v9331_v27 = vsub.f32 %v9197_v2, %v711_v23  ;;  %v9334_v28 = vsub.f32 %v9199_v3, %v713_v26  ;;  %v707_v26 = vsel %vm613_vm0, %v9364_v11, 0.0 }
  0xa2   : > { %v619_v29 = vpop.xlane.xlu0 %618  ;;  %v625_v30 = vpop.xlane.xlu1 %624 }
  0xa3   : > { %v712_v33 = vmul.f32 0.015625, %v619_v29  ;;  %v714_v34 = vmul.f32 0.015625, %v625_v30  ;;  %v775_v35 = vmul.f32 %v9331_v27, %v9331_v27  ;;  %v777_v38 = vmul.f32 %v9334_v28, %v9334_v28 }
  0xa5   : > { %v9342_v40 = vsub.f32 %v9201_v4, %v712_v33  ;;  %v9345_v43 = vsub.f32 %v9203_v5, %v714_v34  ;;  %v807_v44 = vsel %vm613_vm0, %v775_v35, 0.0  ;;  %v813_v45 = vsel %vm613_vm0, %v777_v38, 0.0  ;;  %v10032_v4 = vld [vmem:[%s12754_s2 + $0x18] sm:$0xff] }
  0xa6   : > { %808 = vadd.xlane.f32.xlu0 %v807_v44  ;;  %v628_v48 = vpop.xlane.xlu0 %627  ;;  %v631_v49 = vpop.xlane.xlu1 %630 }
  0xa7   : > { %v776_v53 = vmul.f32 %v9342_v40, %v9342_v40  ;;  %v715_v54 = vmul.f32 0.015625, %v628_v48  ;;  %v716_v55 = vmul.f32 0.015625, %v631_v49  ;;  %v778_v58 = vmul.f32 %v9345_v43, %v9345_v43 }
  0xa9   : > { %v810_v59 = vsel %vm613_vm0, %v776_v53, 0.0  ;;  %v9357_v60 = vsub.f32 %v9210_v9, %v715_v54  ;;  %v9360_v63 = vsub.f32 %v9212_v10, %v716_v55  ;;  %v816_v12 = vsel %vm613_vm0, %v778_v58, 0.0 }
  0xaa   : > { %814 = vadd.xlane.f32.xlu0 %v813_v45  ;;  %811 = vadd.xlane.f32.xlu1 %v810_v59  ;;  %v634_v1 = vpop.xlane.xlu0 %633  ;;  %v637_v8 = vpop.xlane.xlu1 %636 }
  0xab   : > { %v717_v15 = vmul.f32 0.015625, %v634_v1  ;;  %v718_v18 = vmul.f32 0.015625, %v637_v8  ;;  %v779_v19 = vmul.f32 %v9357_v60, %v9357_v60  ;;  %v780_v33 = vmul.f32 %v9360_v63, %v9360_v63 }
  0xad   : > { %v9370_v22 = vsub.f32 %v9223_v16, %v717_v15  ;;  %v9373_v23 = vsub.f32 %v9225_v17, %v718_v18  ;;  %v819_v34 = vsel %vm613_vm0, %v779_v19, 0.0  ;;  %v822_v48 = vsel %vm613_vm0, %v780_v33, 0.0 }
  0xae   : > { %705 = vadd.xlane.f32.xlu0 %v704_v0  ;;  %817 = vadd.xlane.f32.xlu1 %v816_v12  ;;  %v640_v29 = vpop.xlane.xlu0 %639  ;;  %v643_v30 = vpop.xlane.xlu1 %642 }
  0xaf   : > { %v719_v35 = vmul.f32 0.015625, %v640_v29  ;;  %v720_v38 = vmul.f32 0.015625, %v643_v30  ;;  %v781_v39 = vmul.f32 %v9370_v22, %v9370_v22  ;;  %v782_v54 = vmul.f32 %v9373_v23, %v9373_v23 }
  0xb1   : > { %v9383_v44 = vsub.f32 %v9229_v20, %v719_v35  ;;  %v9386_v45 = vsub.f32 %v9231_v21, %v720_v38  ;;  %v825_v55 = vsel %vm613_vm0, %v781_v39, 0.0  ;;  %v828_v12 = vsel %vm613_vm0, %v782_v54, 0.0 }
  0xb2   : > { %708 = vadd.xlane.f32.xlu1 %v707_v26  ;;  %820 = vadd.xlane.f32.xlu0 %v819_v34  ;;  %v646_v49 = vpop.xlane.xlu0 %645  ;;  %v649_v53 = vpop.xlane.xlu1 %648 }
  0xb3   : > { %v721_v58 = vmul.f32 0.015625, %v646_v49  ;;  %v722_v59 = vmul.f32 0.015625, %v649_v53  ;;  %v783_v0 = vmul.f32 %v9383_v44, %v9383_v44  ;;  %v784_v19 = vmul.f32 %v9386_v45, %v9386_v45 }
  0xb5   : > { %v9395_v1 = vsub.f32 %v9237_v24, %v721_v58  ;;  %v9398_v8 = vsub.f32 %v9239_v25, %v722_v59  ;;  %v831_v26 = vsel %vm613_vm0, %v783_v0, 0.0  ;;  %v834_v38 = vsel %vm613_vm0, %v784_v19, 0.0 }
  0xb6   : > { %823 = vadd.xlane.f32.xlu1 %v822_v48  ;;  %826 = vadd.xlane.f32.xlu0 %v825_v55  ;;  %v652_v15 = vpop.xlane.xlu0 %651  ;;  %v655_v18 = vpop.xlane.xlu1 %654 }
  0xb7   : > { %v723_v29 = vmul.f32 0.015625, %v652_v15  ;;  %v724_v30 = vmul.f32 0.015625, %v655_v18  ;;  %v785_v33 = vmul.f32 %v9395_v1, %v9395_v1  ;;  %v786_v49 = vmul.f32 %v9398_v8, %v9398_v8 }
  0xb9   : > { %v9407_v34 = vsub.f32 %v9250_v31, %v723_v29  ;;  %v9410_v35 = vsub.f32 %v9252_v32, %v724_v30  ;;  %v837_v53 = vsel %vm613_vm0, %v785_v33, 0.0 }
  0xba   : > { %829 = vadd.xlane.f32.xlu1 %v828_v12  ;;  %832 = vadd.xlane.f32.xlu0 %v831_v26  ;;  %v658_v39 = vpop.xlane.xlu0 %657  ;;  %v661_v48 = vpop.xlane.xlu1 %660  ;;  %v840_v12 = vsel %vm613_vm0, %v786_v49, 0.0 }
  0xbb   : > { %v725_v54 = vmul.f32 0.015625, %v658_v39  ;;  %v726_v55 = vmul.f32 0.015625, %v661_v48  ;;  %v787_v58 = vmul.f32 %v9407_v34, %v9407_v34  ;;  %v788_v19 = vmul.f32 %v9410_v35, %v9410_v35  ;;  %v8538_v39 = vld [vmem:[%s12757_s5 + $0x18] sm:$0xff]  }
  0xbc   : > { %v8539_v48 = vld [vmem:[%s12758_s6 + $0x18] sm:$0xff]   ;;  %7960 = vmatprep.subr.bf16.mxu0 %v8538_v39 }
  0xbd   : > { %v9419_v59 = vsub.f32 %v9259_v36, %v725_v54  ;;  %v9422_v0 = vsub.f32 %v9261_v37, %v726_v55  ;;  %v843_v26 = vsel %vm613_vm0, %v787_v58, 0.0  ;;  %8000 = vmatprep.subr.bf16.mxu1 %v8539_v48  ;;  %7961 = vmatpush3.bf16.msra.mxu0 %v8538_v39 }
  0xbe   : > { %835 = vadd.xlane.f32.xlu1 %v834_v38  ;;  %838 = vadd.xlane.f32.xlu0 %v837_v53  ;;  %v664_v15 = vpop.xlane.xlu0 %663  ;;  %v667_v18 = vpop.xlane.xlu1 %666  ;;  %v846_v53 = vsel %vm613_vm0, %v788_v19, 0.0  ;;  %v8540_v19 = vld [vmem:[%s12757_s5 + $0x10] sm:$0xff]  }
  0xbf   : > { %v727_v29 = vmul.f32 0.015625, %v664_v15  ;;  %v728_v30 = vmul.f32 0.015625, %v667_v18  ;;  %v789_v33 = vmul.f32 %v9419_v59, %v9419_v59  ;;  %v790_v58 = vmul.f32 %v9422_v0, %v9422_v0  ;;  %8001 = vmatpush3.bf16.msra.mxu1 %v8539_v48  ;;  %7962 = vmatprep.subr.bf16.mxu0 %v8540_v19 }
  0xc1   : > { %v9431_v38 = vsub.f32 %v9268_v41, %v727_v29  ;;  %v9440_v49 = vsub.f32 %v9270_v42, %v728_v30  ;;  %v849_v15 = vsel %vm613_vm0, %v789_v33, 0.0  ;;  %v852_v33 = vsel %vm613_vm0, %v790_v58, 0.0  ;;  %7963 = vmatpush3.bf16.msra.mxu0 %v8540_v19  ;;  %v8542_v58 = vld [vmem:[%s12757_s5 + $0x8] sm:$0xff]  }
  0xc2   : > { %841 = vadd.xlane.f32.xlu1 %v840_v12  ;;  %844 = vadd.xlane.f32.xlu0 %v843_v26  ;;  %v670_v54 = vpop.xlane.xlu0 %669  ;;  %v673_v55 = vpop.xlane.xlu1 %672  ;;  %v8541_v26 = vld [vmem:[%s12758_s6 + $0x10] sm:$0xff]  }
  0xc3   : > { %v729_v18 = vmul.f32 0.015625, %v670_v54  ;;  %v730_v29 = vmul.f32 0.015625, %v673_v55  ;;  %v791_v41 = vmul.f32 %v9431_v38, %v9431_v38  ;;  %v792_v54 = vmul.f32 %v9440_v49, %v9440_v49  ;;  %8002 = vmatprep.subr.bf16.mxu1 %v8541_v26  ;;  %7964 = vmatprep.subr.bf16.mxu0 %v8542_v58 }
  0xc4   : > { %8003 = vmatpush3.bf16.msra.mxu1 %v8541_v26 }
  0xc5   : > { %v9449_v12 = vsub.f32 %v9277_v46, %v729_v18  ;;  %v9458_v30 = vsub.f32 %v9279_v47, %v730_v29  ;;  %v855_v55 = vsel %vm613_vm0, %v791_v41, 0.0  ;;  %v8543_v41 = vld [vmem:[%s12758_s6 + $0x8] sm:$0xff]   ;;  %v858_v29 = vsel %vm613_vm0, %v792_v54, 0.0  ;;  %7965 = vmatpush3.bf16.msra.mxu0 %v8542_v58 }
  0xc6   : > { %847 = vadd.xlane.f32.xlu1 %v846_v53  ;;  %850 = vadd.xlane.f32.xlu0 %v849_v15  ;;  %v676_v39 = vpop.xlane.xlu0 %675  ;;  %v679_v48 = vpop.xlane.xlu1 %678 }
  0xc7   : > { %v731_v18 = vmul.f32 0.015625, %v676_v39  ;;  %v732_v42 = vmul.f32 0.015625, %v679_v48  ;;  %v793_v46 = vmul.f32 %v9449_v12, %v9449_v12  ;;  %v794_v39 = vmul.f32 %v9458_v30, %v9458_v30  ;;  %8004 = vmatprep.subr.bf16.mxu1 %v8543_v41 }
  0xc8   : > { %8005 = vmatpush3.bf16.msra.mxu1 %v8543_v41 }
  0xc9   : > { %v9467_v53 = vsub.f32 %v9286_v51, %v731_v18  ;;  %v9476_v15 = vsub.f32 %v9288_v52, %v732_v42  ;;  %v861_v48 = vsel %vm613_vm0, %v793_v46, 0.0  ;;  %v8545_v46 = vld [vmem:[%s12758_s6] sm:$0xff]  }
  0xca   : > { %853 = vadd.xlane.f32.xlu1 %v852_v33  ;;  %856 = vadd.xlane.f32.xlu0 %v855_v55  ;;  %v682_v19 = vpop.xlane.xlu0 %681  ;;  %v685_v26 = vpop.xlane.xlu1 %684  ;;  %v8544_v33 = vld [vmem:[%s12757_s5] sm:$0xff]   ;;  %v864_v55 = vsel %vm613_vm0, %v794_v39, 0.0 }
  0xcb   : > { %v733_v18 = vmul.f32 0.015625, %v682_v19  ;;  %v734_v51 = vmul.f32 0.015625, %v685_v26  ;;  %v795_v47 = vmul.f32 %v9467_v53, %v9467_v53  ;;  %v796_v19 = vmul.f32 %v9476_v15, %v9476_v15  ;;  %7966 = vmatprep.subr.bf16.mxu0 %v8544_v33  ;;  %8006 = vmatprep.subr.bf16.mxu1 %v8545_v46 }
  0xcc   : > { %7967 = vmatpush3.bf16.msra.mxu0 %v8544_v33  ;;  %8007 = vmatpush3.bf16.msra.mxu1 %v8545_v46 }
  0xcd   : > { %v9485_v42 = vsub.f32 %v9295_v56, %v733_v18  ;;  %v9494_v54 = vsub.f32 %v9297_v57, %v734_v51  ;;  %v867_v26 = vsel %vm613_vm0, %v795_v47, 0.0  ;;  %v870_v39 = vsel %vm613_vm0, %v796_v19, 0.0 }
  0xce   : > { %859 = vadd.xlane.f32.xlu1 %v858_v29  ;;  %862 = vadd.xlane.f32.xlu0 %v861_v48  ;;  %v688_v58 = vpop.xlane.xlu0 %687  ;;  %v691_v41 = vpop.xlane.xlu1 %690 }
  0xcf   : > { %v735_v18 = vmul.f32 0.015625, %v688_v58  ;;  %v736_v52 = vmul.f32 0.015625, %v691_v41  ;;  %v797_v56 = vmul.f32 %v9485_v42, %v9485_v42  ;;  %v798_v58 = vmul.f32 %v9494_v54, %v9494_v54 }
  0xd1   : > { %v9503_v51 = vsub.f32 %v9304_v61, %v735_v18  ;;  %v9506_v29 = vsub.f32 %v9306_v62, %v736_v52  ;;  %v873_v41 = vsel %vm613_vm0, %v797_v56, 0.0  ;;  %v876_v19 = vsel %vm613_vm0, %v798_v58, 0.0 }
  0xd2   : > { %865 = vadd.xlane.f32.xlu1 %v864_v55  ;;  %868 = vadd.xlane.f32.xlu0 %v867_v26  ;;  %v694_v47 = vpop.xlane.xlu0 %693  ;;  %v697_v48 = vpop.xlane.xlu1 %696 }
  0xd3   : > { %v737_v57 = vmul.f32 0.015625, %v694_v47  ;;  %v738_v33 = vmul.f32 0.015625, %v697_v48  ;;  %v799_v46 = vmul.f32 %v9503_v51, %v9503_v51  ;;  %v800_v56 = vmul.f32 %v9506_v29, %v9506_v29 }
  0xd5   : > { %v9515_v55 = vsub.f32 %v9313_v6, %v737_v57  ;;  %v9518_v52 = vsub.f32 %v9315_v7, %v738_v33  ;;  %v879_v47 = vsel %vm613_vm0, %v799_v46, 0.0 }
  0xd6   : > { %871 = vadd.xlane.f32.xlu1 %v870_v39  ;;  %874 = vadd.xlane.f32.xlu0 %v873_v41  ;;  %v700_v26 = vpop.xlane.xlu0 %699  ;;  %v703_v18 = vpop.xlane.xlu1 %702  ;;  %v882_v41 = vsel %vm613_vm0, %v800_v56, 0.0 }
  0xd7   : > { %v739_v48 = vmul.f32 0.015625, %v700_v26  ;;  %v740_v62 = vmul.f32 0.015625, %v703_v18  ;;  %v801_v57 = vmul.f32 %v9515_v55, %v9515_v55  ;;  %v802_v46 = vmul.f32 %v9518_v52, %v9518_v52 }
  0xd9   : > { %v9527_v39 = vsub.f32 %v9322_v13, %v739_v48  ;;  %v9531_v58 = vsub.f32 %v9324_v14, %v740_v62  ;;  %v885_v33 = vsel %vm613_vm0, %v801_v57, 0.0  ;;  %v888_v18 = vsel %vm613_vm0, %v802_v46, 0.0 }
  0xda   : > { %877 = vadd.xlane.f32.xlu1 %v876_v19  ;;  %880 = vadd.xlane.f32.xlu0 %v879_v47 }
  0xdb   : > { %v803_v26 = vmul.f32 %v9527_v39, %v9527_v39  ;;  %v804_v56 = vmul.f32 %v9531_v58, %v9531_v58 }
  0xdd   : > { %v891_v19 = vsel %vm613_vm0, %v803_v26, 0.0  ;;  %v894_v62 = vsel %vm613_vm0, %v804_v56, 0.0 }
  0xde   : > { %883 = vadd.xlane.f32.xlu1 %v882_v41  ;;  %886 = vadd.xlane.f32.xlu0 %v885_v33 }
  0xe2   : > { %889 = vadd.xlane.f32.xlu1 %v888_v18  ;;  %892 = vadd.xlane.f32.xlu0 %v891_v19 }
  0xe6   : > { %895 = vadd.xlane.f32.xlu1 %v894_v62 }
 0x12f   : > { %v809_v47 = vpop.xlane.xlu0 %808 }
 0x130   : > { %v903_v48 = vmul.f32 0.015625, %v809_v47 }
 0x132   : > { %v935_v57 = vadd.f32 1e-05, %v903_v48 }
 0x133   : > { %v812_v14 = vpop.xlane.xlu1 %811  ;;  %v815_v13 = vpop.xlane.xlu0 %814 }
 0x134   : > { %8566 = vrsqrt.f32 %v935_v57  ;;  %v904_v41 = vmul.f32 0.015625, %v812_v14  ;;  %v905_v33 = vmul.f32 0.015625, %v815_v13 }
 0x136   : > { %v936_v7 = vadd.f32 1e-05, %v904_v41  ;;  %v937_v46 = vadd.f32 1e-05, %v905_v33 }
 0x137   : > { %v818_v6 = vpop.xlane.xlu1 %817  ;;  %v706_v26 = vpop.xlane.xlu0 %705 }
 0x138   : > { %8568 = vrsqrt.f32 %v936_v7  ;;  %v906_v61 = vmul.f32 0.015625, %v818_v6  ;;  %v741_v37 = vmul.f32 0.015625, %v706_v26  ;;  %v9557_v26 = vld [vmem:[%s12755_s3] ss:$0 sm:$0xff] }
 0x139   : > { %8570 = vrsqrt.f32 %v937_v46 }
 0x13a   : > { %v938_v18 = vadd.f32 1e-05, %v906_v61  ;;  %v9544_v19 = vsub.f32 %v9349_v50, %v741_v37 }
 0x13b   : > { %v709_v56 = vpop.xlane.xlu1 %708  ;;  %v821_v62 = vpop.xlane.xlu0 %820 }
 0x13c   : > { %8572 = vrsqrt.f32 %v938_v18  ;;  %v742_v47 = vmul.f32 0.015625, %v709_v56  ;;  %v907_v48 = vmul.f32 0.015625, %v821_v62  ;;  %v805_v13 = vmul.f32 %v9544_v19, %v9544_v19 }
 0x13e   : > { %v9549_v14 = vsub.f32 %v9364_v11, %v742_v47  ;;  %v939_v57 = vadd.f32 1e-05, %v907_v48  ;;  %v897_v6 = vsel %vm613_vm0, %v805_v13, 0.0 }
 0x13f   : > { %v824_v7 = vpop.xlane.xlu1 %823  ;;  %898 = vadd.xlane.f32.xlu0 %v897_v6  ;;  %v827_v61 = vpop.xlane.xlu0 %826 }
 0x140   : > { %8574 = vrsqrt.f32 %v939_v57  ;;  %v908_v37 = vmul.f32 0.015625, %v824_v7  ;;  %v909_v41 = vmul.f32 0.015625, %v827_v61  ;;  %v806_v33 = vmul.f32 %v9549_v14, %v9549_v14 }
 0x141   : > { %v8567_v46 = vpop.eup %8566 }
 0x142   : > { %v940_v18 = vadd.f32 1e-05, %v908_v37  ;;  %v941_v56 = vadd.f32 1e-05, %v909_v41  ;;  %v900_v62 = vsel %vm613_vm0, %v806_v33, 0.0  ;;  %v999_v47 = vmul.f32 %v8567_v46, %v9331_v27 }
 0x143   : > { %901 = vadd.xlane.f32.xlu1 %v900_v62  ;;  %v830_v48 = vpop.xlane.xlu1 %829  ;;  %v833_v13 = vpop.xlane.xlu0 %832  ;;  %v9565_v37 = vld [vmem:[%s12756_s4] ss:$0 sm:$0xff] }
 0x144   : > { %8576 = vrsqrt.f32 %v940_v18  ;;  %v910_v57 = vmul.f32 0.015625, %v830_v48  ;;  %v911_v6 = vmul.f32 0.015625, %v833_v13  ;;  %v1037_v61 = vmul.f32 %v9557_v26, %v999_v47 }
 0x145   : > { %v8569_v7 = vpop.eup %8568  ;;  %8578 = vrsqrt.f32 %v941_v56 }
 0x146   : > { %v8571_v11 = vpop.eup %8570  ;;  %v942_v50 = vadd.f32 1e-05, %v910_v57  ;;  %v943_v32 = vadd.f32 1e-05, %v911_v6  ;;  %v1000_v27 = vmul.f32 %v8569_v7, %v9342_v40  ;;  %v1075_v48 = vadd.f32 %v9565_v37, %v1037_v61 }
 0x147   : > { %v836_v41 = vpop.xlane.xlu1 %835  ;;  %v839_v33 = vpop.xlane.xlu0 %838  ;;  %v1001_v46 = vmul.f32 %v8571_v11, %v9334_v28 }
 0x148   : > { %8580 = vrsqrt.f32 %v942_v50  ;;  %v912_v18 = vmul.f32 0.015625, %v836_v41  ;;  %v913_v62 = vmul.f32 0.015625, %v839_v33  ;;  %v1038_v56 = vmul.f32 %v9557_v26, %v1000_v27 }
 0x149   : > { %v8573_v47 = vpop.eup %8572  ;;  %8582 = vrsqrt.f32 %v943_v32  ;;  %v1039_v31 = vmul.f32 %v9557_v26, %v1001_v46 }
 0x14a   : > { %v944_v13 = vadd.f32 1e-05, %v912_v18  ;;  %v945_v57 = vadd.f32 1e-05, %v913_v62  ;;  %v1076_v6 = vadd.f32 %v9565_v37, %v1038_v56  ;;  %v1002_v36 = vmul.f32 %v8573_v47, %v9345_v43 }
 0x14b   : > { %v842_v40 = vpop.xlane.xlu1 %841  ;;  %v845_v7 = vpop.xlane.xlu0 %844  ;;  %v1077_v18 = vadd.f32 %v9565_v37, %v1039_v31 }
 0x14c   : > { %8584 = vrsqrt.f32 %v944_v13  ;;  %v914_v28 = vmul.f32 0.015625, %v842_v40  ;;  %v915_v50 = vmul.f32 0.015625, %v845_v7  ;;  %v9574_v11 = vpack.c.bf16 %v1076_v6, %v1075_v48  ;;  %v8547_v7 = vld [vmem:[%s12759_s7 + $0x10] sm:$0xff]  }
 0x14d   : > { %v8575_v27 = vpop.eup %8574  ;;  %8586 = vrsqrt.f32 %v945_v57  ;;  %v1040_v32 = vmul.f32 %v9557_v26, %v1002_v36  ;;  %v8546_v57 = vld [vmem:[%s12759_s7 + $0x18] sm:$0xff]  }
 0x14e   : > { %v946_v61 = vadd.f32 1e-05, %v914_v28  ;;  %v947_v41 = vadd.f32 1e-05, %v915_v50  ;;  %7968 = vmatprep.mubr.msk.bf16.mxu0 %vm613_vm0, %v9574_v11  ;;  %8008 = vmatprep.mubr.msk.bf16.mxu1 %vm613_vm0, %v9574_v11  ;;  %v1003_v43 = vmul.f32 %v8575_v27, %v9357_v60 }
 0x14f   : > { %v848_v33 = vpop.xlane.xlu1 %847  ;;  %v851_v46 = vpop.xlane.xlu0 %850  ;;  %v1078_v62 = vadd.f32 %v9565_v37, %v1040_v32  ;;  %8040 = vmatprep.subr.bf16.mxu0 %v8546_v57 }
 0x150   : > { %8588 = vrsqrt.f32 %v946_v61  ;;  %v916_v56 = vmul.f32 0.015625, %v848_v33  ;;  %v917_v47 = vmul.f32 0.015625, %v851_v46  ;;  %v1041_v13 = vmul.f32 %v9557_v26, %v1003_v43 }
 0x151   : > { %v8577_v36 = vpop.eup %8576  ;;  %8590 = vrsqrt.f32 %v947_v41  ;;  %v9584_v48 = vpack.c.bf16 %v1078_v62, %v1077_v18 }
 0x152   : > { %v8579_v60 = vpop.eup %8578  ;;  %v948_v6 = vadd.f32 1e-05, %v916_v56  ;;  %v949_v40 = vadd.f32 1e-05, %v917_v47  ;;  %v1004_v31 = vmul.f32 %v8577_v36, %v9360_v63  ;;  %v1079_v43 = vadd.f32 %v9565_v37, %v1041_v13 }
 0x153   : > { %7969 = vmatmul.mubr.msk.bf16.vlgmr.msra.gmra.mxu0 %vm613_vm0, %v9584_v48  ;;  %8009 = vmatmul.mubr.msk.bf16.vlgmr.msra.gmra.mxu1 %vm613_vm0, %v9584_v48  ;;  %v854_v28 = vpop.xlane.xlu1 %853  ;;  %v857_v50 = vpop.xlane.xlu0 %856  ;;  %v1005_v27 = vmul.f32 %v8579_v60, %v9370_v22 }
 0x154   : > { %8592 = vrsqrt.f32 %v948_v6  ;;  %v918_v32 = vmul.f32 0.015625, %v854_v28  ;;  %v919_v61 = vmul.f32 0.015625, %v857_v50  ;;  %v1042_v41 = vmul.f32 %v9557_v26, %v1004_v31  ;;  %8041 = vmatpush3.bf16.msra.mxu0 %v8546_v57 }
 0x155   : > { %v8581_v63 = vpop.eup %8580  ;;  %8594 = vrsqrt.f32 %v949_v40  ;;  %8042 = vmatprep.subr.bf16.mxu0 %v8547_v7  ;;  %v1043_v36 = vmul.f32 %v9557_v26, %v1005_v27 }
 0x156   : > { %v8583_v33 = vpop.eup %8582  ;;  %v950_v46 = vadd.f32 1e-05, %v918_v32  ;;  %v951_v18 = vadd.f32 1e-05, %v919_v61  ;;  %v1080_v62 = vadd.f32 %v9565_v37, %v1042_v41  ;;  %v1006_v56 = vmul.f32 %v8581_v63, %v9373_v23 }
 0x157   : > { %v860_v22 = vpop.xlane.xlu1 %859  ;;  %v863_v47 = vpop.xlane.xlu0 %862  ;;  %v1007_v60 = vmul.f32 %v8583_v33, %v9383_v44  ;;  %v1081_v41 = vadd.f32 %v9565_v37, %v1043_v36 }
 0x158   : > { %8596 = vrsqrt.f32 %v950_v46  ;;  %v920_v6 = vmul.f32 0.015625, %v860_v22  ;;  %v921_v40 = vmul.f32 0.015625, %v863_v47  ;;  %v9605_v31 = vpack.c.bf16 %v1080_v62, %v1079_v43  ;;  %8043 = vmatpush3.bf16.msra.mxu0 %v8547_v7 }
 0x159   : > { %v8585_v13 = vpop.eup %8584  ;;  %8598 = vrsqrt.f32 %v951_v18  ;;  %v1044_v57 = vmul.f32 %v9557_v26, %v1006_v56  ;;  %v1045_v28 = vmul.f32 %v9557_v26, %v1007_v60 }
 0x15a   : > { %v8587_v23 = vpop.eup %8586  ;;  %v952_v50 = vadd.f32 1e-05, %v920_v6  ;;  %v953_v32 = vadd.f32 1e-05, %v921_v40  ;;  %7972 = vmatprep.mubr.msk.bf16.mxu0 %vm613_vm0, %v9605_v31  ;;  %8012 = vmatprep.mubr.msk.bf16.mxu1 %vm613_vm0, %v9605_v31  ;;  %v1008_v44 = vmul.f32 %v8585_v13, %v9386_v45 }
 0x15b   : > { %v866_v27 = vpop.xlane.xlu1 %865  ;;  %v869_v61 = vpop.xlane.xlu0 %868  ;;  %v1082_v63 = vadd.f32 %v9565_v37, %v1044_v57  ;;  %v1009_v43 = vmul.f32 %v8587_v23, %v9395_v1  ;;  %v1083_v56 = vadd.f32 %v9565_v37, %v1045_v28 }
 0x15c   : > { %8600 = vrsqrt.f32 %v952_v50  ;;  %v922_v7 = vmul.f32 0.015625, %v866_v27  ;;  %v923_v33 = vmul.f32 0.015625, %v869_v61  ;;  %v1046_v46 = vmul.f32 %v9557_v26, %v1008_v44 }
 0x15d   : > { %v8589_v18 = vpop.eup %8588  ;;  %8602 = vrsqrt.f32 %v953_v32  ;;  %v9618_v62 = vpack.c.bf16 %v1082_v63, %v1081_v41  ;;  %v1047_v40 = vmul.f32 %v9557_v26, %v1009_v43 }
 0x15e   : > { %v8591_v45 = vpop.eup %8590  ;;  %v954_v22 = vadd.f32 1e-05, %v922_v7  ;;  %v955_v47 = vadd.f32 1e-05, %v923_v33  ;;  %v1084_v36 = vadd.f32 %v9565_v37, %v1046_v46  ;;  %v1010_v60 = vmul.f32 %v8589_v18, %v9398_v8 }
 0x15f   : > { %7973 = vmatmul.mubr.msk.bf16.gmra.mxu0 %vm613_vm0, %v9618_v62  ;;  %8013 = vmatmul.mubr.msk.bf16.gmra.mxu1 %vm613_vm0, %v9618_v62  ;;  %v872_v1 = vpop.xlane.xlu1 %871  ;;  %v875_v6 = vpop.xlane.xlu0 %874  ;;  %v1011_v13 = vmul.f32 %v8591_v45, %v9407_v34  ;;  %v1085_v43 = vadd.f32 %v9565_v37, %v1047_v40 }
 0x160   : > { %8604 = vrsqrt.f32 %v954_v22  ;;  %v924_v57 = vmul.f32 0.015625, %v872_v1  ;;  %v925_v28 = vmul.f32 0.015625, %v875_v6  ;;  %v9629_v23 = vpack.c.bf16 %v1084_v36, %v1083_v56 }
 0x161   : > { %v8593_v50 = vpop.eup %8592  ;;  %8606 = vrsqrt.f32 %v955_v47  ;;  %v1048_v8 = vmul.f32 %v9557_v26, %v1010_v60  ;;  %v1049_v32 = vmul.f32 %v9557_v26, %v1011_v13 }
 0x162   : > { %v8595_v44 = vpop.eup %8594  ;;  %v956_v27 = vadd.f32 1e-05, %v924_v57  ;;  %v957_v61 = vadd.f32 1e-05, %v925_v28  ;;  %7976 = vmatprep.mubr.msk.bf16.mxu0 %vm613_vm0, %v9629_v23  ;;  %8016 = vmatprep.mubr.msk.bf16.mxu1 %vm613_vm0, %v9629_v23  ;;  %v1012_v34 = vmul.f32 %v8593_v50, %v9410_v35 }
 0x163   : > { %v878_v41 = vpop.xlane.xlu1 %877  ;;  %v881_v63 = vpop.xlane.xlu0 %880  ;;  %v1086_v7 = vadd.f32 %v9565_v37, %v1048_v8  ;;  %v1013_v33 = vmul.f32 %v8595_v44, %v9419_v59  ;;  %v1087_v47 = vadd.f32 %v9565_v37, %v1049_v32  ;;  %v8548_v59 = vld [vmem:[%s12759_s7 + $0x8] sm:$0xff]   ;;  %v8549_v32 = vld [vmem:[%s12759_s7] sm:$0xff]  }
 0x164   : > { %8608 = vrsqrt.f32 %v956_v27  ;;  %v926_v46 = vmul.f32 0.015625, %v878_v41  ;;  %v927_v18 = vmul.f32 0.015625, %v881_v63  ;;  %v1050_v56 = vmul.f32 %v9557_v26, %v1012_v34  ;;  %8044 = vmatprep.subr.bf16.mxu0 %v8548_v59 }
 0x165   : > { %v8597_v45 = vpop.eup %8596  ;;  %8610 = vrsqrt.f32 %v957_v61  ;;  %v9642_v22 = vpack.c.bf16 %v1086_v7, %v1085_v43  ;;  %v1051_v57 = vmul.f32 %v9557_v26, %v1013_v33  ;;  %8045 = vmatpush3.bf16.msra.mxu0 %v8548_v59 }
 0x166   : > { %v8599_v35 = vpop.eup %8598  ;;  %v958_v36 = vadd.f32 1e-05, %v926_v46  ;;  %v959_v60 = vadd.f32 1e-05, %v927_v18  ;;  %v1088_v1 = vadd.f32 %v9565_v37, %v1050_v56  ;;  %v1014_v6 = vmul.f32 %v8597_v45, %v9422_v0  ;;  %8046 = vmatprep.subr.bf16.mxu0 %v8549_v32 }
 0x167   : > { %7977 = vmatmul.mubr.msk.bf16.gmra.mxu0 %vm613_vm0, %v9642_v22  ;;  %8017 = vmatmul.mubr.msk.bf16.gmra.mxu1 %vm613_vm0, %v9642_v22  ;;  %v884_v40 = vpop.xlane.xlu1 %883  ;;  %v887_v13 = vpop.xlane.xlu0 %886  ;;  %v1015_v28 = vmul.f32 %v8599_v35, %v9431_v38  ;;  %v1089_v33 = vadd.f32 %v9565_v37, %v1051_v57 }
 0x168   : > { %8612 = vrsqrt.f32 %v958_v36  ;;  %v928_v50 = vmul.f32 0.015625, %v884_v40  ;;  %v929_v8 = vmul.f32 0.015625, %v887_v13  ;;  %v9656_v0 = vpack.c.bf16 %v1088_v1, %v1087_v47 }
 0x169   : > { %v8601_v44 = vpop.eup %8600  ;;  %8614 = vrsqrt.f32 %v959_v60  ;;  %v1052_v27 = vmul.f32 %v9557_v26, %v1014_v6  ;;  %v1053_v61 = vmul.f32 %v9557_v26, %v1015_v28  ;;  %8047 = vmatpush3.bf16.msra.mxu0 %v8549_v32 }
 0x16a   : > { %v8603_v34 = vpop.eup %8602  ;;  %v960_v41 = vadd.f32 1e-05, %v928_v50  ;;  %v961_v38 = vadd.f32 1e-05, %v929_v8  ;;  %7980 = vmatprep.mubr.msk.bf16.mxu0 %vm613_vm0, %v9656_v0  ;;  %8020 = vmatprep.mubr.msk.bf16.mxu1 %vm613_vm0, %v9656_v0  ;;  %v1016_v63 = vmul.f32 %v8601_v44, %v9440_v49 }
 0x16b   : > { %v890_v43 = vpop.xlane.xlu1 %889  ;;  %v893_v7 = vpop.xlane.xlu0 %892  ;;  %v1090_v46 = vadd.f32 %v9565_v37, %v1052_v27  ;;  %v1017_v18 = vmul.f32 %v8603_v34, %v9449_v12  ;;  %v1091_v49 = vadd.f32 %v9565_v37, %v1053_v61 }
 0x16c   : > { %8616 = vrsqrt.f32 %v960_v41  ;;  %v930_v56 = vmul.f32 0.015625, %v890_v43  ;;  %v931_v45 = vmul.f32 0.015625, %v893_v7  ;;  %v1054_v47 = vmul.f32 %v9557_v26, %v1016_v63 }
 0x16d   : > { %v8605_v35 = vpop.eup %8604  ;;  %8618 = vrsqrt.f32 %v961_v38  ;;  %v9672_v36 = vpack.c.bf16 %v1090_v46, %v1089_v33  ;;  %v1055_v60 = vmul.f32 %v9557_v26, %v1017_v18 }
 0x16e   : > { %v8607_v1 = vpop.eup %8606  ;;  %v962_v6 = vadd.f32 1e-05, %v930_v56  ;;  %v963_v59 = vadd.f32 1e-05, %v931_v45  ;;  %v1092_v12 = vadd.f32 %v9565_v37, %v1054_v47  ;;  %v1018_v40 = vmul.f32 %v8605_v35, %v9458_v30 }
 0x16f   : > { %7981 = vmatmul.mubr.msk.bf16.gmra.mxu0 %vm613_vm0, %v9672_v36  ;;  %8021 = vmatmul.mubr.msk.bf16.gmra.mxu1 %vm613_vm0, %v9672_v36  ;;  %v896_v13 = vpop.xlane.xlu1 %895  ;;  %v1019_v57 = vmul.f32 %v8607_v1, %v9467_v53  ;;  %v1093_v44 = vadd.f32 %v9565_v37, %v1055_v60 }
 0x170   : > { %8620 = vrsqrt.f32 %v962_v6  ;;  %v932_v28 = vmul.f32 0.015625, %v896_v13  ;;  %v9683_v50 = vpack.c.bf16 %v1092_v12, %v1091_v49  ;;  %v1056_v8 = vmul.f32 %v9557_v26, %v1018_v40 }
 0x171   : > { %v8609_v32 = vpop.eup %8608  ;;  %8622 = vrsqrt.f32 %v963_v59  ;;  %v1057_v34 = vmul.f32 %v9557_v26, %v1019_v57 }
 0x172   : > { %v8611_v30 = vpop.eup %8610  ;;  %v964_v27 = vadd.f32 1e-05, %v932_v28  ;;  %7984 = vmatprep.mubr.msk.bf16.mxu0 %vm613_vm0, %v9683_v50  ;;  %8024 = vmatprep.mubr.msk.bf16.mxu1 %vm613_vm0, %v9683_v50  ;;  %v1094_v53 = vadd.f32 %v9565_v37, %v1056_v8  ;;  %v1020_v61 = vmul.f32 %v8609_v32, %v9476_v15 }
 0x173   : > { %v1021_v41 = vmul.f32 %v8611_v30, %v9485_v42  ;;  %v1095_v46 = vadd.f32 %v9565_v37, %v1057_v34 }
 0x174   : > { %8624 = vrsqrt.f32 %v964_v27  ;;  %v9695_v38 = vpack.c.bf16 %v1094_v53, %v1093_v44  ;;  %v1058_v63 = vmul.f32 %v9557_v26, %v1020_v61 }
 0x175   : > { %v8613_v43 = vpop.eup %8612  ;;  %v1059_v7 = vmul.f32 %v9557_v26, %v1021_v41 }
 0x176   : > { %v8615_v33 = vpop.eup %8614  ;;  %v1096_v18 = vadd.f32 %v9565_v37, %v1058_v63  ;;  %v1022_v56 = vmul.f32 %v8613_v43, %v9494_v54 }
 0x177   : > { %7985 = vmatmul.mubr.msk.bf16.gmra.mxu0 %vm613_vm0, %v9695_v38  ;;  %8025 = vmatmul.mubr.msk.bf16.gmra.mxu1 %vm613_vm0, %v9695_v38  ;;  %v1023_v15 = vmul.f32 %v8615_v33, %v9503_v51  ;;  %v1097_v35 = vadd.f32 %v9565_v37, %v1059_v7 }
 0x178   : > { %v9707_v42 = vpack.c.bf16 %v1096_v18, %v1095_v46  ;;  %v1060_v45 = vmul.f32 %v9557_v26, %v1022_v56 }
 0x179   : > { %v8617_v47 = vpop.eup %8616  ;;  %v1061_v51 = vmul.f32 %v9557_v26, %v1023_v15 }
 0x17a   : > { %v8619_v49 = vpop.eup %8618  ;;  %7988 = vmatprep.mubr.msk.bf16.mxu0 %vm613_vm0, %v9707_v42  ;;  %8028 = vmatprep.mubr.msk.bf16.mxu1 %vm613_vm0, %v9707_v42  ;;  %v1098_v54 = vadd.f32 %v9565_v37, %v1060_v45  ;;  %v1024_v60 = vmul.f32 %v8617_v47, %v9506_v29 }
 0x17b   : > { %v1025_v1 = vmul.f32 %v8619_v49, %v9515_v55  ;;  %v1099_v57 = vadd.f32 %v9565_v37, %v1061_v51 }
 0x17c   : > { %v9719_v6 = vpack.c.bf16 %v1098_v54, %v1097_v35  ;;  %v1062_v59 = vmul.f32 %v9557_v26, %v1024_v60 }
 0x17d   : > { %v8621_v12 = vpop.eup %8620  ;;  %v1063_v40 = vmul.f32 %v9557_v26, %v1025_v1 }
 0x17e   : > { %v8623_v13 = vpop.eup %8622  ;;  %v1100_v28 = vadd.f32 %v9565_v37, %v1062_v59  ;;  %v1026_v8 = vmul.f32 %v8621_v12, %v9518_v52 }
 0x17f   : > { %7989 = vmatmul.mubr.msk.bf16.gmra.mxu0 %vm613_vm0, %v9719_v6  ;;  %8029 = vmatmul.mubr.msk.bf16.gmra.mxu1 %vm613_vm0, %v9719_v6  ;;  %v1027_v29 = vmul.f32 %v8623_v13, %v9527_v39  ;;  %v1101_v30 = vadd.f32 %v9565_v37, %v1063_v40 }
 0x180   : > { %v1119_v55 = vpack.c.bf16 %v1100_v28, %v1099_v57  ;;  %v1064_v32 = vmul.f32 %v9557_v26, %v1026_v8 }
 0x181   : > { %v8625_v44 = vpop.eup %8624  ;;  %v1065_v53 = vmul.f32 %v9557_v26, %v1027_v29 }
 0x182   : > { %7992 = vmatprep.mubr.msk.bf16.mxu0 %vm613_vm0, %v1119_v55  ;;  %8032 = vmatprep.mubr.msk.bf16.mxu1 %vm613_vm0, %v1119_v55  ;;  %v1102_v52 = vadd.f32 %v9565_v37, %v1064_v32  ;;  %v1028_v27 = vmul.f32 %v8625_v44, %v9531_v58 }
 0x183   : > { %v1103_v39 = vadd.f32 %v9565_v37, %v1065_v53 }
 0x184   : > { %v1120_v61 = vpack.c.bf16 %v1102_v52, %v1101_v30  ;;  %v1066_v34 = vmul.f32 %v9557_v26, %v1028_v27 }
 0x186   : > { %v1104_v41 = vadd.f32 %v9565_v37, %v1066_v34 }
 0x187   : > { %7993 = vmatmul.mubr.msk.bf16.gmra.mxu0 %vm613_vm0, %v1120_v61  ;;  %8033 = vmatmul.mubr.msk.bf16.gmra.mxu1 %vm613_vm0, %v1120_v61 }
 0x188   : > { %v1121_v63 = vpack.c.bf16 %v1104_v41, %v1103_v39 }
 0x18a   : > { %7996 = vmatprep.mubr.msk.bf16.mxu0 %vm613_vm0, %v1121_v63  ;;  %8036 = vmatprep.mubr.msk.bf16.mxu1 %vm613_vm0, %v1121_v63 }
 0x1c8   : > { %v899_v43 = vpop.xlane.xlu0 %898 }
 0x1c9   : > { %v933_v58 = vmul.f32 0.015625, %v899_v43 }
 0x1cb   : > { %v965_v7 = vadd.f32 1e-05, %v933_v58 }
 0x1cc   : > { %v902_v33 = vpop.xlane.xlu1 %901 }
 0x1cd   : > { %8626 = vrsqrt.f32 %v965_v7  ;;  %v934_v46 = vmul.f32 0.015625, %v902_v33 }
 0x1cf   : > { %v966_v18 = vadd.f32 1e-05, %v934_v46 }
 0x1d1   : > { %8628 = vrsqrt.f32 %v966_v18 }
 0x1da   : > { %v8627_v56 = vpop.eup %8626 }
 0x1db   : > { %v1029_v15 = vmul.f32 %v8627_v56, %v9544_v19 }
 0x1dd   : > { %v1067_v35 = vmul.f32 %v9557_v26, %v1029_v15 }
 0x1de   : > { %v8629_v45 = vpop.eup %8628 }
 0x1df   : > { %v1030_v47 = vmul.f32 %v8629_v45, %v9549_v14  ;;  %v1105_v54 = vadd.f32 %v9565_v37, %v1067_v35 }
 0x1e1   : > { %v1068_v49 = vmul.f32 %v9557_v26, %v1030_v47 }
 0x1e3   : > { %v1106_v60 = vadd.f32 %v9565_v37, %v1068_v49 }
 0x1e5   : > { %v1122_v51 = vpack.c.bf16 %v1106_v60, %v1105_v54 }
 0x1e7   : > { %7997 = vmatmul.mubr.msk.bf16.gmra.mxu0 %vm613_vm0, %v1122_v51  ;;  %8037 = vmatmul.mubr.msk.bf16.gmra.mxu1 %vm613_vm0, %v1122_v51 }
 0x1e8   : > { %8048 = vmatprep.mubr.msk.bf16.mxu0 %vm613_vm0, %v9574_v11 }
 0x1ef   : > { %8049 = vmatmul.mubr.msk.bf16.vlgmr.msra.gmra.mxu0 %vm613_vm0, %v9584_v48 }
 0x1f0   : > { %8052 = vmatprep.mubr.msk.bf16.mxu0 %vm613_vm0, %v9605_v31 }
 0x1f7   : > { %8053 = vmatmul.mubr.msk.bf16.gmra.mxu0 %vm613_vm0, %v9618_v62 }
 0x1f8   : > { %8056 = vmatprep.mubr.msk.bf16.mxu0 %vm613_vm0, %v9629_v23 }
 0x1ff   : > { %8057 = vmatmul.mubr.msk.bf16.gmra.mxu0 %vm613_vm0, %v9642_v22 }
 0x200   : > { %8060 = vmatprep.mubr.msk.bf16.mxu0 %vm613_vm0, %v9656_v0 }
 0x207   : > { %8061 = vmatmul.mubr.msk.bf16.gmra.mxu0 %vm613_vm0, %v9672_v36 }
 0x208   : > { %8064 = vmatprep.mubr.msk.bf16.mxu0 %vm613_vm0, %v9683_v50 }
 0x20f   : > { %8065 = vmatmul.mubr.msk.bf16.gmra.mxu0 %vm613_vm0, %v9695_v38 }
 0x210   : > { %8068 = vmatprep.mubr.msk.bf16.mxu0 %vm613_vm0, %v9707_v42 }
 0x213   : > { %v7970_v19 = vpop.f32.mrf.mxu0  ;;  %v8010_v14 = vpop.f32.mrf.mxu1 }
 0x215   : > { %v1237_v26 = vpop.f32.mrf.mxu0  ;;  %v1462_v37 = vpop.f32.mrf.mxu1 }
 0x216   : > { %v1364_v22 = vmul.f32 0.17677669, %v1237_v26 }
 0x217   : > { %v7971_v11 = vpop.f32.mrf.mxu0  ;;  %v8011_v48 = vpop.f32.mrf.mxu1  ;;  %8069 = vmatmul.mubr.msk.bf16.gmra.mxu0 %vm613_vm0, %v9719_v6 }
 0x218   : > { %v9777_v31 = vpack.c.bf16 %v8011_v48, %v8010_v14  ;;  %8072 = vmatprep.mubr.msk.bf16.mxu0 %vm613_vm0, %v1119_v55  ;;  %v1367_v57 = vmul.f32 0.17677669, %v7971_v11  ;;  %v1366_v55 = vmul.f32 0.17677669, %v7970_v19 }
 0x219   : > { %v1240_v62 = vpop.f32.mrf.mxu0  ;;  %v1465_v23 = vpop.f32.mrf.mxu1 }
 0x21a   : > { %v1365_v0 = vmul.f32 0.17677669, %v1240_v62  ;;  %v9780_v36 = vpack.c.bf16 %v1465_v23, %v1462_v37  ;;  %8496 = vmatprep.subr.msk.bf16.mxu1 %vm1830_vm1, %v9777_v31  ;;  %v1841_v50 = vsel %vm1830_vm1, %v9777_v31, 0  ;;  %v9803_v27 = vpack.c.bf16 %v1367_v57, %v1366_v55 }
 0x21b   : > { %8081 = vmatpush3.bf16.xpose.msra.mxu1 %v1841_v50 }
 0x21c   : > { %v9786_v38 = vpack.c.bf16 %v1365_v0, %v1364_v22  ;;  %8497 = vmatprep.subr.msk.bf16.mxu1 %vm1830_vm1, %v9780_v36  ;;  %v1838_v12 = vsel %vm1830_vm1, %v9780_v36, 0 }
 0x21e   : > { %8084 = vmatprep.mubr.msk.bf16.mxu1 %vm1830_vm1, %v9786_v38 }
 0x21f   : > { %v7974_v42 = vpop.f32.mrf.mxu0  ;;  %v8014_v1 = vpop.f32.mrf.mxu1  ;;  %8073 = vmatmul.mubr.msk.bf16.gmra.mxu0 %vm613_vm0, %v1120_v61 }
 0x220   : > { %8076 = vmatprep.mubr.msk.bf16.mxu0 %vm613_vm0, %v1121_v63  ;;  %v1370_v19 = vmul.f32 0.17677669, %v7974_v42 }
 0x221   : > { %v1253_v6 = vpop.f32.mrf.mxu0  ;;  %v1478_v59 = vpop.f32.mrf.mxu1 }
 0x222   : > { %v1368_v32 = vmul.f32 0.17677669, %v1253_v6 }
 0x223   : > { %v7975_v40 = vpop.f32.mrf.mxu0  ;;  %v8015_v13 = vpop.f32.mrf.mxu1  ;;  %8083 = vmatpush3.bf16.xpose.msra.mxu1 %v1838_v12 }
 0x224   : > { %v9796_v28 = vpack.c.bf16 %v8015_v13, %v8014_v1  ;;  %v1371_v49 = vmul.f32 0.17677669, %v7975_v40 }
 0x225   : > { %v1256_v8 = vpop.f32.mrf.mxu0  ;;  %v1481_v29 = vpop.f32.mrf.mxu1 }
 0x226   : > { %v1369_v44 = vmul.f32 0.17677669, %v1256_v8  ;;  %8498 = vmatprep.subr.msk.bf16.mxu1 %vm1830_vm1, %v9796_v28  ;;  %v9807_v39 = vpack.c.bf16 %v1481_v29, %v1478_v59  ;;  %v1902_v41 = vsel %vm1830_vm1, %v9796_v28, 0  ;;  %v9829_v11 = vpack.c.bf16 %v1371_v49, %v1370_v19 }
 0x227   : > { %v9800_v30 = vpop.f32.mrf.mxu0  ;;  %v8018_v52 = vpop.f32.mrf.mxu1  ;;  %8077 = vmatmul.mubr.msk.bf16.gmra.mxu0 %vm613_vm0, %v1122_v51 }
 0x228   : > { %v9805_v53 = vpack.c.bf16 %v1369_v44, %v1368_v32  ;;  %v1899_v45 = vsel %vm1830_vm1, %v9807_v39, 0 }
 0x229   : > { %v1269_v61 = vpop.f32.mrf.mxu0  ;;  %v1494_v34 = vpop.f32.mrf.mxu1 }
 0x22a   : > { %8085 = vmatmul.mubr.msk.bf16.vlgmr.msra.gmra.mxu1 %vm1830_vm1, %v9803_v27  ;;  %v1372_v14 = vmul.f32 0.17677669, %v1269_v61 }
 0x22b   : > { %v7979_v63 = vpop.f32.mrf.mxu0  ;;  %v8019_v43 = vpop.f32.mrf.mxu1  ;;  %8089 = vmatpush3.bf16.xpose.msra.mxu1 %v1902_v41  ;;  %8092 = vmatprep.mubr.msk.bf16.mxu1 %vm1830_vm1, %v9805_v53 }
 0x22c   : > { %8499 = vmatprep.subr.msk.bf16.mxu1 %vm1830_vm1, %v9807_v39  ;;  %v9821_v15 = vpack.c.bf16 %v8019_v43, %v8018_v52  ;;  %v1375_v43 = vmul.f32 0.17677669, %v7979_v63 }
 0x22d   : > { %v1272_v58 = vpop.f32.mrf.mxu0  ;;  %v1497_v7 = vpop.f32.mrf.mxu1 }
 0x22e   : > { %v1373_v54 = vmul.f32 0.17677669, %v1272_v58  ;;  %v9833_v22 = vpack.c.bf16 %v1497_v7, %v1494_v34  ;;  %v1963_v0 = vsel %vm1830_vm1, %v9821_v15, 0 }
 0x22f   : > { %v9817_v33 = vpop.f32.mrf.mxu0  ;;  %v8022_v46 = vpop.f32.mrf.mxu1 }
 0x230   : > { %v9831_v48 = vpack.c.bf16 %v1373_v54, %v1372_v14  ;;  %v1960_v61 = vsel %vm1830_vm1, %v9833_v22, 0 }
 0x231   : > { %v1285_v18 = vpop.f32.mrf.mxu0  ;;  %v9819_v56 = vpop.f32.mrf.mxu1 }
 0x232   : > { %v1376_v49 = vmul.f32 0.17677669, %v1285_v18 }
 0x233   : > { %v9825_v47 = vpop.f32.mrf.mxu0  ;;  %v8023_v35 = vpop.f32.mrf.mxu1  ;;  %8091 = vmatpush3.bf16.xpose.msra.mxu1 %v1899_v45 }
 0x234   : > { %8500 = vmatprep.subr.msk.bf16.mxu1 %vm1830_vm1, %v9821_v15  ;;  %v9857_v52 = vpack.c.bf16 %v8023_v35, %v8022_v46  ;;  %v1374_v46 = vmul.f32 0.17677669, %v9800_v30 }
 0x235   : > { %v1288_v60 = vpop.f32.mrf.mxu0  ;;  %v1513_v51 = vpop.f32.mrf.mxu1 }
 0x236   : > { %v1377_v58 = vmul.f32 0.17677669, %v1288_v60  ;;  %v9870_v14 = vpack.c.bf16 %v1375_v43, %v1374_v46  ;;  %v9875_v60 = vpack.c.bf16 %v1513_v51, %v9819_v56  ;;  %v2024_v30 = vsel %vm1830_vm1, %v9857_v52, 0 }
 0x237   : > { %v7986_v26 = vpop.f32.mrf.mxu0  ;;  %v8026_v37 = vpop.f32.mrf.mxu1 }
 0x238   : > { %v2021_v43 = vsel %vm1830_vm1, %v9875_v60, 0 }
 0x239   : > { %v1301_v62 = vpop.f32.mrf.mxu0  ;;  %v1526_v23 = vpop.f32.mrf.mxu1 }
 0x23a   : > { %8093 = vmatmul.mubr.msk.bf16.vlgmr.msra.gmra.mxu1 %vm1830_vm1, %v9829_v11  ;;  %v1380_v12 = vmul.f32 0.17677669, %v1301_v62  ;;  %v9872_v62 = vpack.c.bf16 %v1377_v58, %v1376_v49  ;;  %v1379_v58 = vmul.f32 0.17677669, %v9825_v47 }
 0x23b   : > { %v7987_v50 = vpop.f32.mrf.mxu0  ;;  %v8027_v1 = vpop.f32.mrf.mxu1  ;;  %8097 = vmatpush3.bf16.xpose.msra.mxu1 %v1963_v0  ;;  %8100 = vmatprep.mubr.msk.bf16.mxu1 %vm1830_vm1, %v9831_v48  ;;  %v1382_v0 = vmul.f32 0.17677669, %v7986_v26 }
 0x23c   : > { %v9841_v42 = vpack.c.bf16 %v8027_v1, %v8026_v37  ;;  %8501 = vmatprep.subr.msk.bf16.mxu1 %vm1830_vm1, %v9833_v22  ;;  %v1383_v37 = vmul.f32 0.17677669, %v7987_v50 }
 0x23d   : > { %v1304_v6 = vpop.f32.mrf.mxu0  ;;  %v1529_v59 = vpop.f32.mrf.mxu1 }
 0x23e   : > { %12920 = vst [vmem:[#allocation34_spill] sm:$0xff] %v9841_v42  ;;  %v1381_v40 = vmul.f32 0.17677669, %v1304_v6  ;;  %v9845_v13 = vpack.c.bf16 %v1529_v59, %v1526_v23  ;;  %8504 = vmatprep.subr.msk.bf16.mxu0 %vm1830_vm1, %v9841_v42  ;;  %v2085_v57 = vsel %vm1830_vm1, %v9841_v42, 0  ;;  %v9883_v50 = vpack.c.bf16 %v1383_v37, %v1382_v0 }
 0x23f   : > { %v9851_v8 = vpop.f32.mrf.mxu0  ;;  %v8030_v29 = vpop.f32.mrf.mxu1  ;;  %8113 = vmatpush3.bf16.xpose.msra.mxu0 %v2085_v57 }
 0x240   : > { %12921 = vst [vmem:[#allocation35_spill] sm:$0xff] %v9845_v13  ;;  %v9853_v55 = vpack.c.bf16 %v1381_v40, %v1380_v12  ;;  %8505 = vmatprep.subr.msk.bf16.mxu0 %vm1830_vm1, %v9845_v13  ;;  %v2082_v35 = vsel %vm1830_vm1, %v9845_v13, 0  ;;  %12923 = vst [vmem:[#allocation37_spill] sm:$0xff] %v9883_v50  ;;  %v7426_v13 = vld [vmem:[%s10011_s16 + $0x5] ss:$0 sm:$0xff] }
 0x241   : > { %v1317_v32 = vpop.f32.mrf.mxu0  ;;  %v1542_v44 = vpop.f32.mrf.mxu1 }
 0x242   : > { %12922 = vst [vmem:[#allocation36_spill] sm:$0xff] %v9853_v55  ;;  %8116 = vmatprep.mubr.msk.bf16.mxu0 %vm1830_vm1, %v9853_v55 }
 0x243   : > { %v9863_v34 = vpop.f32.mrf.mxu0  ;;  %v8031_v41 = vpop.f32.mrf.mxu1  ;;  %8099 = vmatpush3.bf16.xpose.msra.mxu1 %v1960_v61 }
 0x244   : > { %8502 = vmatprep.subr.msk.bf16.mxu1 %vm1830_vm1, %v9857_v52  ;;  %v9901_v61 = vpack.c.bf16 %v8031_v41, %v8030_v29  ;;  %v1384_v29 = vmul.f32 0.17677669, %v1317_v32 }
 0x245   : > { %v1320_v7 = vpop.f32.mrf.mxu0  ;;  %v1545_v45 = vpop.f32.mrf.mxu1 }
 0x246   : > { %12927 = vst [vmem:[#allocation41_spill] sm:$0xff] %v9901_v61  ;;  %v1385_v46 = vmul.f32 0.17677669, %v1320_v7  ;;  %v2146_v47 = vsel %vm1830_vm1, %v9901_v61, 0  ;;  %v1386_v7 = vmul.f32 0.17677669, %v9851_v8 }
 0x247   : > { %v7994_v54 = vpop.f32.mrf.mxu0  ;;  %v8034_v19 = vpop.f32.mrf.mxu1  ;;  %8115 = vmatpush3.bf16.xpose.msra.mxu0 %v2082_v35  ;;  %v1378_v35 = vmul.f32 0.17677669, %v9817_v33 }
 0x248   : > { %v9915_v37 = vpack.c.bf16 %v1385_v46, %v1384_v29 }
 0x249   : > { %v1333_v63 = vpop.f32.mrf.mxu0  ;;  %v1558_v23 = vpop.f32.mrf.mxu1  ;;  %v9913_v41 = vpack.c.bf16 %v1379_v58, %v1378_v35 }
 0x24a   : > { %8101 = vmatmul.mubr.msk.bf16.vlgmr.msra.gmra.mxu1 %vm1830_vm1, %v9870_v14  ;;  %v1388_v26 = vmul.f32 0.17677669, %v1333_v63  ;;  %12929 = vst [vmem:[#allocation43_spill] sm:$0xff] %v9915_v37  ;;  %v9917_v63 = vpack.c.bf16 %v1545_v45, %v1542_v44  ;;  %v1387_v44 = vmul.f32 0.17677669, %v9863_v34 }
 0x24b   : > { %v7995_v18 = vpop.f32.mrf.mxu0  ;;  %v8035_v1 = vpop.f32.mrf.mxu1  ;;  %8105 = vmatpush3.bf16.xpose.msra.mxu1 %v2024_v30  ;;  %8108 = vmatprep.mubr.msk.bf16.mxu1 %vm1830_vm1, %v9872_v62  ;;  %12928 = vst [vmem:[#allocation42_spill] sm:$0xff] %v9913_v41 }
 0x24c   : > { %v9885_v6 = vpack.c.bf16 %v8035_v1, %v8034_v19  ;;  %8503 = vmatprep.subr.msk.bf16.mxu1 %vm1830_vm1, %v9875_v60  ;;  %v1391_v19 = vmul.f32 0.17677669, %v7995_v18  ;;  %12930 = vst [vmem:[#allocation44_spill] sm:$0xff] %v9917_v63  ;;  %v2143_v32 = vsel %vm1830_vm1, %v9917_v63, 0  ;;  %v9935_v45 = vpack.c.bf16 %v1387_v44, %v1386_v7 }
 0x24d   : > { %v1336_v56 = vpop.f32.mrf.mxu0  ;;  %v1561_v51 = vpop.f32.mrf.mxu1 }
 0x24e   : > { %12924 = vst [vmem:[#allocation38_spill] sm:$0xff] %v9885_v6  ;;  %v1389_v59 = vmul.f32 0.17677669, %v1336_v56  ;;  %v9889_v12 = vpack.c.bf16 %v1561_v51, %v1558_v23  ;;  %8117 = vmatmul.mubr.msk.bf16.vlgmr.msra.gmra.mxu0 %vm1830_vm1, %v9883_v50  ;;  %8508 = vmatprep.subr.msk.bf16.mxu0 %vm1830_vm1, %v9885_v6  ;;  %v2207_v40 = vsel %vm1830_vm1, %v9885_v6, 0  ;;  %v1390_v23 = vmul.f32 0.17677669, %v7994_v54 }
 0x24f   : > { %8129 = vmatpush3.bf16.xpose.msra.mxu0 %v2207_v40  ;;  %12932 = vst [vmem:[#allocation46_spill] sm:$0xff] %v9935_v45 }
 0x250   : > { %12925 = vst [vmem:[#allocation39_spill] sm:$0xff] %v9889_v12  ;;  %v9897_v57 = vpack.c.bf16 %v1389_v59, %v1388_v26  ;;  %8509 = vmatprep.subr.msk.bf16.mxu0 %vm1830_vm1, %v9889_v12  ;;  %v2204_v49 = vsel %vm1830_vm1, %v9889_v12, 0  ;;  %v9925_v33 = vpack.c.bf16 %v1391_v19, %v1390_v23 }
 0x252   : > { %12926 = vst [vmem:[#allocation40_spill] sm:$0xff] %v9897_v57  ;;  %8132 = vmatprep.mubr.msk.bf16.mxu0 %vm1830_vm1, %v9897_v57  ;;  %12931 = vst [vmem:[#allocation45_spill] sm:$0xff] %v9925_v33 }
 0x253   : > { %8107 = vmatpush3.bf16.xpose.msra.mxu1 %v2021_v43 }
 0x254   : > { %8506 = vmatprep.subr.msk.bf16.mxu1 %vm1830_vm1, %v9901_v61 }
 0x257   : > { %8131 = vmatpush3.bf16.xpose.msra.mxu0 %v2204_v49 }
 0x25a   : > { %8109 = vmatmul.mubr.msk.bf16.vlgmr.msra.gmra.mxu1 %vm1830_vm1, %v9913_v41 }
 0x25b   : > { %8121 = vmatpush3.bf16.xpose.msra.mxu1 %v2146_v47  ;;  %8124 = vmatprep.mubr.msk.bf16.mxu1 %vm1830_vm1, %v9915_v37 }
 0x25c   : > { %8507 = vmatprep.subr.msk.bf16.mxu1 %vm1830_vm1, %v9917_v63 }
 0x25e   : > { %8133 = vmatmul.mubr.msk.bf16.vlgmr.msra.gmra.mxu0 %vm1830_vm1, %v9925_v33 }
 0x263   : > { %8123 = vmatpush3.bf16.xpose.msra.mxu1 %v2143_v32 }
 0x26a   : > { %8125 = vmatmul.mubr.msk.bf16.vlgmr.msra.gmra.mxu1 %vm1830_vm1, %v9935_v45 }
 0x2a7   : > { %v7998_v54 = vpop.f32.mrf.mxu0  ;;  %v8038_v0 = vpop.f32.mrf.mxu1 }
 0x2a9   : > { %v1349_v30 = vpop.f32.mrf.mxu0  ;;  %v1574_v18 = vpop.f32.mrf.mxu1 }
 0x2aa   : > { %v1392_v40 = vmul.f32 0.17677669, %v1349_v30 }
 0x2ab   : > { %v7999_v1 = vpop.f32.mrf.mxu0  ;;  %v8039_v56 = vpop.f32.mrf.mxu1 }
 0x2ac   : > { %v9939_v51 = vpack.c.bf16 %v8039_v56, %v8038_v0  ;;  %v1395_v44 = vmul.f32 0.17677669, %v7999_v1  ;;  %v1394_v0 = vmul.f32 0.17677669, %v7998_v54 }
 0x2ad   : > { %v1352_v26 = vpop.f32.mrf.mxu0  ;;  %v1577_v59 = vpop.f32.mrf.mxu1 }
 0x2ae   : > { %12933 = vst [vmem:[#allocation47_spill] sm:$0xff] %v9939_v51  ;;  %v1393_v43 = vmul.f32 0.17677669, %v1352_v26  ;;  %v9941_v34 = vpack.c.bf16 %v1577_v59, %v1574_v18  ;;  %8510 = vmatprep.subr.msk.bf16.mxu1 %vm1830_vm1, %v9939_v51  ;;  %v2268_v8 = vsel %vm1830_vm1, %v9939_v51, 0  ;;  %v9963_v18 = vpack.c.bf16 %v1395_v44, %v1394_v0 }
 0x2af   : > { %v8050_v58 = vpop.f32.mrf.mxu0  ;;  %8137 = vmatpush3.bf16.xpose.msra.mxu1 %v2268_v8 }
 0x2b0   : > { %12934 = vst [vmem:[#allocation48_spill] sm:$0xff] %v9941_v34  ;;  %v9947_v46 = vpack.c.bf16 %v1393_v43, %v1392_v40  ;;  %8511 = vmatprep.subr.msk.bf16.mxu1 %vm1830_vm1, %v9941_v34  ;;  %v2265_v47 = vsel %vm1830_vm1, %v9941_v34, 0  ;;  %12938 = vst [vmem:[#allocation52_spill] sm:$0xff] %v9963_v18 }
 0x2b1   : > { %v1655_v35 = vpop.f32.mrf.mxu0 }
 0x2b2   : > { %12935 = vst [vmem:[#allocation49_spill] sm:$0xff] %v9947_v46  ;;  %8140 = vmatprep.mubr.msk.bf16.mxu1 %vm1830_vm1, %v9947_v46 }
 0x2b3   : > { %v8051_v49 = vpop.f32.mrf.mxu0 }
 0x2b4   : > { %v9953_v29 = vpack.c.bf16 %v8051_v49, %v8050_v58 }
 0x2b5   : > { %v1658_v19 = vpop.f32.mrf.mxu0 }
 0x2b6   : > { %12936 = vst [vmem:[#allocation50_spill] sm:$0xff] %v9953_v29  ;;  %v9955_v23 = vpack.c.bf16 %v1658_v19, %v1655_v35  ;;  %8144 = vmatprep.subr.bf16.mxu0 %v9953_v29 }
 0x2b7   : > { %v8054_v32 = vpop.f32.mrf.mxu0  ;;  %8139 = vmatpush3.bf16.xpose.msra.mxu1 %v2265_v47  ;;  %8145 = vmatpush3.bf16.msra.mxu0 %v9953_v29 }
 0x2b8   : > { %12937 = vst [vmem:[#allocation51_spill] sm:$0xff] %v9955_v23  ;;  %8146 = vmatprep.subr.bf16.mxu0 %v9955_v23 }
 0x2b9   : > { %v1671_v7 = vpop.f32.mrf.mxu0 }
 0x2bb   : > { %v8055_v30 = vpop.f32.mrf.mxu0  ;;  %8147 = vmatpush3.bf16.msra.mxu0 %v9955_v23 }
 0x2bc   : > { %v9965_v56 = vpack.c.bf16 %v8055_v30, %v8054_v32 }
 0x2bd   : > { %v1674_v26 = vpop.f32.mrf.mxu0 }
 0x2be   : > { %12939 = vst [vmem:[#allocation53_spill] sm:$0xff] %v9965_v56  ;;  %v9967_v59 = vpack.c.bf16 %v1674_v26, %v1671_v7  ;;  %8141 = vmatmul.mubr.msk.bf16.vlgmr.msra.gmra.mxu1 %vm1830_vm1, %v9963_v18  ;;  %8152 = vmatprep.subr.bf16.mxu1 %v9965_v56 }
 0x2bf   : > { %v8058_v1 = vpop.f32.mrf.mxu0  ;;  %8153 = vmatpush3.bf16.msra.mxu1 %v9965_v56 }
 0x2c0   : > { %12940 = vst [vmem:[#allocation54_spill] sm:$0xff] %v9967_v59  ;;  %8154 = vmatprep.subr.bf16.mxu1 %v9967_v59 }
 0x2c1   : > { %v9974_v54 = vpop.f32.mrf.mxu0 }
 0x2c3   : > { %v8059_v40 = vpop.f32.mrf.mxu0  ;;  %8155 = vmatpush3.bf16.msra.mxu1 %v9967_v59  ;;  %v10040_v59 = vld [vmem:[%s12754_s2 + $0x8] sm:$0xff] }
 0x2c4   : > { %v9977_v43 = vpack.c.bf16 %v8059_v40, %v8058_v1 }
 0x2c5   : > { %v9979_v8 = vpop.f32.mrf.mxu0 }
 0x2c6   : > { %8160 = vmatprep.subr.bf16.mxu0 %v9977_v43 }
 0x2c7   : > { %v8062_v58 = vpop.f32.mrf.mxu0 }
 0x2c9   : > { %v9982_v35 = vpop.f32.mrf.mxu0 }
 0x2cb   : > { %v8063_v49 = vpop.f32.mrf.mxu0 }
 0x2cc   : > { %v9984_v19 = vpack.c.bf16 %v8063_v49, %v8062_v58 }
 0x2cd   : > { %v9986_v47 = vpop.f32.mrf.mxu0 }
 0x2ce   : > { %8168 = vmatprep.subr.bf16.mxu1 %v9984_v19 }
 0x2cf   : > { %v8066_v32 = vpop.f32.mrf.mxu0 }
 0x2d1   : > { %v9989_v44 = vpop.f32.mrf.mxu0 }
 0x2d2   : > { %12941 = vst [vmem:[#allocation55_spill] sm:$0xff] %v9989_v44 }
 0x2d3   : > { %v8067_v7 = vpop.f32.mrf.mxu0 }
 0x2d4   : > { %v9991_v0 = vpack.c.bf16 %v8067_v7, %v8066_v32  ;;  %v10016_v7 = vld [vmem:[%s12754_s2 + $0x10] sm:$0xff] }
 0x2d5   : > { %v9993_v30 = vpop.f32.mrf.mxu0 }
 0x2d6   : > { %12942 = vst [vmem:[#allocation56_spill] sm:$0xff] %v9993_v30 }
 0x2d7   : > { %v8070_v26 = vpop.f32.mrf.mxu0 }
 0x2d9   : > { %v9995_v1 = vpop.f32.mrf.mxu0 }
 0x2da   : > { %12943 = vst [vmem:[#allocation57_spill] sm:$0xff] %v9995_v1 }
 0x2db   : > { %v8071_v40 = vpop.f32.mrf.mxu0 }
 0x2dc   : > { %v9997_v25 = vpack.c.bf16 %v8071_v40, %v8070_v26 }
 0x2dd   : > { %v9999_v58 = vpop.f32.mrf.mxu0 }
 0x2de   : > { %12944 = vst [vmem:[#allocation58_spill] sm:$0xff] %v9999_v58 }
 0x2df   : > { %v8074_v49 = vpop.f32.mrf.mxu0 }
 0x2e1   : > { %v10001_v21 = vpop.f32.mrf.mxu0 }
 0x2e2   : > { %12945 = vst [vmem:[#allocation59_spill] sm:$0xff] %v10001_v21 }
 0x2e3   : > { %v8075_v24 = vpop.f32.mrf.mxu0 }
 0x2e4   : > { %v10003_v20 = vpack.c.bf16 %v8075_v24, %v8074_v49  ;;  %v10023_v24 = vld [vmem:[%s12754_s2] sm:$0xff] }
 0x2e5   : > { %v10005_v17 = vpop.f32.mrf.mxu0  ;;  %v7421_v49 = vld [vmem:[%s10011_s16] ss:$0 sm:$0xff] }
 0x2e6   : > { %12946 = vst [vmem:[#allocation60_spill] sm:$0xff] %v10003_v20  ;;  %12947 = vst [vmem:[#allocation61_spill] sm:$0xff] %v10005_v17 }
 0x2e7   : > { %v8078_v32 = vpop.f32.mrf.mxu0 }
 0x2e9   : > { %v10018_v26 = vpop.f32.mrf.mxu0 }
 0x2ea   : > { %12948 = vst [vmem:[#allocation62_spill] sm:$0xff] %v10018_v26  ;;  %v8086_v40 = vpop.f32.mrf.mxu1 }
 0x2eb   : > { %v1886_v10 = vadd.f32 %v8086_v40, %v10016_v7  ;;  %v8079_v16 = vpop.f32.mrf.mxu0 }
 0x2ec   : > { %v10027_v9 = vpack.c.bf16 %v8079_v16, %v8078_v32  ;;  %v1877_v5 = vpop.f32.mrf.mxu1 }
 0x2ed   : > { %v1878_v3 = vadd.f32 %v1877_v5, %v10023_v24  ;;  %v10035_v2 = vadd.f32 %v7421_v49, %v1886_v10 }
 0x2ee   : > { %12949 = vst [vmem:[#allocation63_spill] sm:$0xff] %v10027_v9  ;;  %v8087_v56 = vpop.f32.mrf.mxu1 }
 0x2ef   : > { %v1889_v16 = vadd.f32 %v8087_v56, %v10032_v4  ;;  %v2405_v32 = vsel %vm1830_vm1, %v10035_v2, -inf  ;;  %v10045_v40 = vadd.f32 %v7421_v49, %v1878_v3 }
 0x2f0   : > { %2406 = vmax.xlane.f32.xlu0 %v2405_v32  ;;  %v1880_v29 = vpop.f32.mrf.mxu1  ;;  %v7422_v32 = vld [vmem:[%s10011_s16 + $0x1] ss:$0 sm:$0xff] }
 0x2f1   : > { %v1881_v5 = vadd.f32 %v1880_v29, %v10040_v59  ;;  %v10048_v10 = vadd.f32 %v7421_v49, %v1889_v16  ;;  %v2399_v26 = vsel %vm1830_vm1, %v10045_v40, -inf }
 0x2f3   : > { %v2408_v23 = vsel %vm1830_vm1, %v10048_v10, -inf  ;;  %v10054_v46 = vadd.f32 %v7421_v49, %v1881_v5 }
 0x2f4   : > { %2409 = vmax.xlane.f32.xlu1 %v2408_v23  ;;  %2400 = vmax.xlane.f32.xlu0 %v2399_v26 }
 0x2f5   : > { %v2402_v3 = vsel %vm1830_vm1, %v10054_v46, -inf }
 0x2f8   : > { %2403 = vmax.xlane.f32.xlu1 %v2402_v3 }
 0x2fa   : > { %v8094_v56 = vpop.f32.mrf.mxu1 }
 0x2fb   : > { %v1947_v29 = vadd.f32 %v8094_v56, %v10016_v7 }
 0x2fc   : > { %v1938_v16 = vpop.f32.mrf.mxu1 }
 0x2fd   : > { %v1939_v18 = vadd.f32 %v1938_v16, %v10023_v24  ;;  %v10061_v33 = vadd.f32 %v7422_v32, %v1947_v29 }
 0x2fe   : > { %v8095_v34 = vpop.f32.mrf.mxu1 }
 0x2ff   : > { %v1950_v49 = vadd.f32 %v8095_v34, %v10032_v4  ;;  %v2417_v23 = vsel %vm1830_vm1, %v10061_v33, -inf  ;;  %v10066_v26 = vadd.f32 %v7422_v32, %v1939_v18 }
 0x300   : > { %v1941_v5 = vpop.f32.mrf.mxu1  ;;  %2418 = vmax.xlane.f32.xlu0 %v2417_v23  ;;  %v7423_v23 = vld [vmem:[%s10011_s16 + $0x2] ss:$0 sm:$0xff] }
 0x301   : > { %v1942_v3 = vadd.f32 %v1941_v5, %v10040_v59  ;;  %v10069_v9 = vadd.f32 %v7422_v32, %v1950_v49  ;;  %v2411_v29 = vsel %vm1830_vm1, %v10066_v26, -inf  ;;  %v10081_v5 = vpop.f32.mrf.mxu0 }
 0x302   : > { %12950 = vst [vmem:[#allocation64_spill] sm:$0xff] %v10081_v5 }
 0x303   : > { %v2420_v56 = vsel %vm1830_vm1, %v10069_v9, -inf  ;;  %v10075_v16 = vadd.f32 %v7422_v32, %v1942_v3  ;;  %v7425_v3 = vld [vmem:[%s10011_s16 + $0x4] ss:$0 sm:$0xff] }
 0x304   : > { %2421 = vmax.xlane.f32.xlu1 %v2420_v56  ;;  %2412 = vmax.xlane.f32.xlu0 %v2411_v29 }
 0x305   : > { %v2414_v34 = vsel %vm1830_vm1, %v10075_v16, -inf }
 0x308   : > { %2415 = vmax.xlane.f32.xlu1 %v2414_v34 }
 0x30a   : > { %v8102_v18 = vpop.f32.mrf.mxu1 }
 0x30b   : > { %v2008_v49 = vadd.f32 %v8102_v18, %v10016_v7 }
 0x30c   : > { %v1999_v51 = vpop.f32.mrf.mxu1 }
 0x30d   : > { %v10083_v57 = vadd.f32 %v7423_v23, %v2008_v49  ;;  %v2000_v58 = vadd.f32 %v1999_v51, %v10023_v24 }
 0x30e   : > { %v8103_v1 = vpop.f32.mrf.mxu1  ;;  %v8118_v32 = vpop.f32.mrf.mxu0 }
 0x30f   : > { %v2011_v56 = vadd.f32 %v8103_v1, %v10032_v4  ;;  %v2130_v29 = vadd.f32 %v8118_v32, %v10016_v7  ;;  %v2429_v34 = vsel %vm1830_vm1, %v10083_v57, -inf  ;;  %v10096_v6 = vadd.f32 %v7423_v23, %v2000_v58 }
 0x310   : > { %v2002_v45 = vpop.f32.mrf.mxu1  ;;  %2430 = vmax.xlane.f32.xlu0 %v2429_v34  ;;  %v2121_v18 = vpop.f32.mrf.mxu0 }
 0x311   : > { %v10091_v12 = vadd.f32 %v7423_v23, %v2011_v56  ;;  %v10093_v5 = vadd.f32 %v7425_v3, %v2130_v29  ;;  %v2003_v49 = vadd.f32 %v2002_v45, %v10040_v59  ;;  %v2122_v37 = vadd.f32 %v2121_v18, %v10023_v24 }
 0x312   : > { %v8119_v51 = vpop.f32.mrf.mxu0  ;;  %v2423_v45 = vsel %vm1830_vm1, %v10096_v6, -inf }
 0x313   : > { %v2133_v1 = vadd.f32 %v8119_v51, %v10032_v4  ;;  %v2432_v32 = vsel %vm1830_vm1, %v10091_v12, -inf  ;;  %v2453_v34 = vsel %vm1830_vm1, %v10093_v5, -inf  ;;  %v10111_v51 = vadd.f32 %v7423_v23, %v2003_v49 }
 0x314   : > { %2433 = vmax.xlane.f32.xlu1 %v2432_v32  ;;  %2454 = vmax.xlane.f32.xlu0 %v2453_v34  ;;  %v2124_v56 = vpop.f32.mrf.mxu0  ;;  %v10113_v17 = vadd.f32 %v7425_v3, %v2122_v37  ;;  %v7424_v34 = vld [vmem:[%s10011_s16 + $0x3] ss:$0 sm:$0xff] }
 0x315   : > { %v10104_v29 = vadd.f32 %v7425_v3, %v2133_v1  ;;  %v2125_v58 = vadd.f32 %v2124_v56, %v10040_v59  ;;  %v2426_v21 = vsel %vm1830_vm1, %v10111_v51, -inf }
 0x316   : > { %v2447_v56 = vsel %vm1830_vm1, %v10113_v17, -inf }
 0x317   : > { %v2456_v18 = vsel %vm1830_vm1, %v10104_v29, -inf  ;;  %v10121_v50 = vadd.f32 %v7425_v3, %v2125_v58 }
 0x318   : > { %2424 = vmax.xlane.f32.xlu0 %v2423_v45  ;;  %2457 = vmax.xlane.f32.xlu1 %v2456_v18  ;;  %v7427_v18 = vld [vmem:[%s10011_s16 + $0x6] ss:$0 sm:$0xff] }
 0x319   : > { %v2450_v61 = vsel %vm1830_vm1, %v10121_v50, -inf }
 0x31a   : > { %v8110_v32 = vpop.f32.mrf.mxu1 }
 0x31b   : > { %v2069_v1 = vadd.f32 %v8110_v32, %v10016_v7 }
 0x31c   : > { %v2060_v63 = vpop.f32.mrf.mxu1  ;;  %2427 = vmax.xlane.f32.xlu1 %v2426_v21  ;;  %2448 = vmax.xlane.f32.xlu0 %v2447_v56 }
 0x31d   : > { %v10123_v37 = vadd.f32 %v7424_v34, %v2069_v1  ;;  %v2061_v23 = vadd.f32 %v2060_v63, %v10023_v24 }
 0x31e   : > { %v8111_v49 = vpop.f32.mrf.mxu1  ;;  %v8134_v45 = vpop.f32.mrf.mxu0 }
 0x31f   : > { %v2072_v32 = vadd.f32 %v8111_v49, %v10032_v4  ;;  %v2252_v20 = vadd.f32 %v8134_v45, %v10016_v7  ;;  %v2441_v3 = vsel %vm1830_vm1, %v10123_v37, -inf  ;;  %v10138_v49 = vadd.f32 %v7424_v34, %v2061_v23 }
 0x320   : > { %v2063_v58 = vpop.f32.mrf.mxu1  ;;  %v2243_v21 = vpop.f32.mrf.mxu0  ;;  %2451 = vmax.xlane.f32.xlu1 %v2450_v61  ;;  %2442 = vmax.xlane.f32.xlu0 %v2441_v3 }
 0x321   : > { %v10133_v1 = vadd.f32 %v7424_v34, %v2072_v32  ;;  %v10135_v63 = vadd.f32 %v7427_v18, %v2252_v20  ;;  %v2064_v56 = vadd.f32 %v2063_v58, %v10040_v59  ;;  %v2244_v45 = vadd.f32 %v2243_v21, %v10023_v24 }
 0x322   : > { %v8135_v55 = vpop.f32.mrf.mxu0  ;;  %v2435_v23 = vsel %vm1830_vm1, %v10138_v49, -inf }
 0x323   : > { %12951 = vst [vmem:[#allocation65_spill] sm:$0xff] %v10135_v63  ;;  %v2255_v30 = vadd.f32 %v8135_v55, %v10032_v4  ;;  %v2444_v44 = vsel %vm1830_vm1, %v10133_v1, -inf  ;;  %v2477_v61 = vsel %vm1830_vm1, %v10135_v63, -inf  ;;  %v10153_v55 = vadd.f32 %v7424_v34, %v2064_v56 }
 0x324   : > { %v2246_v32 = vpop.f32.mrf.mxu0  ;;  %2445 = vmax.xlane.f32.xlu1 %v2444_v44  ;;  %2478 = vmax.xlane.f32.xlu0 %v2477_v61  ;;  %v10155_v21 = vadd.f32 %v7427_v18, %v2244_v45 }
 0x325   : > { %v10146_v20 = vadd.f32 %v7427_v18, %v2255_v30  ;;  %v2247_v3 = vadd.f32 %v2246_v32, %v10040_v59  ;;  %v2438_v30 = vsel %vm1830_vm1, %v10153_v55, -inf }
 0x326   : > { %v2471_v61 = vsel %vm1830_vm1, %v10155_v21, -inf }
 0x327   : > { %v2480_v58 = vsel %vm1830_vm1, %v10146_v20, -inf  ;;  %v10163_v32 = vadd.f32 %v7427_v18, %v2247_v3 }
 0x328   : > { %2481 = vmax.xlane.f32.xlu1 %v2480_v58  ;;  %2436 = vmax.xlane.f32.xlu0 %v2435_v23 }
 0x329   : > { %12952 = vst [vmem:[#allocation66_spill] sm:$0xff] %v10163_v32 }
 0x32a   : > { %v8126_v41 = vpop.f32.mrf.mxu1 }
 0x32b   : > { %v2191_v44 = vadd.f32 %v8126_v41, %v10016_v7  ;;  %v2474_v41 = vsel %vm1830_vm1, %v10163_v32, -inf }
 0x32c   : > { %v2182_v63 = vpop.f32.mrf.mxu1  ;;  %2439 = vmax.xlane.f32.xlu1 %v2438_v30  ;;  %2472 = vmax.xlane.f32.xlu0 %v2471_v61 }
 0x32d   : > { %v2183_v34 = vadd.f32 %v2182_v63, %v10023_v24  ;;  %v10166_v56 = vadd.f32 %v7426_v13, %v2191_v44 }
 0x32e   : > { %v8127_v45 = vpop.f32.mrf.mxu1 }
 0x32f   : > { %12953 = vst [vmem:[#allocation67_spill] sm:$0xff] %v10166_v56  ;;  %v2194_v23 = vadd.f32 %v8127_v45, %v10032_v4  ;;  %v2465_v58 = vsel %vm1830_vm1, %v10166_v56, -inf  ;;  %v10173_v42 = vadd.f32 %v7426_v13, %v2183_v34 }
 0x330   : > { %v2185_v18 = vpop.f32.mrf.mxu1  ;;  %2475 = vmax.xlane.f32.xlu1 %v2474_v41  ;;  %2466 = vmax.xlane.f32.xlu0 %v2465_v58 }
 0x331   : > { %12954 = vst [vmem:[#allocation68_spill] sm:$0xff] %v10173_v42  ;;  %v2186_v3 = vadd.f32 %v2185_v18, %v10040_v59  ;;  %v10176_v30 = vadd.f32 %v7426_v13, %v2194_v23  ;;  %v2459_v44 = vsel %vm1830_vm1, %v10173_v42, -inf }
 0x333   : > { %12955 = vst [vmem:[#allocation69_spill] sm:$0xff] %v10176_v30  ;;  %v2468_v63 = vsel %vm1830_vm1, %v10176_v30, -inf  ;;  %v10182_v61 = vadd.f32 %v7426_v13, %v2186_v3  ;;  %v7428_v3 = vld [vmem:[%s10011_s16 + $0x7] ss:$0 sm:$0xff] }
 0x334   : > { %2469 = vmax.xlane.f32.xlu1 %v2468_v63  ;;  %2460 = vmax.xlane.f32.xlu0 %v2459_v44 }
 0x335   : > { %12956 = vst [vmem:[#allocation70_spill] sm:$0xff] %v10182_v61  ;;  %v2462_v34 = vsel %vm1830_vm1, %v10182_v61, -inf }
 0x338   : > { %2463 = vmax.xlane.f32.xlu1 %v2462_v34 }
 0x349   : > { %3231 = vrot.lane.b32.xlu1 %v9780_v36, %s9095_s28 }
 0x34d   : > { %3306 = vrot.lane.b32.xlu1 %v9796_v28, %s9095_s28 }
 0x379   : > { %v2407_v45 = vpop.xlane.xlu0 %2406 }
 0x37a   : > { %v2497_v63 = vsub.f32 %v10035_v2, %v2407_v45 }
 0x37d   : > { %v2410_v23 = vpop.xlane.xlu1 %2409  ;;  %v2401_v41 = vpop.xlane.xlu0 %2400 }
 0x37e   : > { %v2498_v58 = vsub.f32 %v10048_v10, %v2410_v23  ;;  %v2495_v13 = vsub.f32 %v10045_v40, %v2401_v41  ;;  %v8142_v18 = vpop.f32.mrf.mxu1  ;;  %v2531_v10 = vmul.f32 1.442695, %v2497_v63 }
 0x37f   : > { %v2313_v44 = vadd.f32 %v8142_v18, %v10016_v7 }
 0x380   : > { %v2533_v34 = vmul.f32 1.442695, %v2498_v58  ;;  %v2304_v61 = vpop.f32.mrf.mxu1  ;;  %v2527_v56 = vmul.f32 1.442695, %v2495_v13 }
 0x381   : > { %v2404_v36 = vpop.xlane.xlu1 %2403  ;;  %v2305_v42 = vadd.f32 %v2304_v61, %v10023_v24  ;;  %v10196_v28 = vadd.f32 %v7428_v3, %v2313_v44 }
 0x382   : > { %v2496_v30 = vsub.f32 %v10054_v46, %v2404_v36  ;;  %v8143_v32 = vpop.f32.mrf.mxu1  ;;  %8630 = vpow2.f32 %v2533_v34 }
 0x383   : > { %v2316_v40 = vadd.f32 %v8143_v32, %v10032_v4  ;;  %v2489_v23 = vsel %vm1830_vm1, %v10196_v28, -inf  ;;  %v10202_v2 = vadd.f32 %v7428_v3, %v2305_v42  ;;  %8632 = vpow2.f32 %v2527_v56 }
 0x384   : > { %v2529_v7 = vmul.f32 1.442695, %v2496_v30  ;;  %2490 = vmax.xlane.f32.xlu0 %v2489_v23  ;;  %v2307_v45 = vpop.f32.mrf.mxu1 }
 0x385   : > { %v2308_v24 = vadd.f32 %v2307_v45, %v10040_v59  ;;  %v10205_v61 = vadd.f32 %v7428_v3, %v2316_v40  ;;  %v2483_v4 = vsel %vm1830_vm1, %v10202_v2, -inf }
 0x386   : > { %8634 = vpow2.f32 %v2529_v7 }
 0x387   : > { %8636 = vpow2.f32 %v2531_v10  ;;  %v2492_v46 = vsel %vm1830_vm1, %v10205_v61, -inf  ;;  %v10211_v32 = vadd.f32 %v7428_v3, %v2308_v24 }
 0x388   : > { %2493 = vmax.xlane.f32.xlu1 %v2492_v46  ;;  %2484 = vmax.xlane.f32.xlu0 %v2483_v4 }
 0x389   : > { %v2419_v42 = vpop.xlane.xlu0 %2418  ;;  %v2486_v56 = vsel %vm1830_vm1, %v10211_v32, -inf }
 0x38a   : > { %v2501_v13 = vsub.f32 %v10061_v33, %v2419_v42 }
 0x38c   : > { %2487 = vmax.xlane.f32.xlu1 %v2486_v56  ;;  %v2539_v40 = vmul.f32 1.442695, %v2501_v13 }
 0x38d   : > { %v2422_v59 = vpop.xlane.xlu1 %2421  ;;  %v2413_v30 = vpop.xlane.xlu0 %2412 }
 0x38e   : > { %v2502_v41 = vsub.f32 %v10069_v9, %v2422_v59  ;;  %v2499_v58 = vsub.f32 %v10066_v26, %v2413_v30 }
 0x38f   : > { %v10218_v63 = vpop.eup %8630 }
 0x390   : > { %v2541_v18 = vmul.f32 1.442695, %v2502_v41  ;;  %v2535_v3 = vmul.f32 1.442695, %v2499_v58  ;;  %v10220_v34 = vpop.eup %8632 }
 0x391   : > { %v2416_v44 = vpop.xlane.xlu1 %2415 }
 0x392   : > { %v2500_v36 = vsub.f32 %v10075_v16, %v2416_v44  ;;  %8638 = vpow2.f32 %v2541_v18  ;;  %v10234_v16 = vpack.c.bf16 %v9979_v8, %v9974_v54 }
 0x393   : > { %v10223_v10 = vpop.eup %8634  ;;  %8640 = vpow2.f32 %v2535_v3 }
 0x394   : > { %v10225_v23 = vpop.eup %8636  ;;  %v2537_v9 = vmul.f32 1.442695, %v2500_v36  ;;  %v2719_v26 = vpack.c.bf16 %v10223_v10, %v10220_v34 }
 0x395   : > { %v2720_v33 = vpack.c.bf16 %v10218_v63, %v10225_v23 }
 0x396   : > { %8642 = vpow2.f32 %v2537_v9  ;;  %8148 = vmatprep.mubr.msk.bf16.mxu0 %vm1830_vm1, %v2719_v26 }
 0x397   : > { %8644 = vpow2.f32 %v2539_v40  ;;  %8149 = vmatmul.mubr.msk.bf16.vlgmr.msra.gmra.mxu0 %vm1830_vm1, %v2720_v33 }
 0x398   : > { %8161 = vmatpush3.bf16.msra.mxu0 %v9977_v43 }
 0x399   : > { %8162 = vmatprep.subr.bf16.mxu0 %v10234_v16  ;;  %v2431_v7 = vpop.xlane.xlu0 %2430 }
 0x39c   : > { %8163 = vmatpush3.bf16.msra.mxu0 %v10234_v16 }
 0x39d   : > { %8176 = vmatprep.subr.bf16.mxu0 %v9991_v0  ;;  %v2434_v45 = vpop.xlane.xlu1 %2433  ;;  %v2455_v24 = vpop.xlane.xlu0 %2454  ;;  %3225 = vrot.lane.b32.xlu1 %v9786_v38, %s9095_s28 }
 0x39e   : > { %3233 = vrot.lane.b32.xlu0 %v9777_v31, %s9095_s28  ;;  %v2506_v54 = vsub.f32 %v10091_v12, %v2434_v45  ;;  %v2505_v31 = vsub.f32 %v10083_v57, %v2431_v7  ;;  %v10273_v57 = vpack.c.bf16 %v9986_v47, %v9982_v35  ;;  %v2513_v35 = vsub.f32 %v10093_v5, %v2455_v24  ;;  %v12957_v24 = vld [vmem:[#allocation34_spill] sm:$0xff] }
 0x39f   : > { %v10246_v8 = vpop.eup %8638 }
 0x3a0   : > { %v10250_v42 = vpop.eup %8640  ;;  %v2549_v12 = vmul.f32 1.442695, %v2506_v54  ;;  %v2547_v18 = vmul.f32 1.442695, %v2505_v31  ;;  %v12958_v54 = vld [vmem:[#allocation65_spill] sm:$0xff] }
 0x3a1   : > { %v2425_v46 = vpop.xlane.xlu0 %2424  ;;  %v2458_v4 = vpop.xlane.xlu1 %2457  ;;  %3304 = vrot.lane.b32.xlu1 %v9807_v39, %s9095_s28 }
 0x3a2   : > { %v2503_v56 = vsub.f32 %v10096_v6, %v2425_v46  ;;  %3227 = vrot.lane.b32.xlu0 %v9803_v27, %s9095_s28  ;;  %8646 = vpow2.f32 %v2549_v12 }
 0x3a3   : > { %v10255_v38 = vpop.eup %8642 }
 0x3a4   : > { %v10258_v59 = vpop.eup %8644  ;;  %v2721_v30 = vpack.c.bf16 %v10255_v38, %v10250_v42  ;;  %v2543_v41 = vmul.f32 1.442695, %v2503_v56 }
 0x3a5   : > { %v2428_v58 = vpop.xlane.xlu1 %2427  ;;  %v2449_v39 = vpop.xlane.xlu0 %2448  ;;  %3298 = vrot.lane.b32.xlu1 %v9805_v53, %s9095_s28  ;;  %v2722_v6 = vpack.c.bf16 %v10246_v8, %v10258_v59 }
 0x3a6   : > { %v2504_v27 = vsub.f32 %v10111_v51, %v2428_v58  ;;  %v2511_v13 = vsub.f32 %v10113_v17, %v2449_v39  ;;  %8156 = vmatprep.mubr.msk.bf16.mxu1 %vm1830_vm1, %v2721_v30  ;;  %3379 = vrot.lane.b32.xlu0 %v9821_v15, %s9095_s28  ;;  %8648 = vpow2.f32 %v2543_v41  ;;  %v2514_v51 = vsub.f32 %v10104_v29, %v2458_v4  ;;  %v12959_v30 = vld [vmem:[#allocation35_spill] sm:$0xff]  ;;  %v12960_v39 = vld [vmem:[#allocation66_spill] sm:$0xff] }
 0x3a7   : > { %8157 = vmatmul.mubr.msk.bf16.vlgmr.msra.gmra.mxu1 %vm1830_vm1, %v2722_v6 }
 0x3a8   : > { %v2545_v53 = vmul.f32 1.442695, %v2504_v27  ;;  %8169 = vmatpush3.bf16.msra.mxu1 %v9984_v19  ;;  %v2559_v17 = vmul.f32 1.442695, %v2511_v13  ;;  %v2565_v29 = vmul.f32 1.442695, %v2514_v51 }
 0x3a9   : > { %8170 = vmatprep.subr.bf16.mxu1 %v10273_v57  ;;  %v2452_v3 = vpop.xlane.xlu1 %2451  ;;  %v2443_v44 = vpop.xlane.xlu0 %2442  ;;  %3377 = vrot.lane.b32.xlu1 %v9833_v22, %s9095_s28  ;;  %v12961_v27 = vld [vmem:[#allocation42_spill] sm:$0xff] }
 0x3aa   : > { %8650 = vpow2.f32 %v2545_v53  ;;  %v2512_v15 = vsub.f32 %v10121_v50, %v2452_v3  ;;  %3300 = vrot.lane.b32.xlu0 %v9829_v11, %s9095_s28  ;;  %v2563_v11 = vmul.f32 1.442695, %v2513_v35  ;;  %v12964_v53 = vld [vmem:[#allocation56_spill] sm:$0xff] }
 0x3ab   : > { %8652 = vpow2.f32 %v2547_v18  ;;  %v12963_v18 = vld [vmem:[#allocation55_spill] sm:$0xff] }
 0x3ac   : > { %v2561_v47 = vmul.f32 1.442695, %v2512_v15  ;;  %8171 = vmatpush3.bf16.msra.mxu1 %v10273_v57  ;;  %8654 = vpow2.f32 %v2559_v17  ;;  %v10330_v51 = vpack.c.bf16 %v12964_v53, %v12963_v18  ;;  %v12982_v18 = vld [vmem:[#allocation39_spill] sm:$0xff] }
 0x3ad   : > { %8184 = vmatprep.subr.bf16.mxu1 %v9997_v25  ;;  %v2446_v36 = vpop.xlane.xlu1 %2445  ;;  %v2479_v40 = vpop.xlane.xlu0 %2478  ;;  %3371 = vrot.lane.b32.xlu1 %v9831_v48, %s9095_s28  ;;  %v2509_v48 = vsub.f32 %v10123_v37, %v2443_v44 }
 0x3ae   : > { %8656 = vpow2.f32 %v2561_v47  ;;  %3452 = vrot.lane.b32.xlu0 %v9857_v52, %s9095_s28  ;;  %v2510_v22 = vsub.f32 %v10133_v1, %v2446_v36  ;;  %v2521_v46 = vsub.f32 %v12958_v54, %v2479_v40  ;;  %v12965_v47 = vld [vmem:[#allocation36_spill] sm:$0xff]  ;;  %v12967_v36 = vld [vmem:[#allocation69_spill] sm:$0xff]  ;;  %v12976_v54 = vld [vmem:[#allocation59_spill] sm:$0xff] }
 0x3af   : > { %8658 = vpow2.f32 %v2565_v29  ;;  %v10299_v33 = vpop.eup %8646 }
 0x3b0   : > { %8660 = vpow2.f32 %v2563_v11  ;;  %v2557_v26 = vmul.f32 1.442695, %v2510_v22  ;;  %v2579_v17 = vmul.f32 1.442695, %v2521_v46  ;;  %v12968_v11 = vld [vmem:[#allocation68_spill] sm:$0xff]  ;;  %v12977_v46 = vld [vmem:[#allocation61_spill] sm:$0xff] }
 0x3b1   : > { %v2482_v50 = vpop.xlane.xlu1 %2481  ;;  %v2437_v5 = vpop.xlane.xlu0 %2436  ;;  %3450 = vrot.lane.b32.xlu1 %v9875_v60, %s9095_s28 }
 0x3b2   : > { %v2507_v9 = vsub.f32 %v10138_v49, %v2437_v5  ;;  %3373 = vrot.lane.b32.xlu0 %v9870_v14, %s9095_s28  ;;  %v2522_v52 = vsub.f32 %v10146_v20, %v2482_v50  ;;  %v2555_v20 = vmul.f32 1.442695, %v2509_v48  ;;  %8662 = vpow2.f32 %v2557_v26  ;;  %v12969_v50 = vld [vmem:[#allocation41_spill] sm:$0xff]  ;;  %v12970_v5 = vld [vmem:[#allocation67_spill] sm:$0xff] }
 0x3b3   : > { %v10303_v60 = vpop.eup %8648 }
 0x3b4   : > { %v2551_v1 = vmul.f32 1.442695, %v2507_v9  ;;  %v2581_v56 = vmul.f32 1.442695, %v2522_v52 }
 0x3b5   : > { %v2440_v7 = vpop.xlane.xlu1 %2439  ;;  %v2473_v45 = vpop.xlane.xlu0 %2472  ;;  %3444 = vrot.lane.b32.xlu1 %v9872_v62, %s9095_s28 }
 0x3b6   : > { %v2508_v49 = vsub.f32 %v10153_v55, %v2440_v7  ;;  %v2519_v14 = vsub.f32 %v10155_v21, %v2473_v45  ;;  %3525 = vrot.lane.b32.xlu0 %v12957_v24, %s9095_s28  ;;  %8664 = vpow2.f32 %v2551_v1  ;;  %v12972_v1 = vld [vmem:[#allocation60_spill] sm:$0xff] }
 0x3b7   : > { %v10309_v37 = vpop.eup %8650  ;;  %v12973_v45 = vld [vmem:[#allocation44_spill] sm:$0xff] }
 0x3b8   : > { %v10312_v4 = vpop.eup %8652  ;;  %v2553_v31 = vmul.f32 1.442695, %v2508_v49  ;;  %v2723_v62 = vpack.c.bf16 %v10309_v37, %v10303_v60  ;;  %v2575_v55 = vmul.f32 1.442695, %v2519_v14  ;;  %v12974_v14 = vld [vmem:[#allocation70_spill] sm:$0xff] }
 0x3b9   : > { %v2476_v12 = vpop.xlane.xlu1 %2475  ;;  %v2467_v21 = vpop.xlane.xlu0 %2466  ;;  %3523 = vrot.lane.b32.xlu1 %v12959_v30, %s9095_s28  ;;  %v2724_v41 = vpack.c.bf16 %v10299_v33, %v10312_v4  ;;  %v12980_v30 = vld [vmem:[#allocation38_spill] sm:$0xff] }
 0x3ba   : > { %v10320_v58 = vpop.eup %8654  ;;  %8666 = vpow2.f32 %v2553_v31  ;;  %v2520_v6 = vsub.f32 %v12960_v39, %v2476_v12  ;;  %8164 = vmatprep.mubr.msk.bf16.mxu0 %vm1830_vm1, %v2723_v62  ;;  %3446 = vrot.lane.b32.xlu0 %v12961_v27, %s9095_s28  ;;  %v2517_v9 = vsub.f32 %v12970_v5, %v2467_v21  ;;  %v12979_v12 = vld [vmem:[#allocation43_spill] sm:$0xff] }
 0x3bb   : > { %v10326_v13 = vpop.eup %8656  ;;  %8668 = vpow2.f32 %v2555_v20  ;;  %8165 = vmatmul.mubr.msk.bf16.vlgmr.msra.gmra.mxu0 %vm1830_vm1, %v2724_v41  ;;  %v12975_v20 = vld [vmem:[#allocation37_spill] sm:$0xff] }
 0x3bc   : > { %12962 = vst [vmem:[#allocation34_spill] sm:$0xff] %v10326_v13  ;;  %8670 = vpow2.f32 %v2581_v56  ;;  %v2577_v3 = vmul.f32 1.442695, %v2520_v6  ;;  %8177 = vmatpush3.bf16.msra.mxu0 %v9991_v0  ;;  %v2727_v44 = vpack.c.bf16 %v10326_v13, %v10320_v58  ;;  %v10339_v29 = vpop.eup %8658  ;;  %v10360_v56 = vpack.c.bf16 %v12977_v46, %v12976_v54  ;;  %v12999_v46 = vld [vmem:[#allocation49_spill] sm:$0xff] }
 0x3bd   : > { %8672 = vpow2.f32 %v2575_v55  ;;  %8178 = vmatprep.subr.bf16.mxu0 %v10330_v51  ;;  %v2470_v15 = vpop.xlane.xlu1 %2469  ;;  %v2461_v35 = vpop.xlane.xlu0 %2460  ;;  %3517 = vrot.lane.b32.xlu1 %v12965_v47, %s9095_s28  ;;  %12966 = vst [vmem:[#allocation65_spill] sm:$0xff] %v10339_v29  ;;  %v2571_v31 = vmul.f32 1.442695, %v2517_v9  ;;  %v12992_v9 = vld [vmem:[#allocation63_spill] sm:$0xff] }
 0x3be   : > { %8674 = vpow2.f32 %v2577_v3  ;;  %v2518_v40 = vsub.f32 %v12967_v36, %v2470_v15  ;;  %v2515_v22 = vsub.f32 %v12968_v11, %v2461_v35  ;;  %8180 = vmatprep.mubr.msk.bf16.mxu0 %vm1830_vm1, %v2727_v44  ;;  %3598 = vrot.lane.b32.xlu0 %v12969_v50, %s9095_s28  ;;  %v10347_v48 = vpop.eup %8660  ;;  %v12984_v3 = vld [vmem:[#allocation46_spill] sm:$0xff]  ;;  %v12986_v15 = vld [vmem:[#allocation57_spill] sm:$0xff]  ;;  %v12989_v11 = vld [vmem:[#allocation40_spill] sm:$0xff] }
 0x3bf   : > { %8676 = vpow2.f32 %v2579_v17  ;;  %12971 = vst [vmem:[#allocation35_spill] sm:$0xff] %v10347_v48  ;;  %v2728_v49 = vpack.c.bf16 %v10339_v29, %v10347_v48  ;;  %v10364_v55 = vpop.eup %8662  ;;  %v12987_v35 = vld [vmem:[#allocation58_spill] sm:$0xff]  ;;  %v12990_v50 = vld [vmem:[#allocation47_spill] sm:$0xff] }
 0x3c0   : > { %v2573_v26 = vmul.f32 1.442695, %v2518_v40  ;;  %8179 = vmatpush3.bf16.msra.mxu0 %v10330_v51  ;;  %v2567_v52 = vmul.f32 1.442695, %v2515_v22  ;;  %12978 = vst [vmem:[#allocation66_spill] sm:$0xff] %v10364_v55  ;;  %v1824_v47 = vpack.c.bf16 %v12987_v35, %v12986_v15 }
 0x3c1   : > { %8192 = vmatprep.subr.bf16.mxu0 %v12972_v1  ;;  %v2464_v7 = vpop.xlane.xlu1 %2463  ;;  %3596 = vrot.lane.b32.xlu1 %v12973_v45, %s9095_s28 }
 0x3c2   : > { %v2516_v24 = vsub.f32 %v12974_v14, %v2464_v7  ;;  %3519 = vrot.lane.b32.xlu0 %v12975_v20, %s9095_s28  ;;  %8678 = vpow2.f32 %v2573_v26  ;;  %v12993_v26 = vld [vmem:[#allocation48_spill] sm:$0xff]  ;;  %v12995_v7 = vld [vmem:[#allocation45_spill] sm:$0xff] }
 0x3c3   : > { %8181 = vmatmul.mubr.msk.bf16.vlgmr.msra.gmra.mxu0 %vm1830_vm1, %v2728_v49  ;;  %8680 = vpow2.f32 %v2567_v52  ;;  %v10369_v21 = vpop.eup %8664 }
 0x3c4   : > { %v2569_v62 = vmul.f32 1.442695, %v2516_v24  ;;  %8193 = vmatpush3.bf16.msra.mxu0 %v12972_v1  ;;  %v12998_v24 = vld [vmem:[#allocation52_spill] sm:$0xff] }
 0x3c5   : > { %8194 = vmatprep.subr.bf16.mxu0 %v10360_v56  ;;  %3590 = vrot.lane.b32.xlu1 %v12979_v12, %s9095_s28  ;;  %v3232_v54 = vpop.permute.xlu1 %3231 }
 0x3c6   : > { %8682 = vpow2.f32 %v2569_v62  ;;  %3671 = vrot.lane.b32.xlu0 %v12980_v30, %s9095_s28  ;;  %v13001_v62 = vld [vmem:[#allocation64_spill] sm:$0xff]  ;;  %v13002_v30 = vld [vmem:[#allocation51_spill] sm:$0xff] }
 0x3c7   : > { %v10373_v41 = vpop.eup %8666  ;;  %8684 = vpow2.f32 %v2571_v31  ;;  %v13000_v31 = vld [vmem:[#allocation62_spill] sm:$0xff] }
 0x3c8   : > { %v10375_v39 = vpop.eup %8668  ;;  %8195 = vmatpush3.bf16.msra.mxu0 %v10360_v56  ;;  %v2725_v6 = vpack.c.bf16 %v10373_v41, %v10369_v21  ;;  %v10433_v12 = vpack.c.bf16 %v13001_v62, %v13000_v31 }
 0x3c9   : > { %v10380_v27 = vpop.eup %8670  ;;  %3669 = vrot.lane.b32.xlu1 %v12982_v18, %s9095_s28  ;;  %v2726_v53 = vpack.c.bf16 %v10364_v55, %v10375_v39  ;;  %v3307_v18 = vpop.permute.xlu1 %3306  ;;  %v9084_v55 = vld [vmem:[%s10011_s16 + $0x5] ss:$0 sm:$0xff] }
 0x3ca   : > { %12981 = vst [vmem:[#allocation42_spill] sm:$0xff] %v10380_v27  ;;  %v10386_v17 = vpop.eup %8672  ;;  %8172 = vmatprep.mubr.msk.bf16.mxu1 %vm1830_vm1, %v2725_v6  ;;  %3592 = vrot.lane.b32.xlu0 %v12984_v3, %s9095_s28  ;;  %v13003_v6 = vld [vmem:[#allocation50_spill] sm:$0xff]  ;;  %v13005_v3 = vld [vmem:[#allocation53_spill] sm:$0xff] }
 0x3cb   : > { %12983 = vst [vmem:[#allocation55_spill] sm:$0xff] %v10386_v17  ;;  %v10391_v44 = vpop.eup %8674  ;;  %8173 = vmatmul.mubr.msk.bf16.vlgmr.msra.gmra.mxu1 %vm1830_vm1, %v2726_v53  ;;  %v13004_v53 = vld [vmem:[#allocation54_spill] sm:$0xff] }
 0x3cc   : > { %12985 = vst [vmem:[#allocation56_spill] sm:$0xff] %v10391_v44  ;;  %v10396_v36 = vpop.eup %8676  ;;  %8185 = vmatpush3.bf16.msra.mxu1 %v9997_v25  ;;  %v2731_v40 = vpack.c.bf16 %v10391_v44, %v10386_v17 }
 0x3cd   : > { %12988 = vst [vmem:[#allocation36_spill] sm:$0xff] %v10396_v36  ;;  %8186 = vmatprep.subr.bf16.mxu1 %v1824_v47  ;;  %3663 = vrot.lane.b32.xlu1 %v12989_v11, %s9095_s28  ;;  %v2732_v22 = vpack.c.bf16 %v10380_v27, %v10396_v36 }
 0x3ce   : > { %8196 = vmatprep.mubr.msk.bf16.mxu0 %vm1830_vm1, %v2731_v40  ;;  %3744 = vrot.lane.b32.xlu0 %v12990_v50, %s9095_s28 }
 0x3cf   : > { %8197 = vmatmul.mubr.msk.bf16.vlgmr.msra.gmra.mxu0 %vm1830_vm1, %v2732_v22  ;;  %v10409_v5 = vpop.eup %8678 }
 0x3d0   : > { %8187 = vmatpush3.bf16.msra.mxu1 %v1824_v47  ;;  %12991 = vst [vmem:[#allocation69_spill] sm:$0xff] %v10409_v5  ;;  %v10414_v52 = vpop.eup %8680 }
 0x3d1   : > { %8200 = vmatprep.subr.bf16.mxu1 %v12992_v9  ;;  %3742 = vrot.lane.b32.xlu1 %v12993_v26, %s9095_s28  ;;  %12994 = vst [vmem:[#allocation68_spill] sm:$0xff] %v10414_v52 }
 0x3d2   : > { %3665 = vrot.lane.b32.xlu0 %v12995_v7, %s9095_s28 }
 0x3d3   : > { %v10418_v45 = vpop.eup %8682 }
 0x3d4   : > { %12996 = vst [vmem:[#allocation41_spill] sm:$0xff] %v10418_v45  ;;  %v10420_v49 = vpop.eup %8684  ;;  %v2729_v14 = vpack.c.bf16 %v10418_v45, %v10414_v52 }
 0x3d5   : > { %12997 = vst [vmem:[#allocation67_spill] sm:$0xff] %v10420_v49  ;;  %3738 = vrot.lane.b32.xlu1 %v12998_v24, %s9095_s28  ;;  %v2730_v20 = vpack.c.bf16 %v10409_v5, %v10420_v49 }
 0x3d6   : > { %8188 = vmatprep.mubr.msk.bf16.mxu1 %vm1830_vm1, %v2729_v14  ;;  %3736 = vrot.lane.b32.xlu0 %v12999_v46, %s9095_s28 }
 0x3d7   : > { %8189 = vmatmul.mubr.msk.bf16.vlgmr.msra.gmra.mxu1 %vm1830_vm1, %v2730_v20 }
 0x3d8   : > { %8201 = vmatpush3.bf16.msra.mxu1 %v12992_v9 }
 0x3d9   : > { %8202 = vmatprep.subr.bf16.mxu1 %v10433_v12  ;;  %4177 = vrot.lane.b32.xlu1 %v13002_v30, %s9095_s28 }
 0x3da   : > { %4179 = vrot.lane.b32.xlu0 %v13003_v6, %s9095_s28 }
 0x3dc   : > { %8203 = vmatpush3.bf16.msra.mxu1 %v10433_v12 }
 0x3dd   : > { %8514 = vmatprep.subr.msk.bf16.mxu1 %vm1830_vm1, %v3307_v18  ;;  %4240 = vrot.lane.b32.xlu1 %v13004_v53, %s9095_s28 }
 0x3de   : > { %4242 = vrot.lane.b32.xlu0 %v13005_v3, %s9095_s28 }
 0x3e1   : > { %4303 = vrot.lane.b32.xlu1 %v10234_v16, %s9095_s28 }
 0x3e2   : > { %4305 = vrot.lane.b32.xlu0 %v9977_v43, %s9095_s28 }
 0x3e5   : > { %4366 = vrot.lane.b32.xlu1 %v10273_v57, %s9095_s28 }
 0x3e6   : > { %4368 = vrot.lane.b32.xlu0 %v9984_v19, %s9095_s28 }
 0x3e9   : > { %4429 = vrot.lane.b32.xlu1 %v10330_v51, %s9095_s28 }
 0x3ea   : > { %4431 = vrot.lane.b32.xlu0 %v9991_v0, %s9095_s28 }
 0x3ed   : > { %4494 = vrot.lane.b32.xlu1 %v9997_v25, %s9095_s28 }
 0x3f1   : > { %4492 = vrot.lane.b32.xlu1 %v1824_v47, %s9095_s28 }
 0x40d   : > { %v2491_v16 = vpop.xlane.xlu0 %2490 }
 0x40e   : > { %v2525_v19 = vsub.f32 %v10196_v28, %v2491_v16 }
 0x410   : > { %v2587_v47 = vmul.f32 1.442695, %v2525_v19 }
 0x411   : > { %v2494_v15 = vpop.xlane.xlu1 %2493  ;;  %v2485_v43 = vpop.xlane.xlu0 %2484 }
 0x412   : > { %v2526_v35 = vsub.f32 %v10205_v61, %v2494_v15  ;;  %v2523_v57 = vsub.f32 %v10202_v2, %v2485_v43  ;;  %v3318_v15 = vsel %vm1830_vm1, %v3307_v18, 0 }
 0x414   : > { %v2589_v40 = vmul.f32 1.442695, %v2526_v35  ;;  %v2583_v11 = vmul.f32 1.442695, %v2523_v57 }
 0x415   : > { %v2488_v51 = vpop.xlane.xlu1 %2487  ;;  %v3234_v22 = vpop.permute.xlu0 %3233 }
 0x416   : > { %v2524_v0 = vsub.f32 %v10211_v32, %v2488_v51  ;;  %8512 = vmatprep.subr.msk.bf16.mxu0 %vm1830_vm1, %v3234_v22  ;;  %v3245_v25 = vsel %vm1830_vm1, %v3234_v22, 0  ;;  %8686 = vpow2.f32 %v2589_v40  ;;  %v3242_v32 = vsel %vm1830_vm1, %v3232_v54, 0 }
 0x417   : > { %8209 = vmatpush3.bf16.xpose.msra.mxu0 %v3245_v25  ;;  %8688 = vpow2.f32 %v2583_v11 }
 0x418   : > { %v2585_v50 = vmul.f32 1.442695, %v2524_v0  ;;  %8513 = vmatprep.subr.msk.bf16.mxu0 %vm1830_vm1, %v3232_v54 }
 0x419   : > { %v3226_v2 = vpop.permute.xlu1 %3225  ;;  %v3228_v61 = vpop.permute.xlu0 %3227 }
 0x41a   : > { %8690 = vpow2.f32 %v2585_v50  ;;  %8212 = vmatprep.mubr.msk.bf16.mxu0 %vm1830_vm1, %v3226_v2 }
 0x41b   : > { %8692 = vpow2.f32 %v2587_v47 }
 0x41d   : > { %v3305_v28 = vpop.permute.xlu1 %3304  ;;  %v3380_v26 = vpop.permute.xlu0 %3379 }
 0x41e   : > { %v3391_v62 = vsel %vm1830_vm1, %v3380_v26, 0  ;;  %v3315_v11 = vsel %vm1830_vm1, %v3305_v28, 0 }
 0x41f   : > { %8211 = vmatpush3.bf16.xpose.msra.mxu0 %v3242_v32 }
 0x420   : > { %8516 = vmatprep.subr.msk.bf16.mxu0 %vm1830_vm1, %v3380_v26 }
 0x421   : > { %v3299_v7 = vpop.permute.xlu1 %3298  ;;  %v3301_v14 = vpop.permute.xlu0 %3300 }
 0x423   : > { %v10473_v24 = vpop.eup %8686 }
 0x424   : > { %13006 = vst [vmem:[#allocation60_spill] sm:$0xff] %v10473_v24  ;;  %v10475_v31 = vpop.eup %8688 }
 0x425   : > { %v3378_v20 = vpop.permute.xlu1 %3377  ;;  %v3453_v46 = vpop.permute.xlu0 %3452  ;;  %13007 = vst [vmem:[#allocation44_spill] sm:$0xff] %v10475_v31 }
 0x426   : > { %8213 = vmatmul.mubr.msk.bf16.vlgmr.msra.gmra.mxu0 %vm1830_vm1, %v3228_v61  ;;  %v3388_v57 = vsel %vm1830_vm1, %v3378_v20, 0  ;;  %v3464_v47 = vsel %vm1830_vm1, %v3453_v46, 0 }
 0x427   : > { %v10479_v30 = vpop.eup %8690  ;;  %8225 = vmatpush3.bf16.xpose.msra.mxu0 %v3391_v62 }
 0x428   : > { %13008 = vst [vmem:[#allocation70_spill] sm:$0xff] %v10479_v30  ;;  %v10481_v6 = vpop.eup %8692  ;;  %8517 = vmatprep.subr.msk.bf16.mxu0 %vm1830_vm1, %v3378_v20  ;;  %v2733_v54 = vpack.c.bf16 %v10479_v30, %v10475_v31 }
 0x429   : > { %13009 = vst [vmem:[#allocation37_spill] sm:$0xff] %v10481_v6  ;;  %v3372_v53 = vpop.permute.xlu1 %3371  ;;  %v3374_v3 = vpop.permute.xlu0 %3373  ;;  %v2734_v16 = vpack.c.bf16 %v10473_v24, %v10481_v6 }
 0x42a   : > { %8204 = vmatprep.mubr.msk.bf16.mxu1 %vm1830_vm1, %v2733_v54  ;;  %8228 = vmatprep.mubr.msk.bf16.mxu0 %vm1830_vm1, %v3372_v53 }
 0x42b   : > { %8205 = vmatmul.mubr.msk.bf16.vlgmr.msra.gmra.mxu1 %vm1830_vm1, %v2734_v16 }
 0x42c   : > { %8217 = vmatpush3.bf16.xpose.msra.mxu1 %v3318_v15  ;;  %8220 = vmatprep.mubr.msk.bf16.mxu1 %vm1830_vm1, %v3299_v7 }
 0x42d   : > { %8515 = vmatprep.subr.msk.bf16.mxu1 %vm1830_vm1, %v3305_v28  ;;  %v3451_v43 = vpop.permute.xlu1 %3450  ;;  %v3526_v35 = vpop.permute.xlu0 %3525 }
 0x42e   : > { %v3537_v22 = vsel %vm1830_vm1, %v3526_v35, 0  ;;  %v3461_v32 = vsel %vm1830_vm1, %v3451_v43, 0 }
 0x42f   : > { %8227 = vmatpush3.bf16.xpose.msra.mxu0 %v3388_v57 }
 0x430   : > { %8520 = vmatprep.subr.msk.bf16.mxu0 %vm1830_vm1, %v3526_v35 }
 0x431   : > { %v3445_v19 = vpop.permute.xlu1 %3444  ;;  %v3447_v40 = vpop.permute.xlu0 %3446 }
 0x434   : > { %8219 = vmatpush3.bf16.xpose.msra.mxu1 %v3315_v11 }
 0x435   : > { %8518 = vmatprep.subr.msk.bf16.mxu1 %vm1830_vm1, %v3453_v46  ;;  %v3524_v18 = vpop.permute.xlu1 %3523  ;;  %v3599_v51 = vpop.permute.xlu0 %3598 }
 0x436   : > { %8229 = vmatmul.mubr.msk.bf16.vlgmr.msra.gmra.mxu0 %vm1830_vm1, %v3374_v3  ;;  %v3534_v61 = vsel %vm1830_vm1, %v3524_v18, 0  ;;  %v3610_v54 = vsel %vm1830_vm1, %v3599_v51, 0 }
 0x437   : > { %8241 = vmatpush3.bf16.xpose.msra.mxu0 %v3537_v22 }
 0x438   : > { %8521 = vmatprep.subr.msk.bf16.mxu0 %vm1830_vm1, %v3524_v18 }
 0x439   : > { %v3518_v0 = vpop.permute.xlu1 %3517  ;;  %v3520_v25 = vpop.permute.xlu0 %3519 }
 0x43a   : > { %8244 = vmatprep.mubr.msk.bf16.mxu0 %vm1830_vm1, %v3518_v0 }
 0x43b   : > { %8221 = vmatmul.mubr.msk.bf16.vlgmr.msra.gmra.mxu1 %vm1830_vm1, %v3301_v14 }
 0x43c   : > { %8233 = vmatpush3.bf16.xpose.msra.mxu1 %v3464_v47  ;;  %8236 = vmatprep.mubr.msk.bf16.mxu1 %vm1830_vm1, %v3445_v19 }
 0x43d   : > { %8519 = vmatprep.subr.msk.bf16.mxu1 %vm1830_vm1, %v3451_v43  ;;  %v3597_v50 = vpop.permute.xlu1 %3596  ;;  %v3672_v2 = vpop.permute.xlu0 %3671 }
 0x43e   : > { %v3683_v20 = vsel %vm1830_vm1, %v3672_v2, 0  ;;  %v3607_v35 = vsel %vm1830_vm1, %v3597_v50, 0 }
 0x43f   : > { %8243 = vmatpush3.bf16.xpose.msra.mxu0 %v3534_v61 }
 0x440   : > { %8524 = vmatprep.subr.msk.bf16.mxu0 %vm1830_vm1, %v3672_v2 }
 0x441   : > { %v3591_v28 = vpop.permute.xlu1 %3590  ;;  %v3593_v26 = vpop.permute.xlu0 %3592 }
 0x444   : > { %8235 = vmatpush3.bf16.xpose.msra.mxu1 %v3461_v32 }
 0x445   : > { %8522 = vmatprep.subr.msk.bf16.mxu1 %vm1830_vm1, %v3599_v51  ;;  %v3670_v7 = vpop.permute.xlu1 %3669  ;;  %v3745_v14 = vpop.permute.xlu0 %3744 }
 0x446   : > { %8245 = vmatmul.mubr.msk.bf16.vlgmr.msra.gmra.mxu0 %vm1830_vm1, %v3520_v25  ;;  %v3680_v16 = vsel %vm1830_vm1, %v3670_v7, 0 }
 0x447   : > { %8257 = vmatpush3.bf16.xpose.msra.mxu0 %v3683_v20 }
 0x448   : > { %8525 = vmatprep.subr.msk.bf16.mxu0 %vm1830_vm1, %v3670_v7 }
 0x449   : > { %v3664_v46 = vpop.permute.xlu1 %3663  ;;  %v3666_v62 = vpop.permute.xlu0 %3665 }
 0x44a   : > { %8260 = vmatprep.mubr.msk.bf16.mxu0 %vm1830_vm1, %v3664_v46 }
 0x44b   : > { %8237 = vmatmul.mubr.msk.bf16.vlgmr.msra.gmra.mxu1 %vm1830_vm1, %v3447_v40  ;;  %v3756_v40 = vsel %vm1830_vm1, %v3745_v14, 0 }
 0x44c   : > { %8249 = vmatpush3.bf16.xpose.msra.mxu1 %v3610_v54  ;;  %8252 = vmatprep.mubr.msk.bf16.mxu1 %vm1830_vm1, %v3591_v28 }
 0x44d   : > { %8523 = vmatprep.subr.msk.bf16.mxu1 %vm1830_vm1, %v3597_v50  ;;  %v3743_v53 = vpop.permute.xlu1 %3742  ;;  %v3737_v3 = vpop.permute.xlu0 %3736 }
 0x44e   : > { %v3753_v18 = vsel %vm1830_vm1, %v3743_v53, 0 }
 0x44f   : > { %8259 = vmatpush3.bf16.xpose.msra.mxu0 %v3680_v16 }
 0x451   : > { %v3739_v15 = vpop.permute.xlu1 %3738  ;;  %v4180_v43 = vpop.permute.xlu0 %4179 }
 0x452   : > { %8272 = vmatprep.subr.bf16.mxu0 %v4180_v43 }
 0x454   : > { %8251 = vmatpush3.bf16.xpose.msra.mxu1 %v3607_v35 }
 0x455   : > { %8526 = vmatprep.subr.msk.bf16.mxu1 %vm1830_vm1, %v3745_v14  ;;  %v4243_v57 = vpop.permute.xlu0 %4242  ;;  %v4178_v19 = vpop.permute.xlu1 %4177 }
 0x456   : > { %8261 = vmatmul.mubr.msk.bf16.vlgmr.msra.gmra.mxu0 %vm1830_vm1, %v3666_v62 }
 0x457   : > { %8273 = vmatpush3.bf16.msra.mxu0 %v4180_v43  ;;  %v10534_v0 = vpop.f32.mrf.mxu0 }
 0x458   : > { %8274 = vmatprep.subr.bf16.mxu0 %v4178_v19  ;;  %13011 = vst [vmem:[#allocation61_spill] sm:$0xff] %v10534_v0 }
 0x459   : > { %v10524_v11 = vpop.permute.xlu0 %4305  ;;  %v4241_v51 = vpop.permute.xlu1 %4240 }
 0x45a   : > { %v10536_v25 = vpop.f32.mrf.mxu0 }
 0x45b   : > { %8253 = vmatmul.mubr.msk.bf16.vlgmr.msra.gmra.mxu1 %vm1830_vm1, %v3593_v26  ;;  %8275 = vmatpush3.bf16.msra.mxu0 %v4178_v19  ;;  %13012 = vst [vmem:[#allocation43_spill] sm:$0xff] %v10536_v25 }
 0x45c   : > { %8265 = vmatpush3.bf16.xpose.msra.mxu1 %v3756_v40  ;;  %8268 = vmatprep.mubr.msk.bf16.mxu1 %vm1830_vm1, %v3737_v3  ;;  %v10538_v47 = vpop.f32.mrf.mxu0 }
 0x45d   : > { %8527 = vmatprep.subr.msk.bf16.mxu1 %vm1830_vm1, %v3743_v53  ;;  %8288 = vmatprep.subr.bf16.mxu0 %v10524_v11  ;;  %v10531_v22 = vpop.permute.xlu0 %4368  ;;  %13013 = vst [vmem:[#allocation38_spill] sm:$0xff] %v10538_v47 }
 0x45e   : > { %13010 = vst [vmem:[#allocation59_spill] sm:$0xff] %v10531_v22  ;;  %v10540_v50 = vpop.f32.mrf.mxu0 }
 0x45f   : > { %13014 = vst [vmem:[#allocation39_spill] sm:$0xff] %v10540_v50 }
 0x464   : > { %8267 = vmatpush3.bf16.xpose.msra.mxu1 %v3753_v18 }
 0x465   : > { %8280 = vmatprep.subr.bf16.mxu1 %v4243_v57 }
 0x467   : > { %v10548_v26 = vpop.f32.mrf.mxu1 }
 0x468   : > { %13018 = vst [vmem:[#allocation40_spill] sm:$0xff] %v10548_v26 }
 0x469   : > { %v10552_v7 = vpop.f32.mrf.mxu1 }
 0x46a   : > { %13020 = vst [vmem:[#allocation63_spill] sm:$0xff] %v10552_v7 }
 0x46b   : > { %8269 = vmatmul.mubr.msk.bf16.vlgmr.msra.gmra.mxu1 %vm1830_vm1, %v3739_v15  ;;  %v10556_v20 = vpop.f32.mrf.mxu1 }
 0x46c   : > { %8281 = vmatpush3.bf16.msra.mxu1 %v4243_v57  ;;  %13022 = vst [vmem:[#allocation45_spill] sm:$0xff] %v10556_v20 }
 0x46d   : > { %8282 = vmatprep.subr.bf16.mxu1 %v4241_v51  ;;  %v10560_v62 = vpop.f32.mrf.mxu1 }
 0x46e   : > { %13024 = vst [vmem:[#allocation49_spill] sm:$0xff] %v10560_v62 }
 0x470   : > { %8283 = vmatpush3.bf16.msra.mxu1 %v4241_v51 }
 0x471   : > { %8296 = vmatprep.subr.bf16.mxu1 %v10531_v22 }
 0x47b   : > { %v10542_v2 = vpop.f32.mrf.mxu0 }
 0x47c   : > { %13015 = vst [vmem:[#allocation46_spill] sm:$0xff] %v10542_v2 }
 0x47d   : > { %v10544_v61 = vpop.f32.mrf.mxu0 }
 0x47e   : > { %13016 = vst [vmem:[#allocation57_spill] sm:$0xff] %v10544_v61 }
 0x47f   : > { %v10546_v28 = vpop.f32.mrf.mxu0 }
 0x480   : > { %13017 = vst [vmem:[#allocation58_spill] sm:$0xff] %v10546_v28 }
 0x481   : > { %v10550_v32 = vpop.f32.mrf.mxu0 }
 0x482   : > { %13019 = vst [vmem:[#allocation47_spill] sm:$0xff] %v10550_v32 }
 0x483   : > { %v10554_v14 = vpop.f32.mrf.mxu0 }
 0x484   : > { %13021 = vst [vmem:[#allocation48_spill] sm:$0xff] %v10554_v14 }
 0x485   : > { %v10558_v46 = vpop.f32.mrf.mxu0 }
 0x486   : > { %13023 = vst [vmem:[#allocation52_spill] sm:$0xff] %v10558_v46 }
 0x487   : > { %v10564_v53 = vpop.f32.mrf.mxu0 }
 0x488   : > { %13026 = vst [vmem:[#allocation64_spill] sm:$0xff] %v10564_v53  ;;  %v10589_v53 = vld [vmem:[%s12754_s2 + $0x30] sm:$0xff] }
 0x489   : > { %v10568_v16 = vpop.f32.mrf.mxu0 }
 0x48a   : > { %13028 = vst [vmem:[#allocation50_spill] sm:$0xff] %v10568_v16 }
 0x48b   : > { %v10562_v54 = vpop.f32.mrf.mxu1 }
 0x48c   : > { %13025 = vst [vmem:[#allocation62_spill] sm:$0xff] %v10562_v54  ;;  %v10611_v54 = vld [vmem:[%s12754_s2 + $0x28] sm:$0xff] }
 0x48d   : > { %v10566_v3 = vpop.f32.mrf.mxu1 }
 0x48e   : > { %13027 = vst [vmem:[#allocation51_spill] sm:$0xff] %v10566_v3 }
 0x48f   : > { %v10570_v15 = vpop.f32.mrf.mxu0  ;;  %v10572_v43 = vpop.f32.mrf.mxu1 }
 0x490   : > { %13029 = vst [vmem:[#allocation54_spill] sm:$0xff] %v10570_v15  ;;  %13030 = vst [vmem:[#allocation53_spill] sm:$0xff] %v10572_v43 }
 0x491   : > { %v10574_v35 = vpop.f32.mrf.mxu0  ;;  %v10576_v57 = vpop.f32.mrf.mxu1 }
 0x492   : > { %13031 = vst [vmem:[#allocation71_spill] sm:$0xff] %v10574_v35  ;;  %13032 = vst [vmem:[#allocation72_spill] sm:$0xff] %v10576_v57  ;;  %v10594_v35 = vld [vmem:[%s12754_s2 + $0x20] sm:$0xff] }
 0x493   : > { %v10580_v40 = vpop.f32.mrf.mxu0 }
 0x494   : > { %13034 = vst [vmem:[#allocation74_spill] sm:$0xff] %v10580_v40 }
 0x495   : > { %v10584_v51 = vpop.f32.mrf.mxu0 }
 0x496   : > { %13036 = vst [vmem:[#allocation76_spill] sm:$0xff] %v10584_v51  ;;  %v10602_v51 = vld [vmem:[%s12754_s2 + $0x38] sm:$0xff] }
 0x497   : > { %v10578_v19 = vpop.f32.mrf.mxu1 }
 0x498   : > { %13033 = vst [vmem:[#allocation73_spill] sm:$0xff] %v10578_v19 }
 0x499   : > { %v10582_v18 = vpop.f32.mrf.mxu1 }
 0x49a   : > { %13035 = vst [vmem:[#allocation75_spill] sm:$0xff] %v10582_v18  ;;  %v9078_v18 = vld [vmem:[%s10011_s16] ss:$0 sm:$0xff] }
 0x49b   : > { %v10596_v14 = vpop.f32.mrf.mxu1 }
 0x49c   : > { %13037 = vst [vmem:[#allocation77_spill] sm:$0xff] %v10596_v14 }
 0x49d   : > { %v10613_v14 = vpop.f32.mrf.mxu1 }
 0x49e   : > { %13038 = vst [vmem:[#allocation78_spill] sm:$0xff] %v10613_v14 }
 0x4e6   : > { %v8214_v15 = vpop.f32.mrf.mxu0 }
 0x4e7   : > { %v3290_v19 = vadd.f32 %v8214_v15, %v10589_v53 }
 0x4e8   : > { %v3281_v40 = vpop.f32.mrf.mxu0 }
 0x4e9   : > { %v10605_v16 = vadd.f32 %v9078_v18, %v3290_v19  ;;  %v3282_v46 = vadd.f32 %v3281_v40, %v10594_v35 }
 0x4ea   : > { %v8215_v43 = vpop.f32.mrf.mxu0 }
 0x4eb   : > { %v10615_v15 = vadd.f32 %v9078_v18, %v3282_v46  ;;  %v3293_v57 = vadd.f32 %v8215_v43, %v10602_v51  ;;  %v3845_v3 = vsel %vm1830_vm1, %v10605_v16, -inf  ;;  %v10620_v28 = vpop.f32.mrf.mxu1 }
 0x4ec   : > { %3846 = vmax.xlane.f32.xlu0 %v3845_v3  ;;  %v3284_v19 = vpop.f32.mrf.mxu0  ;;  %13039 = vst [vmem:[#allocation79_spill] sm:$0xff] %v10620_v28 }
 0x4ed   : > { %v3285_v40 = vadd.f32 %v3284_v19, %v10611_v54  ;;  %v10623_v2 = vadd.f32 %v9078_v18, %v3293_v57  ;;  %v3839_v46 = vsel %vm1830_vm1, %v10615_v15, -inf  ;;  %v10629_v14 = vpop.f32.mrf.mxu1 }
 0x4ee   : > { %13040 = vst [vmem:[#allocation80_spill] sm:$0xff] %v10629_v14 }
 0x4ef   : > { %v10625_v32 = vadd.f32 %v9078_v18, %v3285_v40  ;;  %v3848_v3 = vsel %vm1830_vm1, %v10623_v2, -inf  ;;  %v10635_v28 = vpop.f32.mrf.mxu1 }
 0x4f0   : > { %3840 = vmax.xlane.f32.xlu0 %v3839_v46  ;;  %13041 = vst [vmem:[#allocation81_spill] sm:$0xff] %v10635_v28  ;;  %v9079_v46 = vld [vmem:[%s10011_s16 + $0x2] ss:$0 sm:$0xff] }
 0x4f1   : > { %v3842_v43 = vsel %vm1830_vm1, %v10625_v32, -inf  ;;  %v10638_v40 = vpop.f32.mrf.mxu1 }
 0x4f2   : > { %3843 = vmax.xlane.f32.xlu1 %v3842_v43  ;;  %13042 = vst [vmem:[#allocation82_spill] sm:$0xff] %v10638_v40  ;;  %v9080_v40 = vld [vmem:[%s10011_s16 + $0x1] ss:$0 sm:$0xff] }
 0x4f4   : > { %3849 = vmax.xlane.f32.xlu0 %v3848_v3 }
 0x4f6   : > { %v8230_v57 = vpop.f32.mrf.mxu0 }
 0x4f7   : > { %v3436_v18 = vadd.f32 %v8230_v57, %v10589_v53 }
 0x4f8   : > { %v3427_v19 = vpop.f32.mrf.mxu0 }
 0x4f9   : > { %v10641_v61 = vadd.f32 %v9079_v46, %v3436_v18  ;;  %v3428_v14 = vadd.f32 %v3427_v19, %v10594_v35 }
 0x4fa   : > { %v8231_v20 = vpop.f32.mrf.mxu0 }
 0x4fb   : > { %v10644_v43 = vadd.f32 %v9079_v46, %v3428_v14  ;;  %v8222_v26 = vpop.f32.mrf.mxu1  ;;  %v3439_v3 = vadd.f32 %v8231_v20, %v10602_v51  ;;  %v3869_v28 = vsel %vm1830_vm1, %v10641_v61, -inf }
 0x4fc   : > { %v3363_v57 = vadd.f32 %v8222_v26, %v10589_v53  ;;  %3870 = vmax.xlane.f32.xlu0 %v3869_v28  ;;  %v3430_v62 = vpop.f32.mrf.mxu0 }
 0x4fd   : > { %v10650_v7 = vadd.f32 %v9079_v46, %v3439_v3  ;;  %v3431_v18 = vadd.f32 %v3430_v62, %v10611_v54  ;;  %v3863_v20 = vsel %vm1830_vm1, %v10644_v43, -inf  ;;  %v3354_v28 = vpop.f32.mrf.mxu1 }
 0x4fe   : > { %v10654_v47 = vadd.f32 %v9080_v40, %v3363_v57  ;;  %v3355_v57 = vadd.f32 %v3354_v28, %v10594_v35 }
 0x4ff   : > { %v10656_v19 = vadd.f32 %v9079_v46, %v3431_v18  ;;  %v3872_v14 = vsel %vm1830_vm1, %v10650_v7, -inf  ;;  %v8223_v46 = vpop.f32.mrf.mxu1 }
 0x500   : > { %3873 = vmax.xlane.f32.xlu1 %v3872_v14  ;;  %3864 = vmax.xlane.f32.xlu0 %v3863_v20  ;;  %v3857_v62 = vsel %vm1830_vm1, %v10654_v47, -inf  ;;  %v3366_v50 = vadd.f32 %v8223_v46, %v10602_v51  ;;  %v9081_v14 = vld [vmem:[%s10011_s16 + $0x4] ss:$0 sm:$0xff]  ;;  %v10673_v31 = vadd.f32 %v9080_v40, %v3355_v57 }
 0x501   : > { %v3866_v26 = vsel %vm1830_vm1, %v10656_v19, -inf  ;;  %v3357_v6 = vpop.f32.mrf.mxu1 }
 0x502   : > { %v10679_v30 = vadd.f32 %v9080_v40, %v3366_v50  ;;  %v3851_v36 = vsel %vm1830_vm1, %v10673_v31, -inf }
 0x504   : > { %3867 = vmax.xlane.f32.xlu1 %v3866_v26  ;;  %3858 = vmax.xlane.f32.xlu0 %v3857_v62 }
 0x506   : > { %v8246_v3 = vpop.f32.mrf.mxu0 }
 0x507   : > { %v3582_v18 = vadd.f32 %v8246_v3, %v10589_v53 }
 0x508   : > { %v3573_v0 = vpop.f32.mrf.mxu0 }
 0x509   : > { %v10670_v20 = vadd.f32 %v9081_v14, %v3582_v18  ;;  %v3574_v25 = vadd.f32 %v3573_v0, %v10594_v35 }
 0x50a   : > { %v8247_v24 = vpop.f32.mrf.mxu0 }
 0x50b   : > { %v10675_v26 = vadd.f32 %v9081_v14, %v3574_v25  ;;  %v3893_v62 = vsel %vm1830_vm1, %v10670_v20, -inf  ;;  %v8238_v28 = vpop.f32.mrf.mxu1  ;;  %v3585_v46 = vadd.f32 %v8247_v24, %v10602_v51  ;;  %v3860_v24 = vsel %vm1830_vm1, %v10679_v30, -inf }
 0x50c   : > { %3894 = vmax.xlane.f32.xlu0 %v3893_v62  ;;  %v3576_v3 = vpop.f32.mrf.mxu0  ;;  %v3509_v25 = vadd.f32 %v8238_v28, %v10589_v53  ;;  %v3358_v62 = vadd.f32 %v3357_v6, %v10611_v54 }
 0x50d   : > { %v3577_v18 = vadd.f32 %v3576_v3, %v10611_v54  ;;  %v3887_v0 = vsel %vm1830_vm1, %v10675_v26, -inf  ;;  %v10691_v50 = vadd.f32 %v9081_v14, %v3585_v46  ;;  %v3500_v27 = vpop.f32.mrf.mxu1  ;;  %v9082_v3 = vld [vmem:[%s10011_s16 + $0x3] ss:$0 sm:$0xff] }
 0x50e   : > { %3888 = vmax.xlane.f32.xlu1 %v3887_v0  ;;  %v10696_v0 = vadd.f32 %v9082_v3, %v3509_v25  ;;  %v3501_v46 = vadd.f32 %v3500_v27, %v10594_v35 }
 0x50f   : > { %v10686_v57 = vadd.f32 %v9081_v14, %v3577_v18  ;;  %v10700_v18 = vadd.f32 %v9080_v40, %v3358_v62  ;;  %v3896_v6 = vsel %vm1830_vm1, %v10691_v50, -inf  ;;  %v9083_v40 = vld [vmem:[%s10011_s16 + $0x6] ss:$0 sm:$0xff] }
 0x510   : > { %3852 = vmax.xlane.f32.xlu0 %v3851_v36  ;;  %v8239_v36 = vpop.f32.mrf.mxu1  ;;  %v3881_v25 = vsel %vm1830_vm1, %v10696_v0, -inf  ;;  %v10715_v45 = vadd.f32 %v9082_v3, %v3501_v46 }
 0x511   : > { %v3890_v28 = vsel %vm1830_vm1, %v10686_v57, -inf  ;;  %v3512_v44 = vadd.f32 %v8239_v36, %v10602_v51 }
 0x512   : > { %3861 = vmax.xlane.f32.xlu1 %v3860_v24 }
 0x513   : > { %v10721_v29 = vadd.f32 %v9082_v3, %v3512_v44 }
 0x514   : > { %3891 = vmax.xlane.f32.xlu0 %v3890_v28  ;;  %v3503_v28 = vpop.f32.mrf.mxu1 }
 0x515   : > { %v3504_v44 = vadd.f32 %v3503_v28, %v10611_v54 }
 0x516   : > { %3897 = vmax.xlane.f32.xlu1 %v3896_v6  ;;  %v8262_v14 = vpop.f32.mrf.mxu0  ;;  %v3854_v6 = vsel %vm1830_vm1, %v10700_v18, -inf }
 0x517   : > { %v3728_v24 = vadd.f32 %v8262_v14, %v10589_v53  ;;  %v10743_v22 = vadd.f32 %v9082_v3, %v3504_v44 }
 0x518   : > { %3882 = vmax.xlane.f32.xlu0 %v3881_v25  ;;  %v3719_v17 = vpop.f32.mrf.mxu0 }
 0x519   : > { %v10710_v62 = vadd.f32 %v9083_v40, %v3728_v24  ;;  %v3720_v5 = vadd.f32 %v3719_v17, %v10594_v35  ;;  %v3878_v3 = vsel %vm1830_vm1, %v10743_v22, -inf }
 0x51a   : > { %3855 = vmax.xlane.f32.xlu1 %v3854_v6  ;;  %v8263_v27 = vpop.f32.mrf.mxu0 }
 0x51b   : > { %v10717_v14 = vadd.f32 %v9083_v40, %v3720_v5  ;;  %v8254_v49 = vpop.f32.mrf.mxu1  ;;  %v3917_v25 = vsel %vm1830_vm1, %v10710_v62, -inf  ;;  %v3731_v17 = vadd.f32 %v8263_v27, %v10602_v51 }
 0x51c   : > { %3918 = vmax.xlane.f32.xlu0 %v3917_v25  ;;  %v3722_v36 = vpop.f32.mrf.mxu0  ;;  %v3655_v5 = vadd.f32 %v8254_v49, %v10589_v53  ;;  %v3875_v25 = vsel %vm1830_vm1, %v10715_v45, -inf }
 0x51d   : > { %v3646_v24 = vpop.f32.mrf.mxu1  ;;  %v3723_v52 = vadd.f32 %v3722_v36, %v10611_v54  ;;  %v3911_v46 = vsel %vm1830_vm1, %v10717_v14, -inf  ;;  %v10733_v48 = vadd.f32 %v9083_v40, %v3731_v17  ;;  %v3884_v36 = vsel %vm1830_vm1, %v10721_v29, -inf }
 0x51e   : > { %3912 = vmax.xlane.f32.xlu1 %v3911_v46  ;;  %v10738_v46 = vadd.f32 %v9084_v55, %v3655_v5  ;;  %v3647_v28 = vadd.f32 %v3646_v24, %v10594_v35 }
 0x51f   : > { %v10728_v6 = vadd.f32 %v9083_v40, %v3723_v52  ;;  %v8255_v13 = vpop.f32.mrf.mxu1  ;;  %v3920_v40 = vsel %vm1830_vm1, %v10733_v48, -inf }
 0x520   : > { %3876 = vmax.xlane.f32.xlu0 %v3875_v25  ;;  %v3905_v5 = vsel %vm1830_vm1, %v10738_v46, -inf  ;;  %v10752_v25 = vadd.f32 %v9084_v55, %v3647_v28 }
 0x521   : > { %v3649_v27 = vpop.f32.mrf.mxu1  ;;  %v3914_v49 = vsel %vm1830_vm1, %v10728_v6, -inf }
 0x522   : > { %3885 = vmax.xlane.f32.xlu1 %v3884_v36  ;;  %v3650_v52 = vadd.f32 %v3649_v27, %v10611_v54  ;;  %v3658_v27 = vadd.f32 %v8255_v13, %v10602_v51  ;;  %v3899_v36 = vsel %vm1830_vm1, %v10752_v25, -inf }
 0x524   : > { %3915 = vmax.xlane.f32.xlu0 %v3914_v49  ;;  %v10748_v17 = vadd.f32 %v9084_v55, %v3650_v52  ;;  %v10759_v44 = vadd.f32 %v9084_v55, %v3658_v27 }
 0x526   : > { %3921 = vmax.xlane.f32.xlu1 %v3920_v40  ;;  %v3902_v24 = vsel %vm1830_vm1, %v10748_v17, -inf  ;;  %v3908_v52 = vsel %vm1830_vm1, %v10759_v44, -inf }
 0x528   : > { %3906 = vmax.xlane.f32.xlu0 %v3905_v5  ;;  %v9085_v5 = vld [vmem:[%s10011_s16 + $0x7] ss:$0 sm:$0xff] }
 0x52a   : > { %3879 = vmax.xlane.f32.xlu1 %v3878_v3 }
 0x52b   : > { %v8270_v13 = vpop.f32.mrf.mxu1 }
 0x52c   : > { %3903 = vmax.xlane.f32.xlu0 %v3902_v24  ;;  %v3801_v55 = vadd.f32 %v8270_v13, %v10589_v53 }
 0x52d   : > { %v3792_v49 = vpop.f32.mrf.mxu1 }
 0x52e   : > { %3900 = vmax.xlane.f32.xlu1 %v3899_v36  ;;  %v10771_v27 = vadd.f32 %v9085_v5, %v3801_v55  ;;  %v3793_v24 = vadd.f32 %v3792_v49, %v10594_v35  ;;  %v10775_v36 = vpop.permute.xlu1 %4303 }
 0x52f   : > { %v8271_v28 = vpop.f32.mrf.mxu1 }
 0x530   : > { %13043 = vst [vmem:[#allocation83_spill] sm:$0xff] %v10771_v27  ;;  %v3804_v53 = vadd.f32 %v8271_v28, %v10602_v51 }
 0x531   : > { %v3795_v40 = vpop.f32.mrf.mxu1 }
 0x532   : > { %3909 = vmax.xlane.f32.xlu1 %v3908_v52  ;;  %v3796_v3 = vadd.f32 %v3795_v40, %v10611_v54  ;;  %v10786_v55 = vpop.permute.xlu1 %4366  ;;  %v10788_v54 = vadd.f32 %v9085_v5, %v3804_v53 }
 0x534   : > { %v10777_v52 = vadd.f32 %v9085_v5, %v3796_v3  ;;  %13046 = vst [vmem:[#allocation86_spill] sm:$0xff] %v10788_v54  ;;  %v3932_v49 = vsel %vm1830_vm1, %v10788_v54, -inf  ;;  %v10796_v3 = vpop.permute.xlu0 %4431 }
 0x536   : > { %13044 = vst [vmem:[#allocation84_spill] sm:$0xff] %v10777_v52  ;;  %v3926_v13 = vsel %vm1830_vm1, %v10777_v52, -inf  ;;  %v10794_v40 = vpop.permute.xlu1 %4429 }
 0x53a   : > { %v10798_v51 = vpop.permute.xlu1 %4494 }
 0x542   : > { %4557 = vrot.lane.b32.xlu0 %v12972_v1, %s9095_s28  ;;  %v3929_v1 = vsel %vm1830_vm1, %v10771_v27, -inf }
 0x543   : > { %4555 = vrot.lane.b32.xlu1 %v10360_v56, %s9095_s28  ;;  %v10781_v56 = vadd.f32 %v9085_v5, %v3793_v24  ;;  %v10800_v24 = vpop.permute.xlu1 %4492 }
 0x545   : > { %13045 = vst [vmem:[#allocation85_spill] sm:$0xff] %v10781_v56  ;;  %v3923_v35 = vsel %vm1830_vm1, %v10781_v56, -inf }
 0x561   : > { %3930 = vmax.xlane.f32.xlu0 %v3929_v1 }
 0x565   : > { %3927 = vmax.xlane.f32.xlu0 %v3926_v13 }
 0x567   : > { %3924 = vmax.xlane.f32.xlu1 %v3923_v35 }
 0x56b   : > { %3933 = vmax.xlane.f32.xlu1 %v3932_v49 }
 0x575   : > { %v3847_v28 = vpop.xlane.xlu0 %3846 }
 0x576   : > { %v3937_v5 = vsub.f32 %v10605_v16, %v3847_v28 }
 0x578   : > { %v3971_v49 = vmul.f32 1.442695, %v3937_v5 }
 0x579   : > { %v3841_v1 = vpop.xlane.xlu0 %3840 }
 0x57a   : > { %v3935_v53 = vsub.f32 %v10615_v15, %v3841_v1 }
 0x57b   : > { %v3844_v13 = vpop.xlane.xlu1 %3843  ;;  %4620 = vrot.lane.b32.xlu0 %v12992_v9, %s9095_s28 }
 0x57c   : > { %v3967_v35 = vmul.f32 1.442695, %v3935_v53  ;;  %v3936_v54 = vsub.f32 %v10625_v32, %v3844_v13  ;;  %4618 = vrot.lane.b32.xlu1 %v10433_v12, %s9095_s28 }
 0x57d   : > { %v3850_v56 = vpop.xlane.xlu0 %3849 }
 0x57e   : > { %v3969_v27 = vmul.f32 1.442695, %v3936_v54  ;;  %v3938_v52 = vsub.f32 %v10623_v2, %v3850_v56  ;;  %8694 = vpow2.f32 %v3967_v35 }
 0x580   : > { %8696 = vpow2.f32 %v3969_v27  ;;  %v3973_v16 = vmul.f32 1.442695, %v3938_v52 }
 0x581   : > { %8698 = vpow2.f32 %v3971_v49 }
 0x582   : > { %8700 = vpow2.f32 %v3973_v16 }
 0x585   : > { %v3871_v15 = vpop.xlane.xlu0 %3870 }
 0x586   : > { %v3945_v53 = vsub.f32 %v10641_v61, %v3871_v15 }
 0x589   : > { %v3874_v28 = vpop.xlane.xlu1 %3873  ;;  %v3865_v1 = vpop.xlane.xlu0 %3864 }
 0x58a   : > { %v3946_v9 = vsub.f32 %v10650_v7, %v3874_v28  ;;  %v3943_v32 = vsub.f32 %v10644_v43, %v3865_v1  ;;  %v3987_v7 = vmul.f32 1.442695, %v3945_v53  ;;  %v2591_v1 = vsel %vm1830_vm1, %v10220_v34, 0.0 }
 0x58b   : > { %v10813_v12 = vpop.eup %8694 }
 0x58c   : > { %v3989_v5 = vmul.f32 1.442695, %v3946_v9  ;;  %v3983_v2 = vmul.f32 1.442695, %v3943_v32 }
 0x58d   : > { %v10815_v54 = vpop.eup %8696  ;;  %v3868_v56 = vpop.xlane.xlu1 %3867 }
 0x58e   : > { %v10817_v27 = vpop.eup %8698  ;;  %v3944_v52 = vsub.f32 %v10656_v19, %v3868_v56  ;;  %v4159_v13 = vpack.c.bf16 %v10815_v54, %v10813_v12  ;;  %8702 = vpow2.f32 %v3989_v5  ;;  %v3859_v49 = vpop.xlane.xlu0 %3858 }
 0x58f   : > { %v10822_v35 = vpop.eup %8700  ;;  %8704 = vpow2.f32 %v3983_v2 }
 0x590   : > { %v3985_v43 = vmul.f32 1.442695, %v3944_v52  ;;  %8276 = vmatprep.mubr.msk.bf16.mxu0 %vm1830_vm1, %v4159_v13  ;;  %v4160_v61 = vpack.c.bf16 %v10822_v35, %v10817_v27 }
 0x592   : > { %8706 = vpow2.f32 %v3985_v43  ;;  %8277 = vmatmul.mubr.msk.bf16.vlgmr.msra.gmra.mxu0 %vm1830_vm1, %v4160_v61 }
 0x593   : > { %8708 = vpow2.f32 %v3987_v7  ;;  %8289 = vmatpush3.bf16.msra.mxu0 %v10524_v11  ;;  %v2594_v7 = vsel %vm1830_vm1, %v10223_v10, 0.0 }
 0x594   : > { %8290 = vmatprep.subr.bf16.mxu0 %v10775_v36 }
 0x595   : > { %v3895_v19 = vpop.xlane.xlu0 %3894 }
 0x596   : > { %v3953_v9 = vsub.f32 %v10670_v20, %v3895_v19 }
 0x597   : > { %8291 = vmatpush3.bf16.msra.mxu0 %v10775_v36  ;;  %v3889_v16 = vpop.xlane.xlu1 %3888  ;;  %v2597_v36 = vsel %vm1830_vm1, %v10225_v23, 0.0 }
 0x598   : > { %8304 = vmatprep.subr.bf16.mxu0 %v10796_v3  ;;  %v3951_v15 = vsub.f32 %v10675_v26, %v3889_v16  ;;  %v4003_v34 = vmul.f32 1.442695, %v3953_v9  ;;  %v2609_v9 = vsel %vm1830_vm1, %v10258_v59, 0.0 }
 0x599   : > { %v3853_v28 = vpop.xlane.xlu0 %3852 }
 0x59a   : > { %2592 = vadd.xlane.f32.xlu0 %v2591_v1  ;;  %v3999_v11 = vmul.f32 1.442695, %v3951_v15  ;;  %v3939_v56 = vsub.f32 %v10673_v31, %v3853_v28 }
 0x59b   : > { %v3862_v32 = vpop.xlane.xlu1 %3861  ;;  %v10836_v53 = vpop.eup %8702 }
 0x59c   : > { %v10840_v2 = vpop.eup %8704  ;;  %v3942_v20 = vsub.f32 %v10679_v30, %v3862_v32  ;;  %8710 = vpow2.f32 %v3999_v11  ;;  %v2603_v30 = vsel %vm1830_vm1, %v10250_v42, 0.0  ;;  %v3975_v16 = vmul.f32 1.442695, %v3939_v56 }
 0x59d   : > { %v3892_v5 = vpop.xlane.xlu0 %3891  ;;  %v2612_v56 = vsel %vm1830_vm1, %v10246_v8, 0.0  ;;  %v2618_v8 = vsel %vm1830_vm1, %v10309_v37, 0.0 }
 0x59e   : > { %v3952_v26 = vsub.f32 %v10686_v57, %v3892_v5  ;;  %2598 = vadd.xlane.f32.xlu0 %v2597_v36  ;;  %v3941_v57 = vsub.f32 %v10654_v47, %v3859_v49  ;;  %v2600_v47 = vsel %vm1830_vm1, %v10218_v63, 0.0  ;;  %v2606_v63 = vsel %vm1830_vm1, %v10255_v38, 0.0 }
 0x59f   : > { %v10844_v52 = vpop.eup %8706  ;;  %v3898_v13 = vpop.xlane.xlu1 %3897  ;;  %v2615_v5 = vsel %vm1830_vm1, %v10303_v60, 0.0 }
 0x5a0   : > { %v10849_v43 = vpop.eup %8708  ;;  %v4001_v61 = vmul.f32 1.442695, %v3952_v26  ;;  %v3954_v23 = vsub.f32 %v10691_v50, %v3898_v13  ;;  %2595 = vadd.xlane.f32.xlu1 %v2594_v7  ;;  %v4163_v31 = vpack.c.bf16 %v10844_v52, %v10840_v2  ;;  %v3981_v50 = vmul.f32 1.442695, %v3942_v20 }
 0x5a1   : > { %v10855_v19 = vpop.xlane.xlu0 %3882  ;;  %v4164_v10 = vpack.c.bf16 %v10836_v53, %v10849_v43  ;;  %v3979_v49 = vmul.f32 1.442695, %v3941_v57  ;;  %v2627_v57 = vsel %vm1830_vm1, %v10369_v21, 0.0 }
 0x5a2   : > { %8712 = vpow2.f32 %v4001_v61  ;;  %v4005_v15 = vmul.f32 1.442695, %v3954_v23  ;;  %2604 = vadd.xlane.f32.xlu0 %v2603_v30  ;;  %8292 = vmatprep.mubr.msk.bf16.mxu0 %vm1830_vm1, %v4163_v31  ;;  %v3949_v31 = vsub.f32 %v10696_v0, %v10855_v19  ;;  %v2624_v0 = vsel %vm1830_vm1, %v10299_v33, 0.0 }
 0x5a3   : > { %8714 = vpow2.f32 %v4003_v34  ;;  %v3856_v28 = vpop.xlane.xlu1 %3855  ;;  %8293 = vmatmul.mubr.msk.bf16.vlgmr.msra.gmra.mxu0 %vm1830_vm1, %v4164_v10 }
 0x5a4   : > { %8716 = vpow2.f32 %v4005_v15  ;;  %v3940_v42 = vsub.f32 %v10700_v18, %v3856_v28  ;;  %8305 = vmatpush3.bf16.msra.mxu0 %v10796_v3  ;;  %2601 = vadd.xlane.f32.xlu1 %v2600_v47  ;;  %v3995_v28 = vmul.f32 1.442695, %v3949_v31  ;;  %v13052_v31 = vld [vmem:[#allocation65_spill] sm:$0xff] }
 0x5a5   : > { %8306 = vmatprep.subr.bf16.mxu0 %v10794_v40  ;;  %v3919_v1 = vpop.xlane.xlu0 %3918  ;;  %8718 = vpow2.f32 %v3975_v16 }
 0x5a6   : > { %v3977_v32 = vmul.f32 1.442695, %v3940_v42  ;;  %2610 = vadd.xlane.f32.xlu0 %v2609_v9  ;;  %8720 = vpow2.f32 %v3981_v50  ;;  %v3961_v59 = vsub.f32 %v10710_v62, %v3919_v1  ;;  %v2633_v42 = vsel %vm1830_vm1, %v10375_v39, 0.0 }
 0x5a7   : > { %v3913_v11 = vpop.xlane.xlu1 %3912 }
 0x5a8   : > { %8722 = vpow2.f32 %v3977_v32  ;;  %8307 = vmatpush3.bf16.msra.mxu0 %v10794_v40  ;;  %2607 = vadd.xlane.f32.xlu1 %v2606_v63  ;;  %v3959_v18 = vsub.f32 %v10717_v14, %v3913_v11  ;;  %v2621_v40 = vsel %vm1830_vm1, %v10312_v4, 0.0  ;;  %v4019_v62 = vmul.f32 1.442695, %v3961_v59  ;;  %v13048_v59 = vld [vmem:[#allocation66_spill] sm:$0xff] }
 0x5a9   : > { %8724 = vpow2.f32 %v3979_v49  ;;  %v3877_v3 = vpop.xlane.xlu0 %3876  ;;  %v10881_v34 = vpop.eup %8710  ;;  %v2630_v11 = vsel %vm1830_vm1, %v10373_v41, 0.0 }
 0x5aa   : > { %2616 = vadd.xlane.f32.xlu0 %v2615_v5  ;;  %v4015_v38 = vmul.f32 1.442695, %v3959_v18  ;;  %v3947_v14 = vsub.f32 %v10715_v45, %v3877_v3  ;;  %v13047_v5 = vld [vmem:[#allocation59_spill] sm:$0xff] }
 0x5ab   : > { %v3886_v36 = vpop.xlane.xlu1 %3885 }
 0x5ac   : > { %2613 = vadd.xlane.f32.xlu1 %v2612_v56  ;;  %v3950_v13 = vsub.f32 %v10721_v29, %v3886_v36  ;;  %8726 = vpow2.f32 %v4015_v38  ;;  %v3991_v30 = vmul.f32 1.442695, %v3947_v14  ;;  %v2636_v36 = vsel %vm1830_vm1, %v13048_v59, 0.0  ;;  %v13049_v38 = vld [vmem:[#allocation35_spill] sm:$0xff] }
 0x5ad   : > { %v3916_v26 = vpop.xlane.xlu0 %3915 }
 0x5ae   : > { %v3960_v20 = vsub.f32 %v10728_v6, %v3916_v26  ;;  %2622 = vadd.xlane.f32.xlu0 %v2621_v40  ;;  %v3997_v16 = vmul.f32 1.442695, %v3950_v13 }
 0x5af   : > { %v10885_v60 = vpop.eup %8712  ;;  %v3922_v7 = vpop.xlane.xlu1 %3921 }
 0x5b0   : > { %v10890_v61 = vpop.eup %8714  ;;  %v4017_v23 = vmul.f32 1.442695, %v3960_v20  ;;  %v3962_v4 = vsub.f32 %v10733_v48, %v3922_v7  ;;  %2619 = vadd.xlane.f32.xlu1 %v2618_v8  ;;  %v4167_v45 = vpack.c.bf16 %v10885_v60, %v10881_v34 }
 0x5b1   : > { %v10895_v6 = vpop.eup %8716  ;;  %v3907_v29 = vpop.xlane.xlu0 %3906 }
 0x5b2   : > { %v4168_v37 = vpack.c.bf16 %v10895_v6, %v10890_v61  ;;  %8728 = vpow2.f32 %v4017_v23  ;;  %v4021_v48 = vmul.f32 1.442695, %v3962_v4  ;;  %2628 = vadd.xlane.f32.xlu0 %v2627_v57  ;;  %8308 = vmatprep.mubr.msk.bf16.mxu0 %vm1830_vm1, %v4167_v45  ;;  %v10904_v10 = vpop.eup %8718  ;;  %v3957_v9 = vsub.f32 %v10738_v46, %v3907_v29 }
 0x5b3   : > { %8730 = vpow2.f32 %v4019_v62  ;;  %v3880_v15 = vpop.xlane.xlu1 %3879  ;;  %v10908_v19 = vpop.eup %8720  ;;  %v2639_v46 = vsel %vm1830_vm1, %v10320_v58, 0.0  ;;  %v2645_v58 = vsel %vm1830_vm1, %v13049_v38, 0.0  ;;  %v13050_v62 = vld [vmem:[#allocation34_spill] sm:$0xff]  ;;  %v2648_v29 = vsel %vm1830_vm1, %v13052_v31, 0.0 }
 0x5b4   : > { %8732 = vpow2.f32 %v4021_v48  ;;  %v3948_v21 = vsub.f32 %v10743_v22, %v3880_v15  ;;  %2625 = vadd.xlane.f32.xlu1 %v2624_v0  ;;  %8309 = vmatmul.mubr.msk.bf16.vlgmr.msra.gmra.mxu0 %vm1830_vm1, %v4168_v37  ;;  %v4011_v41 = vmul.f32 1.442695, %v3957_v9  ;;  %v13054_v0 = vld [vmem:[#allocation41_spill] sm:$0xff] }
 0x5b5   : > { %v10912_v50 = vpop.eup %8722  ;;  %v3904_v47 = vpop.xlane.xlu0 %3903  ;;  %8734 = vpow2.f32 %v3991_v30  ;;  %v13053_v30 = vld [vmem:[#allocation67_spill] sm:$0xff] }
 0x5b6   : > { %v10916_v49 = vpop.eup %8724  ;;  %v3993_v1 = vmul.f32 1.442695, %v3948_v21  ;;  %v3956_v33 = vsub.f32 %v10748_v17, %v3904_v47  ;;  %2634 = vadd.xlane.f32.xlu0 %v2633_v42  ;;  %v4161_v22 = vpack.c.bf16 %v10912_v50, %v10904_v10  ;;  %8736 = vpow2.f32 %v3997_v16 }
 0x5b7   : > { %v3901_v32 = vpop.xlane.xlu1 %3900  ;;  %v4162_v39 = vpack.c.bf16 %v10908_v19, %v10916_v49  ;;  %v2657_v48 = vsel %vm1830_vm1, %v13053_v30, 0.0  ;;  %v2654_v21 = vsel %vm1830_vm1, %v13054_v0, 0.0  ;;  %v13062_v30 = vld [vmem:[#allocation42_spill] sm:$0xff] }
 0x5b8   : > { %8738 = vpow2.f32 %v3993_v1  ;;  %v4009_v63 = vmul.f32 1.442695, %v3956_v33  ;;  %v3955_v18 = vsub.f32 %v10752_v25, %v3901_v32  ;;  %2631 = vadd.xlane.f32.xlu1 %v2630_v11  ;;  %8284 = vmatprep.mubr.msk.bf16.mxu1 %vm1830_vm1, %v4161_v22  ;;  %v4037_v1 = vsel %vm1830_vm1, %v10817_v27, 0.0  ;;  %v13055_v22 = vld [vmem:[#allocation69_spill] sm:$0xff] }
 0x5b9   : > { %8740 = vpow2.f32 %v3995_v28  ;;  %8285 = vmatmul.mubr.msk.bf16.vlgmr.msra.gmra.mxu1 %vm1830_vm1, %v4162_v39  ;;  %v4558_v17 = vpop.permute.xlu0 %4557  ;;  %v10938_v26 = vpop.eup %8726  ;;  %v2660_v9 = vsel %vm1830_vm1, %v13055_v22, 0.0  ;;  %v4031_v27 = vsel %vm1830_vm1, %v10813_v12, 0.0  ;;  %v4040_v39 = vsel %vm1830_vm1, %v10822_v35, 0.0 }
 0x5ba   : > { %v4007_v3 = vmul.f32 1.442695, %v3955_v18  ;;  %8297 = vmatpush3.bf16.msra.mxu1 %v13047_v5  ;;  %2640 = vadd.xlane.f32.xlu0 %v2639_v46  ;;  %8742 = vpow2.f32 %v4009_v63  ;;  %v4034_v63 = vsel %vm1830_vm1, %v10815_v54, 0.0  ;;  %v4064_v18 = vsel %vm1830_vm1, %v10836_v53, 0.0  ;;  %v13057_v46 = vld [vmem:[#allocation55_spill] sm:$0xff] }
 0x5bb   : > { %8298 = vmatprep.subr.bf16.mxu1 %v10786_v55  ;;  %8320 = vmatprep.subr.bf16.mxu0 %v4558_v17  ;;  %v3910_v25 = vpop.xlane.xlu1 %3909  ;;  %v4058_v12 = vsel %vm1830_vm1, %v10844_v52, 0.0  ;;  %v4055_v35 = vsel %vm1830_vm1, %v10840_v2, 0.0  ;;  %v4052_v54 = vsel %vm1830_vm1, %v10908_v19, 0.0  ;;  %v4049_v53 = vsel %vm1830_vm1, %v10916_v49, 0.0 }
 0x5bc   : > { %8744 = vpow2.f32 %v4007_v3  ;;  %v3958_v56 = vsub.f32 %v10759_v44, %v3910_v25  ;;  %8321 = vmatpush3.bf16.msra.mxu0 %v4558_v17  ;;  %2637 = vadd.xlane.f32.xlu1 %v2636_v36  ;;  %v2642_v44 = vsel %vm1830_vm1, %v13050_v62, 0.0  ;;  %v4085_v52 = vsel %vm1830_vm1, %v10890_v61, 0.0  ;;  %v13056_v17 = vld [vmem:[#allocation56_spill] sm:$0xff] }
 0x5bd   : > { %8746 = vpow2.f32 %v4011_v41  ;;  %v4046_v2 = vsel %vm1830_vm1, %v10912_v50, 0.0  ;;  %v4043_v19 = vsel %vm1830_vm1, %v10904_v10, 0.0  ;;  %v2666_v49 = vsel %vm1830_vm1, %v13056_v17, 0.0  ;;  %v8553_v10 = vld [vmem:[%s12760_s8 + $0x10] sm:$0xff]  }
 0x5be   : > { %v4013_v40 = vmul.f32 1.442695, %v3958_v56  ;;  %8299 = vmatpush3.bf16.msra.mxu1 %v10786_v55  ;;  %2646 = vadd.xlane.f32.xlu0 %v2645_v58  ;;  %v13051_v55 = vld [vmem:[#allocation68_spill] sm:$0xff]  ;;  %v2663_v61 = vsel %vm1830_vm1, %v13057_v46, 0.0  ;;  %v4082_v50 = vsel %vm1830_vm1, %v10885_v60, 0.0  ;;  %v4079_v5 = vsel %vm1830_vm1, %v10881_v34, 0.0 }
 0x5bf   : > { %v10941_v14 = vpop.eup %8728  ;;  %8312 = vmatprep.subr.bf16.mxu1 %v10798_v51  ;;  %v4556_v20 = vpop.permute.xlu1 %4555  ;;  %v2651_v23 = vsel %vm1830_vm1, %v13051_v55, 0.0  ;;  %v13058_v25 = vld [vmem:[#allocation84_spill] sm:$0xff]  ;;  %v13059_v56 = vld [vmem:[#allocation83_spill] sm:$0xff] }
 0x5c0   : > { %v10946_v13 = vpop.eup %8730  ;;  %8748 = vpow2.f32 %v4013_v40  ;;  %2643 = vadd.xlane.f32.xlu1 %v2642_v44  ;;  %8322 = vmatprep.subr.bf16.mxu0 %v4556_v20  ;;  %v4171_v7 = vpack.c.bf16 %v10941_v14, %v10938_v26  ;;  %v13060_v40 = vld [vmem:[#allocation85_spill] sm:$0xff] }
 0x5c1   : > { %v10950_v8 = vpop.eup %8732  ;;  %8323 = vmatpush3.bf16.msra.mxu0 %v4556_v20 }
 0x5c2   : > { %v4172_v4 = vpack.c.bf16 %v10950_v8, %v10946_v13  ;;  %2652 = vadd.xlane.f32.xlu0 %v2651_v23  ;;  %8324 = vmatprep.mubr.msk.bf16.mxu0 %vm1830_vm1, %v4171_v7  ;;  %v10957_v45 = vpop.eup %8734 }
 0x5c3   : > { %v10961_v57 = vpop.eup %8736 }
 0x5c4   : > { %2649 = vadd.xlane.f32.xlu1 %v2648_v29  ;;  %8325 = vmatmul.mubr.msk.bf16.vlgmr.msra.gmra.mxu0 %vm1830_vm1, %v4172_v4  ;;  %v4076_v36 = vsel %vm1830_vm1, %v10961_v57, 0.0  ;;  %v13061_v4 = vld [vmem:[#allocation86_spill] sm:$0xff]  ;;  %v4067_v29 = vsel %vm1830_vm1, %v10957_v45, 0.0 }
 0x5c5   : > { %v10964_v37 = vpop.eup %8738 }
 0x5c6   : > { %v10968_v16 = vpop.eup %8740  ;;  %2658 = vadd.xlane.f32.xlu0 %v2657_v48  ;;  %v4165_v15 = vpack.c.bf16 %v10964_v37, %v10957_v45  ;;  %v4070_v7 = vsel %vm1830_vm1, %v10964_v37, 0.0  ;;  %v2672_v48 = vsel %vm1830_vm1, %v13062_v30, 0.0  ;;  %v8550_v37 = vld [vmem:[%s12760_s8 + $0x8] sm:$0xff]   ;;  %v4106_v45 = vsel %vm1830_vm1, %v10941_v14, 0.0 }
 0x5c7   : > { %v4166_v28 = vpack.c.bf16 %v10961_v57, %v10968_v16  ;;  %v10976_v47 = vpop.eup %8742  ;;  %v4073_v62 = vsel %vm1830_vm1, %v10968_v16, 0.0 }
 0x5c8   : > { %2655 = vadd.xlane.f32.xlu1 %v2654_v21  ;;  %8300 = vmatprep.mubr.msk.bf16.mxu1 %vm1830_vm1, %v4165_v15  ;;  %v13063_v15 = vld [vmem:[#allocation36_spill] sm:$0xff]  ;;  %v4103_v21 = vsel %vm1830_vm1, %v10938_v26, 0.0 }
 0x5c9   : > { %v10979_v42 = vpop.eup %8744  ;;  %8301 = vmatmul.mubr.msk.bf16.vlgmr.msra.gmra.mxu1 %vm1830_vm1, %v4166_v28  ;;  %v2669_v0 = vsel %vm1830_vm1, %v13063_v15, 0.0 }
 0x5ca   : > { %8313 = vmatpush3.bf16.msra.mxu1 %v10798_v51  ;;  %4038 = vadd.xlane.f32.xlu0 %v4037_v1  ;;  %v4169_v33 = vpack.c.bf16 %v10976_v47, %v10979_v42  ;;  %v10990_v32 = vpop.eup %8746  ;;  %v4091_v26 = vsel %vm1830_vm1, %v10979_v42, 0.0 }
 0x5cb   : > { %8314 = vmatprep.subr.bf16.mxu1 %v10800_v24 }
 0x5cc   : > { %2661 = vadd.xlane.f32.xlu1 %v2660_v9  ;;  %8316 = vmatprep.mubr.msk.bf16.mxu1 %vm1830_vm1, %v4169_v33  ;;  %v4097_v33 = vsel %vm1830_vm1, %v10990_v32, 0.0  ;;  %v4094_v9 = vsel %vm1830_vm1, %v10976_v47, 0.0  ;;  %v4109_v47 = vsel %vm1830_vm1, %v10946_v13, 0.0 }
 0x5cd   : > { %v10993_v11 = vpop.eup %8748 }
 0x5ce   : > { %8315 = vmatpush3.bf16.msra.mxu1 %v10800_v24  ;;  %4032 = vadd.xlane.f32.xlu0 %v4031_v27  ;;  %v4170_v51 = vpack.c.bf16 %v10993_v11, %v10990_v32  ;;  %v4061_v24 = vsel %vm1830_vm1, %v10849_v43, 0.0  ;;  %v4088_v43 = vsel %vm1830_vm1, %v10895_v6, 0.0  ;;  %v8552_v6 = vld [vmem:[%s12760_s8 + $0x18] sm:$0xff]   ;;  %v4100_v28 = vsel %vm1830_vm1, %v10993_v11, 0.0  ;;  %v8551_v32 = vld [vmem:[%s12760_s8] sm:$0xff]  }
 0x5cf   : > { %8336 = vmatprep.subr.bf16.mxu0 %v8552_v6  ;;  %v4112_v11 = vsel %vm1830_vm1, %v10950_v8, 0.0 }
 0x5d0   : > { %4041 = vadd.xlane.f32.xlu1 %v4040_v39  ;;  %8337 = vmatpush3.bf16.msra.mxu0 %v8552_v6 }
 0x5d1   : > { %8317 = vmatmul.mubr.msk.bf16.vlgmr.msra.gmra.mxu1 %vm1830_vm1, %v4170_v51  ;;  %8338 = vmatprep.subr.bf16.mxu0 %v8553_v10 }
 0x5d2   : > { %4035 = vadd.xlane.f32.xlu0 %v4034_v63  ;;  %v13064_v63 = vld [vmem:[#allocation70_spill] sm:$0xff] }
 0x5d3   : > { %v2678_v42 = vsel %vm1830_vm1, %v13064_v63, 0.0 }
 0x5d4   : > { %4065 = vadd.xlane.f32.xlu1 %v4064_v18  ;;  %8339 = vmatpush3.bf16.msra.mxu0 %v8553_v10  ;;  %v13065_v18 = vld [vmem:[#allocation44_spill] sm:$0xff] }
 0x5d5   : > { %v2675_v8 = vsel %vm1830_vm1, %v13065_v18, 0.0 }
 0x5d6   : > { %4062 = vadd.xlane.f32.xlu0 %v4061_v24  ;;  %v13066_v24 = vld [vmem:[#allocation60_spill] sm:$0xff] }
 0x5d8   : > { %4059 = vadd.xlane.f32.xlu1 %v4058_v12  ;;  %v2684_v12 = vsel %vm1830_vm1, %v13066_v24, 0.0 }
 0x5da   : > { %4056 = vadd.xlane.f32.xlu0 %v4055_v35  ;;  %v13067_v35 = vld [vmem:[#allocation37_spill] sm:$0xff] }
 0x5dc   : > { %4053 = vadd.xlane.f32.xlu1 %v4052_v54  ;;  %v2681_v54 = vsel %vm1830_vm1, %v13067_v35, 0.0 }
 0x5de   : > { %4050 = vadd.xlane.f32.xlu0 %v4049_v53 }
 0x5e0   : > { %4089 = vadd.xlane.f32.xlu1 %v4088_v43 }
 0x5e2   : > { %4086 = vadd.xlane.f32.xlu0 %v4085_v52 }
 0x5e4   : > { %4047 = vadd.xlane.f32.xlu1 %v4046_v2 }
 0x5e6   : > { %4044 = vadd.xlane.f32.xlu0 %v4043_v19 }
 0x5e8   : > { %2667 = vadd.xlane.f32.xlu1 %v2666_v49 }
 0x5ea   : > { %2664 = vadd.xlane.f32.xlu0 %v2663_v61  ;;  %v3931_v3 = vpop.xlane.xlu0 %3930 }
 0x5eb   : > { %v3965_v38 = vsub.f32 %v13059_v56, %v3931_v3 }
 0x5ec   : > { %4083 = vadd.xlane.f32.xlu1 %v4082_v50 }
 0x5ed   : > { %v4027_v55 = vmul.f32 1.442695, %v3965_v38 }
 0x5ee   : > { %4080 = vadd.xlane.f32.xlu0 %v4079_v5  ;;  %v3928_v41 = vpop.xlane.xlu0 %3927 }
 0x5ef   : > { %v3964_v59 = vsub.f32 %v13058_v25, %v3928_v41  ;;  %v13068_v25 = vld [vmem:[#allocation43_spill] sm:$0xff] }
 0x5f0   : > { %v3925_v60 = vpop.xlane.xlu1 %3924  ;;  %4077 = vadd.xlane.f32.xlu1 %v4076_v36  ;;  %v13069_v36 = vld [vmem:[#allocation39_spill] sm:$0xff] }
 0x5f1   : > { %v4025_v58 = vmul.f32 1.442695, %v3964_v59  ;;  %v3963_v20 = vsub.f32 %v13060_v40, %v3925_v60 }
 0x5f2   : > { %4074 = vadd.xlane.f32.xlu0 %v4073_v62  ;;  %v4621_v34 = vpop.permute.xlu0 %4620  ;;  %v13070_v62 = vld [vmem:[#allocation61_spill] sm:$0xff] }
 0x5f3   : > { %v4023_v44 = vmul.f32 1.442695, %v3963_v20  ;;  %8328 = vmatprep.subr.bf16.mxu1 %v4621_v34  ;;  %8750 = vpow2.f32 %v4025_v58 }
 0x5f4   : > { %v3934_v23 = vpop.xlane.xlu1 %3933  ;;  %4071 = vadd.xlane.f32.xlu1 %v4070_v7  ;;  %8329 = vmatpush3.bf16.msra.mxu1 %v4621_v34 }
 0x5f5   : > { %8752 = vpow2.f32 %v4023_v44  ;;  %v3966_v31 = vsub.f32 %v13061_v4, %v3934_v23  ;;  %v13071_v44 = vld [vmem:[#allocation38_spill] sm:$0xff] }
 0x5f6   : > { %4068 = vadd.xlane.f32.xlu0 %v4067_v29  ;;  %8754 = vpow2.f32 %v4027_v55 }
 0x5f7   : > { %v4029_v57 = vmul.f32 1.442695, %v3966_v31 }
 0x5f8   : > { %v4619_v16 = vpop.permute.xlu1 %4618  ;;  %2673 = vadd.xlane.f32.xlu1 %v2672_v48  ;;  %v13073_v48 = vld [vmem:[#allocation49_spill] sm:$0xff] }
 0x5f9   : > { %8756 = vpow2.f32 %v4029_v57  ;;  %8330 = vmatprep.subr.bf16.mxu1 %v4619_v16  ;;  %v13072_v57 = vld [vmem:[#allocation63_spill] sm:$0xff] }
 0x5fa   : > { %2670 = vadd.xlane.f32.xlu0 %v2669_v0  ;;  %8331 = vmatpush3.bf16.msra.mxu1 %v4619_v16 }
 0x5fb   : > { %8372 = vmatprep.subr.bf16.mxu1 %v8550_v37 }
 0x5fc   : > { %4107 = vadd.xlane.f32.xlu1 %v4106_v45 }
 0x5fe   : > { %4104 = vadd.xlane.f32.xlu0 %v4103_v21 }
 0x600   : > { %4101 = vadd.xlane.f32.xlu1 %v4100_v28  ;;  %v8751_v1 = vpop.eup %8750  ;;  %v13074_v28 = vld [vmem:[#allocation40_spill] sm:$0xff] }
 0x601   : > { %v4118_v13 = vsel %vm1830_vm1, %v8751_v1, 0.0 }
 0x602   : > { %v8753_v22 = vpop.eup %8752  ;;  %4098 = vadd.xlane.f32.xlu0 %v4097_v33  ;;  %v13075_v33 = vld [vmem:[#allocation45_spill] sm:$0xff] }
 0x603   : > { %v4173_v14 = vpack.c.bf16 %v8751_v1, %v8753_v22  ;;  %v8755_v27 = vpop.eup %8754  ;;  %v4115_v53 = vsel %vm1830_vm1, %v8753_v22, 0.0 }
 0x604   : > { %4095 = vadd.xlane.f32.xlu1 %v4094_v9  ;;  %v4121_v52 = vsel %vm1830_vm1, %v8755_v27, 0.0 }
 0x605   : > { %8332 = vmatprep.mubr.msk.bf16.mxu1 %vm1830_vm1, %v4173_v14 }
 0x606   : > { %v8757_v51 = vpop.eup %8756  ;;  %4092 = vadd.xlane.f32.xlu0 %v4091_v26 }
 0x607   : > { %v4174_v39 = vpack.c.bf16 %v8757_v51, %v8755_v27  ;;  %v4124_v43 = vsel %vm1830_vm1, %v8757_v51, 0.0 }
 0x608   : > { %4113 = vadd.xlane.f32.xlu1 %v4112_v11  ;;  %v13076_v11 = vld [vmem:[#allocation57_spill] sm:$0xff] }
 0x609   : > { %8333 = vmatmul.mubr.msk.bf16.vlgmr.msra.gmra.mxu1 %vm1830_vm1, %v4174_v39 }
 0x60a   : > { %4110 = vadd.xlane.f32.xlu0 %v4109_v47  ;;  %8373 = vmatpush3.bf16.msra.mxu1 %v8550_v37 }
 0x60b   : > { %8374 = vmatprep.subr.bf16.mxu1 %v8551_v32 }
 0x60c   : > { %2679 = vadd.xlane.f32.xlu1 %v2678_v42 }
 0x60e   : > { %2676 = vadd.xlane.f32.xlu0 %v2675_v8  ;;  %8375 = vmatpush3.bf16.msra.mxu1 %v8551_v32  ;;  %v13077_v32 = vld [vmem:[#allocation47_spill] sm:$0xff] }
 0x610   : > { %2685 = vadd.xlane.f32.xlu1 %v2684_v12  ;;  %v13078_v12 = vld [vmem:[#allocation46_spill] sm:$0xff] }
 0x612   : > { %2682 = vadd.xlane.f32.xlu0 %v2681_v54  ;;  %v13079_v54 = vld [vmem:[#allocation58_spill] sm:$0xff] }
 0x614   : > { %4119 = vadd.xlane.f32.xlu1 %v4118_v13 }
 0x616   : > { %4116 = vadd.xlane.f32.xlu0 %v4115_v53 }
 0x618   : > { %4125 = vadd.xlane.f32.xlu1 %v4124_v43 }
 0x61a   : > { %4122 = vadd.xlane.f32.xlu0 %v4121_v52 }
 0x623   : > { %v2593_v2 = vpop.xlane.xlu0 %2592 }
 0x624   : > { %8758 = vrcp.f32 %v2593_v2 }
 0x627   : > { %v2599_v19 = vpop.xlane.xlu0 %2598 }
 0x629   : > { %v2596_v17 = vpop.xlane.xlu1 %2595 }
 0x62a   : > { %8760 = vrcp.f32 %v2596_v17  ;;  %v13080_v17 = vld [vmem:[#allocation51_spill] sm:$0xff] }
 0x62b   : > { %v2605_v49 = vpop.xlane.xlu0 %2604  ;;  %8762 = vrcp.f32 %v2599_v19 }
 0x62d   : > { %v2602_v6 = vpop.xlane.xlu1 %2601 }
 0x62e   : > { %8764 = vrcp.f32 %v2602_v6  ;;  %v13081_v6 = vld [vmem:[#allocation72_spill] sm:$0xff] }
 0x62f   : > { %v2611_v46 = vpop.xlane.xlu0 %2610  ;;  %8766 = vrcp.f32 %v2605_v49 }
 0x631   : > { %v2608_v61 = vpop.xlane.xlu1 %2607  ;;  %v8759_v50 = vpop.eup %8758 }
 0x632   : > { %8768 = vrcp.f32 %v2608_v61  ;;  %v3175_v59 = vmul.f32 %v8759_v50, %v13068_v25 }
 0x633   : > { %v2617_v3 = vpop.xlane.xlu0 %2616  ;;  %8770 = vrcp.f32 %v2611_v46 }
 0x635   : > { %v2614_v10 = vpop.xlane.xlu1 %2613 }
 0x636   : > { %8772 = vrcp.f32 %v2614_v10 }
 0x637   : > { %v8761_v5 = vpop.eup %8760  ;;  %v2623_v41 = vpop.xlane.xlu0 %2622  ;;  %8774 = vrcp.f32 %v2617_v3 }
 0x638   : > { %v3176_v56 = vmul.f32 %v8761_v5, %v13069_v36  ;;  %v8763_v38 = vpop.eup %8762 }
 0x639   : > { %v2620_v60 = vpop.xlane.xlu1 %2619  ;;  %v3177_v34 = vmul.f32 %v8763_v38, %v13070_v62 }
 0x63a   : > { %8776 = vrcp.f32 %v2620_v60  ;;  %v3207_v58 = vpack.c.bf16 %v3176_v56, %v3175_v59  ;;  %v13083_v59 = vld [vmem:[#allocation53_spill] sm:$0xff] }
 0x63b   : > { %v8765_v40 = vpop.eup %8764  ;;  %v2629_v20 = vpop.xlane.xlu0 %2628  ;;  %8778 = vrcp.f32 %v2623_v41  ;;  %v13082_v41 = vld [vmem:[#allocation62_spill] sm:$0xff] }
 0x63c   : > { %8376 = vmatprep.mubr.msk.bf16.mxu1 %vm1830_vm1, %v3207_v58  ;;  %v3178_v7 = vmul.f32 %v8765_v40, %v13071_v44  ;;  %v8767_v55 = vpop.eup %8766 }
 0x63d   : > { %v2626_v23 = vpop.xlane.xlu1 %2625  ;;  %v3179_v30 = vmul.f32 %v8767_v55, %v13072_v57 }
 0x63e   : > { %8780 = vrcp.f32 %v2626_v23  ;;  %v3208_v4 = vpack.c.bf16 %v3178_v7, %v3177_v34  ;;  %v13085_v34 = vld [vmem:[#allocation50_spill] sm:$0xff] }
 0x63f   : > { %v8769_v31 = vpop.eup %8768  ;;  %v2635_v29 = vpop.xlane.xlu0 %2634  ;;  %8782 = vrcp.f32 %v2629_v20  ;;  %v13084_v20 = vld [vmem:[#allocation52_spill] sm:$0xff] }
 0x640   : > { %8377 = vmatmul.mubr.msk.bf16.vlgmr.msra.gmra.mxu1 %vm1830_vm1, %v3208_v4  ;;  %v3180_v37 = vmul.f32 %v8769_v31, %v13073_v48  ;;  %v8771_v16 = vpop.eup %8770 }
 0x641   : > { %v2632_v15 = vpop.xlane.xlu1 %2631  ;;  %v3181_v1 = vmul.f32 %v8771_v16, %v13074_v28  ;;  %v13088_v28 = vld [vmem:[#allocation75_spill] sm:$0xff] }
 0x642   : > { %8784 = vrcp.f32 %v2632_v15  ;;  %v3209_v0 = vpack.c.bf16 %v3180_v37, %v3179_v30  ;;  %v13087_v30 = vld [vmem:[#allocation64_spill] sm:$0xff] }
 0x643   : > { %v8773_v45 = vpop.eup %8772  ;;  %v2641_v21 = vpop.xlane.xlu0 %2640  ;;  %8786 = vrcp.f32 %v2635_v29  ;;  %v13086_v29 = vld [vmem:[#allocation48_spill] sm:$0xff] }
 0x644   : > { %8380 = vmatprep.mubr.msk.bf16.mxu1 %vm1830_vm1, %v3209_v0  ;;  %v3182_v22 = vmul.f32 %v8773_v45, %v13075_v33  ;;  %v8775_v9 = vpop.eup %8774  ;;  %v13089_v33 = vld [vmem:[#allocation78_spill] sm:$0xff] }
 0x645   : > { %v2638_v14 = vpop.xlane.xlu1 %2637  ;;  %v3183_v39 = vmul.f32 %v8775_v9, %v13076_v11 }
 0x646   : > { %8788 = vrcp.f32 %v2638_v14  ;;  %v3210_v27 = vpack.c.bf16 %v3182_v22, %v3181_v1 }
 0x647   : > { %v8777_v26 = vpop.eup %8776  ;;  %v2647_v51 = vpop.xlane.xlu0 %2646  ;;  %8790 = vrcp.f32 %v2641_v21 }
 0x648   : > { %8381 = vmatmul.mubr.msk.bf16.gmra.mxu1 %vm1830_vm1, %v3210_v27  ;;  %v3184_v47 = vmul.f32 %v8777_v26, %v13077_v32  ;;  %v8779_v63 = vpop.eup %8778 }
 0x649   : > { %v2644_v42 = vpop.xlane.xlu1 %2643  ;;  %v3185_v35 = vmul.f32 %v8779_v63, %v13078_v12 }
 0x64a   : > { %8792 = vrcp.f32 %v2644_v42  ;;  %v3211_v18 = vpack.c.bf16 %v3184_v47, %v3183_v39  ;;  %v13090_v39 = vld [vmem:[#allocation73_spill] sm:$0xff] }
 0x64b   : > { %v8781_v8 = vpop.eup %8780  ;;  %v2653_v24 = vpop.xlane.xlu0 %2652  ;;  %8794 = vrcp.f32 %v2647_v51  ;;  %v13091_v47 = vld [vmem:[#allocation77_spill] sm:$0xff] }
 0x64c   : > { %8384 = vmatprep.mubr.msk.bf16.mxu1 %vm1830_vm1, %v3211_v18  ;;  %v3186_v13 = vmul.f32 %v8781_v8, %v13079_v54  ;;  %v8783_v53 = vpop.eup %8782 }
 0x64d   : > { %v2650_v43 = vpop.xlane.xlu1 %2649  ;;  %v3187_v49 = vmul.f32 %v8783_v53, %v13080_v17 }
 0x64e   : > { %8796 = vrcp.f32 %v2650_v43  ;;  %v3212_v52 = vpack.c.bf16 %v3186_v13, %v3185_v35 }
 0x64f   : > { %v8785_v2 = vpop.eup %8784  ;;  %v2659_v19 = vpop.xlane.xlu0 %2658  ;;  %8798 = vrcp.f32 %v2653_v24 }
 0x650   : > { %8385 = vmatmul.mubr.msk.bf16.gmra.mxu1 %vm1830_vm1, %v3212_v52  ;;  %v3188_v46 = vmul.f32 %v8785_v2, %v13081_v6  ;;  %v8787_v61 = vpop.eup %8786 }
 0x651   : > { %v2656_v3 = vpop.xlane.xlu1 %2655  ;;  %v3189_v25 = vmul.f32 %v8787_v61, %v13082_v41 }
 0x652   : > { %8800 = vrcp.f32 %v2656_v3  ;;  %v3213_v50 = vpack.c.bf16 %v3188_v46, %v3187_v49  ;;  %v8278_v16 = vpop.f32.mrf.mxu0 }
 0x653   : > { %v8789_v10 = vpop.eup %8788  ;;  %v4039_v5 = vpop.xlane.xlu0 %4038  ;;  %8802 = vrcp.f32 %v2659_v19 }
 0x654   : > { %8388 = vmatprep.mubr.msk.bf16.mxu1 %vm1830_vm1, %v3213_v50  ;;  %v3190_v36 = vmul.f32 %v8789_v10, %v13083_v59  ;;  %v8791_v56 = vpop.eup %8790  ;;  %v4223_v14 = vpop.f32.mrf.mxu0 }
 0x655   : > { %v2662_v38 = vpop.xlane.xlu1 %2661  ;;  %v3191_v62 = vmul.f32 %v8791_v56, %v13084_v20 }
 0x656   : > { %8804 = vrcp.f32 %v2662_v38  ;;  %v3214_v60 = vpack.c.bf16 %v3190_v36, %v3189_v25  ;;  %v8279_v42 = vpop.f32.mrf.mxu0 }
 0x657   : > { %v8793_v58 = vpop.eup %8792  ;;  %v4033_v40 = vpop.xlane.xlu0 %4032 }
 0x658   : > { %8389 = vmatmul.mubr.msk.bf16.gmra.mxu1 %vm1830_vm1, %v3214_v60  ;;  %v3192_v44 = vmul.f32 %v8793_v58, %v13085_v34  ;;  %v8795_v7 = vpop.eup %8794  ;;  %8806 = vrcp.f32 %v4033_v40  ;;  %v4226_v53 = vpop.f32.mrf.mxu0 }
 0x659   : > { %v4042_v55 = vpop.xlane.xlu1 %4041  ;;  %v3193_v57 = vmul.f32 %v8795_v7, %v13086_v29 }
 0x65a   : > { %8808 = vrcp.f32 %v4042_v55  ;;  %v3215_v23 = vpack.c.bf16 %v3192_v44, %v3191_v62 }
 0x65b   : > { %v8797_v4 = vpop.eup %8796  ;;  %8810 = vrcp.f32 %v4039_v5  ;;  %v4036_v31 = vpop.xlane.xlu0 %4035 }
 0x65c   : > { %8812 = vrcp.f32 %v4036_v31  ;;  %8392 = vmatprep.mubr.msk.bf16.mxu1 %vm1830_vm1, %v3215_v23  ;;  %v3194_v48 = vmul.f32 %v8797_v4, %v13087_v30  ;;  %v8799_v37 = vpop.eup %8798 }
 0x65d   : > { %v4066_v15 = vpop.xlane.xlu1 %4065  ;;  %v3195_v1 = vmul.f32 %v8799_v37, %v13088_v28 }
 0x65e   : > { %v3216_v0 = vpack.c.bf16 %v3194_v48, %v3193_v57 }
 0x65f   : > { %v8801_v45 = vpop.eup %8800  ;;  %v4063_v21 = vpop.xlane.xlu0 %4062 }
 0x660   : > { %8393 = vmatmul.mubr.msk.bf16.gmra.mxu1 %vm1830_vm1, %v3216_v0  ;;  %v3196_v22 = vmul.f32 %v8801_v45, %v13089_v33  ;;  %v8803_v9 = vpop.eup %8802 }
 0x661   : > { %v4060_v27 = vpop.xlane.xlu1 %4059  ;;  %v3197_v32 = vmul.f32 %v8803_v9, %v13090_v39 }
 0x662   : > { %v3217_v26 = vpack.c.bf16 %v3196_v22, %v3195_v1  ;;  %8814 = vrcp.f32 %v4060_v27  ;;  %v13092_v1 = vld [vmem:[#allocation71_spill] sm:$0xff]  ;;  %v13093_v22 = vld [vmem:[#allocation76_spill] sm:$0xff] }
 0x663   : > { %v8805_v51 = vpop.eup %8804  ;;  %v4057_v11 = vpop.xlane.xlu0 %4056 }
 0x664   : > { %8396 = vmatprep.mubr.msk.bf16.mxu1 %vm1830_vm1, %v3217_v26  ;;  %v3198_v63 = vmul.f32 %v8805_v51, %v13091_v47  ;;  %8816 = vrcp.f32 %v4057_v11  ;;  %v8294_v5 = vpop.f32.mrf.mxu0 }
 0x665   : > { %v4054_v18 = vpop.xlane.xlu1 %4053  ;;  %v8807_v8 = vpop.eup %8806 }
 0x666   : > { %v3218_v24 = vpack.c.bf16 %v3198_v63, %v3197_v32  ;;  %v4679_v2 = vmul.f32 %v8807_v8, %v4223_v14  ;;  %8818 = vrcp.f32 %v4054_v18  ;;  %v4349_v59 = vpop.f32.mrf.mxu0 }
 0x667   : > { %v8809_v12 = vpop.eup %8808  ;;  %v4051_v35 = vpop.xlane.xlu0 %4050 }
 0x668   : > { %v8811_v54 = vpop.eup %8810  ;;  %8397 = vmatmul.mubr.msk.bf16.gmra.mxu1 %vm1830_vm1, %v3218_v24  ;;  %v4682_v43 = vmul.f32 %v8809_v12, %v8279_v42  ;;  %v8295_v62 = vpop.f32.mrf.mxu0 }
 0x669   : > { %v8813_v13 = vpop.eup %8812  ;;  %v11127_v52 = vpop.xlane.xlu1 %4089  ;;  %v4681_v17 = vmul.f32 %v8811_v54, %v8278_v16 }
 0x66a   : > { %v4680_v19 = vmul.f32 %v8813_v13, %v4226_v53  ;;  %v4352_v48 = vpop.f32.mrf.mxu0 }
 0x66b   : > { %v11129_v49 = vpop.xlane.xlu0 %4086  ;;  %v4712_v61 = vpack.c.bf16 %v4682_v43, %v4681_v17 }
 0x66c   : > { %v4711_v6 = vpack.c.bf16 %v4680_v19, %v4679_v2 }
 0x66d   : > { %v4048_v46 = vpop.xlane.xlu1 %4047 }
 0x66e   : > { %8340 = vmatprep.mubr.msk.bf16.mxu0 %vm1830_vm1, %v4711_v6 }
 0x66f   : > { %8341 = vmatmul.mubr.msk.bf16.vlgmr.msra.gmra.mxu0 %vm1830_vm1, %v4712_v61  ;;  %v4045_v3 = vpop.xlane.xlu0 %4044  ;;  %v8815_v38 = vpop.eup %8814 }
 0x670   : > { %8820 = vrcp.f32 %v4045_v3  ;;  %v4688_v0 = vmul.f32 %v8815_v38, %v4352_v48 }
 0x671   : > { %8822 = vrcp.f32 %v4048_v46  ;;  %v2668_v50 = vpop.xlane.xlu1 %2667  ;;  %v8817_v60 = vpop.eup %8816 }
 0x672   : > { %8824 = vrcp.f32 %v2668_v50  ;;  %v4687_v30 = vmul.f32 %v8817_v60, %v4349_v59 }
 0x673   : > { %8826 = vrcp.f32 %v4051_v35  ;;  %v2665_v10 = vpop.xlane.xlu0 %2664  ;;  %v8819_v20 = vpop.eup %8818 }
 0x674   : > { %8828 = vrcp.f32 %v2665_v10  ;;  %v4715_v51 = vpack.c.bf16 %v4688_v0, %v4687_v30  ;;  %v11135_v11 = vpop.f32.mrf.mxu0 }
 0x675   : > { %v4084_v41 = vpop.xlane.xlu1 %4083  ;;  %8830 = vrcp.f32 %v4063_v21 }
 0x676   : > { %8832 = vrcp.f32 %v4066_v15  ;;  %v4475_v18 = vpop.f32.mrf.mxu0 }
 0x677   : > { %v4081_v25 = vpop.xlane.xlu0 %4080  ;;  %8834 = vrcp.f32 %v4084_v41 }
 0x678   : > { %8836 = vrcp.f32 %v4081_v25 }
 0x679   : > { %v8286_v36 = vpop.f32.mrf.mxu1  ;;  %v4078_v56 = vpop.xlane.xlu1 %4077 }
 0x67a   : > { %8838 = vrcp.f32 %v4078_v56 }
 0x67b   : > { %v4286_v58 = vpop.f32.mrf.mxu1  ;;  %v4075_v40 = vpop.xlane.xlu0 %4074 }
 0x67c   : > { %8840 = vrcp.f32 %v4075_v40 }
 0x67d   : > { %v8821_v34 = vpop.eup %8820  ;;  %v8287_v44 = vpop.f32.mrf.mxu1 }
 0x67e   : > { %v4072_v7 = vpop.xlane.xlu1 %4071  ;;  %v8823_v55 = vpop.eup %8822  ;;  %v4686_v4 = vmul.f32 %v8819_v20, %v8287_v44  ;;  %v4683_v37 = vmul.f32 %v8821_v34, %v4286_v58  ;;  %v13094_v20 = vld [vmem:[#allocation54_spill] sm:$0xff] }
 0x67f   : > { %v8825_v23 = vpop.eup %8824  ;;  %v4289_v31 = vpop.f32.mrf.mxu1  ;;  %v13095_v34 = vld [vmem:[#allocation74_spill] sm:$0xff] }
 0x680   : > { %v4069_v29 = vpop.xlane.xlu0 %4068  ;;  %v8827_v57 = vpop.eup %8826  ;;  %v4684_v16 = vmul.f32 %v8823_v55, %v4289_v31  ;;  %v3200_v9 = vmul.f32 %v8825_v23, %v13093_v22 }
 0x681   : > { %8842 = vrcp.f32 %v4069_v29  ;;  %v8829_v15 = vpop.eup %8828  ;;  %v4685_v45 = vmul.f32 %v8827_v57, %v8286_v36 }
 0x682   : > { %8844 = vrcp.f32 %v4072_v7  ;;  %v2674_v21 = vpop.xlane.xlu1 %2673  ;;  %v4713_v28 = vpack.c.bf16 %v4684_v16, %v4683_v37  ;;  %v3199_v33 = vmul.f32 %v8829_v15, %v13092_v1  ;;  %v8831_v26 = vpop.eup %8830 }
 0x683   : > { %8846 = vrcp.f32 %v2674_v21  ;;  %v4714_v14 = vpack.c.bf16 %v4686_v4, %v4685_v45  ;;  %v8833_v47 = vpop.eup %8832  ;;  %v4689_v63 = vmul.f32 %v8831_v26, %v8294_v5 }
 0x684   : > { %v2671_v27 = vpop.xlane.xlu0 %2670  ;;  %8344 = vmatprep.mubr.msk.bf16.mxu0 %vm1830_vm1, %v4713_v28  ;;  %v3219_v39 = vpack.c.bf16 %v3200_v9, %v3199_v33  ;;  %v8835_v8 = vpop.eup %8834  ;;  %v4690_v24 = vmul.f32 %v8833_v47, %v8295_v62 }
 0x685   : > { %8848 = vrcp.f32 %v2671_v27  ;;  %8345 = vmatmul.mubr.msk.bf16.gmra.mxu0 %vm1830_vm1, %v4714_v14  ;;  %v8837_v54 = vpop.eup %8836 }
 0x686   : > { %v4108_v32 = vpop.xlane.xlu1 %4107  ;;  %8850 = vrcp.f32 %v11127_v52  ;;  %8348 = vmatprep.mubr.msk.bf16.mxu0 %vm1830_vm1, %v4715_v51  ;;  %8400 = vmatprep.mubr.msk.bf16.mxu1 %vm1830_vm1, %v3219_v39  ;;  %v4716_v53 = vpack.c.bf16 %v4690_v24, %v4689_v63  ;;  %v8311_v52 = vpop.f32.mrf.mxu0  ;;  %v4695_v41 = vmul.f32 %v8837_v54, %v4475_v18 }
 0x687   : > { %8852 = vrcp.f32 %v11129_v49  ;;  %v8839_v13 = vpop.eup %8838 }
 0x688   : > { %v4105_v42 = vpop.xlane.xlu0 %4104  ;;  %v4478_v5 = vpop.f32.mrf.mxu0 }
 0x689   : > { %v8302_v12 = vpop.f32.mrf.mxu1  ;;  %v8841_v19 = vpop.eup %8840  ;;  %8854 = vrcp.f32 %v4105_v42  ;;  %v4696_v56 = vmul.f32 %v8835_v8, %v4478_v5  ;;  %v13099_v5 = vld [vmem:[#allocation81_spill] sm:$0xff] }
 0x68a   : > { %v4102_v35 = vpop.xlane.xlu1 %4101  ;;  %v4693_v38 = vmul.f32 %v8841_v19, %v8302_v12  ;;  %v8326_v29 = vpop.f32.mrf.mxu0 }
 0x68b   : > { %v4412_v43 = vpop.f32.mrf.mxu1  ;;  %v4719_v31 = vpack.c.bf16 %v4696_v56, %v4695_v41 }
 0x68c   : > { %v4099_v2 = vpop.xlane.xlu0 %4098  ;;  %v4601_v0 = vpop.f32.mrf.mxu0 }
 0x68d   : > { %v8303_v6 = vpop.f32.mrf.mxu1  ;;  %8349 = vmatmul.mubr.msk.bf16.gmra.mxu0 %vm1830_vm1, %v4716_v53 }
 0x68e   : > { %v8843_v17 = vpop.eup %8842  ;;  %v4096_v46 = vpop.xlane.xlu1 %4095  ;;  %v4694_v3 = vmul.f32 %v8839_v13, %v8303_v6 }
 0x68f   : > { %v8845_v49 = vpop.eup %8844  ;;  %8856 = vrcp.f32 %v4096_v46  ;;  %v4415_v50 = vpop.f32.mrf.mxu1  ;;  %v4691_v25 = vmul.f32 %v8843_v17, %v4412_v43 }
 0x690   : > { %v8847_v61 = vpop.eup %8846  ;;  %8858 = vrcp.f32 %v4099_v2  ;;  %v4093_v10 = vpop.xlane.xlu0 %4092  ;;  %v4692_v59 = vmul.f32 %v8845_v49, %v4415_v50  ;;  %v4718_v55 = vpack.c.bf16 %v4694_v3, %v4693_v38  ;;  %v13096_v2 = vld [vmem:[#allocation80_spill] sm:$0xff]  ;;  %v13098_v50 = vld [vmem:[#allocation79_spill] sm:$0xff] }
 0x691   : > { %8860 = vrcp.f32 %v4093_v10  ;;  %v8318_v60 = vpop.f32.mrf.mxu1  ;;  %v3202_v44 = vmul.f32 %v8847_v61, %v13095_v34  ;;  %v8327_v27 = vpop.f32.mrf.mxu0 }
 0x692   : > { %v8849_v36 = vpop.eup %8848  ;;  %8862 = vrcp.f32 %v4102_v35  ;;  %v4114_v58 = vpop.xlane.xlu1 %4113  ;;  %v4717_v40 = vpack.c.bf16 %v4692_v59, %v4691_v25 }
 0x693   : > { %8864 = vrcp.f32 %v4108_v32  ;;  %v3201_v62 = vmul.f32 %v8849_v36, %v13094_v20  ;;  %v8851_v7 = vpop.eup %8850  ;;  %v4538_v30 = vpop.f32.mrf.mxu1 }
 0x694   : > { %v4111_v23 = vpop.xlane.xlu0 %4110  ;;  %v8853_v4 = vpop.eup %8852  ;;  %8352 = vmatprep.mubr.msk.bf16.mxu0 %vm1830_vm1, %v4717_v40  ;;  %v4698_v16 = vmul.f32 %v8851_v7, %v8311_v52  ;;  %v13097_v52 = vld [vmem:[#allocation82_spill] sm:$0xff] }
 0x695   : > { %v3220_v57 = vpack.c.bf16 %v3202_v44, %v3201_v62  ;;  %8353 = vmatmul.mubr.msk.bf16.gmra.mxu0 %vm1830_vm1, %v4718_v55  ;;  %v4697_v37 = vmul.f32 %v8853_v4, %v11135_v11  ;;  %v8319_v45 = vpop.f32.mrf.mxu1  ;;  %v4604_v18 = vpop.f32.mrf.mxu0 }
 0x696   : > { %v2680_v48 = vpop.xlane.xlu1 %2679  ;;  %8356 = vmatprep.mubr.msk.bf16.mxu0 %vm1830_vm1, %v4719_v31  ;;  %v8855_v28 = vpop.eup %8854 }
 0x697   : > { %8866 = vrcp.f32 %v2680_v48  ;;  %8401 = vmatmul.mubr.msk.bf16.gmra.mxu1 %vm1830_vm1, %v3220_v57  ;;  %v4720_v33 = vpack.c.bf16 %v4698_v16, %v4697_v37  ;;  %v4541_v26 = vpop.f32.mrf.mxu1  ;;  %v4703_v63 = vmul.f32 %v8855_v28, %v4601_v0 }
 0x698   : > { %8868 = vrcp.f32 %v4111_v23  ;;  %v2677_v15 = vpop.xlane.xlu0 %2676 }
 0x699   : > { %8870 = vrcp.f32 %v2677_v15 }
 0x69a   : > { %8872 = vrcp.f32 %v4114_v58  ;;  %v2686_v21 = vpop.xlane.xlu1 %2685 }
 0x69b   : > { %8874 = vrcp.f32 %v2686_v21 }
 0x69c   : > { %v8857_v1 = vpop.eup %8856  ;;  %v2683_v22 = vpop.xlane.xlu0 %2682 }
 0x69d   : > { %v8859_v9 = vpop.eup %8858  ;;  %8876 = vrcp.f32 %v2683_v22  ;;  %8357 = vmatmul.mubr.msk.bf16.gmra.mxu0 %vm1830_vm1, %v4720_v33  ;;  %v4700_v39 = vmul.f32 %v8857_v1, %v4541_v26 }
 0x69e   : > { %v8861_v14 = vpop.eup %8860  ;;  %v4701_v47 = vmul.f32 %v8859_v9, %v8318_v60  ;;  %v4120_v36 = vpop.xlane.xlu1 %4119 }
 0x69f   : > { %v8863_v51 = vpop.eup %8862  ;;  %v4699_v11 = vmul.f32 %v8861_v14, %v4538_v30  ;;  %8878 = vrcp.f32 %v4120_v36 }
 0x6a0   : > { %v8865_v32 = vpop.eup %8864  ;;  %v4702_v8 = vmul.f32 %v8863_v51, %v8319_v45  ;;  %v4117_v56 = vpop.xlane.xlu0 %4116 }
 0x6a1   : > { %v4721_v42 = vpack.c.bf16 %v4700_v39, %v4699_v11  ;;  %v4704_v24 = vmul.f32 %v8865_v32, %v4604_v18  ;;  %v13100_v11 = vld [vmem:[#allocation2_spill] sm:$0xff] }
 0x6a2   : > { %v4722_v35 = vpack.c.bf16 %v4702_v8, %v4701_v47  ;;  %v4126_v38 = vpop.xlane.xlu1 %4125 }
 0x6a3   : > { %8360 = vmatprep.mubr.msk.bf16.mxu0 %vm1830_vm1, %v4721_v42  ;;  %v4723_v13 = vpack.c.bf16 %v4704_v24, %v4703_v63  ;;  %8880 = vrcp.f32 %v4126_v38  ;;  %v13102_v63 = vld [vmem:[#allocation3_spill] sm:$0xff] }
 0x6a4   : > { %v8867_v12 = vpop.eup %8866  ;;  %v4123_v60 = vpop.xlane.xlu0 %4122  ;;  %8882 = vrcp.f32 %v4117_v56 }
 0x6a5   : > { %v8869_v54 = vpop.eup %8868  ;;  %8361 = vmatmul.mubr.msk.bf16.gmra.mxu0 %vm1830_vm1, %v4722_v35  ;;  %v3204_v17 = vmul.f32 %v8867_v12, %v13097_v52  ;;  %8884 = vrcp.f32 %v4123_v60  ;;  %v13104_v12 = vld [vmem:[#allocation4_spill] sm:$0xff] }
 0x6a6   : > { %v8871_v53 = vpop.eup %8870  ;;  %8364 = vmatprep.mubr.msk.bf16.mxu0 %vm1830_vm1, %v4723_v13  ;;  %v4705_v46 = vmul.f32 %v8869_v54, %v8326_v29  ;;  %v13106_v13 = vld [vmem:[#allocation5_spill] sm:$0xff] }
 0x6a7   : > { %v8873_v43 = vpop.eup %8872  ;;  %v3203_v19 = vmul.f32 %v8871_v53, %v13096_v2 }
 0x6a8   : > { %v8875_v6 = vpop.eup %8874  ;;  %v4706_v3 = vmul.f32 %v8873_v43, %v8327_v27 }
 0x6a9   : > { %v3221_v49 = vpack.c.bf16 %v3204_v17, %v3203_v19  ;;  %v3206_v41 = vmul.f32 %v8875_v6, %v13099_v5  ;;  %v13108_v5 = vld [vmem:[#allocation6_spill] sm:$0xff] }
 0x6aa   : > { %v8877_v61 = vpop.eup %8876  ;;  %v4724_v25 = vpack.c.bf16 %v4706_v3, %v4705_v46 }
 0x6ab   : > { %8404 = vmatprep.mubr.msk.bf16.mxu1 %vm1830_vm1, %v3221_v49  ;;  %v3205_v10 = vmul.f32 %v8877_v61, %v13098_v50 }
 0x6ac   : > { %v8879_v20 = vpop.eup %8878 }
 0x6ad   : > { %v3222_v59 = vpack.c.bf16 %v3206_v41, %v3205_v10  ;;  %8365 = vmatmul.mubr.msk.bf16.gmra.mxu0 %vm1830_vm1, %v4724_v25  ;;  %v13110_v25 = vld [vmem:[#allocation8_spill] sm:$0xff] }
 0x6af   : > { %8405 = vmatmul.mubr.msk.bf16.gmra.mxu1 %vm1830_vm1, %v3222_v59 }
 0x6b0   : > { %v8881_v34 = vpop.eup %8880 }
 0x6b1   : > { %v8883_v44 = vpop.eup %8882 }
 0x6b2   : > { %v8885_v23 = vpop.eup %8884 }
 0x6c9   : > { %v8334_v58 = vpop.f32.mrf.mxu1 }
 0x6ca   : > { %v4709_v29 = vmul.f32 %v8885_v23, %v8334_v58 }
 0x6cb   : > { %v4664_v40 = vpop.f32.mrf.mxu1 }
 0x6cc   : > { %v4707_v4 = vmul.f32 %v8883_v44, %v4664_v40 }
 0x6cd   : > { %v8335_v62 = vpop.f32.mrf.mxu1 }
 0x6ce   : > { %v4710_v7 = vmul.f32 %v8881_v34, %v8335_v62 }
 0x6cf   : > { %v4667_v55 = vpop.f32.mrf.mxu1 }
 0x6d0   : > { %v4708_v31 = vmul.f32 %v8879_v20, %v4667_v55  ;;  %v4726_v30 = vpack.c.bf16 %v4710_v7, %v4709_v29  ;;  %v13112_v20 = vld [vmem:[#allocation7_spill] sm:$0xff]  ;;  %v13114_v7 = vld [vmem:[#allocation9_spill] sm:$0xff] }
 0x6d2   : > { %v4725_v57 = vpack.c.bf16 %v4708_v31, %v4707_v4 }
 0x6d4   : > { %8368 = vmatprep.mubr.msk.bf16.mxu0 %vm1830_vm1, %v4725_v57 }
 0x6d5   : > { %8369 = vmatmul.mubr.msk.bf16.gmra.mxu0 %vm1830_vm1, %v4726_v30  ;;  %v13116_v30 = vld [vmem:[#allocation10_spill] sm:$0xff] }
 0x700   : > { %v8378_v48 = vpop.f32.mrf.mxu1 }
 0x702   : > { %v5042_v37 = vpop.f32.mrf.mxu1 }
 0x704   : > { %v8379_v16 = vpop.f32.mrf.mxu1 }
 0x706   : > { %v5045_v15 = vpop.f32.mrf.mxu1 }
 0x708   : > { %v8382_v0 = vpop.f32.mrf.mxu1 }
 0x70a   : > { %v5058_v45 = vpop.f32.mrf.mxu1 }
 0x70c   : > { %v8383_v21 = vpop.f32.mrf.mxu1 }
 0x70e   : > { %v5061_v28 = vpop.f32.mrf.mxu1 }
 0x710   : > { %v8386_v1 = vpop.f32.mrf.mxu1 }
 0x712   : > { %v5074_v33 = vpop.f32.mrf.mxu1 }
 0x714   : > { %v8387_v9 = vpop.f32.mrf.mxu1 }
 0x716   : > { %v5077_v32 = vpop.f32.mrf.mxu1 }
 0x718   : > { %v8390_v54 = vpop.f32.mrf.mxu1 }
 0x71a   : > { %v5090_v19 = vpop.f32.mrf.mxu1 }
 0x71c   : > { %v8391_v17 = vpop.f32.mrf.mxu1 }
 0x71e   : > { %v5093_v6 = vpop.f32.mrf.mxu1 }
 0x720   : > { %v8394_v50 = vpop.f32.mrf.mxu1 }
 0x722   : > { %v5106_v58 = vpop.f32.mrf.mxu1 }
 0x724   : > { %v8395_v29 = vpop.f32.mrf.mxu1 }
 0x72f   : > { %v8342_v22 = vpop.f32.mrf.mxu0 }
 0x730   : > { %v5051_v27 = vadd.f32 %v8378_v48, %v8342_v22  ;;  %v13120_v22 = vld [vmem:[#allocation11_spill] sm:$0xff] }
 0x731   : > { %v4821_v14 = vpop.f32.mrf.mxu0 }
 0x732   : > { %v5043_v26 = vadd.f32 %v5042_v37, %v4821_v14  ;;  %v11168_v42 = vadd.f32 %v13102_v63, %v5051_v27  ;;  %v13122_v27 = vld [vmem:[#allocation13_spill] sm:$0xff] }
 0x733   : > { %v8343_v51 = vpop.f32.mrf.mxu0 }
 0x734   : > { %v11165_v39 = vadd.f32 %v13100_v11, %v5043_v26  ;;  %13103 = vst [vmem:[#allocation66_spill] sm:$0xff] %v11168_v42  ;;  %v5054_v18 = vadd.f32 %v8379_v16, %v8343_v51  ;;  %v5209_v43 = vsel %vm613_vm0, %v11168_v42, 0.0 }
 0x735   : > { %v4824_v47 = vpop.f32.mrf.mxu0 }
 0x736   : > { %13101 = vst [vmem:[#allocation59_spill] sm:$0xff] %v11165_v39  ;;  %v5046_v8 = vadd.f32 %v5045_v15, %v4824_v47  ;;  %v5203_v24 = vsel %vm613_vm0, %v11165_v39, 0.0  ;;  %v11176_v53 = vadd.f32 %v13106_v13, %v5054_v18  ;;  %v13118_v15 = vld [vmem:[#allocation12_spill] sm:$0xff] }
 0x737   : > { %5204 = vadd.xlane.f32.xlu0 %v5203_v24 }
 0x738   : > { %v11173_v35 = vadd.f32 %v13104_v12, %v5046_v8  ;;  %13107 = vst [vmem:[#allocation34_spill] sm:$0xff] %v11176_v53  ;;  %v5212_v52 = vsel %vm613_vm0, %v11176_v53, 0.0  ;;  %v13124_v8 = vld [vmem:[#allocation14_spill] sm:$0xff] }
 0x73a   : > { %13105 = vst [vmem:[#allocation35_spill] sm:$0xff] %v11173_v35  ;;  %v5206_v2 = vsel %vm613_vm0, %v11173_v35, 0.0 }
 0x73b   : > { %5210 = vadd.xlane.f32.xlu0 %v5209_v43  ;;  %5207 = vadd.xlane.f32.xlu1 %v5206_v2  ;;  %v13126_v43 = vld [vmem:[#allocation16_spill] sm:$0xff] }
 0x73f   : > { %5213 = vadd.xlane.f32.xlu1 %v5212_v52 }
 0x745   : > { %v8346_v46 = vpop.f32.mrf.mxu0 }
 0x746   : > { %v5067_v49 = vadd.f32 %v8382_v0, %v8346_v46 }
 0x747   : > { %v4837_v61 = vpop.f32.mrf.mxu0 }
 0x748   : > { %v5059_v3 = vadd.f32 %v5058_v45, %v4837_v61  ;;  %v11188_v59 = vadd.f32 %v13110_v25, %v5067_v49  ;;  %v13128_v61 = vld [vmem:[#allocation15_spill] sm:$0xff]  ;;  %v13130_v25 = vld [vmem:[#allocation17_spill] sm:$0xff] }
 0x749   : > { %v8347_v10 = vpop.f32.mrf.mxu0 }
 0x74a   : > { %v11185_v41 = vadd.f32 %v13108_v5, %v5059_v3  ;;  %13111 = vst [vmem:[#allocation65_spill] sm:$0xff] %v11188_v59  ;;  %v5070_v56 = vadd.f32 %v8383_v21, %v8347_v10  ;;  %v5221_v44 = vsel %vm613_vm0, %v11188_v59, 0.0 }
 0x74b   : > { %v4840_v36 = vpop.f32.mrf.mxu0 }
 0x74c   : > { %13109 = vst [vmem:[#allocation68_spill] sm:$0xff] %v11185_v41  ;;  %v5062_v38 = vadd.f32 %v5061_v28, %v4840_v36  ;;  %v5215_v60 = vsel %vm613_vm0, %v11185_v41, 0.0  ;;  %v11198_v55 = vadd.f32 %v13114_v7, %v5070_v56 }
 0x74d   : > { %5216 = vadd.xlane.f32.xlu0 %v5215_v60  ;;  %v8350_v40 = vpop.f32.mrf.mxu0 }
 0x74e   : > { %v11193_v62 = vadd.f32 %v13112_v20, %v5062_v38  ;;  %13115 = vst [vmem:[#allocation41_spill] sm:$0xff] %v11198_v55  ;;  %v5083_v23 = vadd.f32 %v8386_v1, %v8350_v40  ;;  %v5224_v21 = vsel %vm613_vm0, %v11198_v55, 0.0  ;;  %v5109_v1 = vpop.f32.mrf.mxu1  ;;  %v13132_v40 = vld [vmem:[#allocation18_spill] sm:$0xff] }
 0x74f   : > { %v4853_v34 = vpop.f32.mrf.mxu0 }
 0x750   : > { %13113 = vst [vmem:[#allocation67_spill] sm:$0xff] %v11193_v62  ;;  %v5075_v4 = vadd.f32 %v5074_v33, %v4853_v34  ;;  %v5218_v31 = vsel %vm613_vm0, %v11193_v62, 0.0  ;;  %v11206_v0 = vadd.f32 %v13118_v15, %v5083_v23  ;;  %v8398_v63 = vpop.f32.mrf.mxu1  ;;  %v13134_v34 = vld [vmem:[#allocation20_spill] sm:$0xff] }
 0x751   : > { %5222 = vadd.xlane.f32.xlu0 %v5221_v44  ;;  %5219 = vadd.xlane.f32.xlu1 %v5218_v31  ;;  %v8351_v57 = vpop.f32.mrf.mxu0 }
 0x752   : > { %v11203_v48 = vadd.f32 %v13116_v30, %v5075_v4  ;;  %v5086_v37 = vadd.f32 %v8387_v9, %v8351_v57  ;;  %13119 = vst [vmem:[#allocation56_spill] sm:$0xff] %v11206_v0  ;;  %v5122_v46 = vpop.f32.mrf.mxu1  ;;  %v13136_v30 = vld [vmem:[#allocation19_spill] sm:$0xff] }
 0x753   : > { %v4856_v16 = vpop.f32.mrf.mxu0 }
 0x754   : > { %13117 = vst [vmem:[#allocation69_spill] sm:$0xff] %v11203_v48  ;;  %v5078_v45 = vadd.f32 %v5077_v32, %v4856_v16  ;;  %v5227_v28 = vsel %vm613_vm0, %v11203_v48, 0.0  ;;  %v11216_v9 = vadd.f32 %v13122_v27, %v5086_v37  ;;  %v5233_v32 = vsel %vm613_vm0, %v11206_v0, 0.0  ;;  %v8399_v38 = vpop.f32.mrf.mxu1  ;;  %v13140_v27 = vld [vmem:[#allocation22_spill] sm:$0xff] }
 0x755   : > { %5225 = vadd.xlane.f32.xlu1 %v5224_v21  ;;  %5228 = vadd.xlane.f32.xlu0 %v5227_v28  ;;  %v8354_v33 = vpop.f32.mrf.mxu0 }
 0x756   : > { %v11213_v14 = vadd.f32 %v13120_v22, %v5078_v45  ;;  %13123 = vst [vmem:[#allocation84_spill] sm:$0xff] %v11216_v9  ;;  %v5099_v51 = vadd.f32 %v8390_v54, %v8354_v33  ;;  %v5236_v13 = vsel %vm613_vm0, %v11216_v9, 0.0  ;;  %v5125_v31 = vpop.f32.mrf.mxu1 }
 0x757   : > { %v4869_v26 = vpop.f32.mrf.mxu0 }
 0x758   : > { %13121 = vst [vmem:[#allocation55_spill] sm:$0xff] %v11213_v14  ;;  %v5091_v11 = vadd.f32 %v5090_v19, %v4869_v26  ;;  %v5230_v47 = vsel %vm613_vm0, %v11213_v14, 0.0  ;;  %v11228_v54 = vadd.f32 %v13126_v43, %v5099_v51  ;;  %v8402_v16 = vpop.f32.mrf.mxu1  ;;  %v13144_v43 = vld [vmem:[#allocation23_spill] sm:$0xff] }
 0x759   : > { %5234 = vadd.xlane.f32.xlu0 %v5233_v32  ;;  %5231 = vadd.xlane.f32.xlu1 %v5230_v47  ;;  %v8355_v18 = vpop.f32.mrf.mxu0  ;;  %v13142_v47 = vld [vmem:[#allocation24_spill] sm:$0xff] }
 0x75a   : > { %v11223_v24 = vadd.f32 %v13124_v8, %v5091_v11  ;;  %13127 = vst [vmem:[#allocation85_spill] sm:$0xff] %v11228_v54  ;;  %v5102_v2 = vadd.f32 %v8391_v17, %v8355_v18  ;;  %v5245_v17 = vsel %vm613_vm0, %v11228_v54, 0.0  ;;  %v5138_v51 = vpop.f32.mrf.mxu1 }
 0x75b   : > { %v4872_v12 = vpop.f32.mrf.mxu0 }
 0x75c   : > { %13125 = vst [vmem:[#allocation83_spill] sm:$0xff] %v11223_v24  ;;  %v5094_v19 = vadd.f32 %v5093_v6, %v4872_v12  ;;  %v5239_v52 = vsel %vm613_vm0, %v11223_v24, 0.0  ;;  %v11236_v36 = vadd.f32 %v13130_v25, %v5102_v2 }
 0x75d   : > { %5237 = vadd.xlane.f32.xlu1 %v5236_v13  ;;  %5240 = vadd.xlane.f32.xlu0 %v5239_v52  ;;  %v8358_v49 = vpop.f32.mrf.mxu0  ;;  %v13146_v52 = vld [vmem:[#allocation25_spill] sm:$0xff] }
 0x75e   : > { %v11233_v3 = vadd.f32 %v13128_v61, %v5094_v19  ;;  %v5115_v10 = vadd.f32 %v8394_v50, %v8358_v49  ;;  %13131 = vst [vmem:[#allocation42_spill] sm:$0xff] %v11236_v36  ;;  %v8403_v19 = vpop.f32.mrf.mxu1 }
 0x75f   : > { %v4885_v5 = vpop.f32.mrf.mxu0 }
 0x760   : > { %13129 = vst [vmem:[#allocation86_spill] sm:$0xff] %v11233_v3  ;;  %v5107_v56 = vadd.f32 %v5106_v58, %v4885_v5  ;;  %v5242_v6 = vsel %vm613_vm0, %v11233_v3, 0.0  ;;  %v11246_v50 = vadd.f32 %v13134_v34, %v5115_v10  ;;  %v5248_v58 = vsel %vm613_vm0, %v11236_v36, 0.0  ;;  %v13150_v34 = vld [vmem:[#allocation28_spill] sm:$0xff] }
 0x761   : > { %5246 = vadd.xlane.f32.xlu0 %v5245_v17  ;;  %5243 = vadd.xlane.f32.xlu1 %v5242_v6  ;;  %v8359_v60 = vpop.f32.mrf.mxu0  ;;  %v13148_v17 = vld [vmem:[#allocation26_spill] sm:$0xff] }
 0x762   : > { %v11243_v20 = vadd.f32 %v13132_v40, %v5107_v56  ;;  %13135 = vst [vmem:[#allocation70_spill] sm:$0xff] %v11246_v50  ;;  %v5118_v7 = vadd.f32 %v8395_v29, %v8359_v60  ;;  %v5257_v45 = vsel %vm613_vm0, %v11246_v50, 0.0  ;;  %v13138_v29 = vld [vmem:[#allocation21_spill] sm:$0xff] }
 0x763   : > { %v4888_v44 = vpop.f32.mrf.mxu0 }
 0x764   : > { %13133 = vst [vmem:[#allocation36_spill] sm:$0xff] %v11243_v20  ;;  %v5110_v23 = vadd.f32 %v5109_v1, %v4888_v44  ;;  %v5251_v4 = vsel %vm613_vm0, %v11243_v20, 0.0  ;;  %v11258_v21 = vadd.f32 %v13138_v29, %v5118_v7 }
 0x765   : > { %5249 = vadd.xlane.f32.xlu1 %v5248_v58  ;;  %5252 = vadd.xlane.f32.xlu0 %v5251_v4  ;;  %v8362_v57 = vpop.f32.mrf.mxu0  ;;  %v13152_v4 = vld [vmem:[#allocation27_spill] sm:$0xff] }
 0x766   : > { %v11253_v37 = vadd.f32 %v13136_v30, %v5110_v23  ;;  %13139 = vst [vmem:[#allocation60_spill] sm:$0xff] %v11258_v21  ;;  %v5131_v28 = vadd.f32 %v8398_v63, %v8362_v57  ;;  %v5260_v63 = vsel %vm613_vm0, %v11258_v21, 0.0  ;;  %v13154_v57 = vld [vmem:[#allocation29_spill] sm:$0xff] }
 0x767   : > { %v4901_v15 = vpop.f32.mrf.mxu0 }
 0x768   : > { %13137 = vst [vmem:[#allocation44_spill] sm:$0xff] %v11253_v37  ;;  %v5123_v1 = vadd.f32 %v5122_v46, %v4901_v15  ;;  %v5254_v33 = vsel %vm613_vm0, %v11253_v37, 0.0  ;;  %v11266_v18 = vadd.f32 %v13142_v47, %v5131_v28 }
 0x769   : > { %5258 = vadd.xlane.f32.xlu0 %v5257_v45  ;;  %5255 = vadd.xlane.f32.xlu1 %v5254_v33  ;;  %v8363_v22 = vpop.f32.mrf.mxu0 }
 0x76a   : > { %v11263_v26 = vadd.f32 %v13140_v27, %v5123_v1  ;;  %v5134_v11 = vadd.f32 %v8399_v38, %v8363_v22  ;;  %13143 = vst [vmem:[#allocation43_spill] sm:$0xff] %v11266_v18  ;;  %v5269_v5 = vsel %vm613_vm0, %v11266_v18, 0.0  ;;  %v5141_v38 = vpop.f32.mrf.mxu1 }
 0x76b   : > { %v4904_v32 = vpop.f32.mrf.mxu0 }
 0x76c   : > { %13141 = vst [vmem:[#allocation37_spill] sm:$0xff] %v11263_v26  ;;  %v5126_v8 = vadd.f32 %v5125_v31, %v4904_v32  ;;  %v5263_v12 = vsel %vm613_vm0, %v11263_v26, 0.0  ;;  %v11276_v46 = vadd.f32 %v13146_v52, %v5134_v11  ;;  %v13156_v32 = vld [vmem:[#allocation30_spill] sm:$0xff] }
 0x76d   : > { %5261 = vadd.xlane.f32.xlu1 %v5260_v63  ;;  %5264 = vadd.xlane.f32.xlu0 %v5263_v12  ;;  %v8366_v13 = vpop.f32.mrf.mxu0  ;;  %v13158_v12 = vld [vmem:[#allocation32_spill] sm:$0xff] }
 0x76e   : > { %v11273_v2 = vadd.f32 %v13144_v43, %v5126_v8  ;;  %13147 = vst [vmem:[#allocation61_spill] sm:$0xff] %v11276_v46  ;;  %v5147_v61 = vadd.f32 %v8402_v16, %v8366_v13  ;;  %v5272_v40 = vsel %vm613_vm0, %v11276_v46, 0.0 }
 0x76f   : > { %v4917_v49 = vpop.f32.mrf.mxu0  ;;  %v8406_v29 = vpop.f32.mrf.mxu1 }
 0x770   : > { %13145 = vst [vmem:[#allocation39_spill] sm:$0xff] %v11273_v2  ;;  %v5139_v10 = vadd.f32 %v5138_v51, %v4917_v49  ;;  %v5266_v25 = vsel %vm613_vm0, %v11273_v2, 0.0  ;;  %v11288_v44 = vadd.f32 %v13150_v34, %v5147_v61  ;;  %v13160_v49 = vld [vmem:[#allocation31_spill] sm:$0xff] }
 0x771   : > { %5270 = vadd.xlane.f32.xlu0 %v5269_v5  ;;  %5267 = vadd.xlane.f32.xlu1 %v5266_v25  ;;  %v8367_v56 = vpop.f32.mrf.mxu0  ;;  %v5154_v28 = vpop.f32.mrf.mxu1 }
 0x772   : > { %v11283_v6 = vadd.f32 %v13148_v17, %v5139_v10  ;;  %13151 = vst [vmem:[#allocation63_spill] sm:$0xff] %v11288_v44  ;;  %v5150_v7 = vadd.f32 %v8403_v19, %v8367_v56  ;;  %v5281_v16 = vsel %vm613_vm0, %v11288_v44, 0.0  ;;  %v13162_v10 = vld [vmem:[#allocation33_spill] sm:$0xff] }
 0x773   : > { %v4920_v60 = vpop.f32.mrf.mxu0  ;;  %v8407_v33 = vpop.f32.mrf.mxu1 }
 0x774   : > { %13149 = vst [vmem:[#allocation38_spill] sm:$0xff] %v11283_v6  ;;  %v5142_v23 = vadd.f32 %v5141_v38, %v4920_v60  ;;  %v5275_v58 = vsel %vm613_vm0, %v11283_v6, 0.0  ;;  %v11296_v30 = vadd.f32 %v13154_v57, %v5150_v7 }
 0x775   : > { %5273 = vadd.xlane.f32.xlu1 %v5272_v40  ;;  %5276 = vadd.xlane.f32.xlu0 %v5275_v58  ;;  %v5157_v8 = vpop.f32.mrf.mxu1 }
 0x776   : > { %v11293_v31 = vadd.f32 %v13152_v4, %v5142_v23  ;;  %13155 = vst [vmem:[#allocation40_spill] sm:$0xff] %v11296_v30  ;;  %v5284_v45 = vsel %vm613_vm0, %v11296_v30, 0.0 }
 0x778   : > { %13153 = vst [vmem:[#allocation49_spill] sm:$0xff] %v11293_v31  ;;  %v5278_v15 = vsel %vm613_vm0, %v11293_v31, 0.0 }
 0x779   : > { %5282 = vadd.xlane.f32.xlu0 %v5281_v16  ;;  %5279 = vadd.xlane.f32.xlu1 %v5278_v15 }
 0x77d   : > { %5285 = vadd.xlane.f32.xlu1 %v5284_v45 }
 0x795   : > { %v8370_v1 = vpop.f32.mrf.mxu0 }
 0x796   : > { %v5163_v27 = vadd.f32 %v8406_v29, %v8370_v1 }
 0x797   : > { %v4933_v22 = vpop.f32.mrf.mxu0 }
 0x798   : > { %v5155_v51 = vadd.f32 %v5154_v28, %v4933_v22  ;;  %v11308_v13 = vadd.f32 %v13158_v12, %v5163_v27 }
 0x799   : > { %v8371_v11 = vpop.f32.mrf.mxu0 }
 0x79a   : > { %v11305_v47 = vadd.f32 %v13156_v32, %v5155_v51  ;;  %13159 = vst [vmem:[#allocation57_spill] sm:$0xff] %v11308_v13  ;;  %v5166_v43 = vadd.f32 %v8407_v33, %v8371_v11  ;;  %v5293_v25 = vsel %vm613_vm0, %v11308_v13, 0.0 }
 0x79b   : > { %v4936_v63 = vpop.f32.mrf.mxu0 }
 0x79c   : > { %13157 = vst [vmem:[#allocation45_spill] sm:$0xff] %v11305_v47  ;;  %v5158_v19 = vadd.f32 %v5157_v8, %v4936_v63  ;;  %v5287_v52 = vsel %vm613_vm0, %v11305_v47, 0.0  ;;  %v11316_v5 = vadd.f32 %v13162_v10, %v5166_v43 }
 0x79d   : > { %5288 = vadd.xlane.f32.xlu0 %v5287_v52 }
 0x79e   : > { %v11313_v61 = vadd.f32 %v13160_v49, %v5158_v19  ;;  %13163 = vst [vmem:[#allocation46_spill] sm:$0xff] %v11316_v5  ;;  %v5296_v17 = vsel %vm613_vm0, %v11316_v5, 0.0 }
 0x7a0   : > { %13161 = vst [vmem:[#allocation47_spill] sm:$0xff] %v11313_v61  ;;  %v5290_v56 = vsel %vm613_vm0, %v11313_v61, 0.0 }
 0x7a1   : > { %5294 = vadd.xlane.f32.xlu0 %v5293_v25  ;;  %5291 = vadd.xlane.f32.xlu1 %v5290_v56 }
 0x7a5   : > { %5297 = vadd.xlane.f32.xlu1 %v5296_v17 }
 0x7c0   : > { %v5205_v38 = vpop.xlane.xlu0 %5204 }
 0x7c1   : > { %v5299_v60 = vmul.f32 0.015625, %v5205_v38 }
 0x7c3   : > { %v11325_v40 = vsub.f32 %v11165_v39, %v5299_v60 }
 0x7c4   : > { %v5208_v34 = vpop.xlane.xlu1 %5207  ;;  %v5211_v7 = vpop.xlane.xlu0 %5210 }
 0x7c5   : > { %v5300_v23 = vmul.f32 0.015625, %v5208_v34  ;;  %v5301_v58 = vmul.f32 0.015625, %v5211_v7  ;;  %v5363_v4 = vmul.f32 %v11325_v40, %v11325_v40 }
 0x7c7   : > { %v11330_v57 = vsub.f32 %v11173_v35, %v5300_v23  ;;  %v11333_v16 = vsub.f32 %v11168_v42, %v5301_v58  ;;  %v5395_v15 = vsel %vm613_vm0, %v5363_v4, 0.0 }
 0x7c8   : > { %v5214_v45 = vpop.xlane.xlu1 %5213  ;;  %5396 = vadd.xlane.f32.xlu0 %v5395_v15 }
 0x7c9   : > { %v5302_v29 = vmul.f32 0.015625, %v5214_v45  ;;  %v5364_v28 = vmul.f32 %v11330_v57, %v11330_v57  ;;  %v5365_v1 = vmul.f32 %v11333_v16, %v11333_v16 }
 0x7cb   : > { %v11341_v33 = vsub.f32 %v11176_v53, %v5302_v29  ;;  %v5398_v22 = vsel %vm613_vm0, %v5364_v28, 0.0  ;;  %v5401_v27 = vsel %vm613_vm0, %v5365_v1, 0.0 }
 0x7cc   : > { %5399 = vadd.xlane.f32.xlu1 %v5398_v22  ;;  %5402 = vadd.xlane.f32.xlu0 %v5401_v27 }
 0x7cd   : > { %v5366_v51 = vmul.f32 %v11341_v33, %v11341_v33 }
 0x7cf   : > { %v5404_v11 = vsel %vm613_vm0, %v5366_v51, 0.0 }
 0x7d0   : > { %5405 = vadd.xlane.f32.xlu1 %v5404_v11  ;;  %v8554_v11 = vld [vmem:[%s12763_s11 + $0x18] sm:$0xff]  }
 0x7d1   : > { %8408 = vmatprep.subr.bf16.mxu0 %v8554_v11 }
 0x7d2   : > { %8409 = vmatpush3.bf16.msra.mxu0 %v8554_v11 }
 0x7d6   : > { %v5217_v32 = vpop.xlane.xlu0 %5216 }
 0x7d7   : > { %v5303_v8 = vmul.f32 0.015625, %v5217_v32 }
 0x7d9   : > { %v11349_v63 = vsub.f32 %v11185_v41, %v5303_v8 }
 0x7da   : > { %v5220_v12 = vpop.xlane.xlu1 %5219  ;;  %v5223_v43 = vpop.xlane.xlu0 %5222 }
 0x7db   : > { %v5304_v19 = vmul.f32 0.015625, %v5220_v12  ;;  %v5305_v52 = vmul.f32 0.015625, %v5223_v43  ;;  %v5367_v49 = vmul.f32 %v11349_v63, %v11349_v63 }
 0x7dd   : > { %v11354_v10 = vsub.f32 %v11193_v62, %v5304_v19  ;;  %v11357_v25 = vsub.f32 %v11188_v59, %v5305_v52  ;;  %v5407_v56 = vsel %vm613_vm0, %v5367_v49, 0.0 }
 0x7de   : > { %v5226_v17 = vpop.xlane.xlu1 %5225  ;;  %5408 = vadd.xlane.f32.xlu0 %v5407_v56  ;;  %v5229_v38 = vpop.xlane.xlu0 %5228 }
 0x7df   : > { %v5306_v60 = vmul.f32 0.015625, %v5226_v17  ;;  %v5307_v34 = vmul.f32 0.015625, %v5229_v38  ;;  %v5368_v7 = vmul.f32 %v11354_v10, %v11354_v10  ;;  %v5369_v23 = vmul.f32 %v11357_v25, %v11357_v25 }
 0x7e1   : > { %v11365_v58 = vsub.f32 %v11198_v55, %v5306_v60  ;;  %v11368_v4 = vsub.f32 %v11203_v48, %v5307_v34  ;;  %v5410_v15 = vsel %vm613_vm0, %v5368_v7, 0.0  ;;  %v5413_v45 = vsel %vm613_vm0, %v5369_v23, 0.0  ;;  %v8555_v60 = vld [vmem:[%s12763_s11 + $0x10] sm:$0xff]  }
 0x7e2   : > { %v5232_v29 = vpop.xlane.xlu1 %5231  ;;  %5411 = vadd.xlane.f32.xlu1 %v5410_v15  ;;  %5414 = vadd.xlane.f32.xlu0 %v5413_v45  ;;  %v5235_v28 = vpop.xlane.xlu0 %5234  ;;  %v13164_v48 = vmov -1.0  }
 0x7e3   : > { %v5308_v1 = vmul.f32 0.015625, %v5232_v29  ;;  %v5309_v22 = vmul.f32 0.015625, %v5235_v28  ;;  %v5370_v27 = vmul.f32 %v11365_v58, %v11365_v58  ;;  %v5371_v51 = vmul.f32 %v11368_v4, %v11368_v4  ;;  %8410 = vmatprep.subr.bf16.mxu0 %v8555_v60 }
 0x7e4   : > { %8411 = vmatpush3.bf16.msra.mxu0 %v8555_v60 }
 0x7e5   : > { %v11380_v32 = vsub.f32 %v11213_v14, %v5308_v1  ;;  %v11383_v8 = vsub.f32 %v11206_v0, %v5309_v22  ;;  %v5416_v12 = vsel %vm613_vm0, %v5370_v27, 0.0  ;;  %v5419_v43 = vsel %vm613_vm0, %v5371_v51, 0.0  ;;  %v8556_v51 = vld [vmem:[%s12763_s11 + $0x8] sm:$0xff]  }
 0x7e6   : > { %v5238_v19 = vpop.xlane.xlu1 %5237  ;;  %5417 = vadd.xlane.f32.xlu1 %v5416_v12  ;;  %5420 = vadd.xlane.f32.xlu0 %v5419_v43  ;;  %v5241_v52 = vpop.xlane.xlu0 %5240 }
 0x7e7   : > { %v5310_v49 = vmul.f32 0.015625, %v5238_v19  ;;  %v5311_v56 = vmul.f32 0.015625, %v5241_v52  ;;  %v5372_v17 = vmul.f32 %v11380_v32, %v11380_v32  ;;  %v5373_v38 = vmul.f32 %v11383_v8, %v11383_v8  ;;  %8412 = vmatprep.subr.bf16.mxu0 %v8556_v51 }
 0x7e8   : > { %8413 = vmatpush3.bf16.msra.mxu0 %v8556_v51 }
 0x7e9   : > { %v11395_v34 = vsub.f32 %v11216_v9, %v5310_v49  ;;  %v11398_v7 = vsub.f32 %v11223_v24, %v5311_v56  ;;  %v5422_v23 = vsel %vm613_vm0, %v5372_v17, 0.0  ;;  %v5425_v15 = vsel %vm613_vm0, %v5373_v38, 0.0 }
 0x7ea   : > { %v5244_v45 = vpop.xlane.xlu1 %5243  ;;  %5423 = vadd.xlane.f32.xlu1 %v5422_v23  ;;  %5426 = vadd.xlane.f32.xlu0 %v5425_v15  ;;  %v5247_v29 = vpop.xlane.xlu0 %5246  ;;  %v8557_v23 = vld [vmem:[%s12763_s11] sm:$0xff]  }
 0x7eb   : > { %v5312_v28 = vmul.f32 0.015625, %v5244_v45  ;;  %v5313_v1 = vmul.f32 0.015625, %v5247_v29  ;;  %v5374_v22 = vmul.f32 %v11395_v34, %v11395_v34  ;;  %v5375_v27 = vmul.f32 %v11398_v7, %v11398_v7  ;;  %8414 = vmatprep.subr.bf16.mxu0 %v8557_v23 }
 0x7ec   : > { %8415 = vmatpush3.bf16.msra.mxu0 %v8557_v23 }
 0x7ed   : > { %v11410_v11 = vsub.f32 %v11233_v3, %v5312_v28  ;;  %v11413_v12 = vsub.f32 %v11228_v54, %v5313_v1  ;;  %v5428_v43 = vsel %vm613_vm0, %v5374_v22, 0.0  ;;  %v5431_v19 = vsel %vm613_vm0, %v5375_v27, 0.0 }
 0x7ee   : > { %v5250_v52 = vpop.xlane.xlu1 %5249  ;;  %5429 = vadd.xlane.f32.xlu1 %v5428_v43  ;;  %5432 = vadd.xlane.f32.xlu0 %v5431_v19  ;;  %v5253_v49 = vpop.xlane.xlu0 %5252 }
 0x7ef   : > { %v5314_v56 = vmul.f32 0.015625, %v5250_v52  ;;  %v5315_v17 = vmul.f32 0.015625, %v5253_v49  ;;  %v5376_v38 = vmul.f32 %v11410_v11, %v11410_v11  ;;  %v5377_v60 = vmul.f32 %v11413_v12, %v11413_v12 }
 0x7f1   : > { %v11425_v15 = vsub.f32 %v11236_v36, %v5314_v56  ;;  %v11428_v45 = vsub.f32 %v11243_v20, %v5315_v17  ;;  %v5434_v29 = vsel %vm613_vm0, %v5376_v38, 0.0  ;;  %v5437_v28 = vsel %vm613_vm0, %v5377_v60, 0.0 }
 0x7f2   : > { %v5256_v1 = vpop.xlane.xlu1 %5255  ;;  %5435 = vadd.xlane.f32.xlu1 %v5434_v29  ;;  %5438 = vadd.xlane.f32.xlu0 %v5437_v28  ;;  %v5259_v22 = vpop.xlane.xlu0 %5258 }
 0x7f3   : > { %v5316_v27 = vmul.f32 0.015625, %v5256_v1  ;;  %v5317_v51 = vmul.f32 0.015625, %v5259_v22  ;;  %v5378_v43 = vmul.f32 %v11425_v15, %v11425_v15  ;;  %v5379_v19 = vmul.f32 %v11428_v45, %v11428_v45 }
 0x7f5   : > { %v11437_v52 = vsub.f32 %v11253_v37, %v5316_v27  ;;  %v11440_v49 = vsub.f32 %v11246_v50, %v5317_v51  ;;  %v5440_v56 = vsel %vm613_vm0, %v5378_v43, 0.0  ;;  %v5443_v17 = vsel %vm613_vm0, %v5379_v19, 0.0 }
 0x7f6   : > { %v5262_v38 = vpop.xlane.xlu1 %5261  ;;  %5441 = vadd.xlane.f32.xlu1 %v5440_v56  ;;  %5444 = vadd.xlane.f32.xlu0 %v5443_v17  ;;  %v5265_v60 = vpop.xlane.xlu0 %5264 }
 0x7f7   : > { %v5318_v29 = vmul.f32 0.015625, %v5262_v38  ;;  %v5319_v28 = vmul.f32 0.015625, %v5265_v60  ;;  %v5380_v1 = vmul.f32 %v11437_v52, %v11437_v52  ;;  %v5381_v23 = vmul.f32 %v11440_v49, %v11440_v49 }
 0x7f9   : > { %v11449_v22 = vsub.f32 %v11258_v21, %v5318_v29  ;;  %v11452_v27 = vsub.f32 %v11263_v26, %v5319_v28  ;;  %v5446_v51 = vsel %vm613_vm0, %v5380_v1, 0.0  ;;  %v5449_v43 = vsel %vm613_vm0, %v5381_v23, 0.0 }
 0x7fa   : > { %v5268_v19 = vpop.xlane.xlu1 %5267  ;;  %5447 = vadd.xlane.f32.xlu1 %v5446_v51  ;;  %5450 = vadd.xlane.f32.xlu0 %v5449_v43  ;;  %v5271_v56 = vpop.xlane.xlu0 %5270 }
 0x7fb   : > { %v5320_v17 = vmul.f32 0.015625, %v5268_v19  ;;  %v5321_v38 = vmul.f32 0.015625, %v5271_v56  ;;  %v5382_v60 = vmul.f32 %v11449_v22, %v11449_v22  ;;  %v5383_v29 = vmul.f32 %v11452_v27, %v11452_v27 }
 0x7fd   : > { %v11461_v37 = vsub.f32 %v11273_v2, %v5320_v17  ;;  %v11464_v28 = vsub.f32 %v11266_v18, %v5321_v38  ;;  %v5452_v1 = vsel %vm613_vm0, %v5382_v60, 0.0  ;;  %v5455_v23 = vsel %vm613_vm0, %v5383_v29, 0.0 }
 0x7fe   : > { %v5274_v51 = vpop.xlane.xlu1 %5273  ;;  %5453 = vadd.xlane.f32.xlu1 %v5452_v1  ;;  %5456 = vadd.xlane.f32.xlu0 %v5455_v23  ;;  %v5277_v43 = vpop.xlane.xlu0 %5276 }
 0x7ff   : > { %v5322_v19 = vmul.f32 0.015625, %v5274_v51  ;;  %v5323_v56 = vmul.f32 0.015625, %v5277_v43  ;;  %v5384_v26 = vmul.f32 %v11461_v37, %v11461_v37  ;;  %v5385_v17 = vmul.f32 %v11464_v28, %v11464_v28 }
 0x801   : > { %v11473_v2 = vsub.f32 %v11276_v46, %v5322_v19  ;;  %v11476_v38 = vsub.f32 %v11283_v6, %v5323_v56  ;;  %v5458_v60 = vsel %vm613_vm0, %v5384_v26, 0.0  ;;  %v5461_v29 = vsel %vm613_vm0, %v5385_v17, 0.0 }
 0x802   : > { %v5280_v1 = vpop.xlane.xlu1 %5279  ;;  %5459 = vadd.xlane.f32.xlu1 %v5458_v60  ;;  %5462 = vadd.xlane.f32.xlu0 %v5461_v29  ;;  %v5283_v23 = vpop.xlane.xlu0 %5282 }
 0x803   : > { %v5324_v51 = vmul.f32 0.015625, %v5280_v1  ;;  %v5325_v43 = vmul.f32 0.015625, %v5283_v23  ;;  %v5386_v18 = vmul.f32 %v11473_v2, %v11473_v2  ;;  %v5387_v19 = vmul.f32 %v11476_v38, %v11476_v38 }
 0x805   : > { %v11485_v46 = vsub.f32 %v11293_v31, %v5324_v51  ;;  %v11488_v56 = vsub.f32 %v11288_v44, %v5325_v43  ;;  %v5464_v26 = vsel %vm613_vm0, %v5386_v18, 0.0  ;;  %v5467_v17 = vsel %vm613_vm0, %v5387_v19, 0.0 }
 0x806   : > { %v5286_v60 = vpop.xlane.xlu1 %5285  ;;  %5465 = vadd.xlane.f32.xlu1 %v5464_v26  ;;  %5468 = vadd.xlane.f32.xlu0 %v5467_v17 }
 0x807   : > { %v5326_v29 = vmul.f32 0.015625, %v5286_v60  ;;  %v5388_v1 = vmul.f32 %v11485_v46, %v11485_v46  ;;  %v5389_v23 = vmul.f32 %v11488_v56, %v11488_v56 }
 0x809   : > { %v11497_v51 = vsub.f32 %v11296_v30, %v5326_v29  ;;  %v5470_v43 = vsel %vm613_vm0, %v5388_v1, 0.0  ;;  %v5473_v31 = vsel %vm613_vm0, %v5389_v23, 0.0 }
 0x80a   : > { %5471 = vadd.xlane.f32.xlu1 %v5470_v43  ;;  %5474 = vadd.xlane.f32.xlu0 %v5473_v31 }
 0x80b   : > { %v5390_v18 = vmul.f32 %v11497_v51, %v11497_v51 }
 0x80d   : > { %v5476_v19 = vsel %vm613_vm0, %v5390_v18, 0.0 }
 0x80e   : > { %5477 = vadd.xlane.f32.xlu1 %v5476_v19 }
 0x826   : > { %v5289_v26 = vpop.xlane.xlu0 %5288 }
 0x827   : > { %v5327_v17 = vmul.f32 0.015625, %v5289_v26 }
 0x829   : > { %v11505_v60 = vsub.f32 %v11305_v47, %v5327_v17 }
 0x82a   : > { %v5292_v6 = vpop.xlane.xlu1 %5291  ;;  %v5295_v29 = vpop.xlane.xlu0 %5294 }
 0x82b   : > { %v5328_v30 = vmul.f32 0.015625, %v5292_v6  ;;  %v5329_v44 = vmul.f32 0.015625, %v5295_v29  ;;  %v5391_v1 = vmul.f32 %v11505_v60, %v11505_v60 }
 0x82d   : > { %v11510_v31 = vsub.f32 %v11313_v61, %v5328_v30  ;;  %v11513_v23 = vsub.f32 %v11308_v13, %v5329_v44  ;;  %v5479_v43 = vsel %vm613_vm0, %v5391_v1, 0.0 }
 0x82e   : > { %v5298_v18 = vpop.xlane.xlu1 %5297  ;;  %5480 = vadd.xlane.f32.xlu0 %v5479_v43 }
 0x82f   : > { %v5330_v19 = vmul.f32 0.015625, %v5298_v18  ;;  %v5392_v26 = vmul.f32 %v11510_v31, %v11510_v31  ;;  %v5393_v6 = vmul.f32 %v11513_v23, %v11513_v23 }
 0x831   : > { %v11521_v17 = vsub.f32 %v11316_v5, %v5330_v19  ;;  %v5482_v30 = vsel %vm613_vm0, %v5392_v26, 0.0  ;;  %v5485_v29 = vsel %vm613_vm0, %v5393_v6, 0.0 }
 0x832   : > { %5483 = vadd.xlane.f32.xlu1 %v5482_v30  ;;  %5486 = vadd.xlane.f32.xlu0 %v5485_v29 }
 0x833   : > { %v5394_v44 = vmul.f32 %v11521_v17, %v11521_v17 }
 0x835   : > { %v5488_v1 = vsel %vm613_vm0, %v5394_v44, 0.0 }
 0x836   : > { %5489 = vadd.xlane.f32.xlu1 %v5488_v1  ;;  %v11532_v1 = vld [vmem:[%s12761_s9] ss:$0 sm:$0xff] }
 0x851   : > { %v5397_v43 = vpop.xlane.xlu0 %5396 }
 0x852   : > { %v5491_v18 = vmul.f32 0.015625, %v5397_v43 }
 0x854   : > { %v5523_v61 = vadd.f32 1e-05, %v5491_v18  ;;  %v11540_v18 = vld [vmem:[%s12762_s10] ss:$0 sm:$0xff] }
 0x855   : > { %v5400_v47 = vpop.xlane.xlu1 %5399  ;;  %v5403_v13 = vpop.xlane.xlu0 %5402 }
 0x856   : > { %8886 = vrsqrt.f32 %v5523_v61  ;;  %v5492_v19 = vmul.f32 0.015625, %v5400_v47  ;;  %v5493_v5 = vmul.f32 0.015625, %v5403_v13 }
 0x858   : > { %v5524_v21 = vadd.f32 1e-05, %v5492_v19  ;;  %v5525_v26 = vadd.f32 1e-05, %v5493_v5 }
 0x859   : > { %v5406_v20 = vpop.xlane.xlu1 %5405 }
 0x85a   : > { %8888 = vrsqrt.f32 %v5524_v21  ;;  %v5494_v6 = vmul.f32 0.015625, %v5406_v20 }
 0x85b   : > { %8890 = vrsqrt.f32 %v5525_v26 }
 0x85c   : > { %v5526_v30 = vadd.f32 1e-05, %v5494_v6 }
 0x85e   : > { %8892 = vrsqrt.f32 %v5526_v30 }
 0x863   : > { %v8887_v29 = vpop.eup %8886 }
 0x864   : > { %v5587_v44 = vmul.f32 %v8887_v29, %v11325_v40 }
 0x866   : > { %v5625_v20 = vmul.f32 %v11532_v1, %v5587_v44 }
 0x867   : > { %v8889_v43 = vpop.eup %8888  ;;  %v5409_v61 = vpop.xlane.xlu0 %5408 }
 0x868   : > { %v8891_v47 = vpop.eup %8890  ;;  %v5495_v13 = vmul.f32 0.015625, %v5409_v61  ;;  %v5588_v5 = vmul.f32 %v8889_v43, %v11330_v57  ;;  %v5663_v44 = vadd.f32 %v11540_v18, %v5625_v20 }
 0x869   : > { %v5589_v21 = vmul.f32 %v8891_v47, %v11333_v16 }
 0x86a   : > { %v5527_v40 = vadd.f32 1e-05, %v5495_v13  ;;  %v5626_v19 = vmul.f32 %v11532_v1, %v5588_v5 }
 0x86b   : > { %v8893_v26 = vpop.eup %8892  ;;  %v5627_v6 = vmul.f32 %v11532_v1, %v5589_v21  ;;  %v5412_v30 = vpop.xlane.xlu1 %5411 }
 0x86c   : > { %v5415_v29 = vpop.xlane.xlu0 %5414  ;;  %v5590_v61 = vmul.f32 %v8893_v26, %v11341_v33  ;;  %8894 = vrsqrt.f32 %v5527_v40  ;;  %v5496_v57 = vmul.f32 0.015625, %v5412_v30  ;;  %v5664_v43 = vadd.f32 %v11540_v18, %v5626_v19 }
 0x86d   : > { %v5497_v16 = vmul.f32 0.015625, %v5415_v29  ;;  %v5665_v5 = vadd.f32 %v11540_v18, %v5627_v6 }
 0x86e   : > { %v5628_v47 = vmul.f32 %v11532_v1, %v5590_v61  ;;  %v5528_v50 = vadd.f32 1e-05, %v5496_v57  ;;  %v5695_v21 = vpack.c.bf16 %v5664_v43, %v5663_v44 }
 0x86f   : > { %v5529_v13 = vadd.f32 1e-05, %v5497_v16  ;;  %v5418_v3 = vpop.xlane.xlu1 %5417 }
 0x870   : > { %v5421_v36 = vpop.xlane.xlu0 %5420  ;;  %v5666_v24 = vadd.f32 %v11540_v18, %v5628_v47  ;;  %8896 = vrsqrt.f32 %v5528_v50  ;;  %v5498_v33 = vmul.f32 0.015625, %v5418_v3  ;;  %8416 = vmatprep.mubr.msk.bf16.mxu0 %vm613_vm0, %v5695_v21 }
 0x871   : > { %v5499_v40 = vmul.f32 0.015625, %v5421_v36  ;;  %8898 = vrsqrt.f32 %v5529_v13 }
 0x872   : > { %v5696_v20 = vpack.c.bf16 %v5666_v24, %v5665_v5  ;;  %v5530_v26 = vadd.f32 1e-05, %v5498_v33 }
 0x873   : > { %v5531_v19 = vadd.f32 1e-05, %v5499_v40  ;;  %v5424_v30 = vpop.xlane.xlu1 %5423 }
 0x874   : > { %v5427_v29 = vpop.xlane.xlu0 %5426  ;;  %8900 = vrsqrt.f32 %v5530_v26  ;;  %v5500_v61 = vmul.f32 0.015625, %v5424_v30  ;;  %8417 = vmatmul.mubr.msk.bf16.vlgmr.msra.gmra.mxu0 %vm613_vm0, %v5696_v20 }
 0x875   : > { %v5501_v57 = vmul.f32 0.015625, %v5427_v29  ;;  %8902 = vrsqrt.f32 %v5531_v19 }
 0x876   : > { %v5532_v6 = vadd.f32 1e-05, %v5500_v61 }
 0x877   : > { %v5533_v16 = vadd.f32 1e-05, %v5501_v57  ;;  %v5430_v44 = vpop.xlane.xlu1 %5429 }
 0x878   : > { %v5433_v50 = vpop.xlane.xlu0 %5432  ;;  %8904 = vrsqrt.f32 %v5532_v6  ;;  %v5502_v3 = vmul.f32 0.015625, %v5430_v44 }
 0x879   : > { %v5503_v36 = vmul.f32 0.015625, %v5433_v50  ;;  %v8895_v43 = vpop.eup %8894  ;;  %8906 = vrsqrt.f32 %v5533_v16 }
 0x87a   : > { %v5534_v24 = vadd.f32 1e-05, %v5502_v3  ;;  %v5591_v13 = vmul.f32 %v8895_v43, %v11349_v63 }
 0x87b   : > { %v5535_v47 = vadd.f32 1e-05, %v5503_v36  ;;  %v5436_v5 = vpop.xlane.xlu1 %5435 }
 0x87c   : > { %v5439_v21 = vpop.xlane.xlu0 %5438  ;;  %8908 = vrsqrt.f32 %v5534_v24  ;;  %v5504_v33 = vmul.f32 0.015625, %v5436_v5  ;;  %v5629_v26 = vmul.f32 %v11532_v1, %v5591_v13 }
 0x87d   : > { %v5505_v40 = vmul.f32 0.015625, %v5439_v21  ;;  %v8897_v20 = vpop.eup %8896  ;;  %8910 = vrsqrt.f32 %v5535_v47 }
 0x87e   : > { %v8899_v19 = vpop.eup %8898  ;;  %v5536_v30 = vadd.f32 1e-05, %v5504_v33  ;;  %v5592_v61 = vmul.f32 %v8897_v20, %v11354_v10  ;;  %v5667_v36 = vadd.f32 %v11540_v18, %v5629_v26 }
 0x87f   : > { %v5537_v29 = vadd.f32 1e-05, %v5505_v40  ;;  %v5593_v57 = vmul.f32 %v8899_v19, %v11357_v25  ;;  %v5442_v6 = vpop.xlane.xlu1 %5441 }
 0x880   : > { %v5445_v16 = vpop.xlane.xlu0 %5444  ;;  %8912 = vrsqrt.f32 %v5536_v30  ;;  %v5506_v63 = vmul.f32 0.015625, %v5442_v6  ;;  %v5630_v50 = vmul.f32 %v11532_v1, %v5592_v61 }
 0x881   : > { %v5507_v44 = vmul.f32 0.015625, %v5445_v16  ;;  %v8901_v3 = vpop.eup %8900  ;;  %8914 = vrsqrt.f32 %v5537_v29  ;;  %v5631_v21 = vmul.f32 %v11532_v1, %v5593_v57 }
 0x882   : > { %v8903_v43 = vpop.eup %8902  ;;  %v5594_v24 = vmul.f32 %v8901_v3, %v11365_v58  ;;  %v5538_v47 = vadd.f32 1e-05, %v5506_v63  ;;  %v5668_v10 = vadd.f32 %v11540_v18, %v5630_v50 }
 0x883   : > { %v5539_v13 = vadd.f32 1e-05, %v5507_v44  ;;  %v5448_v5 = vpop.xlane.xlu1 %5447  ;;  %v5595_v33 = vmul.f32 %v8903_v43, %v11368_v4  ;;  %v5669_v44 = vadd.f32 %v11540_v18, %v5631_v21 }
 0x884   : > { %v5451_v25 = vpop.xlane.xlu0 %5450  ;;  %8916 = vrsqrt.f32 %v5538_v47  ;;  %v5508_v40 = vmul.f32 0.015625, %v5448_v5  ;;  %v5697_v19 = vpack.c.bf16 %v5668_v10, %v5667_v36  ;;  %v5632_v26 = vmul.f32 %v11532_v1, %v5594_v24 }
 0x885   : > { %v5509_v20 = vmul.f32 0.015625, %v5451_v25  ;;  %v8905_v30 = vpop.eup %8904  ;;  %8918 = vrsqrt.f32 %v5539_v13  ;;  %v5633_v58 = vmul.f32 %v11532_v1, %v5595_v33 }
 0x886   : > { %v8907_v29 = vpop.eup %8906  ;;  %v5540_v61 = vadd.f32 1e-05, %v5508_v40  ;;  %8420 = vmatprep.mubr.msk.bf16.mxu0 %vm613_vm0, %v5697_v19  ;;  %v5596_v16 = vmul.f32 %v8905_v30, %v11380_v32  ;;  %v5670_v50 = vadd.f32 %v11540_v18, %v5632_v26 }
 0x887   : > { %v5541_v6 = vadd.f32 1e-05, %v5509_v20  ;;  %v5597_v57 = vmul.f32 %v8907_v29, %v11383_v8  ;;  %v5454_v4 = vpop.xlane.xlu1 %5453  ;;  %v5671_v13 = vadd.f32 %v11540_v18, %v5633_v58 }
 0x888   : > { %v5457_v63 = vpop.xlane.xlu0 %5456  ;;  %8920 = vrsqrt.f32 %v5540_v61  ;;  %v5510_v3 = vmul.f32 0.015625, %v5454_v4  ;;  %v5634_v43 = vmul.f32 %v11532_v1, %v5596_v16  ;;  %v5698_v47 = vpack.c.bf16 %v5670_v50, %v5669_v44 }
 0x889   : > { %v5511_v36 = vmul.f32 0.015625, %v5457_v63  ;;  %v8909_v24 = vpop.eup %8908  ;;  %8922 = vrsqrt.f32 %v5541_v6  ;;  %v5635_v40 = vmul.f32 %v11532_v1, %v5597_v57 }
 0x88a   : > { %v8911_v10 = vpop.eup %8910  ;;  %v5598_v32 = vmul.f32 %v8909_v24, %v11395_v34  ;;  %v5542_v8 = vadd.f32 1e-05, %v5510_v3  ;;  %v5672_v25 = vadd.f32 %v11540_v18, %v5634_v43  ;;  %8421 = vmatmul.mubr.msk.bf16.gmra.mxu0 %vm613_vm0, %v5698_v47 }
 0x88b   : > { %v5543_v5 = vadd.f32 1e-05, %v5511_v36  ;;  %v5460_v21 = vpop.xlane.xlu1 %5459  ;;  %v5599_v20 = vmul.f32 %v8911_v10, %v11398_v7  ;;  %v5673_v44 = vadd.f32 %v11540_v18, %v5635_v40 }
 0x88c   : > { %v5463_v33 = vpop.xlane.xlu0 %5462  ;;  %8924 = vrsqrt.f32 %v5542_v8  ;;  %v5512_v19 = vmul.f32 0.015625, %v5460_v21  ;;  %v5699_v26 = vpack.c.bf16 %v5672_v25, %v5671_v13  ;;  %v5636_v34 = vmul.f32 %v11532_v1, %v5598_v32 }
 0x88d   : > { %v5513_v30 = vmul.f32 0.015625, %v5463_v33  ;;  %v8913_v58 = vpop.eup %8912  ;;  %8926 = vrsqrt.f32 %v5543_v5  ;;  %v5637_v29 = vmul.f32 %v11532_v1, %v5599_v20 }
 0x88e   : > { %v8915_v61 = vpop.eup %8914  ;;  %v5544_v6 = vadd.f32 1e-05, %v5512_v19  ;;  %8424 = vmatprep.mubr.msk.bf16.mxu0 %vm613_vm0, %v5699_v26  ;;  %v5600_v4 = vmul.f32 %v8913_v58, %v11410_v11  ;;  %v5674_v50 = vadd.f32 %v11540_v18, %v5636_v34 }
 0x88f   : > { %v5545_v16 = vadd.f32 1e-05, %v5513_v30  ;;  %v5601_v57 = vmul.f32 %v8915_v61, %v11413_v12  ;;  %v5466_v7 = vpop.xlane.xlu1 %5465  ;;  %v5675_v13 = vadd.f32 %v11540_v18, %v5637_v29 }
 0x890   : > { %v5469_v63 = vpop.xlane.xlu0 %5468  ;;  %8928 = vrsqrt.f32 %v5544_v6  ;;  %v5514_v3 = vmul.f32 0.015625, %v5466_v7  ;;  %v5638_v43 = vmul.f32 %v11532_v1, %v5600_v4  ;;  %v5700_v47 = vpack.c.bf16 %v5674_v50, %v5673_v44 }
 0x891   : > { %v5515_v36 = vmul.f32 0.015625, %v5469_v63  ;;  %v8917_v24 = vpop.eup %8916  ;;  %8930 = vrsqrt.f32 %v5545_v16  ;;  %v5639_v21 = vmul.f32 %v11532_v1, %v5601_v57 }
 0x892   : > { %v8919_v10 = vpop.eup %8918  ;;  %v5602_v11 = vmul.f32 %v8917_v24, %v11425_v15  ;;  %v5546_v12 = vadd.f32 1e-05, %v5514_v3  ;;  %v5676_v8 = vadd.f32 %v11540_v18, %v5638_v43  ;;  %8425 = vmatmul.mubr.msk.bf16.gmra.mxu0 %vm613_vm0, %v5700_v47 }
 0x893   : > { %v5547_v32 = vadd.f32 1e-05, %v5515_v36  ;;  %v5472_v5 = vpop.xlane.xlu1 %5471  ;;  %v5603_v33 = vmul.f32 %v8919_v10, %v11428_v45  ;;  %v5677_v16 = vadd.f32 %v11540_v18, %v5639_v21 }
 0x894   : > { %v5475_v25 = vpop.xlane.xlu0 %5474  ;;  %8932 = vrsqrt.f32 %v5546_v12  ;;  %v5516_v40 = vmul.f32 0.015625, %v5472_v5  ;;  %v5701_v19 = vpack.c.bf16 %v5676_v8, %v5675_v13  ;;  %v5640_v15 = vmul.f32 %v11532_v1, %v5602_v11 }
 0x895   : > { %v5517_v20 = vmul.f32 0.015625, %v5475_v25  ;;  %v8921_v30 = vpop.eup %8920  ;;  %8934 = vrsqrt.f32 %v5547_v32  ;;  %v5641_v26 = vmul.f32 %v11532_v1, %v5603_v33 }
 0x896   : > { %v8923_v58 = vpop.eup %8922  ;;  %v5548_v34 = vadd.f32 1e-05, %v5516_v40  ;;  %8428 = vmatprep.mubr.msk.bf16.mxu0 %vm613_vm0, %v5701_v19  ;;  %v5604_v61 = vmul.f32 %v8921_v30, %v11437_v52  ;;  %v5678_v4 = vadd.f32 %v11540_v18, %v5640_v15 }
 0x897   : > { %v5549_v29 = vadd.f32 1e-05, %v5517_v20  ;;  %v5605_v6 = vmul.f32 %v8923_v58, %v11440_v49  ;;  %v5478_v45 = vpop.xlane.xlu1 %5477  ;;  %v5679_v50 = vadd.f32 %v11540_v18, %v5641_v26 }
 0x898   : > { %8936 = vrsqrt.f32 %v5548_v34  ;;  %v5518_v57 = vmul.f32 0.015625, %v5478_v45  ;;  %v5642_v7 = vmul.f32 %v11532_v1, %v5604_v61  ;;  %v5702_v44 = vpack.c.bf16 %v5678_v4, %v5677_v16 }
 0x899   : > { %v8925_v63 = vpop.eup %8924  ;;  %8938 = vrsqrt.f32 %v5549_v29  ;;  %v5643_v43 = vmul.f32 %v11532_v1, %v5605_v6 }
 0x89a   : > { %v8927_v3 = vpop.eup %8926  ;;  %v5606_v36 = vmul.f32 %v8925_v63, %v11449_v22  ;;  %v5550_v52 = vadd.f32 1e-05, %v5518_v57  ;;  %v5680_v49 = vadd.f32 %v11540_v18, %v5642_v7  ;;  %8429 = vmatmul.mubr.msk.bf16.gmra.mxu0 %vm613_vm0, %v5702_v44 }
 0x89b   : > { %v5607_v24 = vmul.f32 %v8927_v3, %v11452_v27  ;;  %v5681_v12 = vadd.f32 %v11540_v18, %v5643_v43 }
 0x89c   : > { %8940 = vrsqrt.f32 %v5550_v52  ;;  %v5703_v47 = vpack.c.bf16 %v5680_v49, %v5679_v50  ;;  %v5644_v13 = vmul.f32 %v11532_v1, %v5606_v36 }
 0x89d   : > { %v8929_v10 = vpop.eup %8928  ;;  %v5645_v8 = vmul.f32 %v11532_v1, %v5607_v24 }
 0x89e   : > { %v8931_v11 = vpop.eup %8930  ;;  %8432 = vmatprep.mubr.msk.bf16.mxu0 %vm613_vm0, %v5703_v47  ;;  %v5682_v22 = vadd.f32 %v11540_v18, %v5644_v13  ;;  %v5608_v32 = vmul.f32 %v8929_v10, %v11461_v37 }
 0x89f   : > { %v5609_v5 = vmul.f32 %v8931_v11, %v11464_v28  ;;  %v5683_v20 = vadd.f32 %v11540_v18, %v5645_v8 }
 0x8a0   : > { %v5704_v25 = vpack.c.bf16 %v5682_v22, %v5681_v12  ;;  %v5646_v27 = vmul.f32 %v11532_v1, %v5608_v32 }
 0x8a1   : > { %v8933_v21 = vpop.eup %8932  ;;  %v5647_v30 = vmul.f32 %v11532_v1, %v5609_v5 }
 0x8a2   : > { %v8935_v33 = vpop.eup %8934  ;;  %v5610_v40 = vmul.f32 %v8933_v21, %v11473_v2  ;;  %v5684_v19 = vadd.f32 %v11540_v18, %v5646_v27  ;;  %8433 = vmatmul.mubr.msk.bf16.gmra.mxu0 %vm613_vm0, %v5704_v25 }
 0x8a3   : > { %v5611_v37 = vmul.f32 %v8935_v33, %v11476_v38  ;;  %v5685_v34 = vadd.f32 %v11540_v18, %v5647_v30 }
 0x8a4   : > { %v5705_v15 = vpack.c.bf16 %v5684_v19, %v5683_v20  ;;  %v5648_v28 = vmul.f32 %v11532_v1, %v5610_v40 }
 0x8a5   : > { %v8937_v26 = vpop.eup %8936  ;;  %v5649_v61 = vmul.f32 %v11532_v1, %v5611_v37 }
 0x8a6   : > { %v8939_v58 = vpop.eup %8938  ;;  %8436 = vmatprep.mubr.msk.bf16.mxu0 %vm613_vm0, %v5705_v15  ;;  %v5686_v2 = vadd.f32 %v11540_v18, %v5648_v28  ;;  %v5612_v29 = vmul.f32 %v8937_v26, %v11485_v46 }
 0x8a7   : > { %v5613_v6 = vmul.f32 %v8939_v58, %v11488_v56  ;;  %v5687_v57 = vadd.f32 %v11540_v18, %v5649_v61  ;;  %v8559_v58 = vld [vmem:[%s12765_s13 + $0x30] sm:$0xff]   ;;  %v8564_v61 = vld [vmem:[%s12765_s13 + $0x8] sm:$0xff]  }
 0x8a8   : > { %v5706_v45 = vpack.c.bf16 %v5686_v2, %v5685_v34  ;;  %v5650_v38 = vmul.f32 %v11532_v1, %v5612_v29  ;;  %v8562_v34 = vld [vmem:[%s12765_s13 + $0x18] sm:$0xff]   ;;  %v8563_v2 = vld [vmem:[%s12765_s13 + $0x10] sm:$0xff]   ;;  %v11671_v29 = vld [vmem:[%s12764_s12] ss:$0 sm:$0xff] }
 0x8a9   : > { %v8941_v16 = vpop.eup %8940  ;;  %v5651_v63 = vmul.f32 %v11532_v1, %v5613_v6 }
 0x8aa   : > { %v5614_v4 = vmul.f32 %v8941_v16, %v11497_v51  ;;  %v5688_v7 = vadd.f32 %v11540_v18, %v5650_v38  ;;  %8437 = vmatmul.mubr.msk.bf16.gmra.mxu0 %vm613_vm0, %v5706_v45 }
 0x8ab   : > { %v5689_v56 = vadd.f32 %v11540_v18, %v5651_v63 }
 0x8ac   : > { %v5707_v44 = vpack.c.bf16 %v5688_v7, %v5687_v57  ;;  %v5652_v46 = vmul.f32 %v11532_v1, %v5614_v4 }
 0x8ae   : > { %8440 = vmatprep.mubr.msk.bf16.mxu0 %vm613_vm0, %v5707_v44  ;;  %v5690_v50 = vadd.f32 %v11540_v18, %v5652_v46 }
 0x8b0   : > { %v5708_v3 = vpack.c.bf16 %v5690_v50, %v5689_v56 }
 0x8b2   : > { %8441 = vmatmul.mubr.msk.bf16.gmra.mxu0 %vm613_vm0, %v5708_v3 }
 0x8b7   : > { %v5481_v51 = vpop.xlane.xlu0 %5480 }
 0x8b8   : > { %v5519_v36 = vmul.f32 0.015625, %v5481_v51 }
 0x8ba   : > { %v5551_v52 = vadd.f32 1e-05, %v5519_v36 }
 0x8bb   : > { %v5484_v49 = vpop.xlane.xlu1 %5483  ;;  %v5487_v43 = vpop.xlane.xlu0 %5486 }
 0x8bc   : > { %8942 = vrsqrt.f32 %v5551_v52  ;;  %v5520_v24 = vmul.f32 0.015625, %v5484_v49  ;;  %v5521_v47 = vmul.f32 0.015625, %v5487_v43 }
 0x8be   : > { %v5552_v13 = vadd.f32 1e-05, %v5520_v24  ;;  %v5553_v10 = vadd.f32 1e-05, %v5521_v47 }
 0x8bf   : > { %v5490_v11 = vpop.xlane.xlu1 %5489 }
 0x8c0   : > { %8944 = vrsqrt.f32 %v5552_v13  ;;  %v5522_v12 = vmul.f32 0.015625, %v5490_v11 }
 0x8c1   : > { %8946 = vrsqrt.f32 %v5553_v10  ;;  %v8565_v10 = vld [vmem:[%s12765_s13] sm:$0xff]  }
 0x8c2   : > { %v5554_v22 = vadd.f32 1e-05, %v5522_v12 }
 0x8c4   : > { %8948 = vrsqrt.f32 %v5554_v22 }
 0x8c9   : > { %v8943_v32 = vpop.eup %8942 }
 0x8ca   : > { %v5615_v8 = vmul.f32 %v8943_v32, %v11505_v60 }
 0x8cc   : > { %v5653_v21 = vmul.f32 %v11532_v1, %v5615_v8 }
 0x8cd   : > { %v8945_v5 = vpop.eup %8944 }
 0x8ce   : > { %v8947_v25 = vpop.eup %8946  ;;  %v5616_v27 = vmul.f32 %v8945_v5, %v11510_v31  ;;  %v5691_v30 = vadd.f32 %v11540_v18, %v5653_v21 }
 0x8cf   : > { %v5617_v33 = vmul.f32 %v8947_v25, %v11513_v23 }
 0x8d0   : > { %v5654_v40 = vmul.f32 %v11532_v1, %v5616_v27 }
 0x8d1   : > { %v8949_v20 = vpop.eup %8948  ;;  %v5655_v15 = vmul.f32 %v11532_v1, %v5617_v33 }
 0x8d2   : > { %v5618_v19 = vmul.f32 %v8949_v20, %v11521_v17  ;;  %v5692_v37 = vadd.f32 %v11540_v18, %v5654_v40  ;;  %v8558_v17 = vld [vmem:[%s12765_s13 + $0x38] sm:$0xff]  }
 0x8d3   : > { %v5693_v31 = vadd.f32 %v11540_v18, %v5655_v15  ;;  %8448 = vmatprep.subr.bf16.mxu1 %v8558_v17 }
 0x8d4   : > { %v5709_v60 = vpack.c.bf16 %v5692_v37, %v5691_v30  ;;  %v5656_v28 = vmul.f32 %v11532_v1, %v5618_v19  ;;  %8449 = vmatpush3.bf16.msra.mxu1 %v8558_v17  ;;  %v8560_v1 = vld [vmem:[%s12765_s13 + $0x28] sm:$0xff]  }
 0x8d5   : > { %8450 = vmatprep.subr.bf16.mxu1 %v8559_v58 }
 0x8d6   : > { %8444 = vmatprep.mubr.msk.bf16.mxu0 %vm613_vm0, %v5709_v60  ;;  %v5694_v23 = vadd.f32 %v11540_v18, %v5656_v28  ;;  %v8561_v18 = vld [vmem:[%s12765_s13 + $0x20] sm:$0xff]  }
 0x8d8   : > { %v5710_v26 = vpack.c.bf16 %v5694_v23, %v5693_v31  ;;  %8451 = vmatpush3.bf16.msra.mxu1 %v8559_v58 }
 0x8d9   : > { %8452 = vmatprep.subr.bf16.mxu1 %v8560_v1 }
 0x8da   : > { %8445 = vmatmul.mubr.msk.bf16.gmra.mxu0 %vm613_vm0, %v5710_v26 }
 0x8dc   : > { %8453 = vmatpush3.bf16.msra.mxu1 %v8560_v1 }
 0x8dd   : > { %8454 = vmatprep.subr.bf16.mxu1 %v8561_v18 }
 0x8e0   : > { %8455 = vmatpush3.bf16.msra.mxu1 %v8561_v18 }
 0x8e1   : > { %8456 = vmatprep.subr.bf16.mxu1 %v8562_v34 }
 0x8e4   : > { %8457 = vmatpush3.bf16.msra.mxu1 %v8562_v34 }
 0x8e5   : > { %8458 = vmatprep.subr.bf16.mxu1 %v8563_v2 }
 0x8e8   : > { %8459 = vmatpush3.bf16.msra.mxu1 %v8563_v2 }
 0x8e9   : > { %8460 = vmatprep.subr.bf16.mxu1 %v8564_v61 }
 0x8ec   : > { %8461 = vmatpush3.bf16.msra.mxu1 %v8564_v61 }
 0x8ed   : > { %8462 = vmatprep.subr.bf16.mxu1 %v8565_v10 }
 0x8f0   : > { %8463 = vmatpush3.bf16.msra.mxu1 %v8565_v10 }
 0x934   : > { %v8418_v6 = vpop.f32.mrf.mxu0 }
 0x935   : > { %v11677_v45 = vadd.f32 %v8418_v6, %v11671_v29 }
 0x936   : > { %v5832_v38 = vpop.f32.mrf.mxu0 }
 0x937   : > { %v11680_v16 = vmul.f32 0.70710677, %v11677_v45  ;;  %v11683_v4 = vadd.f32 %v11671_v29, %v5832_v38 }
 0x938   : > { %v8419_v57 = vpop.f32.mrf.mxu0 }
 0x939   : > { %v6089_v7 = vand.u32 2147483647, %v11680_v16  ;;  %v11687_v63 = vmul.f32 0.70710677, %v11683_v4  ;;  %v11690_v44 = vadd.f32 %v8419_v57, %v11671_v29  ;;  %vm6025_vm2 = vcmp.ge.f32.partialorder %v11680_v16, 0.0 }
 0x93a   : > { %v5835_v46 = vpop.f32.mrf.mxu0  ;;  %v12869_v16 = vmov -1.0  }
 0x93b   : > { %v6121_v56 = vmul.f32 0.3275911, %v6089_v7  ;;  %v6087_v50 = vand.u32 2147483647, %v11687_v63  ;;  %v11694_v3 = vmul.f32 0.70710677, %v11690_v44  ;;  %v11697_v51 = vadd.f32 %v11671_v29, %v5835_v46 }
 0x93c   : > { %v6537_v60 = vsub.f32 0.0, %v6089_v7  ;;  %vm6023_vm3 = vcmp.ge.f32.partialorder %v11687_v63, 0.0 }
 0x93d   : > { %v6153_v36 = vadd.f32 1.0, %v6121_v56  ;;  %v6119_v52 = vmul.f32 0.3275911, %v6087_v50  ;;  %v6090_v49 = vand.u32 2147483647, %v11694_v3  ;;  %v6535_v38 = vsub.f32 0.0, %v6087_v50 }
 0x93e   : > { %v11701_v43 = vmul.f32 0.70710677, %v11697_v51  ;;  %v6569_v6 = vmul.f32 %v6537_v60, %v6089_v7  ;;  %v11758_v60 = vmul.f32 0.5, %v11677_v45  ;;  %vm6026_vm4 = vcmp.ge.f32.partialorder %v11694_v3, 0.0 }
 0x93f   : > { %8950 = vrcp.f32 %v6153_v36  ;;  %v6151_v24 = vadd.f32 1.0, %v6119_v52  ;;  %v6122_v47 = vmul.f32 0.3275911, %v6090_v49  ;;  %v6538_v36 = vsub.f32 0.0, %v6090_v49 }
 0x940   : > { %v11704_v13 = vand.u32 2147483647, %v11701_v43  ;;  %v6567_v7 = vmul.f32 %v6535_v38, %v6087_v50  ;;  %vm6024_vm5 = vcmp.ge.f32.partialorder %v11701_v43, 0.0 }
 0x941   : > { %8952 = vrcp.f32 %v6151_v24  ;;  %v6154_v11 = vadd.f32 1.0, %v6122_v47 }
 0x942   : > { %v6120_v12 = vmul.f32 0.3275911, %v11704_v13 }
 0x943   : > { %8954 = vrcp.f32 %v6154_v11 }
 0x944   : > { %v6152_v22 = vadd.f32 1.0, %v6120_v12 }
 0x946   : > { %8956 = vrcp.f32 %v6152_v22  ;;  %v6603_v22 = vmul.f32 1.442695, %v6569_v6  ;;  %v11780_v6 = vsel %vm6023_vm3, 1.0, %v12869_v16 }
 0x94a   : > { %v8422_v32 = vpop.f32.mrf.mxu0 }
 0x94b   : > { %v11713_v5 = vadd.f32 %v8422_v32, %v11671_v29 }
 0x94c   : > { %v11710_v8 = vpop.eup %8950  ;;  %v5848_v27 = vpop.f32.mrf.mxu0 }
 0x94d   : > { %v6249_v25 = vmul.f32 1.0614054, %v11710_v8  ;;  %v11717_v21 = vmul.f32 0.70710677, %v11713_v5  ;;  %v11720_v33 = vadd.f32 %v11671_v29, %v5848_v27 }
 0x94e   : > { %v11722_v40 = vpop.eup %8952  ;;  %v8423_v58 = vpop.f32.mrf.mxu0 }
 0x94f   : > { %v6281_v20 = vadd.f32 -1.4531521, %v6249_v25  ;;  %v6247_v19 = vmul.f32 1.0614054, %v11722_v40  ;;  %v11726_v30 = vand.u32 2147483647, %v11717_v21  ;;  %v11746_v24 = vadd.f32 %v8423_v58, %v11671_v29 }
 0x950   : > { %v11728_v37 = vpop.eup %8954  ;;  %v11732_v28 = vmul.f32 0.70710677, %v11720_v33  ;;  %v5851_v47 = vpop.f32.mrf.mxu0  ;;  %v6570_v25 = vmul.f32 %v6538_v36, %v6090_v49  ;;  %v11763_v49 = vmul.f32 0.5, %v11683_v4  ;;  %vm6029_vm6 = vcmp.ge.f32.partialorder %v11717_v21, 0.0 }
 0x951   : > { %v6313_v15 = vmul.f32 %v11710_v8, %v6281_v20  ;;  %v6279_v31 = vadd.f32 -1.4531521, %v6247_v19  ;;  %v6250_v23 = vmul.f32 1.0614054, %v11728_v37  ;;  %v6125_v26 = vmul.f32 0.3275911, %v11726_v30 }
 0x952   : > { %v11737_v17 = vand.u32 2147483647, %v11732_v28  ;;  %v11750_v27 = vadd.f32 %v11671_v29, %v5851_v47  ;;  %v6536_v19 = vsub.f32 0.0, %v11704_v13  ;;  %vm6027_vm7 = vcmp.ge.f32.partialorder %v11732_v28, 0.0 }
 0x953   : > { %v11739_v1 = vpop.eup %8956  ;;  %v6345_v18 = vadd.f32 1.4214138, %v6313_v15  ;;  %v6311_v34 = vmul.f32 %v11722_v40, %v6279_v31  ;;  %v6282_v2 = vadd.f32 -1.4531521, %v6250_v23  ;;  %v6157_v61 = vadd.f32 1.0, %v6125_v26 }
 0x954   : > { %v6248_v57 = vmul.f32 1.0614054, %v11739_v1  ;;  %v6123_v46 = vmul.f32 0.3275911, %v11737_v17  ;;  %v11755_v15 = vmul.f32 0.70710677, %v11746_v24  ;;  %v6568_v4 = vmul.f32 %v6536_v19, %v11704_v13 }
 0x955   : > { %v6314_v56 = vmul.f32 %v11728_v37, %v6282_v2  ;;  %8958 = vrcp.f32 %v6157_v61  ;;  %v6377_v10 = vmul.f32 %v11710_v8, %v6345_v18  ;;  %v6343_v11 = vadd.f32 1.4214138, %v6311_v34 }
 0x956   : > { %v6280_v52 = vadd.f32 -1.4531521, %v6248_v57  ;;  %v6155_v12 = vadd.f32 1.0, %v6123_v46  ;;  %v6599_v23 = vmul.f32 1.442695, %v6567_v7  ;;  %v11774_v34 = vsel %vm6025_vm2, 1.0, %v12869_v16 }
 0x957   : > { %v6346_v32 = vadd.f32 1.4214138, %v6314_v56  ;;  %v6409_v31 = vadd.f32 -0.28449672, %v6377_v10  ;;  %v6375_v50 = vmul.f32 %v11722_v40, %v6343_v11  ;;  %v11767_v26 = vand.u32 2147483647, %v11755_v15 }
 0x958   : > { %8960 = vrcp.f32 %v6155_v12  ;;  %v6312_v20 = vmul.f32 %v11739_v1, %v6280_v52  ;;  %v6605_v18 = vmul.f32 1.442695, %v6570_v25  ;;  %v11771_v45 = vmul.f32 0.70710677, %v11750_v27  ;;  %v8426_v52 = vpop.f32.mrf.mxu0 }
 0x959   : > { %8962 = vpow2.f32 %v6603_v22  ;;  %v6378_v58 = vmul.f32 %v11728_v37, %v6346_v32  ;;  %v6126_v63 = vmul.f32 0.3275911, %v11767_v26  ;;  %v6441_v61 = vmul.f32 %v11710_v8, %v6409_v31 }
 0x95a   : > { %v6344_v2 = vadd.f32 1.4214138, %v6312_v20  ;;  %v6407_v38 = vadd.f32 -0.28449672, %v6375_v50  ;;  %v11783_v57 = vand.u32 2147483647, %v11771_v45  ;;  %8964 = vpow2.f32 %v6599_v23 }
 0x95b   : > { %v6158_v46 = vadd.f32 1.0, %v6126_v63  ;;  %v6410_v56 = vadd.f32 -0.28449672, %v6378_v58  ;;  %8966 = vpow2.f32 %v6605_v18  ;;  %v6541_v13 = vsub.f32 0.0, %v11726_v30  ;;  %v5864_v18 = vpop.f32.mrf.mxu0 }
 0x95c   : > { %v6124_v36 = vmul.f32 0.3275911, %v11783_v57  ;;  %v6376_v10 = vmul.f32 %v11739_v1, %v6344_v2  ;;  %v6601_v11 = vmul.f32 1.442695, %v6568_v4  ;;  %v6539_v12 = vsub.f32 0.0, %v11737_v17 }
 0x95d   : > { %8968 = vrcp.f32 %v6158_v46  ;;  %v6473_v22 = vadd.f32 0.2548296, %v6441_v61  ;;  %v6439_v7 = vmul.f32 %v11722_v40, %v6407_v38  ;;  %v11796_v20 = vmul.f32 0.5, %v11690_v44 }
 0x95e   : > { %v6156_v25 = vadd.f32 1.0, %v6124_v36  ;;  %v11801_v19 = vsel %vm6026_vm4, 1.0, %v12869_v16  ;;  %v11804_v31 = vmul.f32 0.5, %v11697_v51  ;;  %v11807_v50 = vadd.f32 %v8426_v52, %v11671_v29 }
 0x95f   : > { %v6442_v23 = vmul.f32 %v11728_v37, %v6410_v56  ;;  %v11813_v58 = vsel %vm6024_vm5, 1.0, %v12869_v16  ;;  %v6573_v44 = vmul.f32 %v6541_v13, %v11726_v30  ;;  %v6408_v2 = vadd.f32 -0.28449672, %v6376_v10 }
 0x960   : > { %8970 = vrcp.f32 %v6156_v25  ;;  %v11819_v51 = vmul.f32 0.5, %v11713_v5  ;;  %v6505_v63 = vmul.f32 %v11710_v8, %v6473_v22  ;;  %v6471_v61 = vadd.f32 0.2548296, %v6439_v7  ;;  %v8427_v7 = vpop.f32.mrf.mxu0 }
 0x961   : > { %8972 = vpow2.f32 %v6601_v11  ;;  %v6571_v43 = vmul.f32 %v6539_v12, %v11737_v17  ;;  %v11827_v30 = vmul.f32 0.70710677, %v11807_v50  ;;  %v11830_v46 = vadd.f32 %v11671_v29, %v5864_v18 }
 0x962   : > { %v11789_v47 = vpop.eup %8958  ;;  %v6474_v5 = vadd.f32 0.2548296, %v6442_v23  ;;  %v6611_v56 = vmul.f32 1.442695, %v6573_v44  ;;  %v6440_v8 = vmul.f32 %v11739_v1, %v6408_v2  ;;  %v11835_v17 = vmul.f32 0.5, %v11720_v33 }
 0x963   : > { %v6253_v32 = vmul.f32 1.0614054, %v11789_v47  ;;  %v11838_v21 = vand.u32 2147483647, %v11827_v30  ;;  %v6503_v11 = vmul.f32 %v11722_v40, %v6471_v61  ;;  %v11842_v12 = vsel %vm6029_vm6, 1.0, %v12869_v16 }
 0x964   : > { %v6607_v22 = vmul.f32 1.442695, %v6571_v43  ;;  %v6542_v25 = vsub.f32 0.0, %v11767_v26  ;;  %v11852_v23 = vmul.f32 0.70710677, %v11830_v46  ;;  %v6506_v40 = vmul.f32 %v11728_v37, %v6474_v5 }
 0x965   : > { %v11816_v3 = vpop.eup %8960  ;;  %v6285_v4 = vadd.f32 -1.4531521, %v6253_v32  ;;  %v11847_v32 = vsel %vm6027_vm7, 1.0, %v12869_v16  ;;  %v6129_v33 = vmul.f32 0.3275911, %v11838_v21  ;;  %8974 = vpow2.f32 %v6611_v56 }
 0x966   : > { %v6251_v38 = vmul.f32 1.0614054, %v11816_v3  ;;  %v8963_v36 = vpop.eup %8962  ;;  %v11857_v2 = vmul.f32 0.5, %v11746_v24  ;;  %v6472_v28 = vadd.f32 0.2548296, %v6440_v8  ;;  %8976 = vpow2.f32 %v6607_v22 }
 0x967   : > { %v6317_v52 = vmul.f32 %v11789_v47, %v6285_v4  ;;  %v6665_v10 = vmul.f32 %v8963_v36, %v6505_v63  ;;  %v8965_v44 = vpop.eup %8964  ;;  %v6161_v61 = vadd.f32 1.0, %v6129_v33  ;;  %v11865_v37 = vand.u32 2147483647, %v11852_v23 }
 0x968   : > { %v6283_v13 = vadd.f32 -1.4531521, %v6251_v38  ;;  %v8967_v4 = vpop.eup %8966  ;;  %v11860_v38 = vadd.f32 %v8427_v7, %v11671_v29  ;;  %v6663_v16 = vmul.f32 %v8965_v44, %v6503_v11  ;;  %vm6030_vm8 = vcmp.ge.f32.partialorder %v11755_v15, 0.0 }
 0x969   : > { %v6349_v63 = vadd.f32 1.4214138, %v6317_v52  ;;  %v6697_v36 = vsub.f32 1.0, %v6665_v10  ;;  %v6574_v5 = vmul.f32 %v6542_v25, %v11767_v26  ;;  %8978 = vrcp.f32 %v6161_v61 }
 0x96a   : > { %v6315_v18 = vmul.f32 %v11816_v3, %v6283_v13  ;;  %v11862_v43 = vpop.eup %8968  ;;  %v6666_v56 = vmul.f32 %v8967_v4, %v6506_v40  ;;  %vm6028_vm9 = vcmp.ge.f32.partialorder %v11771_v45, 0.0  ;;  %v6127_v8 = vmul.f32 0.3275911, %v11865_v37 }
 0x96b   : > { %v6254_v24 = vmul.f32 1.0614054, %v11862_v43  ;;  %v6504_v10 = vmul.f32 %v11739_v1, %v6472_v28  ;;  %v6381_v11 = vmul.f32 %v11789_v47, %v6349_v63  ;;  %v11877_v7 = vmul.f32 0.70710677, %v11860_v38 }
 0x96c   : > { %v6347_v13 = vadd.f32 1.4214138, %v6315_v18  ;;  %v6729_v26 = vmul.f32 %v6697_v36, %v11774_v34  ;;  %v6695_v25 = vsub.f32 1.0, %v6663_v16  ;;  %v6159_v40 = vadd.f32 1.0, %v6127_v8  ;;  %v5867_v18 = vpop.f32.mrf.mxu0 }
 0x96d   : > { %v11872_v52 = vpop.eup %8970  ;;  %v6286_v22 = vadd.f32 -1.4531521, %v6254_v24  ;;  %v6613_v61 = vmul.f32 1.442695, %v6574_v5  ;;  %v6540_v54 = vsub.f32 0.0, %v11783_v57  ;;  %v6698_v28 = vsub.f32 1.0, %v6666_v56 }
 0x96e   : > { %v8973_v33 = vpop.eup %8972  ;;  %v6252_v44 = vmul.f32 1.0614054, %v11872_v52  ;;  %v11884_v1 = vand.u32 2147483647, %v11877_v7  ;;  %v6379_v63 = vmul.f32 %v11816_v3, %v6347_v13  ;;  %8980 = vrcp.f32 %v6159_v40 }
 0x96f   : > { %v6318_v4 = vmul.f32 %v11862_v43, %v6286_v22  ;;  %v6664_v14 = vmul.f32 %v8973_v33, %v6504_v10  ;;  %v6413_v34 = vadd.f32 -0.28449672, %v6381_v11  ;;  %v11888_v36 = vadd.f32 %v11671_v29, %v5867_v18 }
 0x970   : > { %v6284_v24 = vadd.f32 -1.4531521, %v6252_v44  ;;  %v6761_v8 = vadd.f32 1.0, %v6729_v26  ;;  %v6727_v22 = vmul.f32 %v6695_v25, %v11780_v6  ;;  %v6130_v9 = vmul.f32 0.3275911, %v11884_v1  ;;  %v8430_v44 = vpop.f32.mrf.mxu0 }
 0x971   : > { %v6350_v16 = vadd.f32 1.4214138, %v6318_v4  ;;  %v11896_v56 = vsel %vm6030_vm8, 1.0, %v13164_v48  ;;  %v11900_v10 = vmul.f32 0.5, %v11750_v27  ;;  %v11905_v11 = vsel %vm6028_vm9, 1.0, %v13164_v48 }
 0x972   : > { %v6316_v5 = vmul.f32 %v11872_v52, %v6284_v24  ;;  %v6730_v6 = vmul.f32 %v6698_v28, %v11801_v19  ;;  %v6411_v33 = vadd.f32 -0.28449672, %v6379_v63  ;;  %v6572_v26 = vmul.f32 %v6540_v54, %v11783_v57  ;;  %v8975_v15 = vpop.eup %8974 }
 0x973   : > { %v6382_v13 = vmul.f32 %v11862_v43, %v6350_v16  ;;  %v6162_v25 = vadd.f32 1.0, %v6130_v9  ;;  %v6696_v40 = vsub.f32 1.0, %v6664_v14  ;;  %v6445_v18 = vmul.f32 %v11789_v47, %v6413_v34  ;;  %v8977_v19 = vpop.eup %8976 }
 0x974   : > { %8982 = vpow2.f32 %v6613_v61  ;;  %v11911_v27 = vmul.f32 0.70710677, %v11888_v36  ;;  %v11914_v4 = vmul.f32 %v6761_v8, %v11758_v60  ;;  %v6759_v45 = vadd.f32 1.0, %v6727_v22 }
 0x975   : > { %v6348_v24 = vadd.f32 1.4214138, %v6316_v5  ;;  %8984 = vrcp.f32 %v6162_v25  ;;  %v6414_v28 = vadd.f32 -0.28449672, %v6382_v13  ;;  %v11917_v54 = vmul.f32 0.5, %v11807_v50  ;;  %v5880_v5 = vpop.f32.mrf.mxu0 }
 0x976   : > { %v11920_v9 = vand.u32 2147483647, %v11911_v27  ;;  %v11923_v14 = vadd.f32 %v8430_v44, %v11671_v29  ;;  %v11925_v57 = vpop.eup %8978  ;;  %v6762_v61 = vadd.f32 1.0, %v6730_v6  ;;  %v6443_v60 = vmul.f32 %v11816_v3, %v6411_v33 }
 0x977   : > { %v6609_v63 = vmul.f32 1.442695, %v6572_v26  ;;  %v11929_v34 = vmul.f32 0.5, %v11830_v46  ;;  %v6728_v16 = vmul.f32 %v6696_v40, %v11813_v58  ;;  %v6477_v8 = vadd.f32 0.2548296, %v6445_v18 }
 0x978   : > { %v6257_v50 = vmul.f32 1.0614054, %v11925_v57  ;;  %v6128_v22 = vmul.f32 0.3275911, %v11920_v9  ;;  %v11935_v13 = vmul.f32 %v6759_v45, %v11763_v49  ;;  %v6380_v25 = vmul.f32 %v11872_v52, %v6348_v24 }
 0x979   : > { %vm6033_vm10 = vcmp.ge.f32.partialorder %v11827_v30, 0.0  ;;  %v6545_v6 = vsub.f32 0.0, %v11838_v21  ;;  %v6446_v46 = vmul.f32 %v11862_v43, %v6414_v28  ;;  %v11942_v58 = vmul.f32 0.70710677, %v11923_v14 }
 0x97a   : > { %v6289_v33 = vadd.f32 -1.4531521, %v6257_v50  ;;  %v6160_v26 = vadd.f32 1.0, %v6128_v22  ;;  %v11945_v44 = vmul.f32 %v6762_v61, %v11796_v20  ;;  %v6475_v40 = vadd.f32 0.2548296, %v6443_v60 }
 0x97b   : > { %8986 = vpow2.f32 %v6609_v63  ;;  %v11948_v49 = vadd.f32 %v11671_v29, %v5880_v5  ;;  %v11950_v18 = vpop.eup %8980  ;;  %v6760_v45 = vadd.f32 1.0, %v6728_v16  ;;  %v6509_v24 = vmul.f32 %v11789_v47, %v6477_v8  ;;  %v8431_v47 = vpop.f32.mrf.mxu0 }
 0x97c   : > { %v6321_v28 = vmul.f32 %v11925_v57, %v6289_v33  ;;  %8988 = vrcp.f32 %v6160_v26  ;;  %v6412_v50 = vadd.f32 -0.28449672, %v6380_v25  ;;  %v11957_v22 = vsel %vm6033_vm10, 1.0, %v13164_v48 }
 0x97d   : > { %vm6031_vm11 = vcmp.ge.f32.partialorder %v11852_v23, 0.0  ;;  %v6255_v20 = vmul.f32 1.0614054, %v11950_v18  ;;  %v6478_v61 = vadd.f32 0.2548296, %v6446_v46  ;;  %v6577_v63 = vmul.f32 %v6545_v6, %v11838_v21 }
 0x97e   : > { %v6353_v60 = vadd.f32 1.4214138, %v6321_v28  ;;  %v11963_v16 = vand.u32 2147483647, %v11942_v58  ;;  %v6507_v8 = vmul.f32 %v11816_v3, %v6475_v40  ;;  %v6543_v30 = vsub.f32 0.0, %v11865_v37 }
 0x97f   : > { %v11970_v5 = vmul.f32 0.70710677, %v11948_v49  ;;  %v11973_v25 = vmul.f32 %v6760_v45, %v11804_v31  ;;  %v6669_v46 = vmul.f32 %v8975_v15, %v6509_v24  ;;  %v6287_v33 = vadd.f32 -1.4531521, %v6255_v20 }
 0x980   : > { %v6133_v21 = vmul.f32 0.3275911, %v11963_v16  ;;  %v6444_v26 = vmul.f32 %v11872_v52, %v6412_v50  ;;  %v11980_v28 = vsel %vm6031_vm11, 1.0, %v13164_v48  ;;  %v6546_v3 = vsub.f32 0.0, %v11884_v1 }
 0x981   : > { %v8983_v6 = vpop.eup %8982  ;;  %v11984_v40 = vand.u32 2147483647, %v11970_v5  ;;  %v6510_v15 = vmul.f32 %v11862_v43, %v6478_v61  ;;  %v6385_v45 = vmul.f32 %v11925_v57, %v6353_v60  ;;  %v6619_v24 = vmul.f32 1.442695, %v6577_v63 }
 0x982   : > { %v11986_v31 = vpop.eup %8984  ;;  %v6165_v20 = vadd.f32 1.0, %v6133_v21  ;;  %v6667_v50 = vmul.f32 %v8977_v19, %v6507_v8  ;;  %v6575_v0 = vmul.f32 %v6543_v30, %v11865_v37  ;;  %vm6034_vm12 = vcmp.ge.f32.partialorder %v11877_v7, 0.0  ;;  %v5883_v21 = vpop.f32.mrf.mxu0 }
 0x983   : > { %v6258_v23 = vmul.f32 1.0614054, %v11986_v31  ;;  %v6701_v62 = vsub.f32 1.0, %v6669_v46  ;;  %v6319_v55 = vmul.f32 %v11950_v18, %v6287_v33  ;;  %v11995_v41 = vadd.f32 %v8431_v47, %v11671_v29 }
 0x984   : > { %8990 = vrcp.f32 %v6165_v20  ;;  %v6476_v59 = vadd.f32 0.2548296, %v6444_v26  ;;  %v6578_v61 = vmul.f32 %v6546_v3, %v11884_v1  ;;  %v6131_v60 = vmul.f32 0.3275911, %v11984_v40 }
 0x985   : > { %v6290_v43 = vadd.f32 -1.4531521, %v6258_v23  ;;  %v6670_v19 = vmul.f32 %v8983_v6, %v6510_v15  ;;  %v6417_v63 = vadd.f32 -0.28449672, %v6385_v45  ;;  %8992 = vpow2.f32 %v6619_v24 }
 0x986   : > { %v12000_v37 = vmul.f32 0.5, %v11860_v38  ;;  %v6699_v8 = vsub.f32 1.0, %v6667_v50  ;;  %v6615_v30 = vmul.f32 1.442695, %v6575_v0  ;;  %v6163_v33 = vadd.f32 1.0, %v6131_v60 }
 0x987   : > { %v6322_v46 = vmul.f32 %v11986_v31, %v6290_v43  ;;  %v6733_v26 = vmul.f32 %v6701_v62, %v11842_v12  ;;  %v6351_v20 = vadd.f32 1.4214138, %v6319_v55  ;;  %v12007_v1 = vsel %vm6034_vm12, 1.0, %v13164_v48 }
 0x988   : > { %v8987_v47 = vpop.eup %8986  ;;  %v12010_v6 = vmul.f32 0.70710677, %v11995_v41  ;;  %v6508_v0 = vmul.f32 %v11872_v52, %v6476_v59  ;;  %v6621_v15 = vmul.f32 1.442695, %v6578_v61  ;;  %8994 = vrcp.f32 %v6163_v33 }
 0x989   : > { %v12012_v38 = vpop.eup %8988  ;;  %v6354_v3 = vadd.f32 1.4214138, %v6322_v46  ;;  %v6702_v45 = vsub.f32 1.0, %v6670_v19  ;;  %v6449_v24 = vmul.f32 %v11925_v57, %v6417_v63  ;;  %v12018_v55 = vadd.f32 %v11671_v29, %v5883_v21 }
 0x98a   : > { %v6256_v62 = vmul.f32 1.0614054, %v12012_v38  ;;  %v6731_v12 = vmul.f32 %v6699_v8, %v11847_v32  ;;  %8996 = vpow2.f32 %v6615_v30  ;;  %v12022_v7 = vmul.f32 0.5, %v11888_v36  ;;  %v8434_v8 = vpop.f32.mrf.mxu0 }
 0x98b   : > { %v12025_v50 = vand.u32 2147483647, %v12010_v6  ;;  %v6765_v59 = vadd.f32 1.0, %v6733_v26  ;;  %v6383_v52 = vmul.f32 %v11950_v18, %v6351_v20  ;;  %v6386_v23 = vmul.f32 %v11986_v31, %v6354_v3 }
 0x98c   : > { %v6288_v43 = vadd.f32 -1.4531521, %v6256_v62  ;;  %8998 = vpow2.f32 %v6621_v15  ;;  %vm6032_vm13 = vcmp.ge.f32.partialorder %v11911_v27, 0.0  ;;  %v6544_v61 = vsub.f32 0.0, %v11920_v9 }
 0x98d   : > { %v6134_v32 = vmul.f32 0.3275911, %v12025_v50  ;;  %v6734_v60 = vmul.f32 %v6702_v45, %v11896_v56  ;;  %v6668_v36 = vmul.f32 %v8987_v47, %v6508_v0  ;;  %v6481_v19 = vadd.f32 0.2548296, %v6449_v24 }
 0x98e   : > { %v12034_v63 = vmul.f32 0.70710677, %v12018_v55  ;;  %v6763_v30 = vadd.f32 1.0, %v6731_v12  ;;  %v6320_v46 = vmul.f32 %v12012_v38, %v6288_v43  ;;  %v6549_v33 = vsub.f32 0.0, %v11963_v16 }
 0x98f   : > { %v6166_v21 = vadd.f32 1.0, %v6134_v32  ;;  %v12039_v26 = vmul.f32 %v6765_v59, %v11819_v51  ;;  %v6415_v20 = vadd.f32 -0.28449672, %v6383_v52  ;;  %v6418_v3 = vadd.f32 -0.28449672, %v6386_v23 }
 0x990   : > { %v12042_v15 = vand.u32 2147483647, %v12034_v63  ;;  %v12049_v47 = vsel %vm6032_vm13, 1.0, %v13164_v48  ;;  %v6576_v0 = vmul.f32 %v6544_v61, %v11920_v9  ;;  %v12053_v45 = vadd.f32 %v8434_v8, %v11671_v29 }
 0x991   : > { %v12044_v56 = vpop.eup %8990  ;;  %9000 = vrcp.f32 %v6166_v21  ;;  %v6766_v51 = vadd.f32 1.0, %v6734_v60  ;;  %v6700_v24 = vsub.f32 1.0, %v6668_v36  ;;  %v6513_v62 = vmul.f32 %v11925_v57, %v6481_v19  ;;  %v5896_v19 = vpop.f32.mrf.mxu0 }
 0x992   : > { %v6261_v12 = vmul.f32 1.0614054, %v12044_v56  ;;  %v8993_v59 = vpop.eup %8992  ;;  %v12058_v52 = vmul.f32 %v6763_v30, %v11835_v17  ;;  %v6352_v23 = vadd.f32 1.4214138, %v6320_v46  ;;  %v12061_v27 = vmul.f32 0.5, %v11923_v14 }
 0x993   : > { %v6132_v9 = vmul.f32 0.3275911, %v12042_v15  ;;  %v6447_v43 = vmul.f32 %v11950_v18, %v6415_v20  ;;  %v6450_v61 = vmul.f32 %v11986_v31, %v6418_v3  ;;  %v6581_v60 = vmul.f32 %v6549_v33, %v11963_v16 }
 0x994   : > { %v6293_v32 = vadd.f32 -1.4531521, %v6261_v12  ;;  %v6617_v57 = vmul.f32 1.442695, %v6576_v0  ;;  %vm6037_vm14 = vcmp.ge.f32.partialorder %v11942_v58, 0.0  ;;  %v12074_v14 = vmul.f32 %v6766_v51, %v11857_v2 }
 0x995   : > { %v6164_v36 = vadd.f32 1.0, %v6132_v9  ;;  %v12069_v17 = vmul.f32 0.70710677, %v12053_v45  ;;  %v12071_v8 = vpop.eup %8994  ;;  %v6732_v30 = vmul.f32 %v6700_v24, %v11905_v11  ;;  %v6673_v46 = vmul.f32 %v8993_v59, %v6513_v62 }
 0x996   : > { %vm6035_vm15 = vcmp.ge.f32.partialorder %v11970_v5, 0.0  ;;  %v6384_v16 = vmul.f32 %v12012_v38, %v6352_v23  ;;  %v6325_v33 = vmul.f32 %v12044_v56, %v6293_v32  ;;  %v6259_v21 = vmul.f32 1.0614054, %v12071_v8 }
 0x997   : > { %9002 = vrcp.f32 %v6164_v36  ;;  %v8997_v20 = vpop.eup %8996  ;;  %v6479_v3 = vadd.f32 0.2548296, %v6447_v43  ;;  %v6482_v0 = vadd.f32 0.2548296, %v6450_v61  ;;  %v6627_v12 = vmul.f32 1.442695, %v6581_v60 }
 0x998   : > { %v12082_v9 = vadd.f32 %v11671_v29, %v5896_v19  ;;  %v12085_v2 = vmul.f32 0.5, %v11948_v49  ;;  %v6291_v11 = vadd.f32 -1.4531521, %v6259_v21  ;;  %v6547_v51 = vsub.f32 0.0, %v11984_v40 }
 0x999   : > { %v12089_v24 = vand.u32 2147483647, %v12069_v17  ;;  %v8999_v62 = vpop.eup %8998  ;;  %v6764_v59 = vadd.f32 1.0, %v6732_v30  ;;  %v6705_v23 = vsub.f32 1.0, %v6673_v46  ;;  %v12094_v43 = vsel %vm6037_vm14, 1.0, %v13164_v48 }
 0x99a   : > { %v12099_v61 = vsel %vm6035_vm15, 1.0, %v13164_v48  ;;  %v6416_v49 = vadd.f32 -0.28449672, %v6384_v16  ;;  %9004 = vpow2.f32 %v6617_v57  ;;  %v6357_v32 = vadd.f32 1.4214138, %v6325_v33  ;;  %v8435_v57 = vpop.f32.mrf.mxu0 }
 0x99b   : > { %v6137_v60 = vmul.f32 0.3275911, %v12089_v24  ;;  %v6511_v19 = vmul.f32 %v11950_v18, %v6479_v3  ;;  %v6514_v30 = vmul.f32 %v11986_v31, %v6482_v0  ;;  %v12107_v58 = vmul.f32 0.70710677, %v12082_v9 }
 0x99c   : > { %9006 = vpow2.f32 %v6627_v12  ;;  %v6323_v5 = vmul.f32 %v12071_v8, %v6291_v11  ;;  %v6579_v46 = vmul.f32 %v6547_v51, %v11984_v40  ;;  %v6737_v21 = vmul.f32 %v6705_v23, %v11957_v22 }
 0x99d   : > { %v6169_v16 = vadd.f32 1.0, %v6137_v60  ;;  %vm6038_vm0 = vcmp.ge.f32.partialorder %v12010_v6, 0.0  ;;  %v6550_v18 = vsub.f32 0.0, %v12025_v50  ;;  %v12117_v31 = vand.u32 2147483647, %v12107_v58 }
 0x99e   : > { %v12111_v33 = vpop.eup %9000  ;;  %v6448_v3 = vmul.f32 %v12012_v38, %v6416_v49  ;;  %v6389_v0 = vmul.f32 %v12044_v56, %v6357_v32  ;;  %v6671_v40 = vmul.f32 %v8997_v20, %v6511_v19  ;;  %v6674_v11 = vmul.f32 %v8999_v62, %v6514_v30 }
 0x99f   : > { %v6262_v12 = vmul.f32 1.0614054, %v12111_v33  ;;  %9008 = vrcp.f32 %v6169_v16  ;;  %v12123_v51 = vmul.f32 0.5, %v11995_v41  ;;  %v12126_v22 = vadd.f32 %v8435_v57, %v11671_v29 }
 0x9a0   : > { %v12129_v23 = vmul.f32 %v6764_v59, %v11900_v10  ;;  %v6355_v60 = vadd.f32 1.4214138, %v6323_v5  ;;  %v6135_v49 = vmul.f32 0.3275911, %v12117_v31  ;;  %v6769_v35 = vadd.f32 1.0, %v6737_v21  ;;  %v5899_v10 = vpop.f32.mrf.mxu0 }
 0x9a1   : > { %v6294_v36 = vadd.f32 -1.4531521, %v6262_v12  ;;  %v6623_v32 = vmul.f32 1.442695, %v6579_v46  ;;  %v12135_v20 = vsel %vm6038_vm0, 1.0, %v13164_v48  ;;  %v6582_v41 = vmul.f32 %v6550_v18, %v12025_v50 }
 0x9a2   : > { %v6480_v62 = vadd.f32 0.2548296, %v6448_v3  ;;  %v6421_v19 = vadd.f32 -0.28449672, %v6389_v0  ;;  %v6167_v16 = vadd.f32 1.0, %v6135_v49  ;;  %v6703_v5 = vsub.f32 1.0, %v6671_v40 }
 0x9a3   : > { %v6326_v30 = vmul.f32 %v12111_v33, %v6294_v36  ;;  %v6706_v57 = vsub.f32 1.0, %v6674_v11  ;;  %v6548_v21 = vsub.f32 0.0, %v12042_v15  ;;  %v12143_v46 = vmul.f32 0.70710677, %v12126_v22 }
 0x9a4   : > { %v12139_v59 = vpop.eup %9002  ;;  %v6387_v6 = vmul.f32 %v12071_v8, %v6355_v60  ;;  %9010 = vrcp.f32 %v6167_v16  ;;  %v6629_v18 = vmul.f32 1.442695, %v6582_v41  ;;  %v12151_v3 = vadd.f32 %v11671_v29, %v5899_v10  ;;  %v8438_v10 = vpop.f32.mrf.mxu0 }
 0x9a5   : > { %v6358_v12 = vadd.f32 1.4214138, %v6326_v30  ;;  %v6260_v50 = vmul.f32 1.0614054, %v12139_v59  ;;  %9012 = vpow2.f32 %v6623_v32  ;;  %v12148_v36 = vand.u32 2147483647, %v12143_v46 }
 0x9a6   : > { %v6512_v0 = vmul.f32 %v12012_v38, %v6480_v62  ;;  %v6453_v40 = vmul.f32 %v12044_v56, %v6421_v19  ;;  %v6735_v30 = vmul.f32 %v6703_v5, %v11980_v28  ;;  %v12158_v16 = vmul.f32 0.5, %v12018_v55 }
 0x9a7   : > { %v6390_v11 = vmul.f32 %v12111_v33, %v6358_v12  ;;  %v6292_v49 = vadd.f32 -1.4531521, %v6260_v50  ;;  %v9005_v60 = vpop.eup %9004  ;;  %vm6036_vm1 = vcmp.ge.f32.partialorder %v12034_v63, 0.0  ;;  %v6138_v32 = vmul.f32 0.3275911, %v12148_v36 }
 0x9a8   : > { %v12163_v41 = vmul.f32 %v6769_v35, %v11917_v54  ;;  %v6738_v38 = vmul.f32 %v6706_v57, %v12007_v1  ;;  %v6419_v62 = vadd.f32 -0.28449672, %v6387_v6  ;;  %v6580_v19 = vmul.f32 %v6548_v21, %v12042_v15 }
 0x9a9   : > { %v9007_v12 = vpop.eup %9006  ;;  %v6324_v50 = vmul.f32 %v12139_v59, %v6292_v49  ;;  %v6553_v28 = vsub.f32 0.0, %v12089_v24  ;;  %v6170_v55 = vadd.f32 1.0, %v6138_v32  ;;  %v12170_v5 = vmul.f32 0.70710677, %v12151_v3 }
 0x9aa   : > { %13165 = vst [vmem:[#allocation58_spill] sm:$0xff] %v12163_v41  ;;  %v6672_v53 = vmul.f32 %v9005_v60, %v6512_v0  ;;  %v6485_v39 = vadd.f32 0.2548296, %v6453_v40  ;;  %v6422_v42 = vadd.f32 -0.28449672, %v6390_v11  ;;  %9014 = vpow2.f32 %v6629_v18 }
 0x9ab   : > { %v6767_v54 = vadd.f32 1.0, %v6735_v30  ;;  %v12177_v1 = vsel %vm6036_vm1, 1.0, %v13164_v48  ;;  %9016 = vrcp.f32 %v6170_v55  ;;  %v12180_v15 = vadd.f32 %v8438_v10, %v11671_v29 }
 0x9ac   : > { %v12172_v35 = vpop.eup %9008  ;;  %v6770_v57 = vadd.f32 1.0, %v6738_v38  ;;  %v6451_v21 = vmul.f32 %v12071_v8, %v6419_v62  ;;  %v12184_v6 = vmul.f32 0.5, %v12053_v45  ;;  %v6356_v0 = vadd.f32 1.4214138, %v6324_v50 }
 0x9ad   : > { %13166 = vst [vmem:[#allocation51_spill] sm:$0xff] %v12180_v15  ;;  %v6265_v18 = vmul.f32 1.0614054, %v12172_v35  ;;  %v6625_v40 = vmul.f32 1.442695, %v6580_v19  ;;  %v6585_v11 = vmul.f32 %v6553_v28, %v12089_v24  ;;  %v6704_v49 = vsub.f32 1.0, %v6672_v53 }
 0x9ae   : > { %v12189_v63 = vand.u32 2147483647, %v12170_v5  ;;  %v6517_v60 = vmul.f32 %v12044_v56, %v6485_v39  ;;  %v6454_v30 = vmul.f32 %v12111_v33, %v6422_v42  ;;  %v12194_v38 = vmul.f32 %v6767_v54, %v11929_v34  ;;  %v5912_v39 = vpop.f32.mrf.mxu0 }
 0x9af   : > { %v6297_v32 = vadd.f32 -1.4531521, %v6265_v18  ;;  %vm6041_vm2 = vcmp.ge.f32.partialorder %v12069_v17, 0.0  ;;  %v12199_v62 = vmul.f32 0.70710677, %v12180_v15  ;;  %v12202_v24 = vmul.f32 %v6770_v57, %v12000_v37 }
 0x9b0   : > { %v6136_v45 = vmul.f32 0.3275911, %v12189_v63  ;;  %v6483_v19 = vadd.f32 0.2548296, %v6451_v21  ;;  %vm6039_vm3 = vcmp.ge.f32.partialorder %v12107_v58, 0.0  ;;  %v6388_v34 = vmul.f32 %v12139_v59, %v6356_v0 }
 0x9b1   : > { %v6329_v53 = vmul.f32 %v12172_v35, %v6297_v32  ;;  %v12206_v42 = vpop.eup %9010  ;;  %v6551_v56 = vsub.f32 0.0, %v12117_v31  ;;  %v12211_v50 = vand.u32 2147483647, %v12199_v62  ;;  %v6736_v37 = vmul.f32 %v6704_v49, %v12049_v47  ;;  %v12247_v58 = vld [vmem:[%s12764_s12] ss:$0 sm:$0xff] }
 0x9b2   : > { %v6168_v10 = vadd.f32 1.0, %v6136_v45  ;;  %v9013_v28 = vpop.eup %9012  ;;  %v6677_v55 = vmul.f32 %v9007_v12, %v6517_v60  ;;  %v6486_v54 = vadd.f32 0.2548296, %v6454_v30  ;;  %v6635_v57 = vmul.f32 1.442695, %v6585_v11  ;;  %v8439_v30 = vpop.f32.mrf.mxu0 }
 0x9b3   : > { %v6361_v21 = vadd.f32 1.4214138, %v6329_v53  ;;  %v6263_v18 = vmul.f32 1.0614054, %v12206_v42  ;;  %v12216_v32 = vadd.f32 %v11671_v29, %v5912_v39  ;;  %v6515_v0 = vmul.f32 %v12071_v8, %v6483_v19 }
 0x9b4   : > { %9018 = vrcp.f32 %v6168_v10  ;;  %v12222_v45 = vsel %vm6041_vm2, 1.0, %v13164_v48  ;;  %v6141_v47 = vmul.f32 0.3275911, %v12211_v50  ;;  %v6420_v12 = vadd.f32 -0.28449672, %v6388_v34 }
 0x9b5   : > { %9020 = vpow2.f32 %v6625_v40  ;;  %v12226_v11 = vmul.f32 0.5, %v12082_v9  ;;  %v6295_v49 = vadd.f32 -1.4531521, %v6263_v18  ;;  %v6583_v60 = vmul.f32 %v6551_v56, %v12117_v31 }
 0x9b6   : > { %v6709_v8 = vsub.f32 1.0, %v6677_v55  ;;  %v6518_v40 = vmul.f32 %v12111_v33, %v6486_v54  ;;  %v12235_v17 = vsel %vm6039_vm3, 1.0, %v13164_v48  ;;  %v6768_v53 = vadd.f32 1.0, %v6736_v37 }
 0x9b7   : > { %v9015_v19 = vpop.eup %9014  ;;  %v6393_v9 = vmul.f32 %v12172_v35, %v6361_v21  ;;  %9022 = vpow2.f32 %v6635_v57  ;;  %v12239_v39 = vmul.f32 0.70710677, %v12216_v32  ;;  %v6675_v34 = vmul.f32 %v9013_v28, %v6515_v0 }
 0x9b8   : > { %v12241_v31 = vpop.eup %9016  ;;  %v6327_v56 = vmul.f32 %v12206_v42, %v6295_v49  ;;  %v6173_v10 = vadd.f32 1.0, %v6141_v47  ;;  %v12250_v33 = vadd.f32 %v12247_v58, %v8439_v30  ;;  %v6452_v37 = vmul.f32 %v12139_v59, %v6420_v12 }
 0x9b9   : > { %v6631_v55 = vmul.f32 1.442695, %v6583_v60  ;;  %v12254_v54 = vmul.f32 0.5, %v12126_v22  ;;  %v6266_v57 = vmul.f32 1.0614054, %v12241_v31  ;;  %v6741_v28 = vmul.f32 %v6709_v8, %v12094_v43 }
 0x9ba   : > { %13167 = vst [vmem:[#allocation72_spill] sm:$0xff] %v12250_v33  ;;  %v6678_v21 = vmul.f32 %v9015_v19, %v6518_v40  ;;  %vm6042_vm4 = vcmp.ge.f32.partialorder %v12143_v46, 0.0  ;;  %v6554_v18 = vsub.f32 0.0, %v12148_v36  ;;  %v12261_v0 = vmul.f32 %v6768_v53, %v12022_v7  ;;  %v5915_v19 = vpop.f32.mrf.mxu0 }
 0x9bb   : > { %v6425_v47 = vadd.f32 -0.28449672, %v6393_v9  ;;  %v6298_v49 = vadd.f32 -1.4531521, %v6266_v57  ;;  %v12264_v12 = vand.u32 2147483647, %v12239_v39  ;;  %9024 = vrcp.f32 %v6173_v10 }
 0x9bc   : > { %v6707_v60 = vsub.f32 1.0, %v6675_v34  ;;  %v6359_v22 = vadd.f32 1.4214138, %v6327_v56  ;;  %v12267_v30 = vmul.f32 0.70710677, %v12250_v33  ;;  %9026 = vpow2.f32 %v6631_v55 }
 0x9bd   : > { %v6484_v43 = vadd.f32 0.2548296, %v6452_v37  ;;  %v6330_v8 = vmul.f32 %v12241_v31, %v6298_v49  ;;  %v6139_v40 = vmul.f32 0.3275911, %v12264_v12  ;;  %v6773_v7 = vadd.f32 1.0, %v6741_v28 }
 0x9be   : > { %v6710_v53 = vsub.f32 1.0, %v6678_v21  ;;  %v6586_v9 = vmul.f32 %v6554_v18, %v12148_v36  ;;  %v12273_v57 = vand.u32 2147483647, %v12267_v30  ;;  %v6457_v34 = vmul.f32 %v12172_v35, %v6425_v47 }
 0x9bf   : > { %v6362_v56 = vadd.f32 1.4214138, %v6330_v8  ;;  %v6552_v10 = vsub.f32 0.0, %v12189_v63  ;;  %v6171_v29 = vadd.f32 1.0, %v6139_v40  ;;  %v6739_v55 = vmul.f32 %v6707_v60, %v12099_v61 }
 0x9c0   : > { %v6391_v49 = vmul.f32 %v12206_v42, %v6359_v22  ;;  %v6142_v28 = vmul.f32 0.3275911, %v12273_v57  ;;  %v12283_v21 = vadd.f32 %v12247_v58, %v5915_v19  ;;  %v6516_v18 = vmul.f32 %v12139_v59, %v6484_v43 }
 0x9c1   : > { %v12277_v37 = vpop.eup %9018  ;;  %v12289_v47 = vsel %vm6042_vm4, 1.0, %v13164_v48  ;;  %9028 = vrcp.f32 %v6171_v29  ;;  %v6742_v61 = vmul.f32 %v6710_v53, %v12135_v20  ;;  %v12294_v60 = vmul.f32 0.5, %v12151_v3  ;;  %v8442_v3 = vpop.f32.mrf.mxu0 }
 0x9c2   : > { %v9021_v36 = vpop.eup %9020  ;;  %v6264_v8 = vmul.f32 1.0614054, %v12277_v37  ;;  %v6557_v22 = vsub.f32 0.0, %v12211_v50  ;;  %v6174_v40 = vadd.f32 1.0, %v6142_v28  ;;  %v6489_v19 = vadd.f32 0.2548296, %v6457_v34 }
 0x9c3   : > { %v6394_v15 = vmul.f32 %v12241_v31, %v6362_v56  ;;  %v6637_v59 = vmul.f32 1.442695, %v6586_v9  ;;  %v6584_v43 = vmul.f32 %v6552_v10, %v12189_v63  ;;  %v12300_v33 = vmul.f32 %v6773_v7, %v12061_v27 }
 0x9c4   : > { %v9023_v46 = vpop.eup %9022  ;;  %v6771_v41 = vadd.f32 1.0, %v6739_v55  ;;  %v6423_v29 = vadd.f32 -0.28449672, %v6391_v49  ;;  %v12303_v20 = vmul.f32 0.70710677, %v12283_v21  ;;  %v6676_v53 = vmul.f32 %v9021_v36, %v6516_v18 }
 0x9c5   : > { %vm6040_vm5 = vcmp.ge.f32.partialorder %v12170_v5, 0.0  ;;  %v6296_v28 = vadd.f32 -1.4531521, %v6264_v8  ;;  %vm6045_vm6 = vcmp.ge.f32.partialorder %v12199_v62, 0.0  ;;  %v6774_v34 = vadd.f32 1.0, %v6742_v61 }
 0x9c6   : > { %v6589_v9 = vmul.f32 %v6557_v22, %v12211_v50  ;;  %9030 = vrcp.f32 %v6174_v40  ;;  %v12309_v63 = vand.u32 2147483647, %v12303_v20  ;;  %v6521_v27 = vmul.f32 %v12172_v35, %v6489_v19  ;;  %v5928_v50 = vpop.f32.mrf.mxu0 }
 0x9c7   : > { %v6426_v7 = vadd.f32 -0.28449672, %v6394_v15  ;;  %9032 = vpow2.f32 %v6637_v59  ;;  %v6633_v56 = vmul.f32 1.442695, %v6584_v43  ;;  %v12313_v10 = vmul.f32 %v6771_v41, %v12085_v2 }
 0x9c8   : > { %v6455_v5 = vmul.f32 %v12206_v42, %v6423_v29  ;;  %v12317_v55 = vsel %vm6040_vm5, 1.0, %v13164_v48  ;;  %v6140_v49 = vmul.f32 0.3275911, %v12309_v63  ;;  %v12320_v36 = vpop.eup %9024  ;;  %v6708_v18 = vsub.f32 1.0, %v6676_v53 }
 0x9c9   : > { %v6328_v8 = vmul.f32 %v12277_v37, %v6296_v28  ;;  %v12326_v35 = vsel %vm6045_vm6, 1.0, %v13164_v48  ;;  %v6823_v2 = vpack.c.bf16 %v11973_v25, %v11935_v13  ;;  %v9027_v41 = vpop.eup %9026  ;;  %v12331_v15 = vmul.f32 %v6774_v34, %v12123_v51 }
 0x9ca   : > { %v6643_v61 = vmul.f32 1.442695, %v6589_v9  ;;  %v6172_v22 = vadd.f32 1.0, %v6140_v49  ;;  %v12334_v40 = vadd.f32 %v12247_v58, %v8442_v3  ;;  %v6681_v19 = vmul.f32 %v9023_v46, %v6521_v27 }
 0x9cb   : > { %v6458_v59 = vmul.f32 %v12241_v31, %v6426_v7  ;;  %9034 = vpow2.f32 %v6633_v56  ;;  %8464 = vmatprep.mubr.bf16.mxu1 %v6823_v2  ;;  %v12338_v62 = vadd.f32 %v12247_v58, %v5928_v50  ;;  %v6487_v43 = vadd.f32 0.2548296, %v6455_v5 }
 0x9cc   : > { %13168 = vst [vmem:[#allocation62_spill] sm:$0xff] %v12334_v40  ;;  %v6269_v13 = vmul.f32 1.0614054, %v12320_v36  ;;  %vm6043_vm7 = vcmp.ge.f32.partialorder %v12239_v39, 0.0  ;;  %9036 = vrcp.f32 %v6172_v22  ;;  %v13169_v25 = vpack.c.bf16 %v11945_v44, %v11914_v4 }
 0x9cd   : > { %v6740_v51 = vmul.f32 %v6708_v18, %v12177_v1  ;;  %v6360_v46 = vadd.f32 1.4214138, %v6328_v8  ;;  %v12347_v29 = vmul.f32 0.5, %v12216_v32  ;;  %v12350_v3 = vmul.f32 0.70710677, %v12334_v40 }
 0x9ce   : > { %8465 = vmatmul.mubr.bf16.vlgmr.msra.gmra.mxu1 %v13169_v25  ;;  %v12352_v53 = vpop.eup %9028  ;;  %9038 = vpow2.f32 %v6643_v61  ;;  %v6555_v39 = vsub.f32 0.0, %v12264_v12  ;;  %v12358_v4 = vmul.f32 0.70710677, %v12338_v62  ;;  %v6713_v44 = vsub.f32 1.0, %v6681_v19 }
 0x9cf   : > { %v6490_v1 = vadd.f32 0.2548296, %v6458_v59  ;;  %v12361_v34 = vsel %vm6043_vm7, 1.0, %v13164_v48  ;;  %v6267_v32 = vmul.f32 1.0614054, %v12352_v53  ;;  %v6519_v9 = vmul.f32 %v12206_v42, %v6487_v43 }
 0x9d0   : > { %v6301_v27 = vadd.f32 -1.4531521, %v6269_v13  ;;  %vm6046_vm8 = vcmp.ge.f32.partialorder %v12267_v30, 0.0  ;;  %v12367_v7 = vand.u32 2147483647, %v12350_v3  ;;  %v6772_v56 = vadd.f32 1.0, %v6740_v51 }
 0x9d1   : > { %v6392_v5 = vmul.f32 %v12277_v37, %v6360_v46  ;;  %v6299_v49 = vadd.f32 -1.4531521, %v6267_v32  ;;  %v6556_v50 = vsub.f32 0.0, %v12309_v63  ;;  %v6587_v18 = vmul.f32 %v6555_v39, %v12264_v12  ;;  %v8443_v46 = vpop.f32.mrf.mxu0 }
 0x9d2   : > { %v6558_v8 = vsub.f32 0.0, %v12273_v57  ;;  %v6145_v2 = vmul.f32 0.3275911, %v12367_v7  ;;  %v12375_v42 = vand.u32 2147483647, %v12358_v4  ;;  %v6745_v30 = vmul.f32 %v6713_v44, %v12222_v45 }
 0x9d3   : > { %v12377_v61 = vpop.eup %9030  ;;  %v6522_v22 = vmul.f32 %v12241_v31, %v6490_v1  ;;  %v6331_v19 = vmul.f32 %v12352_v53, %v6299_v49  ;;  %v12383_v59 = vsel %vm6046_vm8, 1.0, %v13164_v48  ;;  %v6679_v12 = vmul.f32 %v9027_v41, %v6519_v9 }
 0x9d4   : > { %v9033_v43 = vpop.eup %9032  ;;  %v6333_v13 = vmul.f32 %v12320_v36, %v6301_v27  ;;  %v6270_v25 = vmul.f32 1.0614054, %v12377_v61  ;;  %v6177_v51 = vadd.f32 1.0, %v6145_v2  ;;  %v6424_v39 = vadd.f32 -0.28449672, %v6392_v5 }
 0x9d5   : > { %v6363_v32 = vadd.f32 1.4214138, %v6331_v19  ;;  %v6588_v28 = vmul.f32 %v6556_v50, %v12309_v63  ;;  %v6143_v45 = vmul.f32 0.3275911, %v12375_v42  ;;  %v6639_v31 = vmul.f32 1.442695, %v6587_v18  ;;  %v5931_v50 = vpop.f32.mrf.mxu0 }
 0x9d6   : > { %v6302_v44 = vadd.f32 -1.4531521, %v6270_v25  ;;  %v6590_v1 = vmul.f32 %v6558_v8, %v12273_v57  ;;  %9040 = vrcp.f32 %v6177_v51  ;;  %v6682_v49 = vmul.f32 %v9033_v43, %v6522_v22 }
 0x9d7   : > { %v6395_v41 = vmul.f32 %v12352_v53, %v6363_v32  ;;  %v6175_v9 = vadd.f32 1.0, %v6143_v45  ;;  %v12392_v27 = vadd.f32 %v12247_v58, %v8443_v46  ;;  %v6777_v40 = vadd.f32 1.0, %v6745_v30 }
 0x9d8   : > { %v9035_v2 = vpop.eup %9034  ;;  %v6711_v5 = vsub.f32 1.0, %v6679_v12  ;;  %v6334_v19 = vmul.f32 %v12377_v61, %v6302_v44  ;;  %v12396_v63 = vmul.f32 0.5, %v12283_v21  ;;  %v6456_v57 = vmul.f32 %v12277_v37, %v6424_v39 }
 0x9d9   : > { %v12398_v18 = vpop.eup %9036  ;;  %v6365_v8 = vadd.f32 1.4214138, %v6333_v13  ;;  %v6641_v22 = vmul.f32 1.442695, %v6588_v28  ;;  %9042 = vrcp.f32 %v6175_v9  ;;  %v12402_v43 = vmul.f32 %v6772_v56, %v12158_v16 }
 0x9da   : > { %v6427_v25 = vadd.f32 -0.28449672, %v6395_v41  ;;  %v6366_v51 = vadd.f32 1.4214138, %v6334_v19  ;;  %v6268_v30 = vmul.f32 1.0614054, %v12398_v18  ;;  %9044 = vpow2.f32 %v6639_v31 }
 0x9db   : > { %v12405_v12 = vpop.eup %9038  ;;  %v6714_v46 = vsub.f32 1.0, %v6682_v49  ;;  %v12408_v21 = vmul.f32 0.70710677, %v12392_v27  ;;  %v12411_v32 = vadd.f32 %v12247_v58, %v5931_v50  ;;  %v6743_v28 = vmul.f32 %v6711_v5, %v12235_v17 }
 0x9dc   : > { %v6398_v13 = vmul.f32 %v12377_v61, %v6366_v51  ;;  %v6645_v16 = vmul.f32 1.442695, %v6590_v1  ;;  %v6300_v56 = vadd.f32 -1.4531521, %v6268_v30  ;;  %v12416_v39 = vmul.f32 %v6777_v40, %v12184_v6 }
 0x9dd   : > { %v6488_v45 = vadd.f32 0.2548296, %v6456_v57  ;;  %v6397_v44 = vmul.f32 %v12320_v36, %v6365_v8  ;;  %v12420_v31 = vand.u32 2147483647, %v12408_v21  ;;  %v6459_v49 = vmul.f32 %v12352_v53, %v6427_v25 }
 0x9de   : > { %vm6044_vm9 = vcmp.ge.f32.partialorder %v12303_v20, 0.0  ;;  %v6332_v41 = vmul.f32 %v12398_v18, %v6300_v56  ;;  %9046 = vpow2.f32 %v6641_v22  ;;  %v6746_v17 = vmul.f32 %v6714_v46, %v12289_v47 }
 0x9df   : > { %v6430_v1 = vadd.f32 -0.28449672, %v6398_v13  ;;  %v6146_v9 = vmul.f32 0.3275911, %v12420_v31  ;;  %v12428_v6 = vmul.f32 0.70710677, %v12411_v32  ;;  %9048 = vpow2.f32 %v6645_v16 }
 0x9e0   : > { %v6775_v40 = vadd.f32 1.0, %v6743_v28  ;;  %v6364_v5 = vadd.f32 1.4214138, %v6332_v41  ;;  %v6825_v19 = vpack.c.bf16 %v12129_v23, %v12058_v52  ;;  %v6520_v50 = vmul.f32 %v12277_v37, %v6488_v45  ;;  %v8446_v45 = vpop.f32.mrf.mxu0 }
 0x9e1   : > { %v6429_v57 = vadd.f32 -0.28449672, %v6397_v44  ;;  %v6561_v8 = vsub.f32 0.0, %v12367_v7  ;;  %v6178_v22 = vadd.f32 1.0, %v6146_v9  ;;  %v6491_v25 = vadd.f32 0.2548296, %v6459_v49 }
 0x9e2   : > { %v12437_v47 = vsel %vm6044_vm9, 1.0, %v13164_v48  ;;  %v6396_v51 = vmul.f32 %v12398_v18, %v6364_v5  ;;  %v12441_v30 = vand.u32 2147483647, %v12428_v6  ;;  %8468 = vmatprep.mubr.bf16.mxu1 %v6825_v19  ;;  %v6778_v52 = vadd.f32 1.0, %v6746_v17 }
 0x9e3   : > { %v12443_v46 = vpop.eup %9040  ;;  %v6462_v23 = vmul.f32 %v12377_v61, %v6430_v1  ;;  %9050 = vrcp.f32 %v6178_v22  ;;  %v13170_v37 = vpack.c.bf16 %v12074_v14, %v12039_v26  ;;  %v6827_v20 = vpack.c.bf16 %v12261_v0, %v12194_v38 }
 0x9e4   : > { %v12452_v28 = vmul.f32 %v6775_v40, %v12226_v11  ;;  %v6428_v13 = vadd.f32 -0.28449672, %v6396_v51  ;;  %v6273_v16 = vmul.f32 1.0614054, %v12443_v46  ;;  %v6144_v56 = vmul.f32 0.3275911, %v12441_v30 }
 0x9e5   : > { %8469 = vmatmul.mubr.bf16.gmra.mxu1 %v13170_v37  ;;  %v6680_v44 = vmul.f32 %v9035_v2, %v6520_v50  ;;  %v6461_v49 = vmul.f32 %v12320_v36, %v6429_v57  ;;  %v6593_v41 = vmul.f32 %v6561_v8, %v12367_v7  ;;  %v6559_v26 = vsub.f32 0.0, %v12375_v42  ;;  %v5944_v50 = vpop.f32.mrf.mxu0 }
 0x9e6   : > { %8472 = vmatprep.mubr.bf16.mxu1 %v6827_v20  ;;  %v12459_v14 = vpop.eup %9042  ;;  %v6523_v38 = vmul.f32 %v12352_v53, %v6491_v25  ;;  %v6460_v11 = vmul.f32 %v12398_v18, %v6428_v13  ;;  %v6305_v0 = vadd.f32 -1.4531521, %v6273_v16  ;;  %v6176_v17 = vadd.f32 1.0, %v6144_v56 }
 0x9e7   : > { %v6494_v1 = vadd.f32 0.2548296, %v6462_v23  ;;  %v6271_v9 = vmul.f32 1.0614054, %v12459_v14  ;;  %v6562_v2 = vsub.f32 0.0, %v12420_v31  ;;  %v12466_v40 = vadd.f32 %v12247_v58, %v8446_v45  ;;  %v9045_v7 = vpop.eup %9044 }
 0x9e8   : > { %v6492_v5 = vadd.f32 0.2548296, %v6460_v11  ;;  %v6337_v19 = vmul.f32 %v12443_v46, %v6305_v0  ;;  %9052 = vrcp.f32 %v6176_v17  ;;  %v6829_v53 = vpack.c.bf16 %v12402_v43, %v12313_v10  ;;  %v13171_v43 = vld [vmem:[#allocation58_spill] sm:$0xff]  ;;  %v8447_v11 = vpop.f32.mrf.mxu0 }
 0x9e9   : > { %v12472_v57 = vmul.f32 %v6778_v52, %v12254_v54  ;;  %v6712_v8 = vsub.f32 1.0, %v6680_v44  ;;  %v6493_v22 = vadd.f32 0.2548296, %v6461_v49  ;;  %v6303_v25 = vadd.f32 -1.4531521, %v6271_v9 }
 0x9ea   : > { %v6524_v51 = vmul.f32 %v12398_v18, %v6492_v5  ;;  %v6369_v23 = vadd.f32 1.4214138, %v6337_v19  ;;  %v6591_v37 = vmul.f32 %v6559_v26, %v12375_v42  ;;  %v12477_v20 = vmul.f32 0.70710677, %v12466_v40 }
 0x9eb   : > { %v9047_v13 = vpop.eup %9046  ;;  %v6683_v16 = vmul.f32 %v9045_v7, %v6523_v38  ;;  %v6651_v56 = vmul.f32 1.442695, %v6593_v41  ;;  %v6335_v10 = vmul.f32 %v12459_v14, %v6303_v25  ;;  %v13172_v54 = vpack.c.bf16 %v12202_v24, %v13171_v43 }
 0x9ec   : > { %v12484_v52 = vadd.f32 %v12247_v58, %v5944_v50  ;;  %v6526_v18 = vmul.f32 %v12377_v61, %v6494_v1  ;;  %v6684_v45 = vmul.f32 %v9047_v13, %v6524_v51  ;;  %v6401_v42 = vmul.f32 %v12443_v46, %v6369_v23  ;;  %v9049_v49 = vpop.eup %9048 }
 0x9ed   : > { %8473 = vmatmul.mubr.bf16.gmra.mxu1 %v13172_v54  ;;  %v6594_v44 = vmul.f32 %v6562_v2, %v12420_v31  ;;  %v6744_v41 = vmul.f32 %v6712_v8, %v12317_v55  ;;  %v6525_v26 = vmul.f32 %v12320_v36, %v6493_v22  ;;  %v6367_v38 = vadd.f32 1.4214138, %v6335_v10 }
 0x9ee   : > { %8476 = vmatprep.mubr.bf16.mxu1 %v6829_v53  ;;  %v12492_v24 = vand.u32 2147483647, %v12477_v20  ;;  %v6716_v0 = vsub.f32 1.0, %v6684_v45  ;;  %v6647_v17 = vmul.f32 1.442695, %v6591_v37  ;;  %v6560_v61 = vsub.f32 0.0, %v12441_v30 }
 0x9ef   : > { %v12496_v1 = vmul.f32 0.70710677, %v12484_v52  ;;  %v6715_v9 = vsub.f32 1.0, %v6683_v16  ;;  %9054 = vpow2.f32 %v6651_v56  ;;  %v6399_v31 = vmul.f32 %v12459_v14, %v6367_v38 }
 0x9f0   : > { %v6149_v55 = vmul.f32 0.3275911, %v12492_v24  ;;  %v12500_v2 = vpop.eup %9050  ;;  %v6686_v36 = vmul.f32 %v9049_v49, %v6526_v18  ;;  %v6433_v7 = vadd.f32 -0.28449672, %v6401_v42  ;;  %v6653_v5 = vmul.f32 1.442695, %v6594_v44 }
 0x9f1   : > { %v12503_v19 = vadd.f32 %v12247_v58, %v8447_v11  ;;  %v6748_v53 = vmul.f32 %v6716_v0, %v12437_v47  ;;  %v6431_v50 = vadd.f32 -0.28449672, %v6399_v31  ;;  %v6274_v8 = vmul.f32 1.0614054, %v12500_v2 }
 0x9f2   : > { %v6181_v22 = vadd.f32 1.0, %v6149_v55  ;;  %v6685_v25 = vmul.f32 %v12405_v12, %v6525_v26  ;;  %9056 = vpow2.f32 %v6647_v17  ;;  %v6592_v51 = vmul.f32 %v6560_v61, %v12441_v30  ;;  %v5947_v55 = vpop.f32.mrf.mxu0 }
 0x9f3   : > { %v12510_v23 = vand.u32 2147483647, %v12496_v1  ;;  %v6776_v37 = vadd.f32 1.0, %v6744_v41  ;;  %v6747_v13 = vmul.f32 %v6715_v9, %v12361_v34  ;;  %v6306_v16 = vadd.f32 -1.4531521, %v6274_v8 }
 0x9f4   : > { %v13173_v56 = vpack.c.bf16 %v12331_v15, %v12300_v33  ;;  %9058 = vrcp.f32 %v6181_v22  ;;  %v6718_v47 = vsub.f32 1.0, %v6686_v36  ;;  %v6463_v10 = vmul.f32 %v12459_v14, %v6431_v50 }
 0x9f5   : > { %9060 = vpow2.f32 %v6653_v5  ;;  %v6147_v12 = vmul.f32 0.3275911, %v12510_v23  ;;  %v12518_v43 = vpop.eup %9052  ;;  %v6780_v30 = vadd.f32 1.0, %v6748_v53  ;;  %v6465_v54 = vmul.f32 %v12443_v46, %v6433_v7 }
 0x9f6   : > { %8477 = vmatmul.mubr.bf16.gmra.mxu1 %v13173_v56  ;;  %v6338_v18 = vmul.f32 %v12500_v2, %v6306_v16  ;;  %v12523_v34 = vmul.f32 0.70710677, %v12503_v19  ;;  %v6717_v45 = vsub.f32 1.0, %v6685_v25  ;;  %v6272_v33 = vmul.f32 1.0614054, %v12518_v43  ;;  %v13175_v56 = vld [vmem:[#allocation51_spill] sm:$0xff] }
 0x9f7   : > { %v6649_v15 = vmul.f32 1.442695, %v6592_v51  ;;  %v6179_v42 = vadd.f32 1.0, %v6147_v12  ;;  %v6808_v44 = vmul.f32 %v6776_v37, %v12294_v60  ;;  %v6779_v49 = vadd.f32 1.0, %v6747_v13  ;;  %v13174_v37 = vld [vmem:[#allocation72_spill] sm:$0xff] }
 0x9f8   : > { %v6370_v41 = vadd.f32 1.4214138, %v6338_v18  ;;  %v12528_v26 = vand.u32 2147483647, %v12523_v34  ;;  %v6750_v38 = vmul.f32 %v6718_v47, %v12383_v59  ;;  %v6495_v11 = vadd.f32 0.2548296, %v6463_v10 }
 0x9f9   : > { %v6304_v0 = vadd.f32 -1.4531521, %v6272_v33  ;;  %9062 = vrcp.f32 %v6179_v42  ;;  %v6812_v17 = vmul.f32 %v6780_v30, %v12396_v63  ;;  %v6497_v61 = vadd.f32 0.2548296, %v6465_v54 }
 0x9fa   : > { %v6402_v9 = vmul.f32 %v12500_v2, %v6370_v41  ;;  %v6150_v31 = vmul.f32 0.3275911, %v12528_v26  ;;  %v6832_v60 = vpack.c.bf16 %v12472_v57, %v12416_v39  ;;  %v6749_v36 = vmul.f32 %v6717_v45, %v12326_v35 }
 0x9fb   : > { %v6336_v7 = vmul.f32 %v12518_v43, %v6304_v0  ;;  %9064 = vpow2.f32 %v6649_v15  ;;  %v6811_v59 = vmul.f32 %v6779_v49, %v12347_v29  ;;  %v6831_v63 = vpack.c.bf16 %v6808_v44, %v12452_v28 }
 0x9fc   : > { %v6434_v5 = vadd.f32 -0.28449672, %v6402_v9  ;;  %v6182_v53 = vadd.f32 1.0, %v6150_v31  ;;  %v9055_v50 = vpop.eup %9054  ;;  %v6782_v8 = vadd.f32 1.0, %v6750_v38  ;;  %v6527_v22 = vmul.f32 %v12459_v14, %v6495_v11 }
 0x9fd   : > { %v6368_v25 = vadd.f32 1.4214138, %v6336_v7  ;;  %v12542_v51 = vadd.f32 %v12247_v58, %v5947_v55  ;;  %v6529_v39 = vmul.f32 %v12443_v46, %v6497_v61  ;;  %8480 = vmatprep.mubr.bf16.mxu1 %v6831_v63  ;;  %v6833_v57 = vpack.c.bf16 %v6812_v17, %v6811_v59 }
 0x9fe   : > { %v6466_v35 = vmul.f32 %v12500_v2, %v6434_v5  ;;  %9066 = vrcp.f32 %v6182_v53  ;;  %v6781_v29 = vadd.f32 1.0, %v6749_v36  ;;  %v5982_v13 = vmul.f32 0.5, %v13174_v37  ;;  %8481 = vmatmul.mubr.bf16.gmra.mxu1 %v6832_v60 }
 0x9ff   : > { %v6400_v28 = vmul.f32 %v12518_v43, %v6368_v25  ;;  %v9057_v16 = vpop.eup %9056  ;;  %v5981_v14 = vmul.f32 0.5, %v13175_v56  ;;  %vm6049_vm10 = vcmp.ge.f32.partialorder %v12350_v3, 0.0  ;;  %v12551_v47 = vmul.f32 0.70710677, %v12542_v51  ;;  %8484 = vmatprep.mubr.bf16.mxu1 %v6833_v57 }
 0xa00   : > { %v6498_v58 = vadd.f32 0.2548296, %v6466_v35  ;;  %v6814_v10 = vmul.f32 %v6782_v8, %v5982_v13  ;;  %v6687_v12 = vmul.f32 %v9057_v16, %v6527_v22  ;;  %vm6050_vm11 = vcmp.ge.f32.partialorder %v12408_v21, 0.0 }
 0xa01   : > { %v12553_v46 = vpop.eup %9058  ;;  %v6432_v30 = vadd.f32 -0.28449672, %v6400_v28  ;;  %v6689_v18 = vmul.f32 %v9055_v50, %v6529_v39  ;;  %v6813_v15 = vmul.f32 %v6781_v29, %v5981_v14  ;;  %v6081_v3 = vsel %vm6049_vm10, 1.0, %v13164_v48 }
 0xa02   : > { %v9061_v54 = vpop.eup %9060  ;;  %v6530_v45 = vmul.f32 %v12500_v2, %v6498_v58  ;;  %v6277_v33 = vmul.f32 1.0614054, %v12553_v46  ;;  %v12561_v44 = vand.u32 2147483647, %v12551_v47  ;;  %vm6047_vm12 = vcmp.ge.f32.partialorder %v12358_v4, 0.0 }
 0xa03   : > { %v6464_v42 = vmul.f32 %v12518_v43, %v6432_v30  ;;  %v6082_v49 = vsel %vm6050_vm11, 1.0, %v13164_v48  ;;  %v6834_v38 = vpack.c.bf16 %v6814_v10, %v6813_v15  ;;  %v6719_v11 = vsub.f32 1.0, %v6687_v12  ;;  %v13176_v15 = vld [vmem:[#allocation62_spill] sm:$0xff] }
 0xa04   : > { %v6690_v21 = vmul.f32 %v9061_v54, %v6530_v45  ;;  %v6309_v41 = vadd.f32 -1.4531521, %v6277_v33  ;;  %v6148_v2 = vmul.f32 0.3275911, %v12561_v44  ;;  %v6721_v61 = vsub.f32 1.0, %v6689_v18 }
 0xa05   : > { %v6496_v0 = vadd.f32 0.2548296, %v6464_v42  ;;  %v6566_v55 = vsub.f32 0.0, %v12528_v26  ;;  %v6563_v7 = vsub.f32 0.0, %v12510_v23  ;;  %v6079_v53 = vsel %vm6047_vm12, 1.0, %v13164_v48 }
 0xa06   : > { %v12566_v17 = vpop.eup %9062  ;;  %v6722_v9 = vsub.f32 1.0, %v6690_v21  ;;  %v6341_v31 = vmul.f32 %v12553_v46, %v6309_v41  ;;  %v6180_v59 = vadd.f32 1.0, %v6148_v2  ;;  %8485 = vmatmul.mubr.bf16.gmra.mxu1 %v6834_v38  ;;  %vm6048_vm13 = vcmp.ge.f32.partialorder %v12428_v6, 0.0 }
 0xa07   : > { %v6528_v60 = vmul.f32 %v12518_v43, %v6496_v0  ;;  %v6275_v36 = vmul.f32 1.0614054, %v12566_v17  ;;  %v6565_v50 = vsub.f32 0.0, %v12492_v24  ;;  %v6751_v8 = vmul.f32 %v6719_v11, %v6079_v53 }
 0xa08   : > { %v9065_v5 = vpop.eup %9064  ;;  %v6754_v63 = vmul.f32 %v6722_v9, %v6082_v49  ;;  %9068 = vrcp.f32 %v6180_v59  ;;  %v6753_v43 = vmul.f32 %v6721_v61, %v6081_v3  ;;  %v5983_v39 = vmul.f32 0.5, %v12338_v62 }
 0xa09   : > { %v6688_v22 = vmul.f32 %v9065_v5, %v6528_v60  ;;  %v6307_v25 = vadd.f32 -1.4531521, %v6275_v36  ;;  %v6373_v35 = vadd.f32 1.4214138, %v6341_v31  ;;  %v6598_v57 = vmul.f32 %v6566_v55, %v12528_v26 }
 0xa0a   : > { %v5986_v37 = vmul.f32 0.5, %v12392_v27  ;;  %v6595_v28 = vmul.f32 %v6563_v7, %v12510_v23  ;;  %v6786_v16 = vadd.f32 1.0, %v6754_v63  ;;  %v6080_v56 = vsel %vm6048_vm13, 1.0, %v13164_v48 }
 0xa0b   : > { %v9067_v29 = vpop.eup %9066  ;;  %v6720_v4 = vsub.f32 1.0, %v6688_v22  ;;  %v6339_v13 = vmul.f32 %v12566_v17, %v6307_v25  ;;  %v6597_v14 = vmul.f32 %v6565_v50, %v12492_v24  ;;  %v6783_v62 = vadd.f32 1.0, %v6751_v8 }
 0xa0c   : > { %v6278_v58 = vmul.f32 1.0614054, %v9067_v29  ;;  %v5984_v10 = vmul.f32 0.5, %v12411_v32  ;;  %v6785_v30 = vadd.f32 1.0, %v6753_v43  ;;  %v6405_v27 = vmul.f32 %v12553_v46, %v6373_v35 }
 0xa0d   : > { %v6752_v26 = vmul.f32 %v6720_v4, %v6080_v56  ;;  %v6371_v12 = vadd.f32 1.4214138, %v6339_v13  ;;  %v6661_v18 = vmul.f32 1.442695, %v6598_v57  ;;  %v6655_v33 = vmul.f32 1.442695, %v6595_v28 }
 0xa0e   : > { %v6310_v54 = vadd.f32 -1.4531521, %v6278_v58  ;;  %v6564_v6 = vsub.f32 0.0, %v12561_v44  ;;  %v5985_v3 = vmul.f32 0.5, %v13176_v15  ;;  %v6818_v24 = vmul.f32 %v6786_v16, %v5986_v37 }
 0xa0f   : > { %v6784_v45 = vadd.f32 1.0, %v6752_v26  ;;  %v6403_v23 = vmul.f32 %v12566_v17, %v6371_v12  ;;  %v6659_v42 = vmul.f32 1.442695, %v6597_v14  ;;  %v6815_v21 = vmul.f32 %v6783_v62, %v5983_v39 }
 0xa10   : > { %v6342_v49 = vmul.f32 %v9067_v29, %v6310_v54  ;;  %v6817_v38 = vmul.f32 %v6785_v30, %v5985_v3  ;;  %v6437_v11 = vadd.f32 -0.28449672, %v6405_v27  ;;  %9070 = vpow2.f32 %v6661_v18 }
 0xa11   : > { %v6816_v32 = vmul.f32 %v6784_v45, %v5984_v10  ;;  %v6435_v41 = vadd.f32 -0.28449672, %v6403_v23  ;;  %9072 = vpow2.f32 %v6655_v33  ;;  %v6596_v2 = vmul.f32 %v6564_v6, %v12561_v44 }
 0xa12   : > { %v6374_v0 = vadd.f32 1.4214138, %v6342_v49  ;;  %v6836_v9 = vpack.c.bf16 %v6818_v24, %v6817_v38  ;;  %9074 = vpow2.f32 %v6659_v42  ;;  %v6469_v36 = vmul.f32 %v12553_v46, %v6437_v11 }
 0xa13   : > { %v6835_v61 = vpack.c.bf16 %v6816_v32, %v6815_v21  ;;  %v6467_v55 = vmul.f32 %v12566_v17, %v6435_v41  ;;  %v6657_v5 = vmul.f32 1.442695, %v6596_v2  ;;  %vm6054_vm14 = vcmp.ge.f32.partialorder %v12523_v34, 0.0  ;;  %v13177_v2 = vld [vmem:[#allocation66_spill] sm:$0xff] }
 0xa14   : > { %v6406_v31 = vmul.f32 %v9067_v29, %v6374_v0  ;;  %v6501_v8 = vadd.f32 0.2548296, %v6469_v36  ;;  %vm6051_vm15 = vcmp.ge.f32.partialorder %v12496_v1, 0.0  ;;  %vm6053_vm0 = vcmp.ge.f32.partialorder %v12477_v20, 0.0 }
 0xa15   : > { %8488 = vmatprep.mubr.bf16.mxu1 %v6835_v61  ;;  %v9069_v60 = vpop.eup %9068  ;;  %v6499_v63 = vadd.f32 0.2548296, %v6467_v55  ;;  %9076 = vpow2.f32 %v6657_v5  ;;  %v6083_v30 = vsel %vm6051_vm15, 1.0, %v13164_v48  ;;  %v6085_v54 = vsel %vm6053_vm0, 1.0, %v13164_v48  ;;  %v13178_v55 = vld [vmem:[#allocation59_spill] sm:$0xff]  ;;  %v13179_v5 = vld [vmem:[#allocation34_spill] sm:$0xff] }
 0xa16   : > { %v6438_v7 = vadd.f32 -0.28449672, %v6406_v31  ;;  %8489 = vmatmul.mubr.bf16.gmra.mxu1 %v6836_v9  ;;  %v6276_v59 = vmul.f32 1.0614054, %v9069_v60  ;;  %v6533_v35 = vmul.f32 %v12553_v46, %v6501_v8  ;;  %v6086_v46 = vsel %vm6054_vm14, 1.0, %v13164_v48  ;;  %v13180_v8 = vld [vmem:[#allocation35_spill] sm:$0xff] }
 0xa17   : > { %v6531_v43 = vmul.f32 %v12566_v17, %v6499_v63  ;;  %vm6052_vm1 = vcmp.ge.f32.partialorder %v12551_v47, 0.0  ;;  %v5990_v3 = vmul.f32 0.5, %v12503_v19  ;;  %v5987_v24 = vmul.f32 0.5, %v12484_v52 }
 0xa18   : > { %v6470_v53 = vmul.f32 %v9067_v29, %v6438_v7  ;;  %v6308_v50 = vadd.f32 -1.4531521, %v6276_v59  ;;  %v6084_v33 = vsel %vm6052_vm1, 1.0, %v13164_v48  ;;  %v5988_v42 = vmul.f32 0.5, %v12542_v51  ;;  %v12612_v48 = vld [vmem:[%s12766_s14] ss:$0 sm:$0xff] }
 0xa19   : > { %v5989_v21 = vmul.f32 0.5, %v12466_v40  ;;  %vm7231_vm2 = vcmask 519168  }
 0xa1a   : > { %v6502_v22 = vadd.f32 0.2548296, %v6470_v53  ;;  %v6340_v44 = vmul.f32 %v9069_v60, %v6308_v50 }
 0xa1c   : > { %v6534_v25 = vmul.f32 %v9067_v29, %v6502_v22  ;;  %v6372_v39 = vadd.f32 1.4214138, %v6340_v44 }
 0xa1d   : > { %v9071_v57 = vpop.eup %9070 }
 0xa1e   : > { %v6404_v37 = vmul.f32 %v9069_v60, %v6372_v39  ;;  %v9073_v4 = vpop.eup %9072  ;;  %v6694_v13 = vmul.f32 %v9071_v57, %v6534_v25 }
 0xa1f   : > { %v9075_v28 = vpop.eup %9074  ;;  %v6691_v16 = vmul.f32 %v9073_v4, %v6531_v43 }
 0xa20   : > { %v6436_v56 = vadd.f32 -0.28449672, %v6404_v37  ;;  %v6693_v14 = vmul.f32 %v9075_v28, %v6533_v35  ;;  %v6726_v62 = vsub.f32 1.0, %v6694_v13  ;;  %v13181_v35 = vld [vmem:[#allocation65_spill] sm:$0xff]  ;;  %v13182_v28 = vld [vmem:[#allocation68_spill] sm:$0xff] }
 0xa21   : > { %v6723_v29 = vsub.f32 1.0, %v6691_v16 }
 0xa22   : > { %v6468_v58 = vmul.f32 %v9069_v60, %v6436_v56  ;;  %v6725_v17 = vsub.f32 1.0, %v6693_v14  ;;  %v9077_v12 = vpop.eup %9076  ;;  %v6758_v27 = vmul.f32 %v6726_v62, %v6086_v46  ;;  %v13183_v62 = vld [vmem:[#allocation41_spill] sm:$0xff] }
 0xa23   : > { %v6755_v18 = vmul.f32 %v6723_v29, %v6083_v30 }
 0xa24   : > { %v6500_v10 = vadd.f32 0.2548296, %v6468_v58  ;;  %v6757_v45 = vmul.f32 %v6725_v17, %v6085_v54  ;;  %v6790_v23 = vadd.f32 1.0, %v6758_v27 }
 0xa25   : > { %v6787_v20 = vadd.f32 1.0, %v6755_v18  ;;  %v13185_v18 = vld [vmem:[#allocation56_spill] sm:$0xff] }
 0xa26   : > { %v6532_v26 = vmul.f32 %v9069_v60, %v6500_v10  ;;  %v6789_v15 = vadd.f32 1.0, %v6757_v45  ;;  %v6822_v47 = vmul.f32 %v6790_v23, %v5990_v3 }
 0xa27   : > { %v6819_v32 = vmul.f32 %v6787_v20, %v5987_v24  ;;  %v13187_v24 = vld [vmem:[#allocation84_spill] sm:$0xff] }
 0xa28   : > { %v6692_v34 = vmul.f32 %v9077_v12, %v6532_v26  ;;  %v6821_v38 = vmul.f32 %v6789_v15, %v5989_v21  ;;  %v13184_v26 = vld [vmem:[#allocation67_spill] sm:$0xff] }
 0xa2a   : > { %v6724_v1 = vsub.f32 1.0, %v6692_v34  ;;  %v6838_v0 = vpack.c.bf16 %v6822_v47, %v6821_v38 }
 0xa2c   : > { %v6756_v6 = vmul.f32 %v6724_v1, %v6084_v33  ;;  %v13186_v33 = vld [vmem:[#allocation69_spill] sm:$0xff] }
 0xa2e   : > { %v6788_v49 = vadd.f32 1.0, %v6756_v6 }
 0xa30   : > { %v6820_v41 = vmul.f32 %v6788_v49, %v5988_v42 }
 0xa32   : > { %v6837_v11 = vpack.c.bf16 %v6820_v41, %v6819_v32  ;;  %v13188_v32 = vld [vmem:[#allocation55_spill] sm:$0xff] }
 0xa34   : > { %8492 = vmatprep.mubr.bf16.mxu1 %v6837_v11 }
 0xa35   : > { %8493 = vmatmul.mubr.bf16.gmra.mxu1 %v6838_v0 }
 0xa8e   : > { %v8466_v52 = vpop.f32.mrf.mxu1 }
 0xa8f   : > { %v6953_v19 = vadd.f32 %v8466_v52, %v12612_v48  ;;  %v13189_v52 = vld [vmem:[#allocation85_spill] sm:$0xff] }
 0xa90   : > { %v6944_v51 = vpop.f32.mrf.mxu1 }
 0xa91   : > { %v7073_v61 = vadd.f32 %v6953_v19, %v13177_v2  ;;  %v6945_v40 = vadd.f32 %v12612_v48, %v6944_v51 }
 0xa92   : > { %v8467_v9 = vpop.f32.mrf.mxu1 }
 0xa93   : > { %v7583_v31 = vpack.c.bf16 %v7073_v61, %v7073_v61  ;;  %v7071_v60 = vadd.f32 %v6945_v40, %v13178_v55  ;;  %v6956_v36 = vadd.f32 %v8467_v9, %v12612_v48  ;;  %v13190_v40 = vld [vmem:[#allocation83_spill] sm:$0xff] }
 0xa94   : > { %v6947_v7 = vpop.f32.mrf.mxu1 }
 0xa95   : > { %7234 = vst.msk [vmem:[%s12622_s22 + $0x8] sm:$0xf] %vm7231_vm2, %v7583_v31  ;;  %v7581_v59 = vpack.c.bf16 %v7071_v60, %v7071_v60  ;;  %v7074_v53 = vadd.f32 %v6956_v36, %v13179_v5  ;;  %v6948_v63 = vadd.f32 %v12612_v48, %v6947_v7  ;;  %v13191_v36 = vld [vmem:[#allocation42_spill] sm:$0xff] }
 0xa97   : > { %7232 = vst.msk [vmem:[%s12622_s22] sm:$0xf] %vm7231_vm2, %v7581_v59  ;;  %v7584_v50 = vpack.c.bf16 %v7074_v53, %v7074_v53  ;;  %v7072_v22 = vadd.f32 %v6948_v63, %v13180_v8  ;;  %v13192_v53 = vld [vmem:[#allocation86_spill] sm:$0xff] }
 0xa99   : > { %7235 = vst.msk [vmem:[%s12622_s22 + $0xc] sm:$0xf] %vm7231_vm2, %v7584_v50  ;;  %v7582_v44 = vpack.c.bf16 %v7072_v22, %v7072_v22 }
 0xa9b   : > { %7233 = vst.msk [vmem:[%s12622_s22 + $0x4] sm:$0xf] %vm7231_vm2, %v7582_v44 }
 0xaa5   : > { %v8470_v25 = vpop.f32.mrf.mxu1 }
 0xaa6   : > { %v6969_v43 = vadd.f32 %v8470_v25, %v12612_v48  ;;  %v13193_v25 = vld [vmem:[#allocation70_spill] sm:$0xff] }
 0xaa7   : > { %v6960_v39 = vpop.f32.mrf.mxu1 }
 0xaa8   : > { %v7077_v57 = vadd.f32 %v6969_v43, %v13181_v35  ;;  %v6961_v37 = vadd.f32 %v12612_v48, %v6960_v39 }
 0xaa9   : > { %v8471_v4 = vpop.f32.mrf.mxu1 }
 0xaaa   : > { %v7587_v13 = vpack.c.bf16 %v7077_v57, %v7077_v57  ;;  %v7075_v16 = vadd.f32 %v6961_v37, %v13182_v28  ;;  %v6972_v56 = vadd.f32 %v8471_v4, %v12612_v48  ;;  %v13194_v37 = vld [vmem:[#allocation36_spill] sm:$0xff] }
 0xaab   : > { %v6963_v14 = vpop.f32.mrf.mxu1 }
 0xaac   : > { %7238 = vst.msk [vmem:[%s12622_s22 + $0x18] sm:$0xf] %vm7231_vm2, %v7587_v13  ;;  %v7585_v58 = vpack.c.bf16 %v7075_v16, %v7075_v16  ;;  %v7078_v29 = vadd.f32 %v6972_v56, %v13183_v62  ;;  %v6964_v10 = vadd.f32 %v12612_v48, %v6963_v14  ;;  %v13195_v56 = vld [vmem:[#allocation60_spill] sm:$0xff] }
 0xaad   : > { %v8474_v17 = vpop.f32.mrf.mxu1 }
 0xaae   : > { %7236 = vst.msk [vmem:[%s12622_s22 + $0x10] sm:$0xf] %vm7231_vm2, %v7585_v58  ;;  %v7588_v46 = vpack.c.bf16 %v7078_v29, %v7078_v29  ;;  %v7076_v12 = vadd.f32 %v6964_v10, %v13184_v26  ;;  %v6985_v30 = vadd.f32 %v8474_v17, %v12612_v48  ;;  %v13196_v10 = vld [vmem:[#allocation44_spill] sm:$0xff] }
 0xaaf   : > { %v6976_v27 = vpop.f32.mrf.mxu1 }
 0xab0   : > { %7239 = vst.msk [vmem:[%s12622_s22 + $0x1c] sm:$0xf] %vm7231_vm2, %v7588_v46  ;;  %v7586_v54 = vpack.c.bf16 %v7076_v12, %v7076_v12  ;;  %v7081_v34 = vadd.f32 %v6985_v30, %v13185_v18  ;;  %v6977_v45 = vadd.f32 %v12612_v48, %v6976_v27  ;;  %v13197_v30 = vld [vmem:[#allocation43_spill] sm:$0xff] }
 0xab1   : > { %v8475_v1 = vpop.f32.mrf.mxu1 }
 0xab2   : > { %7237 = vst.msk [vmem:[%s12622_s22 + $0x14] sm:$0xf] %vm7231_vm2, %v7586_v54  ;;  %v7591_v23 = vpack.c.bf16 %v7081_v34, %v7081_v34  ;;  %v7079_v20 = vadd.f32 %v6977_v45, %v13186_v33  ;;  %v6988_v6 = vadd.f32 %v8475_v1, %v12612_v48  ;;  %v13198_v45 = vld [vmem:[#allocation37_spill] sm:$0xff] }
 0xab3   : > { %v6979_v15 = vpop.f32.mrf.mxu1 }
 0xab4   : > { %7242 = vst.msk [vmem:[%s12622_s22 + $0x28] sm:$0xf] %vm7231_vm2, %v7591_v23  ;;  %v7589_v3 = vpack.c.bf16 %v7079_v20, %v7079_v20  ;;  %v7082_v42 = vadd.f32 %v6988_v6, %v13187_v24  ;;  %v6980_v49 = vadd.f32 %v12612_v48, %v6979_v15  ;;  %v13199_v6 = vld [vmem:[#allocation61_spill] sm:$0xff] }
 0xab6   : > { %v8478_v21 = vpop.f32.mrf.mxu1  ;;  %7240 = vst.msk [vmem:[%s12622_s22 + $0x20] sm:$0xf] %vm7231_vm2, %v7589_v3  ;;  %v7592_v47 = vpack.c.bf16 %v7082_v42, %v7082_v42  ;;  %v7080_v41 = vadd.f32 %v6980_v49, %v13188_v32  ;;  %v13200_v42 = vld [vmem:[#allocation39_spill] sm:$0xff] }
 0xab7   : > { %v7001_v38 = vadd.f32 %v8478_v21, %v12612_v48 }
 0xab8   : > { %v6992_v11 = vpop.f32.mrf.mxu1  ;;  %7243 = vst.msk [vmem:[%s12622_s22 + $0x2c] sm:$0xf] %vm7231_vm2, %v7592_v47  ;;  %v7590_v0 = vpack.c.bf16 %v7080_v41, %v7080_v41 }
 0xab9   : > { %v7085_v19 = vadd.f32 %v7001_v38, %v13189_v52  ;;  %v6993_v51 = vadd.f32 %v12612_v48, %v6992_v11  ;;  %v13201_v38 = vld [vmem:[#allocation63_spill] sm:$0xff] }
 0xaba   : > { %v8479_v2 = vpop.f32.mrf.mxu1  ;;  %7241 = vst.msk [vmem:[%s12622_s22 + $0x24] sm:$0xf] %vm7231_vm2, %v7590_v0 }
 0xabb   : > { %v7595_v61 = vpack.c.bf16 %v7085_v19, %v7085_v19  ;;  %v7083_v9 = vadd.f32 %v6993_v51, %v13190_v40  ;;  %v7004_v31 = vadd.f32 %v8479_v2, %v12612_v48  ;;  %v13202_v51 = vld [vmem:[#allocation38_spill] sm:$0xff] }
 0xabc   : > { %v6995_v55 = vpop.f32.mrf.mxu1 }
 0xabd   : > { %7246 = vst.msk [vmem:[%s12622_s22 + $0x38] sm:$0xf] %vm7231_vm2, %v7595_v61  ;;  %v7593_v60 = vpack.c.bf16 %v7083_v9, %v7083_v9  ;;  %v7086_v7 = vadd.f32 %v7004_v31, %v13191_v36  ;;  %v6996_v59 = vadd.f32 %v12612_v48, %v6995_v55  ;;  %v13203_v31 = vld [vmem:[#allocation40_spill] sm:$0xff] }
 0xabe   : > { %v8482_v8 = vpop.f32.mrf.mxu1 }
 0xabf   : > { %7244 = vst.msk [vmem:[%s12622_s22 + $0x30] sm:$0xf] %vm7231_vm2, %v7593_v60  ;;  %v7596_v5 = vpack.c.bf16 %v7086_v7, %v7086_v7  ;;  %v7084_v63 = vadd.f32 %v6996_v59, %v13192_v53  ;;  %v7017_v22 = vadd.f32 %v8482_v8, %v12612_v48  ;;  %v13204_v7 = vld [vmem:[#allocation49_spill] sm:$0xff] }
 0xac0   : > { %v7008_v44 = vpop.f32.mrf.mxu1  ;;  %v13205_v8 = vld [vmem:[#allocation57_spill] sm:$0xff] }
 0xac1   : > { %7247 = vst.msk [vmem:[%s12622_s22 + $0x3c] sm:$0xf] %vm7231_vm2, %v7596_v5  ;;  %v7594_v50 = vpack.c.bf16 %v7084_v63, %v7084_v63  ;;  %v7089_v43 = vadd.f32 %v7017_v22, %v13193_v25  ;;  %v7009_v39 = vadd.f32 %v12612_v48, %v7008_v44 }
 0xac2   : > { %v8483_v35 = vpop.f32.mrf.mxu1 }
 0xac3   : > { %7245 = vst.msk [vmem:[%s12622_s22 + $0x34] sm:$0xf] %vm7231_vm2, %v7594_v50  ;;  %v7599_v57 = vpack.c.bf16 %v7089_v43, %v7089_v43  ;;  %v7087_v4 = vadd.f32 %v7009_v39, %v13194_v37  ;;  %v7020_v13 = vadd.f32 %v8483_v35, %v12612_v48  ;;  %v13206_v39 = vld [vmem:[#allocation45_spill] sm:$0xff] }
 0xac4   : > { %v7011_v28 = vpop.f32.mrf.mxu1 }
 0xac5   : > { %7250 = vst.msk [vmem:[%s12622_s22 + $0x48] sm:$0xf] %vm7231_vm2, %v7599_v57  ;;  %v7597_v16 = vpack.c.bf16 %v7087_v4, %v7087_v4  ;;  %v7090_v14 = vadd.f32 %v7020_v13, %v13195_v56  ;;  %v7012_v58 = vadd.f32 %v12612_v48, %v7011_v28  ;;  %v13207_v13 = vld [vmem:[#allocation46_spill] sm:$0xff] }
 0xac6   : > { %v8486_v62 = vpop.f32.mrf.mxu1 }
 0xac7   : > { %7248 = vst.msk [vmem:[%s12622_s22 + $0x40] sm:$0xf] %vm7231_vm2, %v7597_v16  ;;  %v7600_v29 = vpack.c.bf16 %v7090_v14, %v7090_v14  ;;  %v7088_v17 = vadd.f32 %v7012_v58, %v13196_v10  ;;  %v7033_v46 = vadd.f32 %v8486_v62, %v12612_v48  ;;  %v13208_v14 = vld [vmem:[#allocation47_spill] sm:$0xff] }
 0xac8   : > { %v7024_v26 = vpop.f32.mrf.mxu1 }
 0xac9   : > { %7251 = vst.msk [vmem:[%s12622_s22 + $0x4c] sm:$0xf] %vm7231_vm2, %v7600_v29  ;;  %v7598_v12 = vpack.c.bf16 %v7088_v17, %v7088_v17  ;;  %v7093_v27 = vadd.f32 %v7033_v46, %v13197_v30  ;;  %v7025_v54 = vadd.f32 %v12612_v48, %v7024_v26 }
 0xaca   : > { %v8487_v18 = vpop.f32.mrf.mxu1 }
 0xacb   : > { %7249 = vst.msk [vmem:[%s12622_s22 + $0x44] sm:$0xf] %vm7231_vm2, %v7598_v12  ;;  %v7603_v34 = vpack.c.bf16 %v7093_v27, %v7093_v27  ;;  %v7091_v1 = vadd.f32 %v7025_v54, %v13198_v45  ;;  %v7036_v23 = vadd.f32 %v8487_v18, %v12612_v48 }
 0xacc   : > { %v7027_v33 = vpop.f32.mrf.mxu1 }
 0xacd   : > { %7254 = vst.msk [vmem:[%s12622_s22 + $0x58] sm:$0xf] %vm7231_vm2, %v7603_v34  ;;  %v7601_v20 = vpack.c.bf16 %v7091_v1, %v7091_v1  ;;  %v7094_v15 = vadd.f32 %v7036_v23, %v13199_v6  ;;  %v7028_v3 = vadd.f32 %v12612_v48, %v7027_v33 }
 0xacf   : > { %7252 = vst.msk [vmem:[%s12622_s22 + $0x50] sm:$0xf] %vm7231_vm2, %v7601_v20  ;;  %v7604_v24 = vpack.c.bf16 %v7094_v15, %v7094_v15  ;;  %v7092_v49 = vadd.f32 %v7028_v3, %v13200_v42 }
 0xad1   : > { %7255 = vst.msk [vmem:[%s12622_s22 + $0x5c] sm:$0xf] %vm7231_vm2, %v7604_v24  ;;  %v7602_v21 = vpack.c.bf16 %v7092_v49, %v7092_v49 }
 0xad3   : > { %7253 = vst.msk [vmem:[%s12622_s22 + $0x54] sm:$0xf] %vm7231_vm2, %v7602_v21 }
 0xad6   : > { %v8490_v47 = vpop.f32.mrf.mxu1 }
 0xad7   : > { %v7049_v32 = vadd.f32 %v8490_v47, %v12612_v48 }
 0xad8   : > { %v7040_v41 = vpop.f32.mrf.mxu1 }
 0xad9   : > { %v7097_v11 = vadd.f32 %v7049_v32, %v13201_v38  ;;  %v7041_v0 = vadd.f32 %v12612_v48, %v7040_v41 }
 0xada   : > { %v8491_v52 = vpop.f32.mrf.mxu1 }
 0xadb   : > { %v7607_v19 = vpack.c.bf16 %v7097_v11, %v7097_v11  ;;  %v7095_v2 = vadd.f32 %v7041_v0, %v13202_v51  ;;  %v7052_v61 = vadd.f32 %v8491_v52, %v12612_v48 }
 0xadc   : > { %v7043_v40 = vpop.f32.mrf.mxu1 }
 0xadd   : > { %7258 = vst.msk [vmem:[%s12622_s22 + $0x68] sm:$0xf] %vm7231_vm2, %v7607_v19  ;;  %v7605_v9 = vpack.c.bf16 %v7095_v2, %v7095_v2  ;;  %v7098_v55 = vadd.f32 %v7052_v61, %v13203_v31  ;;  %v7044_v60 = vadd.f32 %v12612_v48, %v7043_v40 }
 0xadf   : > { %7256 = vst.msk [vmem:[%s12622_s22 + $0x60] sm:$0xf] %vm7231_vm2, %v7605_v9  ;;  %v7608_v36 = vpack.c.bf16 %v7098_v55, %v7098_v55  ;;  %v7096_v59 = vadd.f32 %v7044_v60, %v13204_v7 }
 0xae1   : > { %7259 = vst.msk [vmem:[%s12622_s22 + $0x6c] sm:$0xf] %vm7231_vm2, %v7608_v36  ;;  %v7606_v5 = vpack.c.bf16 %v7096_v59, %v7096_v59 }
 0xae3   : > { %7257 = vst.msk [vmem:[%s12622_s22 + $0x64] sm:$0xf] %vm7231_vm2, %v7606_v5 }
 0xaf5   : > { %v8494_v53 = vpop.f32.mrf.mxu1 }
 0xaf6   : > { %v7065_v63 = vadd.f32 %v8494_v53, %v12612_v48 }
 0xaf7   : > { %v7056_v50 = vpop.f32.mrf.mxu1 }
 0xaf8   : > { %v7101_v22 = vadd.f32 %v7065_v63, %v13205_v8  ;;  %v7057_v44 = vadd.f32 %v12612_v48, %v7056_v50 }
 0xaf9   : > { %v8495_v25 = vpop.f32.mrf.mxu1 }
 0xafa   : > { %v7611_v43 = vpack.c.bf16 %v7101_v22, %v7101_v22  ;;  %v7099_v35 = vadd.f32 %v7057_v44, %v13206_v39  ;;  %v7068_v57 = vadd.f32 %v8495_v25, %v12612_v48 }
 0xafb   : > { %v7059_v37 = vpop.f32.mrf.mxu1 }
 0xafc   : > { %7262 = vst.msk [vmem:[%s12622_s22 + $0x78] sm:$0xf] %vm7231_vm2, %v7611_v43  ;;  %v7609_v4 = vpack.c.bf16 %v7099_v35, %v7099_v35  ;;  %v7102_v28 = vadd.f32 %v7068_v57, %v13207_v13  ;;  %v7060_v16 = vadd.f32 %v12612_v48, %v7059_v37 }
 0xafe   : > { %7260 = vst.msk [vmem:[%s12622_s22 + $0x70] sm:$0xf] %vm7231_vm2, %v7609_v4  ;;  %v7612_v56 = vpack.c.bf16 %v7102_v28, %v7102_v28  ;;  %v7100_v58 = vadd.f32 %v7060_v16, %v13208_v14 }
 0xb00   : > { %7263 = vst.msk [vmem:[%s12622_s22 + $0x7c] sm:$0xf] %vm7231_vm2, %v7612_v56  ;;  %v7610_v62 = vpack.c.bf16 %v7100_v58, %v7100_v58 }
 0xb02   : > { %7261 = vst.msk [vmem:[%s12622_s22 + $0x74] sm:$0xf] %vm7231_vm2, %v7610_v62 }
 0xb03 PF: > { %s25_s18 = sadd.s32 1, %s9093_s18  }
 0xb04   : > { %p22_p4 = scmp.ge.s32.totalorder %s25_s18, 6  }
 0xb06   :  { %24 = sbr.rel (!%p22_p4) target bundleno = 1 (0x1), region = 113 }

</bundles_post_ra>
